<compile_context>
chip_gen: v6e
topology: v6e:2x2x1
jax: 0.10.0
libtpu: 0.0.40
codegen_flags: <defaults>
</compile_context>

<pallas_src>
import functools

import jax
import jax.numpy as jnp
from jax.experimental import pallas as pl
from jax.experimental.pallas import tpu as pltpu

NUMBER_OF_CLASSES = 10
LANE = 128


def _round_up(n, m):
    return (n + m - 1) // m * m


def _silu(v):
    return v * jax.nn.sigmoid(v)


# ----------------------------- fused kernel -------------------------------- #

def _effnet_fused_kernel(mask_ref, x_ref,
                         stem_w_ref, stem_b_ref,
                         exp_w_ref, exp_b_ref,
                         dw_w_ref, dw_b_ref,
                         se1_w_ref, se1_b_ref,
                         se2_w_ref, se2_b_ref,
                         proj_w_ref, proj_b_ref,
                         head_w_ref, head_b_ref,
                         fc_w_ref, fc_b_ref,
                         o_ref,
                         dwin_ref,
                         *, off, wp, inv_hw):
    """Whole forward pass for one image, all intermediates in VMEM.

    Spatial activations are (pfa, C) arrays in flattened padded coordinates
    (row p = r * wp + c of the zero-ring-padded image, rounded up to a
    multiple of 8 rows).  `mask_ref` is 1 on valid interior pixels, 0 on the
    halo ring / alignment pad.  Conv inputs live in buffers with `off` extra
    zero rows of margin on each side so every 3x3 tap is a plain shifted
    slice read.
    """
    pfa = mask_ref.shape[0]
    mask = mask_ref[...]                                   # (pfa, 1)

    def mxu(a, b):
        # bf16 MXU operands, f32 accumulation; epilogue math stays f32 (v5e).
        return jnp.dot(a.astype(jnp.bfloat16), b.astype(jnp.bfloat16),
                       preferred_element_type=jnp.float32)

    # ---- stem 3x3 conv (BN folded) + SiLU: 9 shifted-tap matmuls ---------- #
    acc = jnp.zeros((pfa, stem_w_ref.shape[2]), jnp.float32)
    for t in range(9):
        dh, dw = divmod(t, 3)
        s = (dh - 1) * wp + (dw - 1)
        acc = acc + mxu(x_ref[off + s:off + s + pfa, :], stem_w_ref[t])
    stem = _silu(acc + stem_b_ref[...])                    # (pfa, c_stem)

    # ---- MBConv expand (1x1 conv) + SiLU ---------------------------------- #
    exp = _silu(mxu(stem, exp_w_ref[...]) + exp_b_ref[...])  # (pfa, c_mid)

    # ---- depthwise 3x3 + SiLU: shifted VPU MACs (no block-diag matmul) ---- #
    dwin_ref[...] = jnp.zeros_like(dwin_ref)               # keep margins zero
    dwin_ref[off:off + pfa, :] = exp * mask                # zero the halo ring
    dacc = jnp.zeros_like(exp)
    for t in range(9):
        dh, dw = divmod(t, 3)
        s = (dh - 1) * wp + (dw - 1)
        dacc = dacc + dwin_ref[off + s:off + s + pfa, :] * dw_w_ref[t:t + 1, :]
    dw_act = _silu(dacc + dw_b_ref[...])                   # (pfa, c_mid)

    # ---- squeeze-and-excitation (pool + two tiny matmuls + gate) ---------- #
    pooled = jnp.sum(dw_act * mask, axis=0, keepdims=True) * inv_hw   # (1, c_mid)
    s1 = _silu(jnp.dot(pooled, se1_w_ref[...],
                       preferred_element_type=jnp.float32) + se1_b_ref[...])
    gate = jax.nn.sigmoid(jnp.dot(s1, se2_w_ref[...],
                                  preferred_element_type=jnp.float32)
                          + se2_b_ref[...])
    gated = dw_act * gate                                  # (pfa, c_mid)

    # ---- project (1x1 conv, linear) + residual ---------------------------- #
    feat = mxu(gated, proj_w_ref[...]) + proj_b_ref[...] + stem   # (pfa, c_stem)

    # ---- head 1x1 conv + SiLU, global average pool, classifier ------------ #
    head = _silu(mxu(feat, head_w_ref[...]) + head_b_ref[...])    # (pfa, hidden)
    pooled_feat = jnp.sum(head * mask, axis=0, keepdims=True) * inv_hw
    logits = jnp.dot(pooled_feat, fc_w_ref[...],
                     preferred_element_type=jnp.float32) + fc_b_ref[...]
    o_ref[...] = logits.astype(o_ref.dtype)                # (1, 128) lane dense


# ------------------------------ wrapper ------------------------------------ #

def _bcast_spec(shape):
    zeros = (0,) * len(shape)
    return pl.BlockSpec(shape, lambda b: zeros)


def effnet_model_forward(params, x_nchw):
    x = jnp.transpose(x_nchw, (0, 2, 3, 1)).astype(jnp.float32)   # NCHW -> NHWC
    B, H, W, c_in = x.shape
    hp, wp = H + 2, W + 2
    pf = hp * wp                                  # flattened padded length
    pfa = _round_up(pf, 8)                        # sublane-aligned length
    off = _round_up(wp + 1, 8)                    # read margin for tap shifts
    rows = _round_up(off + pfa + wp + 1, 8)       # full margin-buffer length
    c_in_p = _round_up(c_in, 8)                   # pad stem contraction dim

    c_stem = params["stem_w"].shape[3]
    c_mid = params["exp_w"].shape[1]
    hidden = params["head_w"].shape[1]
    n_cls = params["fc_w"].shape[1]
    n_pad = _round_up(n_cls, LANE)                # lane-dense classifier output

    # Padded + flattened input with a zero halo ring and zero read margins.
    xpad = jnp.pad(x, ((0, 0), (1, 1), (1, 1), (0, c_in_p - c_in)))
    xflat = xpad.reshape(B, pf, c_in_p)
    xbuf = jnp.pad(xflat, ((0, 0), (off, rows - off - pf), (0, 0)))

    # Interior mask: 1 at valid pixels, 0 on the halo ring / alignment pad.
    pidx = jnp.arange(pfa)
    rr, cc = pidx // wp, pidx % wp
    interior = (pidx < pf) & (rr >= 1) & (rr <= H) & (cc >= 1) & (cc <= W)
    mask = interior.astype(jnp.float32).reshape(pfa, 1)

    # One-time weight packing (tiny, done in XLA outside the kernel).
    stem_w = jnp.pad(params["stem_w"],
                     ((0, 0), (0, 0), (0, c_in_p - c_in), (0, 0)))
    stem_w = stem_w.reshape(9, c_in_p, c_stem)
    dw_w = params["dw_w"].reshape(9, c_mid)
    fc_w = jnp.pad(params["fc_w"], ((0, 0), (0, n_pad - n_cls)))
    fc_b = jnp.pad(params["fc_b"], (0, n_pad - n_cls))

    def row2(v):
        return v.reshape(1, -1)

    operands = (
        mask, xbuf,
        stem_w, row2(params["stem_b"]),
        params["exp_w"], row2(params["exp_b"]),
        dw_w, row2(params["dw_b"]),
        params["se1_w"], row2(params["se1_b"]),
        params["se2_w"], row2(params["se2_b"]),
        params["proj_w"], row2(params["proj_b"]),
        params["head_w"], row2(params["head_b"]),
        fc_w, row2(fc_b),
    )

    in_specs = [_bcast_spec(mask.shape),
                pl.BlockSpec((None, rows, c_in_p), lambda b: (b, 0, 0))]
    in_specs += [_bcast_spec(op.shape) for op in operands[2:]]
    out_specs = pl.BlockSpec((None, 1, n_pad), lambda b: (b, 0, 0))

    flops = 2 * B * pfa * (9 * c_in_p * c_stem + c_stem * c_mid + 9 * c_mid
                           + c_mid * c_stem + c_stem * hidden)
    transcendentals = B * pfa * (c_stem + 2 * c_mid + hidden)
    bytes_accessed = (sum(int(op.size) * op.dtype.itemsize for op in operands)
                      + B * n_pad * 4)

    kernel = functools.partial(_effnet_fused_kernel, off=off, wp=wp,
                               inv_hw=1.0 / float(H * W))

    out = pl.pallas_call(
        kernel,
        out_shape=jax.ShapeDtypeStruct((B, 1, n_pad), jnp.float32),
        grid=(B,),
        in_specs=in_specs,
        out_specs=out_specs,
        scratch_shapes=[pltpu.VMEM((rows, c_mid), jnp.float32)],
        compiler_params=pltpu.CompilerParams(
            dimension_semantics=("parallel",),
            vmem_limit_bytes=32 * 1024 * 1024),
        cost_estimate=pl.CostEstimate(flops=flops,
                                      transcendentals=transcendentals,
                                      bytes_accessed=bytes_accessed),
    )(*operands)
    return out[:, 0, :n_cls]


# ----------------------------- params & reference -------------------------- #

def init_params(key, c_in=4, c_stem=16, c_mid=32, c_se=8, hidden=32,
                num_classes=NUMBER_OF_CLASSES):
    ks = jax.random.split(key, 8)

    def dense(k, fan_in, shape):
        return jax.random.normal(k, shape, jnp.float32) / jnp.sqrt(fan_in)

    p = {}
    p["stem_w"] = dense(ks[0], 9 * c_in, (3, 3, c_in, c_stem))
    p["stem_b"] = jnp.zeros((c_stem,), jnp.float32)
    p["exp_w"] = dense(ks[1], c_stem, (c_stem, c_mid))
    p["exp_b"] = jnp.zeros((c_mid,), jnp.float32)
    p["dw_w"] = dense(ks[2], 9, (3, 3, c_mid))
    p["dw_b"] = jnp.zeros((c_mid,), jnp.float32)
    p["se1_w"] = dense(ks[3], c_mid, (c_mid, c_se))
    p["se1_b"] = jnp.zeros((c_se,), jnp.float32)
    p["se2_w"] = dense(ks[4], c_se, (c_se, c_mid))
    p["se2_b"] = jnp.zeros((c_mid,), jnp.float32)
    p["proj_w"] = dense(ks[5], c_mid, (c_mid, c_stem))
    p["proj_b"] = jnp.zeros((c_stem,), jnp.float32)
    p["head_w"] = dense(ks[6], c_stem, (c_stem, hidden))
    p["head_b"] = jnp.zeros((hidden,), jnp.float32)
    # hier_classification_head: Linear(hidden, NUMBER_OF_CLASSES)
    p["fc_w"] = dense(ks[7], hidden, (hidden, num_classes))
    p["fc_b"] = jnp.zeros((num_classes,), jnp.float32)
    return p


def reference_forward(params, x_nchw):
    """Pure-XLA f32 reference with identical forward semantics."""
    x = jnp.transpose(x_nchw, (0, 2, 3, 1)).astype(jnp.float32)
    dn = ("NHWC", "HWIO", "NHWC")
    stem = _silu(jax.lax.conv_general_dilated(
        x, params["stem_w"], (1, 1), "SAME", dimension_numbers=dn)
        + params["stem_b"])
    exp = _silu(jnp.einsum("bhwc,cd->bhwd", stem, params["exp_w"])
                + params["exp_b"])
    c_mid = exp.shape[-1]
    dw_w = params["dw_w"].reshape(3, 3, 1, c_mid)
    dw = _silu(jax.lax.conv_general_dilated(
        exp, dw_w, (1, 1), "SAME", dimension_numbers=dn,
        feature_group_count=c_mid) + params["dw_b"])
    pooled = jnp.mean(dw, axis=(1, 2))
    s1 = _silu(pooled @ params["se1_w"] + params["se1_b"])
    gate = jax.nn.sigmoid(s1 @ params["se2_w"] + params["se2_b"])
    gated = dw * gate[:, None, None, :]
    feat = (jnp.einsum("bhwc,cd->bhwd", gated, params["proj_w"])
            + params["proj_b"] + stem)
    head = _silu(jnp.einsum("bhwc,cd->bhwd", feat, params["head_w"])
                 + params["head_b"])
    pooled_feat = jnp.mean(head, axis=(1, 2))
    return pooled_feat @ params["fc_w"] + params["fc_b"]


if __name__ == "__main__":
    key = jax.random.PRNGKey(0)
    pkey, xkey = jax.random.split(key)
    params = init_params(pkey)
    x = jax.random.normal(xkey, (2, 4, 16, 16), jnp.float32)   # NCHW like PyTorch

    out = jax.jit(effnet_model_forward)(params, x)
    jax.block_until_ready(out)
    assert out.shape == (2, NUMBER_OF_CLASSES)
    assert out.dtype == jnp.float32

    ref = jax.jit(reference_forward)(params, x)
    jax.block_until_ready(ref)
    err = float(jnp.max(jnp.abs(out - ref)))
    tol = 5e-2 + 5e-2 * float(jnp.max(jnp.abs(ref)))   # bf16 MXU operands
    assert err < tol, f"mismatch vs reference: err={err} tol={tol}"

    print("KERNEL_OK")
</pallas_src>

<mosaic_0001>
module attributes {stable_mosaic.version = 11 : i64} {
  func.func @_effnet_fused_kernel(%arg0: i32, %arg1: memref<328x1xf32, #tpu.memory_space<vmem>>, %arg2: memref<1x376x8xf32, #tpu.memory_space<vmem>>, %arg3: memref<9x8x16xf32, #tpu.memory_space<vmem>>, %arg4: memref<1x16xf32, #tpu.memory_space<vmem>>, %arg5: memref<16x32xf32, #tpu.memory_space<vmem>>, %arg6: memref<1x32xf32, #tpu.memory_space<vmem>>, %arg7: memref<9x32xf32, #tpu.memory_space<vmem>>, %arg8: memref<1x32xf32, #tpu.memory_space<vmem>>, %arg9: memref<32x8xf32, #tpu.memory_space<vmem>>, %arg10: memref<1x8xf32, #tpu.memory_space<vmem>>, %arg11: memref<8x32xf32, #tpu.memory_space<vmem>>, %arg12: memref<1x32xf32, #tpu.memory_space<vmem>>, %arg13: memref<32x16xf32, #tpu.memory_space<vmem>>, %arg14: memref<1x16xf32, #tpu.memory_space<vmem>>, %arg15: memref<16x32xf32, #tpu.memory_space<vmem>>, %arg16: memref<1x32xf32, #tpu.memory_space<vmem>>, %arg17: memref<32x128xf32, #tpu.memory_space<vmem>>, %arg18: memref<1x128xf32, #tpu.memory_space<vmem>>, %arg19: memref<1x1x128xf32, #tpu.memory_space<vmem>>, %arg20: memref<376x32xf32, #tpu.memory_space<vmem>>) attributes {dimension_semantics = [#tpu.dimension_semantics<parallel>], iteration_bounds = array<i64: 2>, scalar_prefetch = 0 : i64, scratch_operands = 1 : i64, tpu.core_type = #tpu.core_type<tc>, window_params = [{pipeline_mode = #tpu.pipeline_mode<synchronous>, transform_indices = @transform_0, window_bounds = array<i64: 328, 1>}, {transform_indices = @transform_1, window_bounds = array<i64: 1, 376, 8>}, {pipeline_mode = #tpu.pipeline_mode<synchronous>, transform_indices = @transform_2, window_bounds = array<i64: 9, 8, 16>}, {pipeline_mode = #tpu.pipeline_mode<synchronous>, transform_indices = @transform_3, window_bounds = array<i64: 1, 16>}, {pipeline_mode = #tpu.pipeline_mode<synchronous>, transform_indices = @transform_4, window_bounds = array<i64: 16, 32>}, {pipeline_mode = #tpu.pipeline_mode<synchronous>, transform_indices = @transform_5, window_bounds = array<i64: 1, 32>}, {pipeline_mode = #tpu.pipeline_mode<synchronous>, transform_indices = @transform_6, window_bounds = array<i64: 9, 32>}, {pipeline_mode = #tpu.pipeline_mode<synchronous>, transform_indices = @transform_7, window_bounds = array<i64: 1, 32>}, {pipeline_mode = #tpu.pipeline_mode<synchronous>, transform_indices = @transform_8, window_bounds = array<i64: 32, 8>}, {pipeline_mode = #tpu.pipeline_mode<synchronous>, transform_indices = @transform_9, window_bounds = array<i64: 1, 8>}, {pipeline_mode = #tpu.pipeline_mode<synchronous>, transform_indices = @transform_10, window_bounds = array<i64: 8, 32>}, {pipeline_mode = #tpu.pipeline_mode<synchronous>, transform_indices = @transform_11, window_bounds = array<i64: 1, 32>}, {pipeline_mode = #tpu.pipeline_mode<synchronous>, transform_indices = @transform_12, window_bounds = array<i64: 32, 16>}, {pipeline_mode = #tpu.pipeline_mode<synchronous>, transform_indices = @transform_13, window_bounds = array<i64: 1, 16>}, {pipeline_mode = #tpu.pipeline_mode<synchronous>, transform_indices = @transform_14, window_bounds = array<i64: 16, 32>}, {pipeline_mode = #tpu.pipeline_mode<synchronous>, transform_indices = @transform_15, window_bounds = array<i64: 1, 32>}, {pipeline_mode = #tpu.pipeline_mode<synchronous>, transform_indices = @transform_16, window_bounds = array<i64: 32, 128>}, {pipeline_mode = #tpu.pipeline_mode<synchronous>, transform_indices = @transform_17, window_bounds = array<i64: 1, 128>}, {transform_indices = @transform_18, window_bounds = array<i64: 1, 1, 128>}]} {
    %c0 = arith.constant 0 : index
    %c0_0 = arith.constant 0 : index
    %0 = vector.load %arg1[%c0, %c0_0] : memref<328x1xf32, #tpu.memory_space<vmem>>, vector<328x1xf32>
    %cst = arith.constant 0.000000e+00 : f32
    %1 = vector.broadcast %cst : f32 to vector<328x16xf32>
    %c0_1 = arith.constant 0 : index
    %c5 = arith.constant 5 : index
    %c0_2 = arith.constant 0 : index
    %2 = vector.load %arg2[%c0_1, %c5, %c0_2] : memref<1x376x8xf32, #tpu.memory_space<vmem>>, vector<1x328x8xf32>
    %3 = vector.shape_cast %2 : vector<1x328x8xf32> to vector<328x8xf32>
    %c0_3 = arith.constant 0 : index
    %c0_4 = arith.constant 0 : index
    %c0_5 = arith.constant 0 : index
    %4 = vector.load %arg3[%c0_3, %c0_4, %c0_5] : memref<9x8x16xf32, #tpu.memory_space<vmem>>, vector<1x8x16xf32>
    %5 = vector.shape_cast %4 : vector<1x8x16xf32> to vector<8x16xf32>
    %6 = arith.truncf %3 : vector<328x8xf32> to vector<328x8xbf16>
    %7 = arith.truncf %5 : vector<8x16xf32> to vector<8x16xbf16>
    %cst_6 = arith.constant dense<0.000000e+00> : vector<328x16xf32>
    %8 = tpu.matmul %6, %7, %cst_6 {dimension_numbers = #tpu.dot_dimension_numbers<[1], [0], [0], [1], [0, 0, 1, 1], [], []>} : vector<328x8xbf16>, vector<8x16xbf16>, vector<328x16xf32> -> vector<328x16xf32>
    %9 = arith.addf %1, %8 : vector<328x16xf32>
    %c0_7 = arith.constant 0 : index
    %c6 = arith.constant 6 : index
    %c0_8 = arith.constant 0 : index
    %10 = vector.load %arg2[%c0_7, %c6, %c0_8] : memref<1x376x8xf32, #tpu.memory_space<vmem>>, vector<1x328x8xf32>
    %11 = vector.shape_cast %10 : vector<1x328x8xf32> to vector<328x8xf32>
    %c1 = arith.constant 1 : index
    %c0_9 = arith.constant 0 : index
    %c0_10 = arith.constant 0 : index
    %12 = vector.load %arg3[%c1, %c0_9, %c0_10] : memref<9x8x16xf32, #tpu.memory_space<vmem>>, vector<1x8x16xf32>
    %13 = vector.shape_cast %12 : vector<1x8x16xf32> to vector<8x16xf32>
    %14 = arith.truncf %11 : vector<328x8xf32> to vector<328x8xbf16>
    %15 = arith.truncf %13 : vector<8x16xf32> to vector<8x16xbf16>
    %cst_11 = arith.constant dense<0.000000e+00> : vector<328x16xf32>
    %16 = tpu.matmul %14, %15, %cst_11 {dimension_numbers = #tpu.dot_dimension_numbers<[1], [0], [0], [1], [0, 0, 1, 1], [], []>} : vector<328x8xbf16>, vector<8x16xbf16>, vector<328x16xf32> -> vector<328x16xf32>
    %17 = arith.addf %9, %16 : vector<328x16xf32>
    %c0_12 = arith.constant 0 : index
    %c7 = arith.constant 7 : index
    %c0_13 = arith.constant 0 : index
    %18 = vector.load %arg2[%c0_12, %c7, %c0_13] : memref<1x376x8xf32, #tpu.memory_space<vmem>>, vector<1x328x8xf32>
    %19 = vector.shape_cast %18 : vector<1x328x8xf32> to vector<328x8xf32>
    %c2 = arith.constant 2 : index
    %c0_14 = arith.constant 0 : index
    %c0_15 = arith.constant 0 : index
    %20 = vector.load %arg3[%c2, %c0_14, %c0_15] : memref<9x8x16xf32, #tpu.memory_space<vmem>>, vector<1x8x16xf32>
    %21 = vector.shape_cast %20 : vector<1x8x16xf32> to vector<8x16xf32>
    %22 = arith.truncf %19 : vector<328x8xf32> to vector<328x8xbf16>
    %23 = arith.truncf %21 : vector<8x16xf32> to vector<8x16xbf16>
    %cst_16 = arith.constant dense<0.000000e+00> : vector<328x16xf32>
    %24 = tpu.matmul %22, %23, %cst_16 {dimension_numbers = #tpu.dot_dimension_numbers<[1], [0], [0], [1], [0, 0, 1, 1], [], []>} : vector<328x8xbf16>, vector<8x16xbf16>, vector<328x16xf32> -> vector<328x16xf32>
    %25 = arith.addf %17, %24 : vector<328x16xf32>
    %c0_17 = arith.constant 0 : index
    %c23 = arith.constant 23 : index
    %c0_18 = arith.constant 0 : index
    %26 = vector.load %arg2[%c0_17, %c23, %c0_18] : memref<1x376x8xf32, #tpu.memory_space<vmem>>, vector<1x328x8xf32>
    %27 = vector.shape_cast %26 : vector<1x328x8xf32> to vector<328x8xf32>
    %c3 = arith.constant 3 : index
    %c0_19 = arith.constant 0 : index
    %c0_20 = arith.constant 0 : index
    %28 = vector.load %arg3[%c3, %c0_19, %c0_20] : memref<9x8x16xf32, #tpu.memory_space<vmem>>, vector<1x8x16xf32>
    %29 = vector.shape_cast %28 : vector<1x8x16xf32> to vector<8x16xf32>
    %30 = arith.truncf %27 : vector<328x8xf32> to vector<328x8xbf16>
    %31 = arith.truncf %29 : vector<8x16xf32> to vector<8x16xbf16>
    %cst_21 = arith.constant dense<0.000000e+00> : vector<328x16xf32>
    %32 = tpu.matmul %30, %31, %cst_21 {dimension_numbers = #tpu.dot_dimension_numbers<[1], [0], [0], [1], [0, 0, 1, 1], [], []>} : vector<328x8xbf16>, vector<8x16xbf16>, vector<328x16xf32> -> vector<328x16xf32>
    %33 = arith.addf %25, %32 : vector<328x16xf32>
    %c0_22 = arith.constant 0 : index
    %c24 = arith.constant 24 : index
    %c0_23 = arith.constant 0 : index
    %34 = vector.load %arg2[%c0_22, %c24, %c0_23] : memref<1x376x8xf32, #tpu.memory_space<vmem>>, vector<1x328x8xf32>
    %35 = vector.shape_cast %34 : vector<1x328x8xf32> to vector<328x8xf32>
    %c4 = arith.constant 4 : index
    %c0_24 = arith.constant 0 : index
    %c0_25 = arith.constant 0 : index
    %36 = vector.load %arg3[%c4, %c0_24, %c0_25] : memref<9x8x16xf32, #tpu.memory_space<vmem>>, vector<1x8x16xf32>
    %37 = vector.shape_cast %36 : vector<1x8x16xf32> to vector<8x16xf32>
    %38 = arith.truncf %35 : vector<328x8xf32> to vector<328x8xbf16>
    %39 = arith.truncf %37 : vector<8x16xf32> to vector<8x16xbf16>
    %cst_26 = arith.constant dense<0.000000e+00> : vector<328x16xf32>
    %40 = tpu.matmul %38, %39, %cst_26 {dimension_numbers = #tpu.dot_dimension_numbers<[1], [0], [0], [1], [0, 0, 1, 1], [], []>} : vector<328x8xbf16>, vector<8x16xbf16>, vector<328x16xf32> -> vector<328x16xf32>
    %41 = arith.addf %33, %40 : vector<328x16xf32>
    %c0_27 = arith.constant 0 : index
    %c25 = arith.constant 25 : index
    %c0_28 = arith.constant 0 : index
    %42 = vector.load %arg2[%c0_27, %c25, %c0_28] : memref<1x376x8xf32, #tpu.memory_space<vmem>>, vector<1x328x8xf32>
    %43 = vector.shape_cast %42 : vector<1x328x8xf32> to vector<328x8xf32>
    %c5_29 = arith.constant 5 : index
    %c0_30 = arith.constant 0 : index
    %c0_31 = arith.constant 0 : index
    %44 = vector.load %arg3[%c5_29, %c0_30, %c0_31] : memref<9x8x16xf32, #tpu.memory_space<vmem>>, vector<1x8x16xf32>
    %45 = vector.shape_cast %44 : vector<1x8x16xf32> to vector<8x16xf32>
    %46 = arith.truncf %43 : vector<328x8xf32> to vector<328x8xbf16>
    %47 = arith.truncf %45 : vector<8x16xf32> to vector<8x16xbf16>
    %cst_32 = arith.constant dense<0.000000e+00> : vector<328x16xf32>
    %48 = tpu.matmul %46, %47, %cst_32 {dimension_numbers = #tpu.dot_dimension_numbers<[1], [0], [0], [1], [0, 0, 1, 1], [], []>} : vector<328x8xbf16>, vector<8x16xbf16>, vector<328x16xf32> -> vector<328x16xf32>
    %49 = arith.addf %41, %48 : vector<328x16xf32>
    %c0_33 = arith.constant 0 : index
    %c41 = arith.constant 41 : index
    %c0_34 = arith.constant 0 : index
    %50 = vector.load %arg2[%c0_33, %c41, %c0_34] : memref<1x376x8xf32, #tpu.memory_space<vmem>>, vector<1x328x8xf32>
    %51 = vector.shape_cast %50 : vector<1x328x8xf32> to vector<328x8xf32>
    %c6_35 = arith.constant 6 : index
    %c0_36 = arith.constant 0 : index
    %c0_37 = arith.constant 0 : index
    %52 = vector.load %arg3[%c6_35, %c0_36, %c0_37] : memref<9x8x16xf32, #tpu.memory_space<vmem>>, vector<1x8x16xf32>
    %53 = vector.shape_cast %52 : vector<1x8x16xf32> to vector<8x16xf32>
    %54 = arith.truncf %51 : vector<328x8xf32> to vector<328x8xbf16>
    %55 = arith.truncf %53 : vector<8x16xf32> to vector<8x16xbf16>
    %cst_38 = arith.constant dense<0.000000e+00> : vector<328x16xf32>
    %56 = tpu.matmul %54, %55, %cst_38 {dimension_numbers = #tpu.dot_dimension_numbers<[1], [0], [0], [1], [0, 0, 1, 1], [], []>} : vector<328x8xbf16>, vector<8x16xbf16>, vector<328x16xf32> -> vector<328x16xf32>
    %57 = arith.addf %49, %56 : vector<328x16xf32>
    %c0_39 = arith.constant 0 : index
    %c42 = arith.constant 42 : index
    %c0_40 = arith.constant 0 : index
    %58 = vector.load %arg2[%c0_39, %c42, %c0_40] : memref<1x376x8xf32, #tpu.memory_space<vmem>>, vector<1x328x8xf32>
    %59 = vector.shape_cast %58 : vector<1x328x8xf32> to vector<328x8xf32>
    %c7_41 = arith.constant 7 : index
    %c0_42 = arith.constant 0 : index
    %c0_43 = arith.constant 0 : index
    %60 = vector.load %arg3[%c7_41, %c0_42, %c0_43] : memref<9x8x16xf32, #tpu.memory_space<vmem>>, vector<1x8x16xf32>
    %61 = vector.shape_cast %60 : vector<1x8x16xf32> to vector<8x16xf32>
    %62 = arith.truncf %59 : vector<328x8xf32> to vector<328x8xbf16>
    %63 = arith.truncf %61 : vector<8x16xf32> to vector<8x16xbf16>
    %cst_44 = arith.constant dense<0.000000e+00> : vector<328x16xf32>
    %64 = tpu.matmul %62, %63, %cst_44 {dimension_numbers = #tpu.dot_dimension_numbers<[1], [0], [0], [1], [0, 0, 1, 1], [], []>} : vector<328x8xbf16>, vector<8x16xbf16>, vector<328x16xf32> -> vector<328x16xf32>
    %65 = arith.addf %57, %64 : vector<328x16xf32>
    %c0_45 = arith.constant 0 : index
    %c43 = arith.constant 43 : index
    %c0_46 = arith.constant 0 : index
    %66 = vector.load %arg2[%c0_45, %c43, %c0_46] : memref<1x376x8xf32, #tpu.memory_space<vmem>>, vector<1x328x8xf32>
    %67 = vector.shape_cast %66 : vector<1x328x8xf32> to vector<328x8xf32>
    %c8 = arith.constant 8 : index
    %c0_47 = arith.constant 0 : index
    %c0_48 = arith.constant 0 : index
    %68 = vector.load %arg3[%c8, %c0_47, %c0_48] : memref<9x8x16xf32, #tpu.memory_space<vmem>>, vector<1x8x16xf32>
    %69 = vector.shape_cast %68 : vector<1x8x16xf32> to vector<8x16xf32>
    %70 = arith.truncf %67 : vector<328x8xf32> to vector<328x8xbf16>
    %71 = arith.truncf %69 : vector<8x16xf32> to vector<8x16xbf16>
    %cst_49 = arith.constant dense<0.000000e+00> : vector<328x16xf32>
    %72 = tpu.matmul %70, %71, %cst_49 {dimension_numbers = #tpu.dot_dimension_numbers<[1], [0], [0], [1], [0, 0, 1, 1], [], []>} : vector<328x8xbf16>, vector<8x16xbf16>, vector<328x16xf32> -> vector<328x16xf32>
    %73 = arith.addf %65, %72 : vector<328x16xf32>
    %c0_50 = arith.constant 0 : index
    %c0_51 = arith.constant 0 : index
    %74 = vector.load %arg4[%c0_50, %c0_51] : memref<1x16xf32, #tpu.memory_space<vmem>>, vector<1x16xf32>
    %75 = vector.broadcast %74 : vector<1x16xf32> to vector<328x16xf32>
    %76 = arith.addf %73, %75 : vector<328x16xf32>
    %77 = arith.negf %76 : vector<328x16xf32>
    %78 = math.exp %77 : vector<328x16xf32>
    %cst_52 = arith.constant 1.000000e+00 : f32
    %79 = vector.broadcast %cst_52 : f32 to vector<328x16xf32>
    %80 = arith.addf %79, %78 : vector<328x16xf32>
    %81 = arith.divf %79, %80 : vector<328x16xf32>
    %82 = arith.mulf %76, %81 : vector<328x16xf32>
    %c0_53 = arith.constant 0 : index
    %c0_54 = arith.constant 0 : index
    %83 = vector.load %arg5[%c0_53, %c0_54] : memref<16x32xf32, #tpu.memory_space<vmem>>, vector<16x32xf32>
    %84 = arith.truncf %82 : vector<328x16xf32> to vector<328x16xbf16>
    %85 = arith.truncf %83 : vector<16x32xf32> to vector<16x32xbf16>
    %cst_55 = arith.constant dense<0.000000e+00> : vector<328x32xf32>
    %86 = tpu.matmul %84, %85, %cst_55 {dimension_numbers = #tpu.dot_dimension_numbers<[1], [0], [0], [1], [0, 0, 1, 1], [], []>} : vector<328x16xbf16>, vector<16x32xbf16>, vector<328x32xf32> -> vector<328x32xf32>
    %c0_56 = arith.constant 0 : index
    %c0_57 = arith.constant 0 : index
    %87 = vector.load %arg6[%c0_56, %c0_57] : memref<1x32xf32, #tpu.memory_space<vmem>>, vector<1x32xf32>
    %88 = vector.broadcast %87 : vector<1x32xf32> to vector<328x32xf32>
    %89 = arith.addf %86, %88 : vector<328x32xf32>
    %90 = arith.negf %89 : vector<328x32xf32>
    %91 = math.exp %90 : vector<328x32xf32>
    %cst_58 = arith.constant 1.000000e+00 : f32
    %92 = vector.broadcast %cst_58 : f32 to vector<328x32xf32>
    %93 = arith.addf %92, %91 : vector<328x32xf32>
    %94 = arith.divf %92, %93 : vector<328x32xf32>
    %95 = arith.mulf %89, %94 : vector<328x32xf32>
    %cst_59 = arith.constant 0.000000e+00 : f32
    %96 = vector.broadcast %cst_59 : f32 to vector<376x32xf32>
    %c0_60 = arith.constant 0 : index
    %c0_61 = arith.constant 0 : index
    %97 = vector.load %arg20[%c0_60, %c0_61] : memref<376x32xf32, #tpu.memory_space<vmem>>, vector<376x32xf32>
    tpu.vector_store %arg20[%c0_60, %c0_61], %96 {strides = array<i32>} : memref<376x32xf32, #tpu.memory_space<vmem>>, vector<376x32xf32>,
    %98 = vector.broadcast %0 : vector<328x1xf32> to vector<328x32xf32>
    %99 = arith.mulf %95, %98 : vector<328x32xf32>
    %c24_62 = arith.constant 24 : index
    %c0_63 = arith.constant 0 : index
    %100 = vector.load %arg20[%c24_62, %c0_63] : memref<376x32xf32, #tpu.memory_space<vmem>>, vector<328x32xf32>
    tpu.vector_store %arg20[%c24_62, %c0_63], %99 {strides = array<i32>} : memref<376x32xf32, #tpu.memory_space<vmem>>, vector<328x32xf32>,
    %cst_64 = arith.constant 0.000000e+00 : f32
    %101 = vector.broadcast %cst_64 : f32 to vector<328x32xf32>
    %c5_65 = arith.constant 5 : index
    %c0_66 = arith.constant 0 : index
    %102 = vector.load %arg20[%c5_65, %c0_66] : memref<376x32xf32, #tpu.memory_space<vmem>>, vector<328x32xf32>
    %c0_67 = arith.constant 0 : index
    %c0_68 = arith.constant 0 : index
    %103 = vector.load %arg7[%c0_67, %c0_68] : memref<9x32xf32, #tpu.memory_space<vmem>>, vector<1x32xf32>
    %104 = vector.broadcast %103 : vector<1x32xf32> to vector<328x32xf32>
    %105 = arith.mulf %102, %104 : vector<328x32xf32>
    %106 = arith.addf %101, %105 : vector<328x32xf32>
    %c6_69 = arith.constant 6 : index
    %c0_70 = arith.constant 0 : index
    %107 = vector.load %arg20[%c6_69, %c0_70] : memref<376x32xf32, #tpu.memory_space<vmem>>, vector<328x32xf32>
    %c1_71 = arith.constant 1 : index
    %c0_72 = arith.constant 0 : index
    %108 = vector.load %arg7[%c1_71, %c0_72] : memref<9x32xf32, #tpu.memory_space<vmem>>, vector<1x32xf32>
    %109 = vector.broadcast %108 : vector<1x32xf32> to vector<328x32xf32>
    %110 = arith.mulf %107, %109 : vector<328x32xf32>
    %111 = arith.addf %106, %110 : vector<328x32xf32>
    %c7_73 = arith.constant 7 : index
    %c0_74 = arith.constant 0 : index
    %112 = vector.load %arg20[%c7_73, %c0_74] : memref<376x32xf32, #tpu.memory_space<vmem>>, vector<328x32xf32>
    %c2_75 = arith.constant 2 : index
    %c0_76 = arith.constant 0 : index
    %113 = vector.load %arg7[%c2_75, %c0_76] : memref<9x32xf32, #tpu.memory_space<vmem>>, vector<1x32xf32>
    %114 = vector.broadcast %113 : vector<1x32xf32> to vector<328x32xf32>
    %115 = arith.mulf %112, %114 : vector<328x32xf32>
    %116 = arith.addf %111, %115 : vector<328x32xf32>
    %c23_77 = arith.constant 23 : index
    %c0_78 = arith.constant 0 : index
    %117 = vector.load %arg20[%c23_77, %c0_78] : memref<376x32xf32, #tpu.memory_space<vmem>>, vector<328x32xf32>
    %c3_79 = arith.constant 3 : index
    %c0_80 = arith.constant 0 : index
    %118 = vector.load %arg7[%c3_79, %c0_80] : memref<9x32xf32, #tpu.memory_space<vmem>>, vector<1x32xf32>
    %119 = vector.broadcast %118 : vector<1x32xf32> to vector<328x32xf32>
    %120 = arith.mulf %117, %119 : vector<328x32xf32>
    %121 = arith.addf %116, %120 : vector<328x32xf32>
    %c24_81 = arith.constant 24 : index
    %c0_82 = arith.constant 0 : index
    %122 = vector.load %arg20[%c24_81, %c0_82] : memref<376x32xf32, #tpu.memory_space<vmem>>, vector<328x32xf32>
    %c4_83 = arith.constant 4 : index
    %c0_84 = arith.constant 0 : index
    %123 = vector.load %arg7[%c4_83, %c0_84] : memref<9x32xf32, #tpu.memory_space<vmem>>, vector<1x32xf32>
    %124 = vector.broadcast %123 : vector<1x32xf32> to vector<328x32xf32>
    %125 = arith.mulf %122, %124 : vector<328x32xf32>
    %126 = arith.addf %121, %125 : vector<328x32xf32>
    %c25_85 = arith.constant 25 : index
    %c0_86 = arith.constant 0 : index
    %127 = vector.load %arg20[%c25_85, %c0_86] : memref<376x32xf32, #tpu.memory_space<vmem>>, vector<328x32xf32>
    %c5_87 = arith.constant 5 : index
    %c0_88 = arith.constant 0 : index
    %128 = vector.load %arg7[%c5_87, %c0_88] : memref<9x32xf32, #tpu.memory_space<vmem>>, vector<1x32xf32>
    %129 = vector.broadcast %128 : vector<1x32xf32> to vector<328x32xf32>
    %130 = arith.mulf %127, %129 : vector<328x32xf32>
    %131 = arith.addf %126, %130 : vector<328x32xf32>
    %c41_89 = arith.constant 41 : index
    %c0_90 = arith.constant 0 : index
    %132 = vector.load %arg20[%c41_89, %c0_90] : memref<376x32xf32, #tpu.memory_space<vmem>>, vector<328x32xf32>
    %c6_91 = arith.constant 6 : index
    %c0_92 = arith.constant 0 : index
    %133 = vector.load %arg7[%c6_91, %c0_92] : memref<9x32xf32, #tpu.memory_space<vmem>>, vector<1x32xf32>
    %134 = vector.broadcast %133 : vector<1x32xf32> to vector<328x32xf32>
    %135 = arith.mulf %132, %134 : vector<328x32xf32>
    %136 = arith.addf %131, %135 : vector<328x32xf32>
    %c42_93 = arith.constant 42 : index
    %c0_94 = arith.constant 0 : index
    %137 = vector.load %arg20[%c42_93, %c0_94] : memref<376x32xf32, #tpu.memory_space<vmem>>, vector<328x32xf32>
    %c7_95 = arith.constant 7 : index
    %c0_96 = arith.constant 0 : index
    %138 = vector.load %arg7[%c7_95, %c0_96] : memref<9x32xf32, #tpu.memory_space<vmem>>, vector<1x32xf32>
    %139 = vector.broadcast %138 : vector<1x32xf32> to vector<328x32xf32>
    %140 = arith.mulf %137, %139 : vector<328x32xf32>
    %141 = arith.addf %136, %140 : vector<328x32xf32>
    %c43_97 = arith.constant 43 : index
    %c0_98 = arith.constant 0 : index
    %142 = vector.load %arg20[%c43_97, %c0_98] : memref<376x32xf32, #tpu.memory_space<vmem>>, vector<328x32xf32>
    %c8_99 = arith.constant 8 : index
    %c0_100 = arith.constant 0 : index
    %143 = vector.load %arg7[%c8_99, %c0_100] : memref<9x32xf32, #tpu.memory_space<vmem>>, vector<1x32xf32>
    %144 = vector.broadcast %143 : vector<1x32xf32> to vector<328x32xf32>
    %145 = arith.mulf %142, %144 : vector<328x32xf32>
    %146 = arith.addf %141, %145 : vector<328x32xf32>
    %c0_101 = arith.constant 0 : index
    %c0_102 = arith.constant 0 : index
    %147 = vector.load %arg8[%c0_101, %c0_102] : memref<1x32xf32, #tpu.memory_space<vmem>>, vector<1x32xf32>
    %148 = vector.broadcast %147 : vector<1x32xf32> to vector<328x32xf32>
    %149 = arith.addf %146, %148 : vector<328x32xf32>
    %150 = arith.negf %149 : vector<328x32xf32>
    %151 = math.exp %150 : vector<328x32xf32>
    %cst_103 = arith.constant 1.000000e+00 : f32
    %152 = vector.broadcast %cst_103 : f32 to vector<328x32xf32>
    %153 = arith.addf %152, %151 : vector<328x32xf32>
    %154 = arith.divf %152, %153 : vector<328x32xf32>
    %155 = arith.mulf %149, %154 : vector<328x32xf32>
    %156 = vector.broadcast %0 : vector<328x1xf32> to vector<328x32xf32>
    %157 = arith.mulf %155, %156 : vector<328x32xf32>
    %cst_104 = arith.constant dense<0.000000e+00> : vector<32xf32>
    %158 = vector.multi_reduction <add>, %157, %cst_104 [0] : vector<328x32xf32> to vector<32xf32>
    %159 = vector.shape_cast %158 : vector<32xf32> to vector<1x32xf32>
    %cst_105 = arith.constant 3.906250e-03 : f32
    %160 = vector.broadcast %cst_105 : f32 to vector<1x32xf32>
    %161 = arith.mulf %159, %160 : vector<1x32xf32>
    %c0_106 = arith.constant 0 : index
    %c0_107 = arith.constant 0 : index
    %162 = vector.load %arg9[%c0_106, %c0_107] : memref<32x8xf32, #tpu.memory_space<vmem>>, vector<32x8xf32>
    %cst_108 = arith.constant dense<0.000000e+00> : vector<1x8xf32>
    %163 = tpu.matmul %161, %162, %cst_108 {dimension_numbers = #tpu.dot_dimension_numbers<[1], [0], [0], [1], [0, 0, 1, 1], [], []>} : vector<1x32xf32>, vector<32x8xf32>, vector<1x8xf32> -> vector<1x8xf32>
    %c0_109 = arith.constant 0 : index
    %c0_110 = arith.constant 0 : index
    %164 = vector.load %arg10[%c0_109, %c0_110] : memref<1x8xf32, #tpu.memory_space<vmem>>, vector<1x8xf32>
    %165 = arith.addf %163, %164 : vector<1x8xf32>
    %166 = arith.negf %165 : vector<1x8xf32>
    %167 = math.exp %166 : vector<1x8xf32>
    %cst_111 = arith.constant 1.000000e+00 : f32
    %168 = vector.broadcast %cst_111 : f32 to vector<1x8xf32>
    %169 = arith.addf %168, %167 : vector<1x8xf32>
    %170 = arith.divf %168, %169 : vector<1x8xf32>
    %171 = arith.mulf %165, %170 : vector<1x8xf32>
    %c0_112 = arith.constant 0 : index
    %c0_113 = arith.constant 0 : index
    %172 = vector.load %arg11[%c0_112, %c0_113] : memref<8x32xf32, #tpu.memory_space<vmem>>, vector<8x32xf32>
    %cst_114 = arith.constant dense<0.000000e+00> : vector<1x32xf32>
    %173 = tpu.matmul %171, %172, %cst_114 {dimension_numbers = #tpu.dot_dimension_numbers<[1], [0], [0], [1], [0, 0, 1, 1], [], []>} : vector<1x8xf32>, vector<8x32xf32>, vector<1x32xf32> -> vector<1x32xf32>
    %c0_115 = arith.constant 0 : index
    %c0_116 = arith.constant 0 : index
    %174 = vector.load %arg12[%c0_115, %c0_116] : memref<1x32xf32, #tpu.memory_space<vmem>>, vector<1x32xf32>
    %175 = arith.addf %173, %174 : vector<1x32xf32>
    %176 = arith.negf %175 : vector<1x32xf32>
    %177 = math.exp %176 : vector<1x32xf32>
    %cst_117 = arith.constant 1.000000e+00 : f32
    %178 = vector.broadcast %cst_117 : f32 to vector<1x32xf32>
    %179 = arith.addf %178, %177 : vector<1x32xf32>
    %180 = arith.divf %178, %179 : vector<1x32xf32>
    %181 = vector.broadcast %180 : vector<1x32xf32> to vector<328x32xf32>
    %182 = arith.mulf %155, %181 : vector<328x32xf32>
    %c0_118 = arith.constant 0 : index
    %c0_119 = arith.constant 0 : index
    %183 = vector.load %arg13[%c0_118, %c0_119] : memref<32x16xf32, #tpu.memory_space<vmem>>, vector<32x16xf32>
    %184 = arith.truncf %182 : vector<328x32xf32> to vector<328x32xbf16>
    %185 = arith.truncf %183 : vector<32x16xf32> to vector<32x16xbf16>
    %cst_120 = arith.constant dense<0.000000e+00> : vector<328x16xf32>
    %186 = tpu.matmul %184, %185, %cst_120 {dimension_numbers = #tpu.dot_dimension_numbers<[1], [0], [0], [1], [0, 0, 1, 1], [], []>} : vector<328x32xbf16>, vector<32x16xbf16>, vector<328x16xf32> -> vector<328x16xf32>
    %c0_121 = arith.constant 0 : index
    %c0_122 = arith.constant 0 : index
    %187 = vector.load %arg14[%c0_121, %c0_122] : memref<1x16xf32, #tpu.memory_space<vmem>>, vector<1x16xf32>
    %188 = vector.broadcast %187 : vector<1x16xf32> to vector<328x16xf32>
    %189 = arith.addf %186, %188 : vector<328x16xf32>
    %190 = arith.addf %189, %82 : vector<328x16xf32>
    %c0_123 = arith.constant 0 : index
    %c0_124 = arith.constant 0 : index
    %191 = vector.load %arg15[%c0_123, %c0_124] : memref<16x32xf32, #tpu.memory_space<vmem>>, vector<16x32xf32>
    %192 = arith.truncf %190 : vector<328x16xf32> to vector<328x16xbf16>
    %193 = arith.truncf %191 : vector<16x32xf32> to vector<16x32xbf16>
    %cst_125 = arith.constant dense<0.000000e+00> : vector<328x32xf32>
    %194 = tpu.matmul %192, %193, %cst_125 {dimension_numbers = #tpu.dot_dimension_numbers<[1], [0], [0], [1], [0, 0, 1, 1], [], []>} : vector<328x16xbf16>, vector<16x32xbf16>, vector<328x32xf32> -> vector<328x32xf32>
    %c0_126 = arith.constant 0 : index
    %c0_127 = arith.constant 0 : index
    %195 = vector.load %arg16[%c0_126, %c0_127] : memref<1x32xf32, #tpu.memory_space<vmem>>, vector<1x32xf32>
    %196 = vector.broadcast %195 : vector<1x32xf32> to vector<328x32xf32>
    %197 = arith.addf %194, %196 : vector<328x32xf32>
    %198 = arith.negf %197 : vector<328x32xf32>
    %199 = math.exp %198 : vector<328x32xf32>
    %cst_128 = arith.constant 1.000000e+00 : f32
    %200 = vector.broadcast %cst_128 : f32 to vector<328x32xf32>
    %201 = arith.addf %200, %199 : vector<328x32xf32>
    %202 = arith.divf %200, %201 : vector<328x32xf32>
    %203 = arith.mulf %197, %202 : vector<328x32xf32>
    %204 = vector.broadcast %0 : vector<328x1xf32> to vector<328x32xf32>
    %205 = arith.mulf %203, %204 : vector<328x32xf32>
    %cst_129 = arith.constant dense<0.000000e+00> : vector<32xf32>
    %206 = vector.multi_reduction <add>, %205, %cst_129 [0] : vector<328x32xf32> to vector<32xf32>
    %207 = vector.shape_cast %206 : vector<32xf32> to vector<1x32xf32>
    %cst_130 = arith.constant 3.906250e-03 : f32
    %208 = vector.broadcast %cst_130 : f32 to vector<1x32xf32>
    %209 = arith.mulf %207, %208 : vector<1x32xf32>
    %c0_131 = arith.constant 0 : index
    %c0_132 = arith.constant 0 : index
    %210 = vector.load %arg17[%c0_131, %c0_132] : memref<32x128xf32, #tpu.memory_space<vmem>>, vector<32x128xf32>
    %cst_133 = arith.constant dense<0.000000e+00> : vector<1x128xf32>
    %211 = tpu.matmul %209, %210, %cst_133 {dimension_numbers = #tpu.dot_dimension_numbers<[1], [0], [0], [1], [0, 0, 1, 1], [], []>} : vector<1x32xf32>, vector<32x128xf32>, vector<1x128xf32> -> vector<1x128xf32>
    %c0_134 = arith.constant 0 : index
    %c0_135 = arith.constant 0 : index
    %212 = vector.load %arg18[%c0_134, %c0_135] : memref<1x128xf32, #tpu.memory_space<vmem>>, vector<1x128xf32>
    %213 = arith.addf %211, %212 : vector<1x128xf32>
    %c0_136 = arith.constant 0 : index
    %c0_137 = arith.constant 0 : index
    %c0_138 = arith.constant 0 : index
    %214 = vector.load %arg19[%c0_136, %c0_137, %c0_138] : memref<1x1x128xf32, #tpu.memory_space<vmem>>, vector<1x1x128xf32>
    %215 = vector.shape_cast %214 : vector<1x1x128xf32> to vector<1x128xf32>
    %216 = vector.shape_cast %213 : vector<1x128xf32> to vector<1x1x128xf32>
    tpu.vector_store %arg19[%c0_136, %c0_137, %c0_138], %216 {strides = array<i32>} : memref<1x1x128xf32, #tpu.memory_space<vmem>>, vector<1x1x128xf32>,
    return
  }
  func.func @transform_0(%arg0: i32) -> (i32, i32) {
    %c0_i32 = arith.constant 0 : i32
    %c0_i32_0 = arith.constant 0 : i32
    %c0_i32_1 = arith.constant 0 : i32
    return %c0_i32, %c0_i32_0 : i32, i32
  }
  func.func @transform_1(%arg0: i32) -> (i32, i32, i32) {
    %c0_i32 = arith.constant 0 : i32
    %c0_i32_0 = arith.constant 0 : i32
    %c0_i32_1 = arith.constant 0 : i32
    return %arg0, %c0_i32, %c0_i32_0 : i32, i32, i32
  }
  func.func @transform_2(%arg0: i32) -> (i32, i32, i32) {
    %c0_i32 = arith.constant 0 : i32
    %c0_i32_0 = arith.constant 0 : i32
    %c0_i32_1 = arith.constant 0 : i32
    %c0_i32_2 = arith.constant 0 : i32
    return %c0_i32, %c0_i32_0, %c0_i32_1 : i32, i32, i32
  }
  func.func @transform_3(%arg0: i32) -> (i32, i32) {
    %c0_i32 = arith.constant 0 : i32
    %c0_i32_0 = arith.constant 0 : i32
    %c0_i32_1 = arith.constant 0 : i32
    return %c0_i32, %c0_i32_0 : i32, i32
  }
  func.func @transform_4(%arg0: i32) -> (i32, i32) {
    %c0_i32 = arith.constant 0 : i32
    %c0_i32_0 = arith.constant 0 : i32
    %c0_i32_1 = arith.constant 0 : i32
    return %c0_i32, %c0_i32_0 : i32, i32
  }
  func.func @transform_5(%arg0: i32) -> (i32, i32) {
    %c0_i32 = arith.constant 0 : i32
    %c0_i32_0 = arith.constant 0 : i32
    %c0_i32_1 = arith.constant 0 : i32
    return %c0_i32, %c0_i32_0 : i32, i32
  }
  func.func @transform_6(%arg0: i32) -> (i32, i32) {
    %c0_i32 = arith.constant 0 : i32
    %c0_i32_0 = arith.constant 0 : i32
    %c0_i32_1 = arith.constant 0 : i32
    return %c0_i32, %c0_i32_0 : i32, i32
  }
  func.func @transform_7(%arg0: i32) -> (i32, i32) {
    %c0_i32 = arith.constant 0 : i32
    %c0_i32_0 = arith.constant 0 : i32
    %c0_i32_1 = arith.constant 0 : i32
    return %c0_i32, %c0_i32_0 : i32, i32
  }
  func.func @transform_8(%arg0: i32) -> (i32, i32) {
    %c0_i32 = arith.constant 0 : i32
    %c0_i32_0 = arith.constant 0 : i32
    %c0_i32_1 = arith.constant 0 : i32
    return %c0_i32, %c0_i32_0 : i32, i32
  }
  func.func @transform_9(%arg0: i32) -> (i32, i32) {
    %c0_i32 = arith.constant 0 : i32
    %c0_i32_0 = arith.constant 0 : i32
    %c0_i32_1 = arith.constant 0 : i32
    return %c0_i32, %c0_i32_0 : i32, i32
  }
  func.func @transform_10(%arg0: i32) -> (i32, i32) {
    %c0_i32 = arith.constant 0 : i32
    %c0_i32_0 = arith.constant 0 : i32
    %c0_i32_1 = arith.constant 0 : i32
    return %c0_i32, %c0_i32_0 : i32, i32
  }
  func.func @transform_11(%arg0: i32) -> (i32, i32) {
    %c0_i32 = arith.constant 0 : i32
    %c0_i32_0 = arith.constant 0 : i32
    %c0_i32_1 = arith.constant 0 : i32
    return %c0_i32, %c0_i32_0 : i32, i32
  }
  func.func @transform_12(%arg0: i32) -> (i32, i32) {
    %c0_i32 = arith.constant 0 : i32
    %c0_i32_0 = arith.constant 0 : i32
    %c0_i32_1 = arith.constant 0 : i32
    return %c0_i32, %c0_i32_0 : i32, i32
  }
  func.func @transform_13(%arg0: i32) -> (i32, i32) {
    %c0_i32 = arith.constant 0 : i32
    %c0_i32_0 = arith.constant 0 : i32
    %c0_i32_1 = arith.constant 0 : i32
    return %c0_i32, %c0_i32_0 : i32, i32
  }
  func.func @transform_14(%arg0: i32) -> (i32, i32) {
    %c0_i32 = arith.constant 0 : i32
    %c0_i32_0 = arith.constant 0 : i32
    %c0_i32_1 = arith.constant 0 : i32
    return %c0_i32, %c0_i32_0 : i32, i32
  }
  func.func @transform_15(%arg0: i32) -> (i32, i32) {
    %c0_i32 = arith.constant 0 : i32
    %c0_i32_0 = arith.constant 0 : i32
    %c0_i32_1 = arith.constant 0 : i32
    return %c0_i32, %c0_i32_0 : i32, i32
  }
  func.func @transform_16(%arg0: i32) -> (i32, i32) {
    %c0_i32 = arith.constant 0 : i32
    %c0_i32_0 = arith.constant 0 : i32
    %c0_i32_1 = arith.constant 0 : i32
    return %c0_i32, %c0_i32_0 : i32, i32
  }
  func.func @transform_17(%arg0: i32) -> (i32, i32) {
    %c0_i32 = arith.constant 0 : i32
    %c0_i32_0 = arith.constant 0 : i32
    %c0_i32_1 = arith.constant 0 : i32
    return %c0_i32, %c0_i32_0 : i32, i32
  }
  func.func @transform_18(%arg0: i32) -> (i32, i32, i32) {
    %c0_i32 = arith.constant 0 : i32
    %c0_i32_0 = arith.constant 0 : i32
    %c0_i32_1 = arith.constant 0 : i32
    return %arg0, %c0_i32, %c0_i32_0 : i32, i32, i32
  }
}

</mosaic_0001>

<bundles_post_ra>
// kernel: effnet_model_forward.1
= control target key start
LH: loop header
LB: loop body
LE: loop exit
PB: predicated region body
PF: predicated region fallthrough
CT: control target
= control target key end

     0   :  { %s15361_s0 = inlined_call_operand.vmem [shape: f32[328,1], index: 0, kind: input, shape index: {}]   ;;  %s15362_s1 = inlined_call_operand.vmem [shape: f32[2,376,8], index: 1, kind: input, shape index: {}]   ;;  %s15363_s2 = inlined_call_operand.vmem [shape: f32[9,8,16], index: 2, kind: input, shape index: {}]   ;;  %s15364_s3 = inlined_call_operand.vmem [shape: f32[1,16], index: 3, kind: input, shape index: {}]   ;;  %s15365_s4 = inlined_call_operand.vmem [shape: f32[16,32], index: 4, kind: input, shape index: {}]   ;;  %s15366_s5 = inlined_call_operand.vmem [shape: f32[1,32], index: 5, kind: input, shape index: {}]   ;;  %s15367_s6 = inlined_call_operand.vmem [shape: f32[9,32], index: 6, kind: input, shape index: {}]   ;;  %s15368_s7 = inlined_call_operand.vmem [shape: f32[1,32], index: 7, kind: input, shape index: {}]   ;;  %s15369_s8 = inlined_call_operand.vmem [shape: f32[32,8], index: 8, kind: input, shape index: {}]   ;;  %s15370_s9 = inlined_call_operand.vmem [shape: f32[1,8], index: 9, kind: input, shape index: {}]   ;;  %s15371_s10 = inlined_call_operand.vmem [shape: f32[8,32], index: 10, kind: input, shape index: {}]   ;;  %s15372_s11 = inlined_call_operand.vmem [shape: f32[1,32], index: 11, kind: input, shape index: {}]   ;;  %s15373_s12 = inlined_call_operand.vmem [shape: f32[32,16], index: 12, kind: input, shape index: {}]   ;;  %s15374_s13 = inlined_call_operand.vmem [shape: f32[1,16], index: 13, kind: input, shape index: {}]   ;;  %s15375_s14 = inlined_call_operand.vmem [shape: f32[16,32], index: 14, kind: input, shape index: {}]   ;;  %s15376_s15 = inlined_call_operand.vmem [shape: f32[1,32], index: 15, kind: input, shape index: {}]   ;;  %s15377_s16 = inlined_call_operand.vmem [shape: f32[32,128], index: 16, kind: input, shape index: {}]   ;;  %s15378_s17 = inlined_call_operand.vmem [shape: f32[1,128], index: 17, kind: input, shape index: {}]   ;;  %s15379_s18 = inlined_call_operand.hbm [shape: f32[2,1,128], index: 18, kind: output, shape index: {}]  }
   0x1   :  { %15538 = sst [smem:[#allocation118_spill]] %s15361_s0 }
   0x2   :  { %15539 = sst [smem:[#allocation119_spill]] %s15362_s1 }
   0x3   :  { %15540 = sst [smem:[#allocation120_spill]] %s15363_s2 }
   0x4   :  { %15541 = sst [smem:[#allocation121_spill]] %s15364_s3 }
   0x5   :  { %15542 = sst [smem:[#allocation122_spill]] %s15365_s4 }
   0x6   :  { %15543 = sst [smem:[#allocation123_spill]] %s15366_s5 }
   0x7   :  { %15544 = sst [smem:[#allocation124_spill]] %s15367_s6 }
   0x8   :  { %15545 = sst [smem:[#allocation125_spill]] %s15368_s7 }
   0x9   :  { %15546 = sst [smem:[#allocation126_spill]] %s15369_s8 }
   0xa   :  { %23 = vsyncpa [#allocation4], 0 }
   0xb   :  { %25 = vsyncpa [#allocation4 + $0x1], 0  ;;  %s10768_s27 = smov 0   ;;  %s10770_s28 = smov 0  }
   0xc   :  { %s10772_s29 = smov 0   ;;  %s10774_s30 = smov 0  }
   0xd LB: > { %s10789_s0 = sadd.s32 4294967295, %s10667_s30   ;;  %s8078_s19 = sadd.s32 4294967294, %s10667_s30   ;;  %s10667_s30 = sphi %s10774_s30, %s15881_s30   ;;  %s10663_s29 = sphi %s10772_s29, %s15880_s29   ;;  %s10659_s28 = sphi %s10770_s28, %s15879_s28   ;;  %s10655_s27 = sphi %s10768_s27, %s15878_s27  }
   0xe   : > { %s10793_s1 = sadd.s32 1, %s10667_s30   ;;  %s421_s20 = sadd.s32 1, %s10663_s29 }
   0xf   : > { %s418_s21 = ssub.s32 %s10667_s30, %s10793_s1  ;;  %p431_p0 = scmp.ne.s32.totalorder %s10663_s29, %s10659_s28 }
  0x10   : > { %p419_p1 = scmp.eq.s32.totalorder %s418_s21, 0  ;;  %p432_p2 = scmp.eq.s32.totalorder %s10789_s0, 1 }
  0x11   : > { %p437_p3 = scmp.ne.s32.totalorder %s10659_s28, %s10655_s27  ;;  %p438_p4 = scmp.eq.s32.totalorder %s8078_s19, 1 }
  0x12   : > { %s10804_s22 = scalar_select %p419_p1, %s10663_s29, %s421_s20  }
  0x13   : > { %p10806_p5 = por %p432_p2, %p431_p0  ;;  %p10810_p6 = por %p438_p4, %p437_p3 }
  0x14   : > { %15547 = sst [smem:[#allocation6_spill]] %s10804_s22  ;;  %p8081_p7 = scmp.ge.s32.totalorder %s10667_s30, 1 }
  0x15   : > { %p515_p8 = scmp.lt.s32.totalorder %s10667_s30, 3 }
  0x17   : > { %p516_p9 = pnand %p8081_p7, %p515_p8 }
  0x19   : > { %519 = sbr.rel (%p516_p9) target bundleno = 2858 (0xb2a), region = 92 }
  0x1e   : > { %s15550_s26 = sld [smem:[#allocation120_spill]]  ;;  %vm808_vm0 = vcmask 1043456   ;;  %p568_p10 = scmp.lt.s32.totalorder %s10789_s0, 1  ;;  %v15382_v2 = vmov 0.0   ;;  %vm10670_vm1 = vmmov 0   ;;  %vm744_vm2 = vcmask 64512  }
  0x1f   : > { %8806 = vmatprep.subr.bf16.mxu0 %v15382_v2  ;;  %8892 = vmatprep.subr.bf16.mxu1 %v15382_v2  ;;  %s15551_s20 = sld [smem:[#allocation119_spill]]  ;;  %vm4248_vm3 = vcmask 130048   ;;  %vm4799_vm4 = vcmask 261120  }
  0x20   : > { %8808 = vmatprep.mubr.msk.bf16.mxu0 %vm10670_vm1, %v15382_v2  ;;  %8894 = vmatprep.mubr.msk.bf16.mxu1 %vm10670_vm1, %v15382_v2  ;;  %s569_s24 = scalar_select %p568_p10, %s10789_s0, 1 }
  0x21   : > { %s15574_s4 = sld [smem:[#allocation122_spill]] }
  0x22   : > { %s9867_s25 = smul.u32 376, %s569_s24  ;;  %s15580_s3 = sld [smem:[#allocation121_spill]] }
  0x23   : > { %s15623_s5 = sld [smem:[#allocation123_spill]]  ;;  %s566_s24 = sand.u32 1, %s10659_s28  }
  0x24   : > { %v8083_v0 = vld [vmem:[%s15550_s26 + $0x8] sm:$0xff]  ;;  %v656_v1 = vld [vmem:[%s15550_s26] sm:$0xff]  ;;  %v8126_v5 = vld [vmem:[%s15550_s26 + $0x10] sm:$0xff]  ;;  %s15631_s6 = sld [smem:[#allocation124_spill]] }
  0x25   : > { %v743_v3 = vpack.c.bf16 %v8083_v0, %v8083_v0  ;;  %v678_v4 = vpack.c.bf16 %v656_v1, %v656_v1  ;;  %v1342_v8 = vpack.c.bf16 %v8126_v5, %v8126_v5  ;;  %s10840_s21 = scalar_lea.vmem %s15551_s20, %s9867_s25  ;;  %v8148_v42 = vld [vmem:[%s15550_s26 + $0x18] sm:$0xff]  ;;  %s15581_s20 = sld [smem:[#allocation118_spill]] }
  0x26   : > { %v679_v9 = vld [vmem:[%s10840_s21 + $0x6] sm:$0xff]  ;;  %v680_v10 = vld [vmem:[%s10840_s21 + $0xe] sm:$0xff]  ;;  %v681_v16 = vld [vmem:[%s10840_s21 + $0x16] sm:$0xff]  ;;  %v1714_v45 = vpack.c.bf16 %v8148_v42, %v8148_v42  ;;  %s15638_s7 = sld [smem:[#allocation125_spill]] }
  0x27   : > { %v810_v6 = vsel %vm808_vm0, %v743_v3, 0  ;;  %v1076_v7 = vsel %vm808_vm0, %v678_v4, 0  ;;  %v615_v11 = vld [vmem:[%s10840_s21 + $0x5] sm:$0xff]  ;;  %v722_v12 = vpack.c.bf16 %v680_v10, %v679_v9  ;;  %v616_v13 = vld [vmem:[%s10840_s21 + $0xd] sm:$0xff]  ;;  %v1407_v14 = vsel %vm808_vm0, %v1342_v8, 0  ;;  %v617_v18 = vld [vmem:[%s10840_s21 + $0x15] sm:$0xff] }
  0x28   : > { %8807 = vmatpush3.bf16.msra.mxu0 %v810_v6  ;;  %8893 = vmatpush3.bf16.msra.mxu1 %v1076_v7  ;;  %v657_v15 = vpack.c.bf16 %v616_v13, %v615_v11  ;;  %v682_v17 = vld [vmem:[%s10840_s21 + $0x1e] sm:$0xff]  ;;  %v683_v22 = vld [vmem:[%s10840_s21 + $0x26] sm:$0xff]  ;;  %v684_v23 = vld [vmem:[%s10840_s21 + $0x2e] sm:$0xff]  ;;  %v1779_v47 = vsel %vm808_vm0, %v1714_v45, 0  ;;  %s15672_s8 = sld [smem:[#allocation126_spill]] }
  0x29   : > { %8978 = vmatprep.subr.bf16.mxu0 %v15382_v2  ;;  %9064 = vmatprep.subr.bf16.mxu1 %v15382_v2  ;;  %v618_v19 = vld [vmem:[%s10840_s21 + $0x1d] sm:$0xff]  ;;  %v723_v20 = vpack.c.bf16 %v682_v17, %v681_v16  ;;  %v619_v24 = vld [vmem:[%s10840_s21 + $0x25] sm:$0xff]  ;;  %v620_v25 = vld [vmem:[%s10840_s21 + $0x2d] sm:$0xff]  ;;  %v724_v26 = vpack.c.bf16 %v684_v23, %v683_v22 }
  0x2a   : > { %v658_v21 = vpack.c.bf16 %v618_v19, %v617_v18  ;;  %v659_v27 = vpack.c.bf16 %v620_v25, %v619_v24  ;;  %v685_v28 = vld [vmem:[%s10840_s21 + $0x36] sm:$0xff]  ;;  %v686_v29 = vld [vmem:[%s10840_s21 + $0x3e] sm:$0xff]  ;;  %v687_v34 = vld [vmem:[%s10840_s21 + $0x46] sm:$0xff] }
  0x2b   : > { %8809 = vmatmul.mubr.msk.bf16.vlgmr.msra.gmra.mxu0 %vm744_vm2, %v722_v12  ;;  %8895 = vmatmul.mubr.msk.bf16.vlgmr.msra.gmra.mxu1 %vm744_vm2, %v657_v15  ;;  %v621_v30 = vld [vmem:[%s10840_s21 + $0x35] sm:$0xff]  ;;  %v622_v31 = vld [vmem:[%s10840_s21 + $0x3d] sm:$0xff]  ;;  %v725_v32 = vpack.c.bf16 %v686_v29, %v685_v28  ;;  %v623_v36 = vld [vmem:[%s10840_s21 + $0x45] sm:$0xff] }
  0x2c   : > { %8979 = vmatpush3.bf16.msra.mxu0 %v1407_v14  ;;  %8812 = vmatprep.mubr.msk.bf16.mxu0 %vm10670_vm1, %v15382_v2  ;;  %v660_v33 = vpack.c.bf16 %v622_v31, %v621_v30  ;;  %v688_v35 = vld [vmem:[%s10840_s21 + $0x4e] sm:$0xff]  ;;  %v689_v40 = vld [vmem:[%s10840_s21 + $0x56] sm:$0xff]  ;;  %v690_v41 = vld [vmem:[%s10840_s21 + $0x5e] sm:$0xff] }
  0x2d   : > { %8898 = vmatprep.mubr.msk.bf16.mxu1 %vm10670_vm1, %v15382_v2  ;;  %9150 = vmatprep.subr.bf16.mxu0 %v15382_v2  ;;  %v624_v37 = vld [vmem:[%s10840_s21 + $0x4d] sm:$0xff]  ;;  %v726_v38 = vpack.c.bf16 %v688_v35, %v687_v34  ;;  %v625_v43 = vld [vmem:[%s10840_s21 + $0x55] sm:$0xff]  ;;  %v626_v44 = vld [vmem:[%s10840_s21 + $0x5d] sm:$0xff]  ;;  %v727_v46 = vpack.c.bf16 %v690_v41, %v689_v40 }
  0x2e   : > { %v661_v39 = vpack.c.bf16 %v624_v37, %v623_v36  ;;  %v662_v48 = vpack.c.bf16 %v626_v44, %v625_v43  ;;  %9065 = vmatpush3.bf16.msra.mxu1 %v1779_v47  ;;  %v691_v49 = vld [vmem:[%s10840_s21 + $0x66] sm:$0xff]  ;;  %v692_v50 = vld [vmem:[%s10840_s21 + $0x6e] sm:$0xff]  ;;  %v693_v55 = vld [vmem:[%s10840_s21 + $0x76] sm:$0xff] }
  0x2f   : > { %9236 = vmatprep.subr.bf16.mxu1 %v15382_v2  ;;  %v627_v51 = vld [vmem:[%s10840_s21 + $0x65] sm:$0xff]  ;;  %v628_v52 = vld [vmem:[%s10840_s21 + $0x6d] sm:$0xff]  ;;  %v728_v53 = vpack.c.bf16 %v692_v50, %v691_v49  ;;  %v629_v57 = vld [vmem:[%s10840_s21 + $0x75] sm:$0xff] }
  0x30   : > { %v663_v54 = vpack.c.bf16 %v628_v52, %v627_v51  ;;  %v694_v56 = vld [vmem:[%s10840_s21 + $0x7e] sm:$0xff]  ;;  %v695_v61 = vld [vmem:[%s10840_s21 + $0x86] sm:$0xff]  ;;  %v696_v62 = vld [vmem:[%s10840_s21 + $0x8e] sm:$0xff] }
  0x31   : > { %v630_v58 = vld [vmem:[%s10840_s21 + $0x7d] sm:$0xff]  ;;  %v729_v59 = vpack.c.bf16 %v694_v56, %v693_v55  ;;  %v631_v63 = vld [vmem:[%s10840_s21 + $0x85] sm:$0xff]  ;;  %v632_v0 = vld [vmem:[%s10840_s21 + $0x8d] sm:$0xff]  ;;  %v730_v1 = vpack.c.bf16 %v696_v62, %v695_v61 }
  0x32   : > { %v664_v60 = vpack.c.bf16 %v630_v58, %v629_v57  ;;  %v665_v3 = vpack.c.bf16 %v632_v0, %v631_v63  ;;  %v697_v4 = vld [vmem:[%s10840_s21 + $0x96] sm:$0xff]  ;;  %v698_v5 = vld [vmem:[%s10840_s21 + $0x9e] sm:$0xff]  ;;  %v699_v10 = vld [vmem:[%s10840_s21 + $0xa6] sm:$0xff] }
  0x33   : > { %8813 = vmatmul.mubr.msk.bf16.gmra.mxu0 %vm744_vm2, %v723_v20  ;;  %8899 = vmatmul.mubr.msk.bf16.gmra.mxu1 %vm744_vm2, %v658_v21  ;;  %v633_v6 = vld [vmem:[%s10840_s21 + $0x95] sm:$0xff]  ;;  %v634_v7 = vld [vmem:[%s10840_s21 + $0x9d] sm:$0xff]  ;;  %v731_v8 = vpack.c.bf16 %v698_v5, %v697_v4  ;;  %v635_v12 = vld [vmem:[%s10840_s21 + $0xa5] sm:$0xff] }
  0x34   : > { %8816 = vmatprep.mubr.msk.bf16.mxu0 %vm10670_vm1, %v15382_v2  ;;  %8902 = vmatprep.mubr.msk.bf16.mxu1 %vm10670_vm1, %v15382_v2  ;;  %v666_v9 = vpack.c.bf16 %v634_v7, %v633_v6  ;;  %v700_v11 = vld [vmem:[%s10840_s21 + $0xae] sm:$0xff]  ;;  %v701_v16 = vld [vmem:[%s10840_s21 + $0xb6] sm:$0xff]  ;;  %v702_v17 = vld [vmem:[%s10840_s21 + $0xbe] sm:$0xff] }
  0x35   : > { %v636_v13 = vld [vmem:[%s10840_s21 + $0xad] sm:$0xff]  ;;  %v732_v14 = vpack.c.bf16 %v700_v11, %v699_v10  ;;  %v637_v18 = vld [vmem:[%s10840_s21 + $0xb5] sm:$0xff]  ;;  %v638_v19 = vld [vmem:[%s10840_s21 + $0xbd] sm:$0xff]  ;;  %v733_v20 = vpack.c.bf16 %v702_v17, %v701_v16 }
  0x36   : > { %v667_v15 = vpack.c.bf16 %v636_v13, %v635_v12  ;;  %v668_v21 = vpack.c.bf16 %v638_v19, %v637_v18  ;;  %v703_v22 = vld [vmem:[%s10840_s21 + $0xc6] sm:$0xff]  ;;  %v704_v23 = vld [vmem:[%s10840_s21 + $0xce] sm:$0xff]  ;;  %v705_v28 = vld [vmem:[%s10840_s21 + $0xd6] sm:$0xff] }
  0x37   : > { %v639_v24 = vld [vmem:[%s10840_s21 + $0xc5] sm:$0xff]  ;;  %v640_v25 = vld [vmem:[%s10840_s21 + $0xcd] sm:$0xff]  ;;  %v641_v30 = vld [vmem:[%s10840_s21 + $0xd5] sm:$0xff] }
  0x38   : > { %v706_v29 = vld [vmem:[%s10840_s21 + $0xde] sm:$0xff]  ;;  %v707_v34 = vld [vmem:[%s10840_s21 + $0xe6] sm:$0xff]  ;;  %v708_v35 = vld [vmem:[%s10840_s21 + $0xee] sm:$0xff] }
  0x39   : > { %v642_v31 = vld [vmem:[%s10840_s21 + $0xdd] sm:$0xff]  ;;  %v643_v36 = vld [vmem:[%s10840_s21 + $0xe5] sm:$0xff]  ;;  %v644_v37 = vld [vmem:[%s10840_s21 + $0xed] sm:$0xff] }
  0x3a   : > { %v709_v40 = vld [vmem:[%s10840_s21 + $0xf6] sm:$0xff]  ;;  %v710_v41 = vld [vmem:[%s10840_s21 + $0xfe] sm:$0xff]  ;;  %v712_v47 = vld [vmem:[%s10840_s21 + $0x10e] sm:$0xff] }
  0x3b   : > { %8817 = vmatmul.mubr.msk.bf16.gmra.mxu0 %vm744_vm2, %v724_v26  ;;  %8903 = vmatmul.mubr.msk.bf16.gmra.mxu1 %vm744_vm2, %v659_v27  ;;  %v734_v26 = vpack.c.bf16 %v704_v23, %v703_v22  ;;  %v669_v27 = vpack.c.bf16 %v640_v25, %v639_v24  ;;  %v645_v42 = vld [vmem:[%s10840_s21 + $0xf5] sm:$0xff]  ;;  %v646_v43 = vld [vmem:[%s10840_s21 + $0xfd] sm:$0xff]  ;;  %v737_v44 = vpack.c.bf16 %v710_v41, %v709_v40  ;;  %v648_v49 = vld [vmem:[%s10840_s21 + $0x10d] sm:$0xff] }
  0x3c   : > { %8820 = vmatprep.mubr.msk.bf16.mxu0 %vm10670_vm1, %v15382_v2  ;;  %8906 = vmatprep.mubr.msk.bf16.mxu1 %vm10670_vm1, %v15382_v2  ;;  %v672_v45 = vpack.c.bf16 %v646_v43, %v645_v42  ;;  %v713_v52 = vld [vmem:[%s10840_s21 + $0x116] sm:$0xff]  ;;  %v715_v58 = vld [vmem:[%s10840_s21 + $0x126] sm:$0xff] }
  0x3d   : > { %v650_v55 = vld [vmem:[%s10840_s21 + $0x11d] sm:$0xff]  ;;  %v652_v61 = vld [vmem:[%s10840_s21 + $0x12d] sm:$0xff] }
  0x3e   : > { %v717_v0 = vld [vmem:[%s10840_s21 + $0x136] sm:$0xff]  ;;  %v719_v7 = vld [vmem:[%s10840_s21 + $0x146] sm:$0xff] }
  0x3f   : > { %v654_v4 = vld [vmem:[%s10840_s21 + $0x13d] sm:$0xff]  ;;  %v1278_v12 = vld [vmem:[%s10840_s21 + $0x7] sm:$0xff]  ;;  %v1279_v13 = vld [vmem:[%s10840_s21 + $0xf] sm:$0xff] }
  0x40   : > { %v8170_v11 = vld [vmem:[%s15550_s26 + $0x20] sm:$0xff]  ;;  %v1321_v17 = vpack.c.bf16 %v1279_v13, %v1278_v12  ;;  %v1654_v23 = vld [vmem:[%s10840_s21 + $0x37] sm:$0xff]  ;;  %v1665_v13 = vld [vmem:[%s10840_s21 + $0x8f] sm:$0xff] }
  0x41   : > { %v1651_v16 = vld [vmem:[%s10840_s21 + $0x1f] sm:$0xff]  ;;  %v1664_v12 = vld [vmem:[%s10840_s21 + $0x87] sm:$0xff] }
  0x42   : > { %v1655_v24 = vld [vmem:[%s10840_s21 + $0x3f] sm:$0xff] }
  0x43   : > { %8821 = vmatmul.mubr.msk.bf16.gmra.mxu0 %vm744_vm2, %v725_v32  ;;  %8907 = vmatmul.mubr.msk.bf16.gmra.mxu1 %vm744_vm2, %v660_v33  ;;  %v735_v32 = vpack.c.bf16 %v706_v29, %v705_v28  ;;  %v670_v33 = vpack.c.bf16 %v642_v31, %v641_v30  ;;  %v1695_v25 = vpack.c.bf16 %v1655_v24, %v1654_v23 }
  0x44   : > { %8824 = vmatprep.mubr.msk.bf16.mxu0 %vm10670_vm1, %v15382_v2  ;;  %8910 = vmatprep.mubr.msk.bf16.mxu1 %vm10670_vm1, %v15382_v2 }
  0x4b   : > { %8825 = vmatmul.mubr.msk.bf16.gmra.mxu0 %vm744_vm2, %v726_v38  ;;  %8911 = vmatmul.mubr.msk.bf16.gmra.mxu1 %vm744_vm2, %v661_v39  ;;  %v736_v38 = vpack.c.bf16 %v708_v35, %v707_v34  ;;  %v671_v39 = vpack.c.bf16 %v644_v37, %v643_v36  ;;  %v1659_v34 = vld [vmem:[%s10840_s21 + $0x5f] sm:$0xff] }
  0x4c   : > { %8828 = vmatprep.mubr.msk.bf16.mxu0 %vm10670_vm1, %v15382_v2  ;;  %8914 = vmatprep.mubr.msk.bf16.mxu1 %vm10670_vm1, %v15382_v2 }
  0x53   : > { %8829 = vmatmul.mubr.msk.bf16.gmra.mxu0 %vm744_vm2, %v727_v46  ;;  %8915 = vmatmul.mubr.msk.bf16.gmra.mxu1 %vm744_vm2, %v662_v48  ;;  %v711_v46 = vld [vmem:[%s10840_s21 + $0x106] sm:$0xff] }
  0x54   : > { %8832 = vmatprep.mubr.msk.bf16.mxu0 %vm10670_vm1, %v15382_v2  ;;  %8918 = vmatprep.mubr.msk.bf16.mxu1 %vm10670_vm1, %v15382_v2  ;;  %v647_v48 = vld [vmem:[%s10840_s21 + $0x105] sm:$0xff]  ;;  %v738_v50 = vpack.c.bf16 %v712_v47, %v711_v46  ;;  %v1661_v47 = vld [vmem:[%s10840_s21 + $0x6f] sm:$0xff] }
  0x55   : > { %v673_v51 = vpack.c.bf16 %v648_v49, %v647_v48  ;;  %v1660_v46 = vld [vmem:[%s10840_s21 + $0x67] sm:$0xff] }
  0x5b   : > { %8833 = vmatmul.mubr.msk.bf16.gmra.mxu0 %vm744_vm2, %v728_v53  ;;  %8919 = vmatmul.mubr.msk.bf16.gmra.mxu1 %vm744_vm2, %v663_v54  ;;  %v714_v53 = vld [vmem:[%s10840_s21 + $0x11e] sm:$0xff]  ;;  %v649_v54 = vld [vmem:[%s10840_s21 + $0x115] sm:$0xff] }
  0x5c   : > { %8836 = vmatprep.mubr.msk.bf16.mxu0 %vm10670_vm1, %v15382_v2  ;;  %8922 = vmatprep.mubr.msk.bf16.mxu1 %vm10670_vm1, %v15382_v2  ;;  %v739_v56 = vpack.c.bf16 %v714_v53, %v713_v52  ;;  %v674_v57 = vpack.c.bf16 %v650_v55, %v649_v54  ;;  %v1698_v52 = vpack.c.bf16 %v1661_v47, %v1660_v46 }
  0x63   : > { %8837 = vmatmul.mubr.msk.bf16.gmra.mxu0 %vm744_vm2, %v729_v59  ;;  %8923 = vmatmul.mubr.msk.bf16.gmra.mxu1 %vm744_vm2, %v664_v60  ;;  %v716_v59 = vld [vmem:[%s10840_s21 + $0x12e] sm:$0xff]  ;;  %v651_v60 = vld [vmem:[%s10840_s21 + $0x125] sm:$0xff] }
  0x64   : > { %8840 = vmatprep.mubr.msk.bf16.mxu0 %vm10670_vm1, %v15382_v2  ;;  %8926 = vmatprep.mubr.msk.bf16.mxu1 %vm10670_vm1, %v15382_v2  ;;  %v740_v62 = vpack.c.bf16 %v716_v59, %v715_v58  ;;  %v675_v63 = vpack.c.bf16 %v652_v61, %v651_v60 }
  0x6b   : > { %8841 = vmatmul.mubr.msk.bf16.gmra.mxu0 %vm744_vm2, %v730_v1  ;;  %8927 = vmatmul.mubr.msk.bf16.gmra.mxu1 %vm744_vm2, %v665_v3  ;;  %v718_v1 = vld [vmem:[%s10840_s21 + $0x13e] sm:$0xff]  ;;  %v653_v3 = vld [vmem:[%s10840_s21 + $0x135] sm:$0xff] }
  0x6c   : > { %8844 = vmatprep.mubr.msk.bf16.mxu0 %vm10670_vm1, %v15382_v2  ;;  %8930 = vmatprep.mubr.msk.bf16.mxu1 %vm10670_vm1, %v15382_v2  ;;  %v741_v5 = vpack.c.bf16 %v718_v1, %v717_v0  ;;  %v676_v6 = vpack.c.bf16 %v654_v4, %v653_v3 }
  0x73   : > { %8845 = vmatmul.mubr.msk.bf16.gmra.mxu0 %vm744_vm2, %v731_v8  ;;  %8931 = vmatmul.mubr.msk.bf16.gmra.mxu1 %vm744_vm2, %v666_v9  ;;  %v655_v8 = vld [vmem:[%s10840_s21 + $0x145] sm:$0xff]  ;;  %v742_v9 = vpack.c.bf16 %v719_v7, %v719_v7 }
  0x74   : > { %8848 = vmatprep.mubr.msk.bf16.mxu0 %vm10670_vm1, %v15382_v2  ;;  %8934 = vmatprep.mubr.msk.bf16.mxu1 %vm10670_vm1, %v15382_v2  ;;  %v677_v10 = vpack.c.bf16 %v655_v8, %v655_v8 }
  0x7b   : > { %8849 = vmatmul.mubr.msk.bf16.gmra.mxu0 %vm744_vm2, %v732_v14  ;;  %8935 = vmatmul.mubr.msk.bf16.gmra.mxu1 %vm744_vm2, %v667_v15  ;;  %v2086_v14 = vpack.c.bf16 %v8170_v11, %v8170_v11  ;;  %v1650_v15 = vld [vmem:[%s10840_s21 + $0x17] sm:$0xff] }
  0x7c   : > { %8852 = vmatprep.mubr.msk.bf16.mxu0 %vm10670_vm1, %v15382_v2  ;;  %8938 = vmatprep.mubr.msk.bf16.mxu1 %vm10670_vm1, %v15382_v2  ;;  %v1693_v18 = vpack.c.bf16 %v1651_v16, %v1650_v15 }
  0x7d   : > { %v2151_v19 = vsel %vm808_vm0, %v2086_v14, 0 }
  0x83   : > { %8853 = vmatmul.mubr.msk.bf16.gmra.mxu0 %vm744_vm2, %v733_v20  ;;  %8939 = vmatmul.mubr.msk.bf16.gmra.mxu1 %vm744_vm2, %v668_v21  ;;  %v1652_v20 = vld [vmem:[%s10840_s21 + $0x27] sm:$0xff]  ;;  %v1653_v21 = vld [vmem:[%s10840_s21 + $0x2f] sm:$0xff] }
  0x84   : > { %8856 = vmatprep.mubr.msk.bf16.mxu0 %vm10670_vm1, %v15382_v2  ;;  %8942 = vmatprep.mubr.msk.bf16.mxu1 %vm10670_vm1, %v15382_v2  ;;  %v1694_v22 = vpack.c.bf16 %v1653_v21, %v1652_v20 }
  0x8b   : > { %8857 = vmatmul.mubr.msk.bf16.gmra.mxu0 %vm744_vm2, %v734_v26  ;;  %8943 = vmatmul.mubr.msk.bf16.gmra.mxu1 %vm744_vm2, %v669_v27  ;;  %v1656_v26 = vld [vmem:[%s10840_s21 + $0x47] sm:$0xff]  ;;  %v1657_v27 = vld [vmem:[%s10840_s21 + $0x4f] sm:$0xff] }
  0x8c   : > { %8860 = vmatprep.mubr.msk.bf16.mxu0 %vm10670_vm1, %v15382_v2  ;;  %8946 = vmatprep.mubr.msk.bf16.mxu1 %vm10670_vm1, %v15382_v2  ;;  %v1696_v28 = vpack.c.bf16 %v1657_v27, %v1656_v26  ;;  %v1667_v26 = vld [vmem:[%s10840_s21 + $0x9f] sm:$0xff] }
  0x93   : > { %8861 = vmatmul.mubr.msk.bf16.gmra.mxu0 %vm744_vm2, %v735_v32  ;;  %8947 = vmatmul.mubr.msk.bf16.gmra.mxu1 %vm744_vm2, %v670_v33  ;;  %v1658_v33 = vld [vmem:[%s10840_s21 + $0x57] sm:$0xff] }
  0x94   : > { %8864 = vmatprep.mubr.msk.bf16.mxu0 %vm10670_vm1, %v15382_v2  ;;  %8950 = vmatprep.mubr.msk.bf16.mxu1 %vm10670_vm1, %v15382_v2 }
  0x9b   : > { %8865 = vmatmul.mubr.msk.bf16.gmra.mxu0 %vm744_vm2, %v736_v38  ;;  %8951 = vmatmul.mubr.msk.bf16.gmra.mxu1 %vm744_vm2, %v671_v39  ;;  %v1697_v38 = vpack.c.bf16 %v1659_v34, %v1658_v33 }
  0x9c   : > { %8868 = vmatprep.mubr.msk.bf16.mxu0 %vm10670_vm1, %v15382_v2  ;;  %8954 = vmatprep.mubr.msk.bf16.mxu1 %vm10670_vm1, %v15382_v2 }
  0xa3   : > { %8869 = vmatmul.mubr.msk.bf16.gmra.mxu0 %vm744_vm2, %v737_v44  ;;  %8955 = vmatmul.mubr.msk.bf16.gmra.mxu1 %vm744_vm2, %v672_v45 }
  0xa4   : > { %8872 = vmatprep.mubr.msk.bf16.mxu0 %vm10670_vm1, %v15382_v2  ;;  %8958 = vmatprep.mubr.msk.bf16.mxu1 %vm10670_vm1, %v15382_v2 }
  0xab   : > { %8873 = vmatmul.mubr.msk.bf16.gmra.mxu0 %vm744_vm2, %v738_v50  ;;  %8959 = vmatmul.mubr.msk.bf16.gmra.mxu1 %vm744_vm2, %v673_v51  ;;  %v8192_v50 = vld [vmem:[%s15550_s26 + $0x28] sm:$0xff] }
  0xac   : > { %8876 = vmatprep.mubr.msk.bf16.mxu0 %vm10670_vm1, %v15382_v2  ;;  %8962 = vmatprep.mubr.msk.bf16.mxu1 %vm10670_vm1, %v15382_v2  ;;  %v2458_v53 = vpack.c.bf16 %v8192_v50, %v8192_v50 }
  0xb3   : > { %8877 = vmatmul.mubr.msk.bf16.gmra.mxu0 %vm744_vm2, %v739_v56  ;;  %8963 = vmatmul.mubr.msk.bf16.gmra.mxu1 %vm744_vm2, %v674_v57  ;;  %v2523_v57 = vsel %vm808_vm0, %v2458_v53, 0 }
  0xb4   : > { %8880 = vmatprep.mubr.msk.bf16.mxu0 %vm10670_vm1, %v15382_v2  ;;  %8966 = vmatprep.mubr.msk.bf16.mxu1 %vm10670_vm1, %v15382_v2 }
  0xbb   : > { %8881 = vmatmul.mubr.msk.bf16.gmra.mxu0 %vm744_vm2, %v740_v62  ;;  %8967 = vmatmul.mubr.msk.bf16.gmra.mxu1 %vm744_vm2, %v675_v63  ;;  %v1662_v62 = vld [vmem:[%s10840_s21 + $0x77] sm:$0xff]  ;;  %v1663_v63 = vld [vmem:[%s10840_s21 + $0x7f] sm:$0xff] }
  0xbc   : > { %8884 = vmatprep.mubr.msk.bf16.mxu0 %vm10670_vm1, %v15382_v2  ;;  %8970 = vmatprep.mubr.msk.bf16.mxu1 %vm10670_vm1, %v15382_v2  ;;  %v1699_v4 = vpack.c.bf16 %v1663_v63, %v1662_v62 }
  0xc3   : > { %8885 = vmatmul.mubr.msk.bf16.gmra.mxu0 %vm744_vm2, %v741_v5  ;;  %8971 = vmatmul.mubr.msk.bf16.gmra.mxu1 %vm744_vm2, %v676_v6 }
  0xc4   : > { %8888 = vmatprep.mubr.msk.bf16.mxu0 %vm10670_vm1, %v15382_v2  ;;  %8974 = vmatprep.mubr.msk.bf16.mxu1 %vm10670_vm1, %v15382_v2 }
  0xcb   : > { %8889 = vmatmul.mubr.msk.bf16.gmra.mxu0 %vm744_vm2, %v742_v9  ;;  %8975 = vmatmul.mubr.msk.bf16.gmra.mxu1 %vm744_vm2, %v677_v10 }
  0xcc   : > { %8980 = vmatprep.mubr.msk.bf16.mxu0 %vm10670_vm1, %v15382_v2  ;;  %9066 = vmatprep.mubr.msk.bf16.mxu1 %vm10670_vm1, %v15382_v2 }
  0xd3   : > { %8981 = vmatmul.mubr.msk.bf16.vlgmr.msra.gmra.mxu0 %vm744_vm2, %v1321_v17  ;;  %9067 = vmatmul.mubr.msk.bf16.vlgmr.msra.gmra.mxu1 %vm744_vm2, %v1693_v18  ;;  %v1700_v17 = vpack.c.bf16 %v1665_v13, %v1664_v12 }
  0xd4   : > { %9151 = vmatpush3.bf16.msra.mxu0 %v2151_v19  ;;  %8984 = vmatprep.mubr.msk.bf16.mxu0 %vm10670_vm1, %v15382_v2 }
  0xd5   : > { %9070 = vmatprep.mubr.msk.bf16.mxu1 %vm10670_vm1, %v15382_v2  ;;  %9322 = vmatprep.subr.bf16.mxu0 %v15382_v2 }
  0xd6   : > { %9237 = vmatpush3.bf16.msra.mxu1 %v2523_v57 }
  0xd7   : > { %9408 = vmatprep.subr.bf16.mxu1 %v15382_v2 }
  0xdb   : > { %8985 = vmatmul.mubr.msk.bf16.gmra.mxu0 %vm744_vm2, %v1693_v18  ;;  %9071 = vmatmul.mubr.msk.bf16.gmra.mxu1 %vm744_vm2, %v1694_v22 }
  0xdc   : > { %8988 = vmatprep.mubr.msk.bf16.mxu0 %vm10670_vm1, %v15382_v2  ;;  %9074 = vmatprep.mubr.msk.bf16.mxu1 %vm10670_vm1, %v15382_v2 }
  0xe3   : > { %8989 = vmatmul.mubr.msk.bf16.gmra.mxu0 %vm744_vm2, %v1694_v22  ;;  %9075 = vmatmul.mubr.msk.bf16.gmra.mxu1 %vm744_vm2, %v1695_v25 }
  0xe4   : > { %8992 = vmatprep.mubr.msk.bf16.mxu0 %vm10670_vm1, %v15382_v2  ;;  %9078 = vmatprep.mubr.msk.bf16.mxu1 %vm10670_vm1, %v15382_v2 }
  0xeb   : > { %v846_v29 = vpop.f32.mrf.mxu0  ;;  %8993 = vmatmul.mubr.msk.bf16.gmra.mxu0 %vm744_vm2, %v1695_v25  ;;  %v1112_v30 = vpop.f32.mrf.mxu1  ;;  %9079 = vmatmul.mubr.msk.bf16.gmra.mxu1 %vm744_vm2, %v1696_v28  ;;  %v1666_v25 = vld [vmem:[%s10840_s21 + $0x97] sm:$0xff] }
  0xec   : > { %8996 = vmatprep.mubr.msk.bf16.mxu0 %vm10670_vm1, %v15382_v2  ;;  %v11094_v31 = vadd.f32 %v1112_v30, %v846_v29  ;;  %9082 = vmatprep.mubr.msk.bf16.mxu1 %vm10670_vm1, %v15382_v2  ;;  %v1701_v30 = vpack.c.bf16 %v1667_v26, %v1666_v25 }
  0xed   : > { %v8810_v32 = vpop.f32.mrf.mxu0  ;;  %v8896_v35 = vpop.f32.mrf.mxu1 }
  0xef   : > { %v849_v36 = vpop.f32.mrf.mxu0  ;;  %v1115_v37 = vpop.f32.mrf.mxu1 }
  0xf0   : > { %v11100_v39 = vadd.f32 %v1115_v37, %v849_v36 }
  0xf1   : > { %v8811_v40 = vpop.f32.mrf.mxu0  ;;  %v8897_v41 = vpop.f32.mrf.mxu1 }
  0xf2   : > { %v1668_v40 = vld [vmem:[%s10840_s21 + $0xa7] sm:$0xff]  ;;  %v1669_v41 = vld [vmem:[%s10840_s21 + $0xaf] sm:$0xff] }
  0xf3   : > { %v854_v42 = vpop.f32.mrf.mxu0  ;;  %8997 = vmatmul.mubr.msk.bf16.gmra.mxu0 %vm744_vm2, %v1696_v28  ;;  %v1120_v43 = vpop.f32.mrf.mxu1  ;;  %9083 = vmatmul.mubr.msk.bf16.gmra.mxu1 %vm744_vm2, %v1697_v38  ;;  %v1702_v46 = vpack.c.bf16 %v1669_v41, %v1668_v40  ;;  %v1676_v40 = vld [vmem:[%s10840_s21 + $0xe7] sm:$0xff]  ;;  %v1677_v41 = vld [vmem:[%s10840_s21 + $0xef] sm:$0xff] }
  0xf4   : > { %9000 = vmatprep.mubr.msk.bf16.mxu0 %vm10670_vm1, %v15382_v2  ;;  %v11106_v44 = vadd.f32 %v1120_v43, %v854_v42  ;;  %9086 = vmatprep.mubr.msk.bf16.mxu1 %vm10670_vm1, %v15382_v2 }
  0xf5   : > { %v8814_v45 = vpop.f32.mrf.mxu0  ;;  %v8900_v48 = vpop.f32.mrf.mxu1 }
  0xf7   : > { %v857_v49 = vpop.f32.mrf.mxu0  ;;  %v1123_v51 = vpop.f32.mrf.mxu1 }
  0xf8   : > { %v11115_v54 = vadd.f32 %v1123_v51, %v857_v49 }
  0xf9   : > { %v8815_v55 = vpop.f32.mrf.mxu0  ;;  %v8901_v56 = vpop.f32.mrf.mxu1 }
  0xfa   : > { %v1670_v55 = vld [vmem:[%s10840_s21 + $0xb7] sm:$0xff]  ;;  %v1671_v56 = vld [vmem:[%s10840_s21 + $0xbf] sm:$0xff] }
  0xfb   : > { %v862_v58 = vpop.f32.mrf.mxu0  ;;  %9001 = vmatmul.mubr.msk.bf16.gmra.mxu0 %vm744_vm2, %v1697_v38  ;;  %v1128_v59 = vpop.f32.mrf.mxu1  ;;  %9087 = vmatmul.mubr.msk.bf16.gmra.mxu1 %vm744_vm2, %v1698_v52 }
  0xfc   : > { %9004 = vmatprep.mubr.msk.bf16.mxu0 %vm10670_vm1, %v15382_v2  ;;  %v11122_v60 = vadd.f32 %v1128_v59, %v862_v58  ;;  %9090 = vmatprep.mubr.msk.bf16.mxu1 %vm10670_vm1, %v15382_v2 }
  0xfd   : > { %v8818_v61 = vpop.f32.mrf.mxu0  ;;  %v8904_v0 = vpop.f32.mrf.mxu1 }
  0xfe   : > { %v1703_v61 = vpack.c.bf16 %v1671_v56, %v1670_v55 }
  0xff   : > { %v865_v1 = vpop.f32.mrf.mxu0  ;;  %v1131_v3 = vpop.f32.mrf.mxu1 }
 0x100   : > { %v11129_v5 = vadd.f32 %v1131_v3, %v865_v1 }
 0x101   : > { %v8819_v6 = vpop.f32.mrf.mxu0  ;;  %v8905_v7 = vpop.f32.mrf.mxu1 }
 0x102   : > { %v1672_v7 = vld [vmem:[%s10840_s21 + $0xc7] sm:$0xff] }
 0x103   : > { %v870_v8 = vpop.f32.mrf.mxu0  ;;  %9005 = vmatmul.mubr.msk.bf16.gmra.mxu0 %vm744_vm2, %v1698_v52  ;;  %v1136_v9 = vpop.f32.mrf.mxu1  ;;  %9091 = vmatmul.mubr.msk.bf16.gmra.mxu1 %vm744_vm2, %v1699_v4 }
 0x104   : > { %9008 = vmatprep.mubr.msk.bf16.mxu0 %vm10670_vm1, %v15382_v2  ;;  %v11135_v10 = vadd.f32 %v1136_v9, %v870_v8  ;;  %9094 = vmatprep.mubr.msk.bf16.mxu1 %vm10670_vm1, %v15382_v2  ;;  %v1673_v8 = vld [vmem:[%s10840_s21 + $0xcf] sm:$0xff] }
 0x105   : > { %v8822_v11 = vpop.f32.mrf.mxu0  ;;  %v8908_v14 = vpop.f32.mrf.mxu1  ;;  %v1704_v13 = vpack.c.bf16 %v1673_v8, %v1672_v7 }
 0x107   : > { %v873_v15 = vpop.f32.mrf.mxu0  ;;  %v1139_v16 = vpop.f32.mrf.mxu1 }
 0x108   : > { %v11141_v18 = vadd.f32 %v1139_v16, %v873_v15 }
 0x109   : > { %v8823_v19 = vpop.f32.mrf.mxu0  ;;  %v8909_v20 = vpop.f32.mrf.mxu1 }
 0x10b   : > { %v878_v21 = vpop.f32.mrf.mxu0  ;;  %9009 = vmatmul.mubr.msk.bf16.gmra.mxu0 %vm744_vm2, %v1699_v4  ;;  %v1144_v22 = vpop.f32.mrf.mxu1  ;;  %9095 = vmatmul.mubr.msk.bf16.gmra.mxu1 %vm744_vm2, %v1700_v17 }
 0x10c   : > { %9012 = vmatprep.mubr.msk.bf16.mxu0 %vm10670_vm1, %v15382_v2  ;;  %v11147_v23 = vadd.f32 %v1144_v22, %v878_v21  ;;  %9098 = vmatprep.mubr.msk.bf16.mxu1 %vm10670_vm1, %v15382_v2  ;;  %v1674_v22 = vld [vmem:[%s10840_s21 + $0xd7] sm:$0xff] }
 0x10d   : > { %v8826_v24 = vpop.f32.mrf.mxu0  ;;  %v8912_v27 = vpop.f32.mrf.mxu1 }
 0x10e   : > { %v1675_v24 = vld [vmem:[%s10840_s21 + $0xdf] sm:$0xff] }
 0x10f   : > { %v881_v28 = vpop.f32.mrf.mxu0  ;;  %v1147_v29 = vpop.f32.mrf.mxu1 }
 0x110   : > { %v11153_v32 = vadd.f32 %v1147_v29, %v881_v28  ;;  %v1705_v28 = vpack.c.bf16 %v1675_v24, %v1674_v22 }
 0x111   : > { %v8827_v33 = vpop.f32.mrf.mxu0  ;;  %v8913_v34 = vpop.f32.mrf.mxu1 }
 0x113   : > { %v886_v35 = vpop.f32.mrf.mxu0  ;;  %9013 = vmatmul.mubr.msk.bf16.gmra.mxu0 %vm744_vm2, %v1700_v17  ;;  %v1152_v36 = vpop.f32.mrf.mxu1  ;;  %9099 = vmatmul.mubr.msk.bf16.gmra.mxu1 %vm744_vm2, %v1701_v30 }
 0x114   : > { %9016 = vmatprep.mubr.msk.bf16.mxu0 %vm10670_vm1, %v15382_v2  ;;  %v11159_v37 = vadd.f32 %v1152_v36, %v886_v35  ;;  %9102 = vmatprep.mubr.msk.bf16.mxu1 %vm10670_vm1, %v15382_v2 }
 0x115   : > { %v8830_v38 = vpop.f32.mrf.mxu0  ;;  %v8916_v42 = vpop.f32.mrf.mxu1 }
 0x117   : > { %v889_v43 = vpop.f32.mrf.mxu0  ;;  %v1155_v45 = vpop.f32.mrf.mxu1 }
 0x118   : > { %v11165_v47 = vadd.f32 %v1155_v45, %v889_v43 }
 0x119   : > { %v8831_v48 = vpop.f32.mrf.mxu0  ;;  %v8917_v49 = vpop.f32.mrf.mxu1 }
 0x11b   : > { %v894_v50 = vpop.f32.mrf.mxu0  ;;  %9017 = vmatmul.mubr.msk.bf16.gmra.mxu0 %vm744_vm2, %v1701_v30  ;;  %v1160_v51 = vpop.f32.mrf.mxu1  ;;  %9103 = vmatmul.mubr.msk.bf16.gmra.mxu1 %vm744_vm2, %v1702_v46 }
 0x11c   : > { %9020 = vmatprep.mubr.msk.bf16.mxu0 %vm10670_vm1, %v15382_v2  ;;  %v11171_v52 = vadd.f32 %v1160_v51, %v894_v50  ;;  %9106 = vmatprep.mubr.msk.bf16.mxu1 %vm10670_vm1, %v15382_v2 }
 0x11d   : > { %v8834_v53 = vpop.f32.mrf.mxu0  ;;  %v8920_v57 = vpop.f32.mrf.mxu1 }
 0x11e   : > { %v1678_v57 = vld [vmem:[%s10840_s21 + $0xf7] sm:$0xff] }
 0x11f   : > { %v897_v58 = vpop.f32.mrf.mxu0  ;;  %v1163_v59 = vpop.f32.mrf.mxu1 }
 0x120   : > { %v11177_v62 = vadd.f32 %v1163_v59, %v897_v58  ;;  %v1679_v58 = vld [vmem:[%s10840_s21 + $0xff] sm:$0xff] }
 0x121   : > { %v8835_v63 = vpop.f32.mrf.mxu0  ;;  %v8921_v0 = vpop.f32.mrf.mxu1 }
 0x122   : > { %v1707_v0 = vpack.c.bf16 %v1679_v58, %v1678_v57 }
 0x123   : > { %v902_v1 = vpop.f32.mrf.mxu0  ;;  %9021 = vmatmul.mubr.msk.bf16.gmra.mxu0 %vm744_vm2, %v1702_v46  ;;  %v1168_v3 = vpop.f32.mrf.mxu1  ;;  %9107 = vmatmul.mubr.msk.bf16.gmra.mxu1 %vm744_vm2, %v1703_v61  ;;  %v1706_v46 = vpack.c.bf16 %v1677_v41, %v1676_v40 }
 0x124   : > { %9024 = vmatprep.mubr.msk.bf16.mxu0 %vm10670_vm1, %v15382_v2  ;;  %v11183_v4 = vadd.f32 %v1168_v3, %v902_v1  ;;  %9110 = vmatprep.mubr.msk.bf16.mxu1 %vm10670_vm1, %v15382_v2 }
 0x125   : > { %v8838_v6 = vpop.f32.mrf.mxu0  ;;  %v8924_v9 = vpop.f32.mrf.mxu1 }
 0x127   : > { %v905_v11 = vpop.f32.mrf.mxu0  ;;  %v1171_v12 = vpop.f32.mrf.mxu1 }
 0x128   : > { %v11189_v14 = vadd.f32 %v1171_v12, %v905_v11  ;;  %v1680_v12 = vld [vmem:[%s10840_s21 + $0x107] sm:$0xff] }
 0x129   : > { %v8839_v15 = vpop.f32.mrf.mxu0  ;;  %v8925_v16 = vpop.f32.mrf.mxu1 }
 0x12b   : > { %v910_v17 = vpop.f32.mrf.mxu0  ;;  %9025 = vmatmul.mubr.msk.bf16.gmra.mxu0 %vm744_vm2, %v1703_v61  ;;  %v1176_v19 = vpop.f32.mrf.mxu1  ;;  %9111 = vmatmul.mubr.msk.bf16.gmra.mxu1 %vm744_vm2, %v1704_v13 }
 0x12c   : > { %9028 = vmatprep.mubr.msk.bf16.mxu0 %vm10670_vm1, %v15382_v2  ;;  %v11195_v20 = vadd.f32 %v1176_v19, %v910_v17  ;;  %9114 = vmatprep.mubr.msk.bf16.mxu1 %vm10670_vm1, %v15382_v2 }
 0x12d   : > { %v8842_v21 = vpop.f32.mrf.mxu0  ;;  %v8928_v25 = vpop.f32.mrf.mxu1 }
 0x12f   : > { %v913_v26 = vpop.f32.mrf.mxu0  ;;  %v1179_v27 = vpop.f32.mrf.mxu1 }
 0x130   : > { %v11201_v29 = vadd.f32 %v1179_v27, %v913_v26 }
 0x131   : > { %v8843_v30 = vpop.f32.mrf.mxu0  ;;  %v8929_v33 = vpop.f32.mrf.mxu1 }
 0x132   : > { %v1682_v30 = vld [vmem:[%s10840_s21 + $0x117] sm:$0xff]  ;;  %v1683_v33 = vld [vmem:[%s10840_s21 + $0x11f] sm:$0xff] }
 0x133   : > { %v918_v34 = vpop.f32.mrf.mxu0  ;;  %9029 = vmatmul.mubr.msk.bf16.gmra.mxu0 %vm744_vm2, %v1704_v13  ;;  %v1184_v35 = vpop.f32.mrf.mxu1  ;;  %9115 = vmatmul.mubr.msk.bf16.gmra.mxu1 %vm744_vm2, %v1705_v28  ;;  %v1681_v13 = vld [vmem:[%s10840_s21 + $0x10f] sm:$0xff]  ;;  %v1709_v40 = vpack.c.bf16 %v1683_v33, %v1682_v30  ;;  %v1688_v33 = vld [vmem:[%s10840_s21 + $0x147] sm:$0xff] }
 0x134   : > { %9032 = vmatprep.mubr.msk.bf16.mxu0 %vm10670_vm1, %v15382_v2  ;;  %v11207_v36 = vadd.f32 %v1184_v35, %v918_v34  ;;  %9118 = vmatprep.mubr.msk.bf16.mxu1 %vm10670_vm1, %v15382_v2  ;;  %v1708_v19 = vpack.c.bf16 %v1681_v13, %v1680_v12  ;;  %v1687_v12 = vld [vmem:[%s10840_s21 + $0x13f] sm:$0xff] }
 0x135   : > { %v8846_v38 = vpop.f32.mrf.mxu0  ;;  %v8932_v42 = vpop.f32.mrf.mxu1 }
 0x137   : > { %v921_v43 = vpop.f32.mrf.mxu0  ;;  %v1187_v45 = vpop.f32.mrf.mxu1 }
 0x138   : > { %v11213_v48 = vadd.f32 %v1187_v45, %v921_v43 }
 0x139   : > { %v8847_v49 = vpop.f32.mrf.mxu0  ;;  %v8933_v50 = vpop.f32.mrf.mxu1 }
 0x13b   : > { %v926_v51 = vpop.f32.mrf.mxu0  ;;  %9033 = vmatmul.mubr.msk.bf16.gmra.mxu0 %vm744_vm2, %v1705_v28  ;;  %v1192_v53 = vpop.f32.mrf.mxu1  ;;  %9119 = vmatmul.mubr.msk.bf16.gmra.mxu1 %vm744_vm2, %v1706_v46 }
 0x13c   : > { %9036 = vmatprep.mubr.msk.bf16.mxu0 %vm10670_vm1, %v15382_v2  ;;  %v11219_v55 = vadd.f32 %v1192_v53, %v926_v51  ;;  %9122 = vmatprep.mubr.msk.bf16.mxu1 %vm10670_vm1, %v15382_v2  ;;  %v1684_v51 = vld [vmem:[%s10840_s21 + $0x127] sm:$0xff]  ;;  %v1685_v53 = vld [vmem:[%s10840_s21 + $0x12f] sm:$0xff] }
 0x13d   : > { %v8850_v56 = vpop.f32.mrf.mxu0  ;;  %v8936_v59 = vpop.f32.mrf.mxu1 }
 0x13e   : > { %v1710_v59 = vpack.c.bf16 %v1685_v53, %v1684_v51 }
 0x13f   : > { %v929_v61 = vpop.f32.mrf.mxu0  ;;  %v1195_v63 = vpop.f32.mrf.mxu1 }
 0x140   : > { %v11225_v1 = vadd.f32 %v1195_v63, %v929_v61 }
 0x141   : > { %v8851_v3 = vpop.f32.mrf.mxu0  ;;  %v8937_v6 = vpop.f32.mrf.mxu1 }
 0x143   : > { %v934_v7 = vpop.f32.mrf.mxu0  ;;  %9037 = vmatmul.mubr.msk.bf16.gmra.mxu0 %vm744_vm2, %v1706_v46  ;;  %v1200_v8 = vpop.f32.mrf.mxu1  ;;  %9123 = vmatmul.mubr.msk.bf16.gmra.mxu1 %vm744_vm2, %v1707_v0 }
 0x144   : > { %9040 = vmatprep.mubr.msk.bf16.mxu0 %vm10670_vm1, %v15382_v2  ;;  %v11231_v9 = vadd.f32 %v1200_v8, %v934_v7  ;;  %9126 = vmatprep.mubr.msk.bf16.mxu1 %vm10670_vm1, %v15382_v2 }
 0x145   : > { %v8854_v11 = vpop.f32.mrf.mxu0  ;;  %v8940_v15 = vpop.f32.mrf.mxu1 }
 0x146   : > { %v1686_v11 = vld [vmem:[%s10840_s21 + $0x137] sm:$0xff] }
 0x147   : > { %v937_v16 = vpop.f32.mrf.mxu0  ;;  %v1203_v17 = vpop.f32.mrf.mxu1 }
 0x148   : > { %v11237_v21 = vadd.f32 %v1203_v17, %v937_v16  ;;  %v1711_v17 = vpack.c.bf16 %v1687_v12, %v1686_v11  ;;  %v8214_v12 = vld [vmem:[%s15550_s26 + $0x30] sm:$0xff] }
 0x149   : > { %v8855_v22 = vpop.f32.mrf.mxu0  ;;  %v8941_v24 = vpop.f32.mrf.mxu1 }
 0x14b   : > { %v942_v25 = vpop.f32.mrf.mxu0  ;;  %9041 = vmatmul.mubr.msk.bf16.gmra.mxu0 %vm744_vm2, %v1707_v0  ;;  %v1208_v26 = vpop.f32.mrf.mxu1  ;;  %9127 = vmatmul.mubr.msk.bf16.gmra.mxu1 %vm744_vm2, %v1708_v19 }
 0x14c   : > { %9044 = vmatprep.mubr.msk.bf16.mxu0 %vm10670_vm1, %v15382_v2  ;;  %v11243_v27 = vadd.f32 %v1208_v26, %v942_v25  ;;  %9130 = vmatprep.mubr.msk.bf16.mxu1 %vm10670_vm1, %v15382_v2 }
 0x14d   : > { %v8858_v28 = vpop.f32.mrf.mxu0  ;;  %v8944_v34 = vpop.f32.mrf.mxu1 }
 0x14e   : > { %v1689_v34 = vld [vmem:[%s10840_s21 + $0x14f] sm:$0xff] }
 0x14f   : > { %v945_v35 = vpop.f32.mrf.mxu0  ;;  %v1211_v38 = vpop.f32.mrf.mxu1 }
 0x150   : > { %v11249_v41 = vadd.f32 %v1211_v38, %v945_v35 }
 0x151   : > { %v8859_v42 = vpop.f32.mrf.mxu0  ;;  %v8945_v43 = vpop.f32.mrf.mxu1 }
 0x152   : > { %v1712_v42 = vpack.c.bf16 %v1689_v34, %v1688_v33 }
 0x153   : > { %v950_v45 = vpop.f32.mrf.mxu0  ;;  %9045 = vmatmul.mubr.msk.bf16.gmra.mxu0 %vm744_vm2, %v1708_v19  ;;  %v1216_v46 = vpop.f32.mrf.mxu1  ;;  %9131 = vmatmul.mubr.msk.bf16.gmra.mxu1 %vm744_vm2, %v1709_v40 }
 0x154   : > { %9048 = vmatprep.mubr.msk.bf16.mxu0 %vm10670_vm1, %v15382_v2  ;;  %v11255_v49 = vadd.f32 %v1216_v46, %v950_v45  ;;  %9134 = vmatprep.mubr.msk.bf16.mxu1 %vm10670_vm1, %v15382_v2 }
 0x155   : > { %v8862_v50 = vpop.f32.mrf.mxu0  ;;  %v8948_v56 = vpop.f32.mrf.mxu1 }
 0x157   : > { %v953_v57 = vpop.f32.mrf.mxu0  ;;  %v1219_v58 = vpop.f32.mrf.mxu1 }
 0x158   : > { %v11261_v61 = vadd.f32 %v1219_v58, %v953_v57  ;;  %v1690_v57 = vld [vmem:[%s10840_s21 + $0x157] sm:$0xff] }
 0x159   : > { %v8863_v63 = vpop.f32.mrf.mxu0  ;;  %v8949_v0 = vpop.f32.mrf.mxu1 }
 0x15a   : > { %v1341_v63 = vpack.c.bf16 %v1688_v33, %v1688_v33 }
 0x15b   : > { %v958_v3 = vpop.f32.mrf.mxu0  ;;  %9049 = vmatmul.mubr.msk.bf16.gmra.mxu0 %vm744_vm2, %v1709_v40  ;;  %v1224_v6 = vpop.f32.mrf.mxu1  ;;  %9135 = vmatmul.mubr.msk.bf16.gmra.mxu1 %vm744_vm2, %v1710_v59 }
 0x15c   : > { %9052 = vmatprep.mubr.msk.bf16.mxu0 %vm10670_vm1, %v15382_v2  ;;  %v11267_v7 = vadd.f32 %v1224_v6, %v958_v3  ;;  %9138 = vmatprep.mubr.msk.bf16.mxu1 %vm10670_vm1, %v15382_v2  ;;  %v1713_v3 = vpack.c.bf16 %v1690_v57, %v1690_v57  ;;  %v2024_v57 = vld [vmem:[%s10840_s21 + $0x28] sm:$0xff] }
 0x15d   : > { %v8866_v8 = vpop.f32.mrf.mxu0  ;;  %v8952_v13 = vpop.f32.mrf.mxu1 }
 0x15f   : > { %v961_v15 = vpop.f32.mrf.mxu0  ;;  %v1227_v16 = vpop.f32.mrf.mxu1 }
 0x160   : > { %v11273_v19 = vadd.f32 %v1227_v16, %v961_v15  ;;  %v2022_v16 = vld [vmem:[%s10840_s21 + $0x18] sm:$0xff] }
 0x161   : > { %v8867_v22 = vpop.f32.mrf.mxu0  ;;  %v8953_v24 = vpop.f32.mrf.mxu1 }
 0x163   : > { %v966_v25 = vpop.f32.mrf.mxu0  ;;  %9053 = vmatmul.mubr.msk.bf16.gmra.mxu0 %vm744_vm2, %v1710_v59  ;;  %v1232_v26 = vpop.f32.mrf.mxu1  ;;  %9139 = vmatmul.mubr.msk.bf16.gmra.mxu1 %vm744_vm2, %v1711_v17 }
 0x164   : > { %9056 = vmatprep.mubr.msk.bf16.mxu0 %vm10670_vm1, %v15382_v2  ;;  %v11279_v28 = vadd.f32 %v1232_v26, %v966_v25  ;;  %9142 = vmatprep.mubr.msk.bf16.mxu1 %vm10670_vm1, %v15382_v2  ;;  %v2830_v25 = vpack.c.bf16 %v8214_v12, %v8214_v12  ;;  %v2394_v26 = vld [vmem:[%s10840_s21 + $0x19] sm:$0xff] }
 0x165   : > { %v8870_v30 = vpop.f32.mrf.mxu0  ;;  %v8956_v35 = vpop.f32.mrf.mxu1 }
 0x166   : > { %v2395_v30 = vld [vmem:[%s10840_s21 + $0x21] sm:$0xff] }
 0x167   : > { %v969_v38 = vpop.f32.mrf.mxu0  ;;  %v1235_v40 = vpop.f32.mrf.mxu1 }
 0x168   : > { %v11285_v43 = vadd.f32 %v1235_v40, %v969_v38  ;;  %v2437_v40 = vpack.c.bf16 %v2395_v30, %v2394_v26  ;;  %v2026_v30 = vld [vmem:[%s10840_s21 + $0x38] sm:$0xff] }
 0x169   : > { %v8871_v45 = vpop.f32.mrf.mxu0  ;;  %v8957_v46 = vpop.f32.mrf.mxu1 }
 0x16a   : > { %v2895_v46 = vsel %vm808_vm0, %v2830_v25, 0 }
 0x16b   : > { %v974_v50 = vpop.f32.mrf.mxu0  ;;  %9057 = vmatmul.mubr.msk.bf16.gmra.mxu0 %vm744_vm2, %v1711_v17  ;;  %v1240_v51 = vpop.f32.mrf.mxu1  ;;  %9143 = vmatmul.mubr.msk.bf16.gmra.mxu1 %vm744_vm2, %v1712_v42  ;;  %v2023_v17 = vld [vmem:[%s10840_s21 + $0x20] sm:$0xff] }
 0x16c   : > { %9060 = vmatprep.mubr.msk.bf16.mxu0 %vm10670_vm1, %v15382_v2  ;;  %v11291_v53 = vadd.f32 %v1240_v51, %v974_v50  ;;  %9146 = vmatprep.mubr.msk.bf16.mxu1 %vm10670_vm1, %v15382_v2  ;;  %v2065_v35 = vpack.c.bf16 %v2023_v17, %v2022_v16 }
 0x16d   : > { %v8874_v56 = vpop.f32.mrf.mxu0  ;;  %v8960_v58 = vpop.f32.mrf.mxu1 }
 0x16e   : > { %v2025_v58 = vld [vmem:[%s10840_s21 + $0x30] sm:$0xff] }
 0x16f   : > { %v977_v59 = vpop.f32.mrf.mxu0  ;;  %v1243_v0 = vpop.f32.mrf.mxu1  ;;  %v2066_v12 = vpack.c.bf16 %v2025_v58, %v2024_v57 }
 0x170   : > { %v11296_v6 = vadd.f32 %v1243_v0, %v977_v59  ;;  %v2396_v0 = vld [vmem:[%s10840_s21 + $0x29] sm:$0xff] }
 0x171   : > { %v8875_v8 = vpop.f32.mrf.mxu0  ;;  %v8961_v11 = vpop.f32.mrf.mxu1 }
 0x173   : > { %v982_v13 = vpop.f32.mrf.mxu0  ;;  %9061 = vmatmul.mubr.msk.bf16.gmra.mxu0 %vm744_vm2, %v1341_v63  ;;  %v1248_v15 = vpop.f32.mrf.mxu1  ;;  %9147 = vmatmul.mubr.msk.bf16.gmra.mxu1 %vm744_vm2, %v1713_v3  ;;  %v2397_v3 = vld [vmem:[%s10840_s21 + $0x31] sm:$0xff] }
 0x174   : > { %9152 = vmatprep.mubr.msk.bf16.mxu0 %vm10670_vm1, %v15382_v2  ;;  %v11307_v22 = vadd.f32 %v1248_v15, %v982_v13  ;;  %9238 = vmatprep.mubr.msk.bf16.mxu1 %vm10670_vm1, %v15382_v2  ;;  %v11329_v15 = vpack.c.bf16 %v2397_v3, %v2396_v0 }
 0x175   : > { %v8878_v24 = vpop.f32.mrf.mxu0  ;;  %v8964_v33 = vpop.f32.mrf.mxu1 }
 0x176   : > { %v2027_v33 = vld [vmem:[%s10840_s21 + $0x40] sm:$0xff] }
 0x177   : > { %v985_v34 = vpop.f32.mrf.mxu0  ;;  %v1251_v38 = vpop.f32.mrf.mxu1 }
 0x178   : > { %v11313_v42 = vadd.f32 %v1251_v38, %v985_v34  ;;  %v2398_v38 = vld [vmem:[%s10840_s21 + $0x39] sm:$0xff] }
 0x179   : > { %v8879_v45 = vpop.f32.mrf.mxu0  ;;  %v8965_v50 = vpop.f32.mrf.mxu1 }
 0x17a   : > { %v2067_v50 = vpack.c.bf16 %v2027_v33, %v2026_v30 }
 0x17b   : > { %v990_v51 = vpop.f32.mrf.mxu0  ;;  %9153 = vmatmul.mubr.msk.bf16.vlgmr.msra.gmra.mxu0 %vm744_vm2, %v2065_v35  ;;  %v1256_v56 = vpop.f32.mrf.mxu1  ;;  %9239 = vmatmul.mubr.msk.bf16.vlgmr.msra.gmra.mxu1 %vm744_vm2, %v2437_v40  ;;  %v2399_v40 = vld [vmem:[%s10840_s21 + $0x41] sm:$0xff] }
 0x17c   : > { %9323 = vmatpush3.bf16.msra.mxu0 %v2895_v46  ;;  %v11320_v59 = vadd.f32 %v1256_v56, %v990_v51  ;;  %9156 = vmatprep.mubr.msk.bf16.mxu0 %vm10670_vm1, %v15382_v2  ;;  %v11346_v56 = vpack.c.bf16 %v2399_v40, %v2398_v38 }
 0x17d   : > { %v8882_v63 = vpop.f32.mrf.mxu0  ;;  %9242 = vmatprep.mubr.msk.bf16.mxu1 %vm10670_vm1, %v15382_v2  ;;  %v8968_v8 = vpop.f32.mrf.mxu1  ;;  %9494 = vmatprep.subr.bf16.mxu0 %v15382_v2 }
 0x17e   : > { %v2028_v8 = vld [vmem:[%s10840_s21 + $0x48] sm:$0xff] }
 0x17f   : > { %v993_v11 = vpop.f32.mrf.mxu0  ;;  %v1259_v13 = vpop.f32.mrf.mxu1 }
 0x180   : > { %v11331_v16 = vadd.f32 %v1259_v13, %v993_v11  ;;  %v2029_v11 = vld [vmem:[%s10840_s21 + $0x50] sm:$0xff] }
 0x181   : > { %v8883_v17 = vpop.f32.mrf.mxu0  ;;  %v8969_v24 = vpop.f32.mrf.mxu1  ;;  %v2068_v30 = vpack.c.bf16 %v2029_v11, %v2028_v8 }
 0x182   : > { %v2400_v17 = vld [vmem:[%s10840_s21 + $0x49] sm:$0xff]  ;;  %v2401_v24 = vld [vmem:[%s10840_s21 + $0x51] sm:$0xff] }
 0x183   : > { %v998_v25 = vpop.f32.mrf.mxu0  ;;  %9157 = vmatmul.mubr.msk.bf16.gmra.mxu0 %vm744_vm2, %v2066_v12  ;;  %v1264_v26 = vpop.f32.mrf.mxu1  ;;  %9243 = vmatmul.mubr.msk.bf16.gmra.mxu1 %vm744_vm2, %v11329_v15 }
 0x184   : > { %9160 = vmatprep.mubr.msk.bf16.mxu0 %vm10670_vm1, %v15382_v2  ;;  %v11340_v34 = vadd.f32 %v1264_v26, %v998_v25  ;;  %9246 = vmatprep.mubr.msk.bf16.mxu1 %vm10670_vm1, %v15382_v2 }
 0x185   : > { %v8886_v35 = vpop.f32.mrf.mxu0  ;;  %v8972_v45 = vpop.f32.mrf.mxu1 }
 0x186   : > { %v11363_v35 = vpack.c.bf16 %v2401_v24, %v2400_v17 }
 0x187   : > { %v1001_v46 = vpop.f32.mrf.mxu0  ;;  %v1267_v51 = vpop.f32.mrf.mxu1 }
 0x188   : > { %v11348_v57 = vadd.f32 %v1267_v51, %v1001_v46  ;;  %v2030_v51 = vld [vmem:[%s10840_s21 + $0x58] sm:$0xff] }
 0x189   : > { %v8887_v58 = vpop.f32.mrf.mxu0  ;;  %v8973_v63 = vpop.f32.mrf.mxu1 }
 0x18a   : > { %v2031_v58 = vld [vmem:[%s10840_s21 + $0x60] sm:$0xff] }
 0x18b   : > { %v1006_v0 = vpop.f32.mrf.mxu0  ;;  %9161 = vmatmul.mubr.msk.bf16.gmra.mxu0 %vm744_vm2, %v2067_v50  ;;  %v1272_v3 = vpop.f32.mrf.mxu1  ;;  %9247 = vmatmul.mubr.msk.bf16.gmra.mxu1 %vm744_vm2, %v11346_v56 }
 0x18c   : > { %9164 = vmatprep.mubr.msk.bf16.mxu0 %vm10670_vm1, %v15382_v2  ;;  %v11357_v12 = vadd.f32 %v1272_v3, %v1006_v0  ;;  %9250 = vmatprep.mubr.msk.bf16.mxu1 %vm10670_vm1, %v15382_v2  ;;  %v2402_v0 = vld [vmem:[%s10840_s21 + $0x59] sm:$0xff]  ;;  %v2403_v3 = vld [vmem:[%s10840_s21 + $0x61] sm:$0xff] }
 0x18d   : > { %v8890_v13 = vpop.f32.mrf.mxu0  ;;  %v8976_v25 = vpop.f32.mrf.mxu1 }
 0x18e   : > { %v2069_v13 = vpack.c.bf16 %v2031_v58, %v2030_v51  ;;  %v11380_v25 = vpack.c.bf16 %v2403_v3, %v2402_v0  ;;  %v2404_v51 = vld [vmem:[%s10840_s21 + $0x69] sm:$0xff]  ;;  %v2405_v58 = vld [vmem:[%s10840_s21 + $0x71] sm:$0xff] }
 0x18f   : > { %v1009_v26 = vpop.f32.mrf.mxu0  ;;  %v1275_v33 = vpop.f32.mrf.mxu1 }
 0x191   : > { %v8891_v38 = vpop.f32.mrf.mxu0  ;;  %v8977_v40 = vpop.f32.mrf.mxu1 }
 0x193   : > { %v1443_v45 = vpop.f32.mrf.mxu0  ;;  %9165 = vmatmul.mubr.msk.bf16.gmra.mxu0 %vm744_vm2, %v2068_v30  ;;  %v1815_v50 = vpop.f32.mrf.mxu1  ;;  %9251 = vmatmul.mubr.msk.bf16.gmra.mxu1 %vm744_vm2, %v11363_v35 }
 0x194   : > { %v1609_v46 = vadd.f32 %v1443_v45, %v11094_v31  ;;  %9168 = vmatprep.mubr.msk.bf16.mxu0 %vm10670_vm1, %v15382_v2  ;;  %9254 = vmatprep.mubr.msk.bf16.mxu1 %vm10670_vm1, %v15382_v2 }
 0x195   : > { %v8982_v63 = vpop.f32.mrf.mxu0  ;;  %v9068_v11 = vpop.f32.mrf.mxu1 }
 0x196   : > { %v11377_v8 = vadd.f32 %v1815_v50, %v1609_v46  ;;  %v2033_v46 = vld [vmem:[%s10840_s21 + $0x70] sm:$0xff]  ;;  %v8236_v11 = vld [vmem:[%s15550_s26 + $0x38] sm:$0xff] }
 0x197   : > { %v1446_v31 = vpop.f32.mrf.mxu0  ;;  %v1818_v24 = vpop.f32.mrf.mxu1 }
 0x198   : > { %v1610_v17 = vadd.f32 %v1446_v31, %v11100_v39  ;;  %v2032_v39 = vld [vmem:[%s10840_s21 + $0x68] sm:$0xff] }
 0x199   : > { %v8983_v26 = vpop.f32.mrf.mxu0  ;;  %v9069_v33 = vpop.f32.mrf.mxu1 }
 0x19a   : > { %v11382_v30 = vadd.f32 %v1818_v24, %v1610_v17  ;;  %v11402_v17 = vpack.c.bf16 %v2405_v58, %v2404_v51  ;;  %v3202_v24 = vpack.c.bf16 %v8236_v11, %v8236_v11  ;;  %v2406_v58 = vld [vmem:[%s10840_s21 + $0x79] sm:$0xff] }
 0x19b   : > { %v1451_v38 = vpop.f32.mrf.mxu0  ;;  %9169 = vmatmul.mubr.msk.bf16.gmra.mxu0 %vm744_vm2, %v2069_v13  ;;  %v1823_v45 = vpop.f32.mrf.mxu1  ;;  %9255 = vmatmul.mubr.msk.bf16.gmra.mxu1 %vm744_vm2, %v11380_v25 }
 0x19c   : > { %v1611_v40 = vadd.f32 %v1451_v38, %v11106_v44  ;;  %9172 = vmatprep.mubr.msk.bf16.mxu0 %vm10670_vm1, %v15382_v2  ;;  %9258 = vmatprep.mubr.msk.bf16.mxu1 %vm10670_vm1, %v15382_v2  ;;  %v2070_v44 = vpack.c.bf16 %v2033_v46, %v2032_v39  ;;  %v2034_v46 = vld [vmem:[%s10840_s21 + $0x78] sm:$0xff] }
 0x19d   : > { %v8986_v50 = vpop.f32.mrf.mxu0  ;;  %v9072_v0 = vpop.f32.mrf.mxu1 }
 0x19e   : > { %v11396_v63 = vadd.f32 %v1823_v45, %v1611_v40  ;;  %v3267_v40 = vsel %vm808_vm0, %v3202_v24, 0  ;;  %v2035_v50 = vld [vmem:[%s10840_s21 + $0x80] sm:$0xff] }
 0x19f   : > { %v1454_v3 = vpop.f32.mrf.mxu0  ;;  %v1826_v13 = vpop.f32.mrf.mxu1  ;;  %9409 = vmatpush3.bf16.msra.mxu1 %v3267_v40  ;;  %v2407_v0 = vld [vmem:[%s10840_s21 + $0x81] sm:$0xff]  ;;  %v2071_v11 = vpack.c.bf16 %v2035_v50, %v2034_v46  ;;  %v2037_v46 = vld [vmem:[%s10840_s21 + $0x90] sm:$0xff] }
 0x1a0   : > { %v1612_v31 = vadd.f32 %v1454_v3, %v11115_v54  ;;  %9580 = vmatprep.subr.bf16.mxu1 %v15382_v2  ;;  %v11423_v24 = vpack.c.bf16 %v2407_v0, %v2406_v58  ;;  %v2409_v58 = vld [vmem:[%s10840_s21 + $0x91] sm:$0xff] }
 0x1a1   : > { %v8987_v26 = vpop.f32.mrf.mxu0  ;;  %v9073_v38 = vpop.f32.mrf.mxu1 }
 0x1a2   : > { %v11404_v33 = vadd.f32 %v1826_v13, %v1612_v31 }
 0x1a3   : > { %v1459_v45 = vpop.f32.mrf.mxu0  ;;  %9173 = vmatmul.mubr.msk.bf16.gmra.mxu0 %vm744_vm2, %v2070_v44  ;;  %v1831_v54 = vpop.f32.mrf.mxu1  ;;  %9259 = vmatmul.mubr.msk.bf16.gmra.mxu1 %vm744_vm2, %v11402_v17 }
 0x1a4   : > { %v1613_v39 = vadd.f32 %v1459_v45, %v11122_v60  ;;  %9176 = vmatprep.mubr.msk.bf16.mxu0 %vm10670_vm1, %v15382_v2  ;;  %9262 = vmatprep.mubr.msk.bf16.mxu1 %vm10670_vm1, %v15382_v2 }
 0x1a5   : > { %v8990_v51 = vpop.f32.mrf.mxu0  ;;  %v9076_v60 = vpop.f32.mrf.mxu1 }
 0x1a6   : > { %v11420_v3 = vadd.f32 %v1831_v54, %v1613_v39  ;;  %v2408_v51 = vld [vmem:[%s10840_s21 + $0x89] sm:$0xff] }
 0x1a7   : > { %v1462_v44 = vpop.f32.mrf.mxu0  ;;  %v1834_v13 = vpop.f32.mrf.mxu1 }
 0x1a8   : > { %v1614_v31 = vadd.f32 %v1462_v44, %v11129_v5  ;;  %v2036_v5 = vld [vmem:[%s10840_s21 + $0x88] sm:$0xff] }
 0x1a9   : > { %v8991_v26 = vpop.f32.mrf.mxu0  ;;  %v9077_v40 = vpop.f32.mrf.mxu1  ;;  %v2072_v44 = vpack.c.bf16 %v2037_v46, %v2036_v5  ;;  %v2039_v5 = vld [vmem:[%s10840_s21 + $0xa0] sm:$0xff] }
 0x1aa   : > { %v11425_v38 = vadd.f32 %v1834_v13, %v1614_v31  ;;  %v11442_v13 = vpack.c.bf16 %v2409_v58, %v2408_v51  ;;  %v2410_v51 = vld [vmem:[%s10840_s21 + $0x99] sm:$0xff]  ;;  %v2411_v58 = vld [vmem:[%s10840_s21 + $0xa1] sm:$0xff] }
 0x1ab   : > { %v1467_v45 = vpop.f32.mrf.mxu0  ;;  %9177 = vmatmul.mubr.msk.bf16.gmra.mxu0 %vm744_vm2, %v2071_v11  ;;  %v1839_v54 = vpop.f32.mrf.mxu1  ;;  %9263 = vmatmul.mubr.msk.bf16.gmra.mxu1 %vm744_vm2, %v11423_v24 }
 0x1ac   : > { %v1615_v39 = vadd.f32 %v1467_v45, %v11135_v10  ;;  %9180 = vmatprep.mubr.msk.bf16.mxu0 %vm10670_vm1, %v15382_v2  ;;  %9266 = vmatprep.mubr.msk.bf16.mxu1 %vm10670_vm1, %v15382_v2 }
 0x1ad   : > { %v8994_v50 = vpop.f32.mrf.mxu0  ;;  %v9080_v60 = vpop.f32.mrf.mxu1 }
 0x1ae   : > { %v11439_v0 = vadd.f32 %v1839_v54, %v1615_v39 }
 0x1af   : > { %v1470_v10 = vpop.f32.mrf.mxu0  ;;  %v1842_v31 = vpop.f32.mrf.mxu1 }
 0x1b0   : > { %v1616_v11 = vadd.f32 %v1470_v10, %v11141_v18  ;;  %v2038_v18 = vld [vmem:[%s10840_s21 + $0x98] sm:$0xff] }
 0x1b1   : > { %v8995_v26 = vpop.f32.mrf.mxu0  ;;  %v9081_v45 = vpop.f32.mrf.mxu1 }
 0x1b2   : > { %v11444_v40 = vadd.f32 %v1842_v31, %v1616_v11  ;;  %v11461_v26 = vpack.c.bf16 %v2411_v58, %v2410_v51  ;;  %v2412_v58 = vld [vmem:[%s10840_s21 + $0xa9] sm:$0xff] }
 0x1b3   : > { %v1475_v50 = vpop.f32.mrf.mxu0  ;;  %9181 = vmatmul.mubr.msk.bf16.gmra.mxu0 %vm744_vm2, %v2072_v44  ;;  %v1847_v54 = vpop.f32.mrf.mxu1  ;;  %9267 = vmatmul.mubr.msk.bf16.gmra.mxu1 %vm744_vm2, %v11442_v13  ;;  %v2073_v44 = vpack.c.bf16 %v2039_v5, %v2038_v18  ;;  %v15554_v18 = vmov 0.0   ;;  %v2041_v5 = vld [vmem:[%s10840_s21 + $0xb0] sm:$0xff] }
 0x1b4   : > { %v1617_v39 = vadd.f32 %v1475_v50, %v11147_v23  ;;  %9184 = vmatprep.mubr.msk.bf16.mxu0 %vm10670_vm1, %v15382_v2  ;;  %9270 = vmatprep.mubr.msk.bf16.mxu1 %vm10670_vm1, %v15382_v2  ;;  %4800 = vst.msk [vmem:[#allocation2] sm:$0xff] %vm4799_vm4, %v15554_v18  ;;  %4801 = vst.msk [vmem:[#allocation2 + $0x8] sm:$0xff] %vm4799_vm4, %v15554_v18 }
 0x1b5   : > { %v8998_v46 = vpop.f32.mrf.mxu0  ;;  %v9084_v10 = vpop.f32.mrf.mxu1  ;;  %4802 = vst.msk [vmem:[#allocation2 + $0x10] sm:$0xff] %vm4799_vm4, %v15554_v18  ;;  %4803 = vst.msk [vmem:[#allocation2 + $0x18] sm:$0xff] %vm4799_vm4, %v15554_v18 }
 0x1b6   : > { %v11458_v60 = vadd.f32 %v1847_v54, %v1617_v39  ;;  %v2413_v10 = vld [vmem:[%s10840_s21 + $0xb1] sm:$0xff]  ;;  %4804 = vst.msk [vmem:[#allocation2 + $0x20] sm:$0xff] %vm4799_vm4, %v15554_v18  ;;  %4805 = vst.msk [vmem:[#allocation2 + $0x28] sm:$0xff] %vm4799_vm4, %v15554_v18 }
 0x1b7   : > { %v1478_v23 = vpop.f32.mrf.mxu0  ;;  %v1850_v31 = vpop.f32.mrf.mxu1  ;;  %4806 = vst.msk [vmem:[#allocation2 + $0x30] sm:$0xff] %vm4799_vm4, %v15554_v18  ;;  %4807 = vst.msk [vmem:[#allocation2 + $0x38] sm:$0xff] %vm4799_vm4, %v15554_v18 }
 0x1b8   : > { %15552 = vst [vmem:[#allocation7_spill] sm:$0xff] %v11458_v60  ;;  %v1618_v11 = vadd.f32 %v1478_v23, %v11153_v32  ;;  %v2040_v32 = vld [vmem:[%s10840_s21 + $0xa8] sm:$0xff]  ;;  %4808 = vst.msk [vmem:[#allocation2 + $0x40] sm:$0xff] %vm4799_vm4, %v15554_v18 }
 0x1b9   : > { %v8999_v45 = vpop.f32.mrf.mxu0  ;;  %v9085_v46 = vpop.f32.mrf.mxu1  ;;  %4809 = vst.msk [vmem:[#allocation2 + $0x48] sm:$0xff] %vm4799_vm4, %v15554_v18  ;;  %4810 = vst.msk [vmem:[#allocation2 + $0x50] sm:$0xff] %vm4799_vm4, %v15554_v18 }
 0x1ba   : > { %v11463_v50 = vadd.f32 %v1850_v31, %v1618_v11  ;;  %v11480_v45 = vpack.c.bf16 %v2413_v10, %v2412_v58  ;;  %v2414_v58 = vld [vmem:[%s10840_s21 + $0xb9] sm:$0xff]  ;;  %4811 = vst.msk [vmem:[#allocation2 + $0x58] sm:$0xff] %vm4799_vm4, %v15554_v18  ;;  %4812 = vst.msk [vmem:[#allocation2 + $0x60] sm:$0xff] %vm4799_vm4, %v15554_v18 }
 0x1bb   : > { %v1483_v2 = vpop.f32.mrf.mxu0  ;;  %9185 = vmatmul.mubr.msk.bf16.gmra.mxu0 %vm744_vm2, %v2073_v44  ;;  %v1855_v54 = vpop.f32.mrf.mxu1  ;;  %9271 = vmatmul.mubr.msk.bf16.gmra.mxu1 %vm744_vm2, %v11461_v26  ;;  %4813 = vst.msk [vmem:[#allocation2 + $0x68] sm:$0xff] %vm4799_vm4, %v15554_v18  ;;  %4814 = vst.msk [vmem:[#allocation2 + $0x70] sm:$0xff] %vm4799_vm4, %v15554_v18 }
 0x1bc   : > { %15553 = vst [vmem:[#allocation8_spill] sm:$0xff] %v11463_v50  ;;  %v1619_v39 = vadd.f32 %v1483_v2, %v11159_v37  ;;  %9188 = vmatprep.mubr.msk.bf16.mxu0 %vm10670_vm1, %v15554_v18  ;;  %9274 = vmatprep.mubr.msk.bf16.mxu1 %vm10670_vm1, %v15554_v18  ;;  %v2074_v37 = vpack.c.bf16 %v2041_v5, %v2040_v32  ;;  %v2043_v32 = vld [vmem:[%s10840_s21 + $0xc0] sm:$0xff]  ;;  %4815 = vst.msk [vmem:[#allocation2 + $0x78] sm:$0xff] %vm4799_vm4, %v15554_v18 }
 0x1bd   : > { %v9002_v51 = vpop.f32.mrf.mxu0  ;;  %v9088_v44 = vpop.f32.mrf.mxu1  ;;  %4816 = vst.msk [vmem:[#allocation2 + $0x80] sm:$0xff] %vm4799_vm4, %v15554_v18  ;;  %4817 = vst.msk [vmem:[#allocation2 + $0x88] sm:$0xff] %vm4799_vm4, %v15554_v18 }
 0x1be   : > { %v11477_v23 = vadd.f32 %v1855_v54, %v1619_v39  ;;  %4818 = vst.msk [vmem:[#allocation2 + $0x90] sm:$0xff] %vm4799_vm4, %v15554_v18  ;;  %4819 = vst.msk [vmem:[#allocation2 + $0x98] sm:$0xff] %vm4799_vm4, %v15554_v18 }
 0x1bf   : > { %v1486_v2 = vpop.f32.mrf.mxu0  ;;  %v1858_v31 = vpop.f32.mrf.mxu1  ;;  %4820 = vst.msk [vmem:[#allocation2 + $0xa0] sm:$0xff] %vm4799_vm4, %v15554_v18  ;;  %4821 = vst.msk [vmem:[#allocation2 + $0xa8] sm:$0xff] %vm4799_vm4, %v15554_v18 }
 0x1c0   : > { %v1620_v11 = vadd.f32 %v1486_v2, %v11165_v47  ;;  %v2042_v47 = vld [vmem:[%s10840_s21 + $0xb8] sm:$0xff]  ;;  %4822 = vst.msk [vmem:[#allocation2 + $0xb0] sm:$0xff] %vm4799_vm4, %v15554_v18  ;;  %4823 = vst.msk [vmem:[#allocation2 + $0xb8] sm:$0xff] %vm4799_vm4, %v15554_v18 }
 0x1c1   : > { %v9003_v46 = vpop.f32.mrf.mxu0  ;;  %v9089_v50 = vpop.f32.mrf.mxu1  ;;  %4824 = vst.msk [vmem:[#allocation2 + $0xc0] sm:$0xff] %vm4799_vm4, %v15554_v18  ;;  %4825 = vst.msk [vmem:[#allocation2 + $0xc8] sm:$0xff] %vm4799_vm4, %v15554_v18 }
 0x1c2   : > { %v11482_v51 = vadd.f32 %v1858_v31, %v1620_v11  ;;  %v2415_v50 = vld [vmem:[%s10840_s21 + $0xc1] sm:$0xff]  ;;  %4826 = vst.msk [vmem:[#allocation2 + $0xd0] sm:$0xff] %vm4799_vm4, %v15554_v18  ;;  %4827 = vst.msk [vmem:[#allocation2 + $0xd8] sm:$0xff] %vm4799_vm4, %v15554_v18 }
 0x1c3   : > { %v1491_v60 = vpop.f32.mrf.mxu0  ;;  %9189 = vmatmul.mubr.msk.bf16.gmra.mxu0 %vm744_vm2, %v2074_v37  ;;  %v1863_v54 = vpop.f32.mrf.mxu1  ;;  %9275 = vmatmul.mubr.msk.bf16.gmra.mxu1 %vm744_vm2, %v11480_v45  ;;  %v11499_v11 = vpack.c.bf16 %v2415_v50, %v2414_v58  ;;  %v2416_v58 = vld [vmem:[%s10840_s21 + $0xc9] sm:$0xff]  ;;  %v2417_v50 = vld [vmem:[%s10840_s21 + $0xd1] sm:$0xff]  ;;  %4828 = vst.msk [vmem:[#allocation2 + $0xe0] sm:$0xff] %vm4799_vm4, %v15554_v18  ;;  %4829 = vst.msk [vmem:[#allocation2 + $0xe8] sm:$0xff] %vm4799_vm4, %v15554_v18 }
 0x1c4   : > { %15555 = vst [vmem:[#allocation9_spill] sm:$0xff] %v11482_v51  ;;  %v1621_v39 = vadd.f32 %v1491_v60, %v11171_v52  ;;  %9192 = vmatprep.mubr.msk.bf16.mxu0 %vm10670_vm1, %v15554_v18  ;;  %9278 = vmatprep.mubr.msk.bf16.mxu1 %vm10670_vm1, %v15554_v18  ;;  %v2075_v60 = vpack.c.bf16 %v2043_v32, %v2042_v47  ;;  %v2045_v47 = vld [vmem:[%s10840_s21 + $0xd0] sm:$0xff]  ;;  %4830 = vst.msk [vmem:[#allocation2 + $0xf0] sm:$0xff] %vm4799_vm4, %v15554_v18 }
 0x1c5   : > { %v9006_v5 = vpop.f32.mrf.mxu0  ;;  %v9092_v44 = vpop.f32.mrf.mxu1  ;;  %4831 = vst.msk [vmem:[#allocation2 + $0xf8] sm:$0xff] %vm4799_vm4, %v15554_v18  ;;  %4832 = vst.msk [vmem:[#allocation2 + $0x100] sm:$0xff] %vm4799_vm4, %v15554_v18 }
 0x1c6   : > { %v11496_v10 = vadd.f32 %v1863_v54, %v1621_v39  ;;  %4833 = vst.msk [vmem:[#allocation2 + $0x108] sm:$0xff] %vm4799_vm4, %v15554_v18  ;;  %4834 = vst.msk [vmem:[#allocation2 + $0x110] sm:$0xff] %vm4799_vm4, %v15554_v18 }
 0x1c7   : > { %v1494_v52 = vpop.f32.mrf.mxu0  ;;  %v1866_v37 = vpop.f32.mrf.mxu1  ;;  %4835 = vst.msk [vmem:[#allocation2 + $0x118] sm:$0xff] %vm4799_vm4, %v15554_v18  ;;  %4836 = vst.msk [vmem:[#allocation2 + $0x120] sm:$0xff] %vm4799_vm4, %v15554_v18 }
 0x1c8   : > { %v1622_v2 = vadd.f32 %v1494_v52, %v11177_v62  ;;  %v2044_v62 = vld [vmem:[%s10840_s21 + $0xc8] sm:$0xff]  ;;  %4837 = vst.msk [vmem:[#allocation2 + $0x128] sm:$0xff] %vm4799_vm4, %v15554_v18  ;;  %4838 = vst.msk [vmem:[#allocation2 + $0x130] sm:$0xff] %vm4799_vm4, %v15554_v18 }
 0x1c9   : > { %v9007_v31 = vpop.f32.mrf.mxu0  ;;  %v9093_v5 = vpop.f32.mrf.mxu1  ;;  %4839 = vst.msk [vmem:[#allocation2 + $0x138] sm:$0xff] %vm4799_vm4, %v15554_v18  ;;  %4840 = vst.msk [vmem:[#allocation2 + $0x140] sm:$0xff] %vm4799_vm4, %v15554_v18 }
 0x1ca   : > { %v11501_v46 = vadd.f32 %v1866_v37, %v1622_v2  ;;  %v11518_v37 = vpack.c.bf16 %v2417_v50, %v2416_v58  ;;  %v2418_v58 = vld [vmem:[%s10840_s21 + $0xd9] sm:$0xff]  ;;  %v2419_v50 = vld [vmem:[%s10840_s21 + $0xe1] sm:$0xff]  ;;  %4841 = vst.msk [vmem:[#allocation2 + $0x148] sm:$0xff] %vm4799_vm4, %v15554_v18  ;;  %4842 = vst.msk [vmem:[#allocation2 + $0x150] sm:$0xff] %vm4799_vm4, %v15554_v18 }
 0x1cb   : > { %v1499_v51 = vpop.f32.mrf.mxu0  ;;  %9193 = vmatmul.mubr.msk.bf16.gmra.mxu0 %vm744_vm2, %v2075_v60  ;;  %v1871_v54 = vpop.f32.mrf.mxu1  ;;  %9279 = vmatmul.mubr.msk.bf16.gmra.mxu1 %vm744_vm2, %v11499_v11  ;;  %4843 = vst.msk [vmem:[#allocation2 + $0x158] sm:$0xff] %vm4799_vm4, %v15554_v18  ;;  %4844 = vst.msk [vmem:[#allocation2 + $0x160] sm:$0xff] %vm4799_vm4, %v15554_v18 }
 0x1cc   : > { %15556 = vst [vmem:[#allocation10_spill] sm:$0xff] %v11501_v46  ;;  %v1623_v39 = vadd.f32 %v1499_v51, %v11183_v4  ;;  %9196 = vmatprep.mubr.msk.bf16.mxu0 %vm10670_vm1, %v15554_v18  ;;  %9282 = vmatprep.mubr.msk.bf16.mxu1 %vm10670_vm1, %v15554_v18  ;;  %v2076_v51 = vpack.c.bf16 %v2045_v47, %v2044_v62  ;;  %v2047_v62 = vld [vmem:[%s10840_s21 + $0xe0] sm:$0xff]  ;;  %4845 = vst.msk [vmem:[#allocation2 + $0x168] sm:$0xff] %vm4799_vm4, %v15554_v18 }
 0x1cd   : > { %v9010_v32 = vpop.f32.mrf.mxu0  ;;  %v9096_v52 = vpop.f32.mrf.mxu1  ;;  %4846 = vst.msk [vmem:[#allocation2 + $0x170] sm:$0xff] %vm4799_vm4, %v15554_v18 }
 0x1ce   : > { %v11515_v44 = vadd.f32 %v1871_v54, %v1623_v39 }
 0x1cf   : > { %v1502_v4 = vpop.f32.mrf.mxu0  ;;  %v1874_v2 = vpop.f32.mrf.mxu1 }
 0x1d0   : > { %v1624_v60 = vadd.f32 %v1502_v4, %v11189_v14  ;;  %v2046_v14 = vld [vmem:[%s10840_s21 + $0xd8] sm:$0xff] }
 0x1d1   : > { %v9011_v31 = vpop.f32.mrf.mxu0  ;;  %v9097_v32 = vpop.f32.mrf.mxu1 }
 0x1d2   : > { %v11520_v5 = vadd.f32 %v1874_v2, %v1624_v60  ;;  %v11537_v2 = vpack.c.bf16 %v2419_v50, %v2418_v58  ;;  %v2420_v58 = vld [vmem:[%s10840_s21 + $0xe9] sm:$0xff]  ;;  %v2421_v50 = vld [vmem:[%s10840_s21 + $0xf1] sm:$0xff] }
 0x1d3   : > { %v1507_v46 = vpop.f32.mrf.mxu0  ;;  %9197 = vmatmul.mubr.msk.bf16.gmra.mxu0 %vm744_vm2, %v2076_v51  ;;  %v1879_v54 = vpop.f32.mrf.mxu1  ;;  %9283 = vmatmul.mubr.msk.bf16.gmra.mxu1 %vm744_vm2, %v11518_v37 }
 0x1d4   : > { %15557 = vst [vmem:[#allocation11_spill] sm:$0xff] %v11520_v5  ;;  %v1625_v39 = vadd.f32 %v1507_v46, %v11195_v20  ;;  %9200 = vmatprep.mubr.msk.bf16.mxu0 %vm10670_vm1, %v15554_v18  ;;  %9286 = vmatprep.mubr.msk.bf16.mxu1 %vm10670_vm1, %v15554_v18  ;;  %v2077_v46 = vpack.c.bf16 %v2047_v62, %v2046_v14  ;;  %v2049_v14 = vld [vmem:[%s10840_s21 + $0xf0] sm:$0xff] }
 0x1d5   : > { %v9014_v47 = vpop.f32.mrf.mxu0  ;;  %v9100_v4 = vpop.f32.mrf.mxu1 }
 0x1d6   : > { %v11534_v52 = vadd.f32 %v1879_v54, %v1625_v39 }
 0x1d7   : > { %v1510_v20 = vpop.f32.mrf.mxu0  ;;  %v1882_v60 = vpop.f32.mrf.mxu1 }
 0x1d8   : > { %v1626_v51 = vadd.f32 %v1510_v20, %v11201_v29  ;;  %v2048_v29 = vld [vmem:[%s10840_s21 + $0xe8] sm:$0xff] }
 0x1d9   : > { %v9015_v31 = vpop.f32.mrf.mxu0  ;;  %v9101_v47 = vpop.f32.mrf.mxu1 }
 0x1da   : > { %v11539_v32 = vadd.f32 %v1882_v60, %v1626_v51  ;;  %v11556_v60 = vpack.c.bf16 %v2421_v50, %v2420_v58  ;;  %v2422_v58 = vld [vmem:[%s10840_s21 + $0xf9] sm:$0xff]  ;;  %v2423_v50 = vld [vmem:[%s10840_s21 + $0x101] sm:$0xff] }
 0x1db   : > { %v1515_v5 = vpop.f32.mrf.mxu0  ;;  %9201 = vmatmul.mubr.msk.bf16.gmra.mxu0 %vm744_vm2, %v2077_v46  ;;  %v1887_v54 = vpop.f32.mrf.mxu1  ;;  %9287 = vmatmul.mubr.msk.bf16.gmra.mxu1 %vm744_vm2, %v11537_v2 }
 0x1dc   : > { %15558 = vst [vmem:[#allocation12_spill] sm:$0xff] %v11539_v32  ;;  %v1627_v39 = vadd.f32 %v1515_v5, %v11207_v36  ;;  %9204 = vmatprep.mubr.msk.bf16.mxu0 %vm10670_vm1, %v15554_v18  ;;  %9290 = vmatprep.mubr.msk.bf16.mxu1 %vm10670_vm1, %v15554_v18  ;;  %v2078_v5 = vpack.c.bf16 %v2049_v14, %v2048_v29  ;;  %v2051_v29 = vld [vmem:[%s10840_s21 + $0x100] sm:$0xff] }
 0x1dd   : > { %v9018_v62 = vpop.f32.mrf.mxu0  ;;  %v9104_v20 = vpop.f32.mrf.mxu1 }
 0x1de   : > { %v11553_v4 = vadd.f32 %v1887_v54, %v1627_v39 }
 0x1df   : > { %v1518_v36 = vpop.f32.mrf.mxu0  ;;  %v1890_v51 = vpop.f32.mrf.mxu1 }
 0x1e0   : > { %v1628_v46 = vadd.f32 %v1518_v36, %v11213_v48  ;;  %v2050_v48 = vld [vmem:[%s10840_s21 + $0xf8] sm:$0xff] }
 0x1e1   : > { %v9019_v31 = vpop.f32.mrf.mxu0  ;;  %v9105_v62 = vpop.f32.mrf.mxu1 }
 0x1e2   : > { %v11558_v47 = vadd.f32 %v1890_v51, %v1628_v46  ;;  %v11575_v51 = vpack.c.bf16 %v2423_v50, %v2422_v58  ;;  %v2424_v58 = vld [vmem:[%s10840_s21 + $0x109] sm:$0xff]  ;;  %v2425_v50 = vld [vmem:[%s10840_s21 + $0x111] sm:$0xff] }
 0x1e3   : > { %v1523_v32 = vpop.f32.mrf.mxu0  ;;  %9205 = vmatmul.mubr.msk.bf16.gmra.mxu0 %vm744_vm2, %v2078_v5  ;;  %v1895_v54 = vpop.f32.mrf.mxu1  ;;  %9291 = vmatmul.mubr.msk.bf16.gmra.mxu1 %vm744_vm2, %v11556_v60 }
 0x1e4   : > { %15559 = vst [vmem:[#allocation13_spill] sm:$0xff] %v11558_v47  ;;  %v1629_v39 = vadd.f32 %v1523_v32, %v11219_v55  ;;  %9208 = vmatprep.mubr.msk.bf16.mxu0 %vm10670_vm1, %v15554_v18  ;;  %9294 = vmatprep.mubr.msk.bf16.mxu1 %vm10670_vm1, %v15554_v18  ;;  %v2079_v32 = vpack.c.bf16 %v2051_v29, %v2050_v48  ;;  %v2053_v48 = vld [vmem:[%s10840_s21 + $0x110] sm:$0xff] }
 0x1e5   : > { %v9022_v14 = vpop.f32.mrf.mxu0  ;;  %v9108_v36 = vpop.f32.mrf.mxu1 }
 0x1e6   : > { %v11572_v20 = vadd.f32 %v1895_v54, %v1629_v39 }
 0x1e7   : > { %v1526_v55 = vpop.f32.mrf.mxu0  ;;  %v1898_v46 = vpop.f32.mrf.mxu1 }
 0x1e8   : > { %v1630_v5 = vadd.f32 %v1526_v55, %v11225_v1  ;;  %v2052_v1 = vld [vmem:[%s10840_s21 + $0x108] sm:$0xff] }
 0x1e9   : > { %v9023_v31 = vpop.f32.mrf.mxu0  ;;  %v9109_v14 = vpop.f32.mrf.mxu1 }
 0x1ea   : > { %v11577_v62 = vadd.f32 %v1898_v46, %v1630_v5  ;;  %v11594_v46 = vpack.c.bf16 %v2425_v50, %v2424_v58  ;;  %v2426_v58 = vld [vmem:[%s10840_s21 + $0x119] sm:$0xff]  ;;  %v2427_v50 = vld [vmem:[%s10840_s21 + $0x121] sm:$0xff] }
 0x1eb   : > { %v1531_v47 = vpop.f32.mrf.mxu0  ;;  %9209 = vmatmul.mubr.msk.bf16.gmra.mxu0 %vm744_vm2, %v2079_v32  ;;  %v1903_v54 = vpop.f32.mrf.mxu1  ;;  %9295 = vmatmul.mubr.msk.bf16.gmra.mxu1 %vm744_vm2, %v11575_v51 }
 0x1ec   : > { %15560 = vst [vmem:[#allocation14_spill] sm:$0xff] %v11577_v62  ;;  %v1631_v39 = vadd.f32 %v1531_v47, %v11231_v9  ;;  %9212 = vmatprep.mubr.msk.bf16.mxu0 %vm10670_vm1, %v15554_v18  ;;  %9298 = vmatprep.mubr.msk.bf16.mxu1 %vm10670_vm1, %v15554_v18  ;;  %v2080_v47 = vpack.c.bf16 %v2053_v48, %v2052_v1  ;;  %v2055_v1 = vld [vmem:[%s10840_s21 + $0x120] sm:$0xff] }
 0x1ed   : > { %v9026_v29 = vpop.f32.mrf.mxu0  ;;  %v9112_v55 = vpop.f32.mrf.mxu1 }
 0x1ee   : > { %v11591_v36 = vadd.f32 %v1903_v54, %v1631_v39 }
 0x1ef   : > { %v1534_v9 = vpop.f32.mrf.mxu0  ;;  %v1906_v5 = vpop.f32.mrf.mxu1 }
 0x1f0   : > { %v1632_v32 = vadd.f32 %v1534_v9, %v11237_v21  ;;  %v2054_v21 = vld [vmem:[%s10840_s21 + $0x118] sm:$0xff] }
 0x1f1   : > { %v9027_v31 = vpop.f32.mrf.mxu0  ;;  %v9113_v29 = vpop.f32.mrf.mxu1 }
 0x1f2   : > { %v11596_v14 = vadd.f32 %v1906_v5, %v1632_v32  ;;  %v11613_v5 = vpack.c.bf16 %v2427_v50, %v2426_v58  ;;  %v2428_v58 = vld [vmem:[%s10840_s21 + $0x129] sm:$0xff]  ;;  %v2429_v50 = vld [vmem:[%s10840_s21 + $0x131] sm:$0xff] }
 0x1f3   : > { %v1539_v62 = vpop.f32.mrf.mxu0  ;;  %9213 = vmatmul.mubr.msk.bf16.gmra.mxu0 %vm744_vm2, %v2080_v47  ;;  %v1911_v54 = vpop.f32.mrf.mxu1  ;;  %9299 = vmatmul.mubr.msk.bf16.gmra.mxu1 %vm744_vm2, %v11594_v46 }
 0x1f4   : > { %15561 = vst [vmem:[#allocation15_spill] sm:$0xff] %v11596_v14  ;;  %v1633_v39 = vadd.f32 %v1539_v62, %v11243_v27  ;;  %9216 = vmatprep.mubr.msk.bf16.mxu0 %vm10670_vm1, %v15554_v18  ;;  %9302 = vmatprep.mubr.msk.bf16.mxu1 %vm10670_vm1, %v15554_v18  ;;  %v2081_v62 = vpack.c.bf16 %v2055_v1, %v2054_v21  ;;  %v2057_v21 = vld [vmem:[%s10840_s21 + $0x130] sm:$0xff] }
 0x1f5   : > { %v9030_v48 = vpop.f32.mrf.mxu0  ;;  %v9116_v9 = vpop.f32.mrf.mxu1 }
 0x1f6   : > { %v11610_v55 = vadd.f32 %v1911_v54, %v1633_v39 }
 0x1f7   : > { %v1542_v27 = vpop.f32.mrf.mxu0  ;;  %v1914_v32 = vpop.f32.mrf.mxu1 }
 0x1f8   : > { %v1634_v47 = vadd.f32 %v1542_v27, %v11249_v41  ;;  %v2056_v41 = vld [vmem:[%s10840_s21 + $0x128] sm:$0xff] }
 0x1f9   : > { %v9031_v31 = vpop.f32.mrf.mxu0  ;;  %v9117_v48 = vpop.f32.mrf.mxu1 }
 0x1fa   : > { %v11615_v29 = vadd.f32 %v1914_v32, %v1634_v47  ;;  %v11632_v32 = vpack.c.bf16 %v2429_v50, %v2428_v58  ;;  %v2430_v58 = vld [vmem:[%s10840_s21 + $0x139] sm:$0xff]  ;;  %v2431_v50 = vld [vmem:[%s10840_s21 + $0x141] sm:$0xff] }
 0x1fb   : > { %v1547_v14 = vpop.f32.mrf.mxu0  ;;  %9217 = vmatmul.mubr.msk.bf16.gmra.mxu0 %vm744_vm2, %v2081_v62  ;;  %v1919_v54 = vpop.f32.mrf.mxu1  ;;  %9303 = vmatmul.mubr.msk.bf16.gmra.mxu1 %vm744_vm2, %v11613_v5 }
 0x1fc   : > { %15562 = vst [vmem:[#allocation16_spill] sm:$0xff] %v11615_v29  ;;  %v1635_v39 = vadd.f32 %v1547_v14, %v11255_v49  ;;  %9220 = vmatprep.mubr.msk.bf16.mxu0 %vm10670_vm1, %v15554_v18  ;;  %9306 = vmatprep.mubr.msk.bf16.mxu1 %vm10670_vm1, %v15554_v18  ;;  %v2082_v14 = vpack.c.bf16 %v2057_v21, %v2056_v41  ;;  %v2059_v41 = vld [vmem:[%s10840_s21 + $0x140] sm:$0xff] }
 0x1fd   : > { %v9034_v1 = vpop.f32.mrf.mxu0  ;;  %v9120_v27 = vpop.f32.mrf.mxu1 }
 0x1fe   : > { %v11629_v9 = vadd.f32 %v1919_v54, %v1635_v39 }
 0x1ff   : > { %v1550_v49 = vpop.f32.mrf.mxu0  ;;  %v1922_v47 = vpop.f32.mrf.mxu1 }
 0x200   : > { %v1636_v62 = vadd.f32 %v1550_v49, %v11261_v61  ;;  %v2058_v61 = vld [vmem:[%s10840_s21 + $0x138] sm:$0xff] }
 0x201   : > { %v9035_v31 = vpop.f32.mrf.mxu0  ;;  %v9121_v1 = vpop.f32.mrf.mxu1 }
 0x202   : > { %v11634_v48 = vadd.f32 %v1922_v47, %v1636_v62  ;;  %v11651_v47 = vpack.c.bf16 %v2431_v50, %v2430_v58  ;;  %v2432_v58 = vld [vmem:[%s10840_s21 + $0x149] sm:$0xff]  ;;  %v2433_v50 = vld [vmem:[%s10840_s21 + $0x151] sm:$0xff] }
 0x203   : > { %v1555_v29 = vpop.f32.mrf.mxu0  ;;  %9221 = vmatmul.mubr.msk.bf16.gmra.mxu0 %vm744_vm2, %v2082_v14  ;;  %v1927_v54 = vpop.f32.mrf.mxu1  ;;  %9307 = vmatmul.mubr.msk.bf16.gmra.mxu1 %vm744_vm2, %v11632_v32 }
 0x204   : > { %15563 = vst [vmem:[#allocation17_spill] sm:$0xff] %v11634_v48  ;;  %v1637_v39 = vadd.f32 %v1555_v29, %v11267_v7  ;;  %9224 = vmatprep.mubr.msk.bf16.mxu0 %vm10670_vm1, %v15554_v18  ;;  %9310 = vmatprep.mubr.msk.bf16.mxu1 %vm10670_vm1, %v15554_v18  ;;  %v2083_v29 = vpack.c.bf16 %v2059_v41, %v2058_v61  ;;  %v2061_v61 = vld [vmem:[%s10840_s21 + $0x150] sm:$0xff] }
 0x205   : > { %v9038_v21 = vpop.f32.mrf.mxu0  ;;  %v9124_v49 = vpop.f32.mrf.mxu1 }
 0x206   : > { %v11648_v27 = vadd.f32 %v1927_v54, %v1637_v39 }
 0x207   : > { %v1558_v7 = vpop.f32.mrf.mxu0  ;;  %v1930_v62 = vpop.f32.mrf.mxu1 }
 0x208   : > { %v1638_v14 = vadd.f32 %v1558_v7, %v11273_v19  ;;  %v2060_v19 = vld [vmem:[%s10840_s21 + $0x148] sm:$0xff] }
 0x209   : > { %v9039_v31 = vpop.f32.mrf.mxu0  ;;  %v9125_v21 = vpop.f32.mrf.mxu1 }
 0x20a   : > { %v11653_v1 = vadd.f32 %v1930_v62, %v1638_v14  ;;  %v11670_v62 = vpack.c.bf16 %v2433_v50, %v2432_v58 }
 0x20b   : > { %v1563_v48 = vpop.f32.mrf.mxu0  ;;  %9225 = vmatmul.mubr.msk.bf16.gmra.mxu0 %vm744_vm2, %v2083_v29  ;;  %v1935_v54 = vpop.f32.mrf.mxu1  ;;  %9311 = vmatmul.mubr.msk.bf16.gmra.mxu1 %vm744_vm2, %v11651_v47 }
 0x20c   : > { %15564 = vst [vmem:[#allocation18_spill] sm:$0xff] %v11653_v1  ;;  %v1639_v39 = vadd.f32 %v1563_v48, %v11279_v28  ;;  %9228 = vmatprep.mubr.msk.bf16.mxu0 %vm10670_vm1, %v15554_v18  ;;  %9314 = vmatprep.mubr.msk.bf16.mxu1 %vm10670_vm1, %v15554_v18  ;;  %v2084_v48 = vpack.c.bf16 %v2061_v61, %v2060_v19  ;;  %v11684_v61 = vld [vmem:[%s10840_s21 + $0x159] sm:$0xff] }
 0x20d   : > { %v9042_v41 = vpop.f32.mrf.mxu0  ;;  %v9128_v7 = vpop.f32.mrf.mxu1 }
 0x20e   : > { %v11667_v49 = vadd.f32 %v1935_v54, %v1639_v39 }
 0x20f   : > { %v1566_v28 = vpop.f32.mrf.mxu0  ;;  %v1938_v14 = vpop.f32.mrf.mxu1 }
 0x210   : > { %v1640_v29 = vadd.f32 %v1566_v28, %v11285_v43  ;;  %v2062_v43 = vld [vmem:[%s10840_s21 + $0x158] sm:$0xff] }
 0x211   : > { %v9043_v31 = vpop.f32.mrf.mxu0  ;;  %v9129_v41 = vpop.f32.mrf.mxu1  ;;  %v2085_v28 = vpack.c.bf16 %v2062_v43, %v2062_v43 }
 0x212   : > { %v11672_v21 = vadd.f32 %v1938_v14, %v1640_v29  ;;  %v8258_v41 = vld [vmem:[%s15550_s26 + $0x40] sm:$0xff] }
 0x213   : > { %v1571_v1 = vpop.f32.mrf.mxu0  ;;  %9229 = vmatmul.mubr.msk.bf16.gmra.mxu0 %vm744_vm2, %v2084_v48  ;;  %v1943_v54 = vpop.f32.mrf.mxu1  ;;  %9315 = vmatmul.mubr.msk.bf16.gmra.mxu1 %vm744_vm2, %v11670_v62  ;;  %v2457_v48 = vpack.c.bf16 %v11684_v61, %v11684_v61 }
 0x214   : > { %v1641_v39 = vadd.f32 %v1571_v1, %v11291_v53  ;;  %9232 = vmatprep.mubr.msk.bf16.mxu0 %vm10670_vm1, %v15554_v18  ;;  %9318 = vmatprep.mubr.msk.bf16.mxu1 %vm10670_vm1, %v15554_v18 }
 0x215   : > { %v9046_v19 = vpop.f32.mrf.mxu0  ;;  %v9132_v50 = vpop.f32.mrf.mxu1 }
 0x216   : > { %v11686_v58 = vadd.f32 %v1943_v54, %v1641_v39  ;;  %v3574_v19 = vpack.c.bf16 %v8258_v41, %v8258_v41  ;;  %v3138_v50 = vld [vmem:[%s10840_s21 + $0x2a] sm:$0xff] }
 0x217   : > { %v1574_v7 = vpop.f32.mrf.mxu0  ;;  %v1946_v1 = vpop.f32.mrf.mxu1 }
 0x218   : > { %v1642_v53 = vadd.f32 %v1574_v7, %v11296_v6  ;;  %v3139_v7 = vld [vmem:[%s10840_s21 + $0x32] sm:$0xff] }
 0x219   : > { %v9047_v29 = vpop.f32.mrf.mxu0  ;;  %v9133_v31 = vpop.f32.mrf.mxu1 }
 0x21a   : > { %v11691_v14 = vadd.f32 %v1946_v1, %v1642_v53 }
 0x21b   : > { %v1579_v39 = vpop.f32.mrf.mxu0  ;;  %9233 = vmatmul.mubr.msk.bf16.gmra.mxu0 %vm744_vm2, %v2085_v28  ;;  %v1951_v6 = vpop.f32.mrf.mxu1  ;;  %9319 = vmatmul.mubr.msk.bf16.gmra.mxu1 %vm744_vm2, %v2457_v48  ;;  %v3181_v48 = vpack.c.bf16 %v3139_v7, %v3138_v50  ;;  %v3141_v50 = vld [vmem:[%s10840_s21 + $0x42] sm:$0xff] }
 0x21c   : > { %15565 = vst [vmem:[#allocation19_spill] sm:$0xff] %v11691_v14  ;;  %v1643_v54 = vadd.f32 %v1579_v39, %v11307_v22  ;;  %9324 = vmatprep.mubr.msk.bf16.mxu0 %vm10670_vm1, %v15554_v18  ;;  %9410 = vmatprep.mubr.msk.bf16.mxu1 %vm10670_vm1, %v15554_v18  ;;  %v3639_v39 = vsel %vm808_vm0, %v3574_v19, 0  ;;  %v3140_v19 = vld [vmem:[%s10840_s21 + $0x3a] sm:$0xff] }
 0x21d   : > { %v9050_v43 = vpop.f32.mrf.mxu0  ;;  %v9136_v1 = vpop.f32.mrf.mxu1 }
 0x21e   : > { %v11705_v53 = vadd.f32 %v1951_v6, %v1643_v54 }
 0x21f   : > { %v1582_v29 = vpop.f32.mrf.mxu0  ;;  %v1954_v22 = vpop.f32.mrf.mxu1 }
 0x220   : > { %v1644_v28 = vadd.f32 %v1582_v29, %v11313_v42  ;;  %v3182_v29 = vpack.c.bf16 %v3141_v50, %v3140_v19 }
 0x221   : > { %v9051_v31 = vpop.f32.mrf.mxu0  ;;  %v9137_v41 = vpop.f32.mrf.mxu1 }
 0x222   : > { %v11709_v43 = vadd.f32 %v1954_v22, %v1644_v28 }
 0x223   : > { %v1587_v14 = vpop.f32.mrf.mxu0  ;;  %9325 = vmatmul.mubr.msk.bf16.vlgmr.msra.gmra.mxu0 %vm744_vm2, %v11329_v15  ;;  %v1959_v6 = vpop.f32.mrf.mxu1  ;;  %9411 = vmatmul.mubr.msk.bf16.vlgmr.msra.gmra.mxu1 %vm744_vm2, %v3181_v48 }
 0x224   : > { %v1645_v54 = vadd.f32 %v1587_v14, %v11320_v59  ;;  %9495 = vmatpush3.bf16.msra.mxu0 %v3639_v39  ;;  %9328 = vmatprep.mubr.msk.bf16.mxu0 %vm10670_vm1, %v15554_v18 }
 0x225   : > { %v9054_v42 = vpop.f32.mrf.mxu0  ;;  %9414 = vmatprep.mubr.msk.bf16.mxu1 %vm10670_vm1, %v15554_v18  ;;  %v9140_v1 = vpop.f32.mrf.mxu1  ;;  %9666 = vmatprep.subr.mxu0 %v15554_v18 }
 0x226   : > { %v11721_v7 = vadd.f32 %v1959_v6, %v1645_v54  ;;  %v3143_v6 = vld [vmem:[%s10840_s21 + $0x52] sm:$0xff] }
 0x227   : > { %v1590_v59 = vpop.f32.mrf.mxu0  ;;  %v1962_v14 = vpop.f32.mrf.mxu1 }
 0x228   : > { %v1646_v15 = vadd.f32 %v1590_v59, %v11331_v16  ;;  %v3142_v16 = vld [vmem:[%s10840_s21 + $0x4a] sm:$0xff] }
 0x229   : > { %v9055_v28 = vpop.f32.mrf.mxu0  ;;  %v9141_v48 = vpop.f32.mrf.mxu1  ;;  %v3183_v1 = vpack.c.bf16 %v3143_v6, %v3142_v16 }
 0x22a   : > { %v11725_v22 = vadd.f32 %v1962_v14, %v1646_v15 }
 0x22b   : > { %v1595_v31 = vpop.f32.mrf.mxu0  ;;  %9329 = vmatmul.mubr.msk.bf16.gmra.mxu0 %vm744_vm2, %v11346_v56  ;;  %v1967_v41 = vpop.f32.mrf.mxu1  ;;  %9415 = vmatmul.mubr.msk.bf16.gmra.mxu1 %vm744_vm2, %v3182_v29 }
 0x22c   : > { %v1647_v39 = vadd.f32 %v1595_v31, %v11340_v34  ;;  %9332 = vmatprep.mubr.msk.bf16.mxu0 %vm10670_vm1, %v15554_v18  ;;  %9418 = vmatprep.mubr.msk.bf16.mxu1 %vm10670_vm1, %v15554_v18 }
 0x22d   : > { %v9058_v54 = vpop.f32.mrf.mxu0  ;;  %v9144_v19 = vpop.f32.mrf.mxu1 }
 0x22e   : > { %v11737_v42 = vadd.f32 %v1967_v41, %v1647_v39  ;;  %v3145_v39 = vld [vmem:[%s10840_s21 + $0x62] sm:$0xff] }
 0x22f   : > { %v1598_v50 = vpop.f32.mrf.mxu0  ;;  %v1970_v56 = vpop.f32.mrf.mxu1 }
 0x230   : > { %v1648_v34 = vadd.f32 %v1598_v50, %v11348_v57  ;;  %v3144_v57 = vld [vmem:[%s10840_s21 + $0x5a] sm:$0xff] }
 0x231   : > { %v9059_v59 = vpop.f32.mrf.mxu0  ;;  %v9145_v14 = vpop.f32.mrf.mxu1 }
 0x232   : > { %v11740_v15 = vadd.f32 %v1970_v56, %v1648_v34  ;;  %v3146_v59 = vld [vmem:[%s10840_s21 + $0x6a] sm:$0xff]  ;;  %v3147_v14 = vld [vmem:[%s10840_s21 + $0x72] sm:$0xff] }
 0x233   : > { %v1603_v29 = vpop.f32.mrf.mxu0  ;;  %9333 = vmatmul.mubr.msk.bf16.gmra.mxu0 %vm744_vm2, %v11363_v35  ;;  %v1975_v48 = vpop.f32.mrf.mxu1  ;;  %9419 = vmatmul.mubr.msk.bf16.gmra.mxu1 %vm744_vm2, %v3183_v1 }
 0x234   : > { %v1649_v28 = vadd.f32 %v1603_v29, %v11357_v12  ;;  %9336 = vmatprep.mubr.msk.bf16.mxu0 %vm10670_vm1, %v15554_v18  ;;  %9422 = vmatprep.mubr.msk.bf16.mxu1 %vm10670_vm1, %v15554_v18  ;;  %v3184_v12 = vpack.c.bf16 %v3145_v39, %v3144_v57 }
 0x235   : > { %v9062_v31 = vpop.f32.mrf.mxu0  ;;  %v9148_v54 = vpop.f32.mrf.mxu1 }
 0x236   : > { %v11752_v41 = vadd.f32 %v1975_v48, %v1649_v28  ;;  %v3185_v31 = vpack.c.bf16 %v3147_v14, %v3146_v59 }
 0x237   : > { %v1606_v35 = vpop.f32.mrf.mxu0  ;;  %v1978_v16 = vpop.f32.mrf.mxu1 }
 0x239   : > { %v9063_v6 = vpop.f32.mrf.mxu0  ;;  %v9149_v19 = vpop.f32.mrf.mxu1 }
 0x23a   : > { %v3149_v19 = vld [vmem:[%s10840_s21 + $0x82] sm:$0xff] }
 0x23b   : > { %v2187_v50 = vpop.f32.mrf.mxu0  ;;  %9337 = vmatmul.mubr.msk.bf16.gmra.mxu0 %vm744_vm2, %v11380_v25  ;;  %v2559_v56 = vpop.f32.mrf.mxu1  ;;  %9423 = vmatmul.mubr.msk.bf16.gmra.mxu1 %vm744_vm2, %v3184_v12 }
 0x23c   : > { %v2353_v34 = vadd.f32 %v2187_v50, %v11377_v8  ;;  %9340 = vmatprep.mubr.msk.bf16.mxu0 %vm10670_vm1, %v15554_v18  ;;  %9426 = vmatprep.mubr.msk.bf16.mxu1 %vm10670_vm1, %v15554_v18 }
 0x23d   : > { %v9154_v1 = vpop.f32.mrf.mxu0  ;;  %v9240_v28 = vpop.f32.mrf.mxu1 }
 0x23e   : > { %v11764_v29 = vadd.f32 %v2559_v56, %v2353_v34 }
 0x23f   : > { %v2190_v48 = vpop.f32.mrf.mxu0  ;;  %v2562_v25 = vpop.f32.mrf.mxu1 }
 0x240   : > { %v2354_v8 = vadd.f32 %v2190_v48, %v11382_v30  ;;  %v3148_v30 = vld [vmem:[%s10840_s21 + $0x7a] sm:$0xff] }
 0x241   : > { %v9155_v57 = vpop.f32.mrf.mxu0  ;;  %v9241_v54 = vpop.f32.mrf.mxu1  ;;  %v3186_v1 = vpack.c.bf16 %v3149_v19, %v3148_v30 }
 0x242   : > { %v11767_v39 = vadd.f32 %v2562_v25, %v2354_v8  ;;  %v3151_v57 = vld [vmem:[%s10840_s21 + $0x92] sm:$0xff] }
 0x243   : > { %v2195_v35 = vpop.f32.mrf.mxu0  ;;  %9341 = vmatmul.mubr.msk.bf16.gmra.mxu0 %vm744_vm2, %v11402_v17  ;;  %v2567_v12 = vpop.f32.mrf.mxu1  ;;  %9427 = vmatmul.mubr.msk.bf16.gmra.mxu1 %vm744_vm2, %v3185_v31 }
 0x244   : > { %v2355_v16 = vadd.f32 %v2195_v35, %v11396_v63  ;;  %9344 = vmatprep.mubr.msk.bf16.mxu0 %vm10670_vm1, %v15554_v18  ;;  %9430 = vmatprep.mubr.msk.bf16.mxu1 %vm10670_vm1, %v15554_v18 }
 0x245   : > { %v9158_v6 = vpop.f32.mrf.mxu0  ;;  %v9244_v34 = vpop.f32.mrf.mxu1 }
 0x246   : > { %v11779_v50 = vadd.f32 %v2567_v12, %v2355_v16 }
 0x247   : > { %v2198_v56 = vpop.f32.mrf.mxu0  ;;  %v2570_v17 = vpop.f32.mrf.mxu1 }
 0x248   : > { %v2356_v63 = vadd.f32 %v2198_v56, %v11404_v33  ;;  %v3150_v33 = vld [vmem:[%s10840_s21 + $0x8a] sm:$0xff] }
 0x249   : > { %v9159_v59 = vpop.f32.mrf.mxu0  ;;  %v9245_v28 = vpop.f32.mrf.mxu1  ;;  %v3187_v12 = vpack.c.bf16 %v3151_v57, %v3150_v33 }
 0x24a   : > { %v11782_v14 = vadd.f32 %v2570_v17, %v2356_v63 }
 0x24b   : > { %v2203_v48 = vpop.f32.mrf.mxu0  ;;  %9345 = vmatmul.mubr.msk.bf16.gmra.mxu0 %vm744_vm2, %v11423_v24  ;;  %v2575_v25 = vpop.f32.mrf.mxu1  ;;  %9431 = vmatmul.mubr.msk.bf16.gmra.mxu1 %vm744_vm2, %v3186_v1  ;;  %v3153_v1 = vld [vmem:[%s10840_s21 + $0xa2] sm:$0xff] }
 0x24c   : > { %v2357_v8 = vadd.f32 %v2203_v48, %v11420_v3  ;;  %9348 = vmatprep.mubr.msk.bf16.mxu0 %vm10670_vm1, %v15554_v18  ;;  %9434 = vmatprep.mubr.msk.bf16.mxu1 %vm10670_vm1, %v15554_v18 }
 0x24d   : > { %v9162_v31 = vpop.f32.mrf.mxu0  ;;  %v9248_v35 = vpop.f32.mrf.mxu1 }
 0x24e   : > { %v11794_v54 = vadd.f32 %v2575_v25, %v2357_v8  ;;  %v15566_v35 = vld [vmem:[#allocation7_spill] sm:$0xff] }
 0x24f   : > { %v2206_v16 = vpop.f32.mrf.mxu0  ;;  %v2578_v24 = vpop.f32.mrf.mxu1 }
 0x250   : > { %v2358_v3 = vadd.f32 %v2206_v16, %v11425_v38  ;;  %v3152_v38 = vld [vmem:[%s10840_s21 + $0x9a] sm:$0xff] }
 0x251   : > { %v9163_v6 = vpop.f32.mrf.mxu0  ;;  %v9249_v19 = vpop.f32.mrf.mxu1  ;;  %v3188_v8 = vpack.c.bf16 %v3153_v1, %v3152_v38 }
 0x252   : > { %v11797_v30 = vadd.f32 %v2578_v24, %v2358_v3 }
 0x253   : > { %v2211_v34 = vpop.f32.mrf.mxu0  ;;  %9349 = vmatmul.mubr.msk.bf16.gmra.mxu0 %vm744_vm2, %v11442_v13  ;;  %v2583_v63 = vpop.f32.mrf.mxu1  ;;  %9435 = vmatmul.mubr.msk.bf16.gmra.mxu1 %vm744_vm2, %v3187_v12  ;;  %v3155_v12 = vld [vmem:[%s10840_s21 + $0xb2] sm:$0xff] }
 0x254   : > { %v2359_v56 = vadd.f32 %v2211_v34, %v11439_v0  ;;  %9352 = vmatprep.mubr.msk.bf16.mxu0 %vm10670_vm1, %v15554_v18  ;;  %9438 = vmatprep.mubr.msk.bf16.mxu1 %vm10670_vm1, %v15554_v18 }
 0x255   : > { %v9166_v17 = vpop.f32.mrf.mxu0  ;;  %v9252_v28 = vpop.f32.mrf.mxu1 }
 0x256   : > { %v11809_v59 = vadd.f32 %v2583_v63, %v2359_v56 }
 0x257   : > { %v2214_v48 = vpop.f32.mrf.mxu0  ;;  %v2586_v13 = vpop.f32.mrf.mxu1 }
 0x258   : > { %v2360_v0 = vadd.f32 %v2214_v48, %v11444_v40  ;;  %v3154_v40 = vld [vmem:[%s10840_s21 + $0xaa] sm:$0xff] }
 0x259   : > { %v9167_v25 = vpop.f32.mrf.mxu0  ;;  %v9253_v33 = vpop.f32.mrf.mxu1  ;;  %v3189_v17 = vpack.c.bf16 %v3155_v12, %v3154_v40 }
 0x25a   : > { %v11812_v31 = vadd.f32 %v2586_v13, %v2360_v0  ;;  %v3156_v25 = vld [vmem:[%s10840_s21 + $0xba] sm:$0xff]  ;;  %v3157_v33 = vld [vmem:[%s10840_s21 + $0xc2] sm:$0xff] }
 0x25b   : > { %v2219_v57 = vpop.f32.mrf.mxu0  ;;  %9353 = vmatmul.mubr.msk.bf16.gmra.mxu0 %vm744_vm2, %v11461_v26  ;;  %v2591_v3 = vpop.f32.mrf.mxu1  ;;  %9439 = vmatmul.mubr.msk.bf16.gmra.mxu1 %vm744_vm2, %v3188_v8  ;;  %v15567_v26 = vld [vmem:[#allocation8_spill] sm:$0xff] }
 0x25c   : > { %v2361_v16 = vadd.f32 %v2219_v57, %v15566_v35  ;;  %9356 = vmatprep.mubr.msk.bf16.mxu0 %vm10670_vm1, %v15554_v18  ;;  %9442 = vmatprep.mubr.msk.bf16.mxu1 %vm10670_vm1, %v15554_v18 }
 0x25d   : > { %v9170_v24 = vpop.f32.mrf.mxu0  ;;  %v9256_v19 = vpop.f32.mrf.mxu1 }
 0x25e   : > { %v11824_v6 = vadd.f32 %v2591_v3, %v2361_v16  ;;  %v3190_v24 = vpack.c.bf16 %v3157_v33, %v3156_v25 }
 0x25f   : > { %v2222_v34 = vpop.f32.mrf.mxu0  ;;  %v2594_v63 = vpop.f32.mrf.mxu1 }
 0x260   : > { %v2362_v56 = vadd.f32 %v2222_v34, %v15567_v26 }
 0x261   : > { %v9171_v38 = vpop.f32.mrf.mxu0  ;;  %v9257_v28 = vpop.f32.mrf.mxu1 }
 0x262   : > { %v11827_v1 = vadd.f32 %v2594_v63, %v2362_v56  ;;  %v3159_v38 = vld [vmem:[%s10840_s21 + $0xd2] sm:$0xff] }
 0x263   : > { %v2227_v48 = vpop.f32.mrf.mxu0  ;;  %9357 = vmatmul.mubr.msk.bf16.gmra.mxu0 %vm744_vm2, %v11480_v45  ;;  %v2599_v13 = vpop.f32.mrf.mxu1  ;;  %9443 = vmatmul.mubr.msk.bf16.gmra.mxu1 %vm744_vm2, %v3189_v17  ;;  %v15568_v45 = vld [vmem:[#allocation9_spill] sm:$0xff] }
 0x264   : > { %v2363_v0 = vadd.f32 %v2227_v48, %v11477_v23  ;;  %9360 = vmatprep.mubr.msk.bf16.mxu0 %vm10670_vm1, %v15554_v18  ;;  %9446 = vmatprep.mubr.msk.bf16.mxu1 %vm10670_vm1, %v15554_v18  ;;  %v3158_v17 = vld [vmem:[%s10840_s21 + $0xca] sm:$0xff] }
 0x265   : > { %v9174_v8 = vpop.f32.mrf.mxu0  ;;  %v9260_v35 = vpop.f32.mrf.mxu1 }
 0x266   : > { %v11839_v57 = vadd.f32 %v2599_v13, %v2363_v0  ;;  %v3191_v8 = vpack.c.bf16 %v3159_v38, %v3158_v17 }
 0x267   : > { %v2230_v16 = vpop.f32.mrf.mxu0  ;;  %v2602_v3 = vpop.f32.mrf.mxu1 }
 0x268   : > { %v2364_v23 = vadd.f32 %v2230_v16, %v15568_v45 }
 0x269   : > { %v9175_v40 = vpop.f32.mrf.mxu0  ;;  %v9261_v19 = vpop.f32.mrf.mxu1 }
 0x26a   : > { %v11842_v12 = vadd.f32 %v2602_v3, %v2364_v23  ;;  %v3161_v40 = vld [vmem:[%s10840_s21 + $0xe2] sm:$0xff] }
 0x26b   : > { %v2235_v34 = vpop.f32.mrf.mxu0  ;;  %9361 = vmatmul.mubr.msk.bf16.gmra.mxu0 %vm744_vm2, %v11499_v11  ;;  %v2607_v56 = vpop.f32.mrf.mxu1  ;;  %9447 = vmatmul.mubr.msk.bf16.gmra.mxu1 %vm744_vm2, %v3190_v24  ;;  %v15569_v11 = vld [vmem:[#allocation10_spill] sm:$0xff]  ;;  %v3160_v24 = vld [vmem:[%s10840_s21 + $0xda] sm:$0xff] }
 0x26c   : > { %v2365_v26 = vadd.f32 %v2235_v34, %v11496_v10  ;;  %9364 = vmatprep.mubr.msk.bf16.mxu0 %vm10670_vm1, %v15554_v18  ;;  %9450 = vmatprep.mubr.msk.bf16.mxu1 %vm10670_vm1, %v15554_v18 }
 0x26d   : > { %v9178_v63 = vpop.f32.mrf.mxu0  ;;  %v9264_v48 = vpop.f32.mrf.mxu1 }
 0x26e   : > { %v11854_v28 = vadd.f32 %v2607_v56, %v2365_v26  ;;  %v3192_v63 = vpack.c.bf16 %v3161_v40, %v3160_v24 }
 0x26f   : > { %v2238_v0 = vpop.f32.mrf.mxu0  ;;  %v2610_v13 = vpop.f32.mrf.mxu1 }
 0x270   : > { %v2366_v10 = vadd.f32 %v2238_v0, %v15569_v11 }
 0x271   : > { %v9179_v25 = vpop.f32.mrf.mxu0  ;;  %v9265_v35 = vpop.f32.mrf.mxu1 }
 0x272   : > { %v11857_v33 = vadd.f32 %v2610_v13, %v2366_v10  ;;  %v3163_v25 = vld [vmem:[%s10840_s21 + $0xf2] sm:$0xff] }
 0x273   : > { %v2243_v16 = vpop.f32.mrf.mxu0  ;;  %9365 = vmatmul.mubr.msk.bf16.gmra.mxu0 %vm744_vm2, %v11518_v37  ;;  %v2615_v23 = vpop.f32.mrf.mxu1  ;;  %9451 = vmatmul.mubr.msk.bf16.gmra.mxu1 %vm744_vm2, %v3191_v8  ;;  %v15570_v37 = vld [vmem:[#allocation11_spill] sm:$0xff]  ;;  %v3162_v8 = vld [vmem:[%s10840_s21 + $0xea] sm:$0xff] }
 0x274   : > { %v2367_v45 = vadd.f32 %v2243_v16, %v11515_v44  ;;  %9368 = vmatprep.mubr.msk.bf16.mxu0 %vm10670_vm1, %v15554_v18  ;;  %9454 = vmatprep.mubr.msk.bf16.mxu1 %vm10670_vm1, %v15554_v18 }
 0x275   : > { %v9182_v3 = vpop.f32.mrf.mxu0  ;;  %v9268_v34 = vpop.f32.mrf.mxu1 }
 0x276   : > { %v11869_v19 = vadd.f32 %v2615_v23, %v2367_v45  ;;  %v3193_v3 = vpack.c.bf16 %v3163_v25, %v3162_v8 }
 0x277   : > { %v2246_v26 = vpop.f32.mrf.mxu0  ;;  %v2618_v56 = vpop.f32.mrf.mxu1 }
 0x278   : > { %v2368_v44 = vadd.f32 %v2246_v26, %v15570_v37 }
 0x279   : > { %v9183_v17 = vpop.f32.mrf.mxu0  ;;  %v9269_v48 = vpop.f32.mrf.mxu1 }
 0x27a   : > { %v11872_v38 = vadd.f32 %v2618_v56, %v2368_v44  ;;  %v3165_v17 = vld [vmem:[%s10840_s21 + $0x102] sm:$0xff] }
 0x27b   : > { %v2251_v0 = vpop.f32.mrf.mxu0  ;;  %9369 = vmatmul.mubr.msk.bf16.gmra.mxu0 %vm744_vm2, %v11537_v2  ;;  %v2623_v10 = vpop.f32.mrf.mxu1  ;;  %9455 = vmatmul.mubr.msk.bf16.gmra.mxu1 %vm744_vm2, %v3192_v63  ;;  %v15571_v2 = vld [vmem:[#allocation12_spill] sm:$0xff]  ;;  %v3164_v63 = vld [vmem:[%s10840_s21 + $0xfa] sm:$0xff] }
 0x27c   : > { %v2369_v11 = vadd.f32 %v2251_v0, %v11534_v52  ;;  %9372 = vmatprep.mubr.msk.bf16.mxu0 %vm10670_vm1, %v15554_v18  ;;  %9458 = vmatprep.mubr.msk.bf16.mxu1 %vm10670_vm1, %v15554_v18 }
 0x27d   : > { %v9186_v13 = vpop.f32.mrf.mxu0  ;;  %v9272_v16 = vpop.f32.mrf.mxu1 }
 0x27e   : > { %v11884_v35 = vadd.f32 %v2623_v10, %v2369_v11  ;;  %v3194_v13 = vpack.c.bf16 %v3165_v17, %v3164_v63  ;;  %v4217_v63 = vld [vmem:[%s15574_s4] sm:$0xff]  ;;  %v4218_v17 = vld [vmem:[%s15574_s4 + $0x8] sm:$0xff]  ;;  %s8526_s4 = sshll.u32 %s10789_s0, 4 }
 0x27f   : > { %v2254_v45 = vpop.f32.mrf.mxu0  ;;  %v2626_v23 = vpop.f32.mrf.mxu1 }
 0x280   : > { %v2370_v52 = vadd.f32 %v2254_v45, %v15571_v2 }
 0x281   : > { %v9187_v24 = vpop.f32.mrf.mxu0  ;;  %v9273_v34 = vpop.f32.mrf.mxu1 }
 0x282   : > { %v11887_v40 = vadd.f32 %v2626_v23, %v2370_v52  ;;  %v3167_v24 = vld [vmem:[%s10840_s21 + $0x112] sm:$0xff] }
 0x283   : > { %v2259_v26 = vpop.f32.mrf.mxu0  ;;  %9373 = vmatmul.mubr.msk.bf16.gmra.mxu0 %vm744_vm2, %v11556_v60  ;;  %v2631_v44 = vpop.f32.mrf.mxu1  ;;  %9459 = vmatmul.mubr.msk.bf16.gmra.mxu1 %vm744_vm2, %v3193_v3  ;;  %v15572_v60 = vld [vmem:[#allocation13_spill] sm:$0xff] }
 0x284   : > { %v2371_v37 = vadd.f32 %v2259_v26, %v11553_v4  ;;  %9376 = vmatprep.mubr.msk.bf16.mxu0 %vm10670_vm1, %v15554_v18  ;;  %9462 = vmatprep.mubr.msk.bf16.mxu1 %vm10670_vm1, %v15554_v18  ;;  %v3166_v3 = vld [vmem:[%s10840_s21 + $0x10a] sm:$0xff] }
 0x285   : > { %v9190_v56 = vpop.f32.mrf.mxu0  ;;  %v9276_v0 = vpop.f32.mrf.mxu1 }
 0x286   : > { %v11899_v48 = vadd.f32 %v2631_v44, %v2371_v37  ;;  %v15573_v44 = vld [vmem:[#allocation14_spill] sm:$0xff] }
 0x287   : > { %v2262_v11 = vpop.f32.mrf.mxu0  ;;  %v2634_v10 = vpop.f32.mrf.mxu1 }
 0x288   : > { %v2372_v4 = vadd.f32 %v2262_v11, %v15572_v60  ;;  %v4240_v11 = vpack.c.bf16 %v4218_v17, %v4217_v63 }
 0x289   : > { %v9191_v8 = vpop.f32.mrf.mxu0  ;;  %v9277_v16 = vpop.f32.mrf.mxu1 }
 0x28a   : > { %v11902_v25 = vadd.f32 %v2634_v10, %v2372_v4  ;;  %9581 = vmatpush3.bf16.msra.mxu1 %v4240_v11  ;;  %v3171_v11 = vld [vmem:[%s10840_s21 + $0x132] sm:$0xff] }
 0x28b   : > { %v2267_v45 = vpop.f32.mrf.mxu0  ;;  %9377 = vmatmul.mubr.msk.bf16.gmra.mxu0 %vm744_vm2, %v11575_v51  ;;  %v2639_v52 = vpop.f32.mrf.mxu1  ;;  %9463 = vmatmul.mubr.msk.bf16.gmra.mxu1 %vm744_vm2, %v3194_v13 }
 0x28c   : > { %v2373_v2 = vadd.f32 %v2267_v45, %v11572_v20  ;;  %9380 = vmatprep.mubr.msk.bf16.mxu0 %vm10670_vm1, %v15554_v18  ;;  %9466 = vmatprep.mubr.msk.bf16.mxu1 %vm10670_vm1, %v15554_v18  ;;  %v3195_v20 = vpack.c.bf16 %v3167_v24, %v3166_v3  ;;  %v3168_v45 = vld [vmem:[%s10840_s21 + $0x11a] sm:$0xff] }
 0x28d   : > { %v9194_v23 = vpop.f32.mrf.mxu0  ;;  %v9280_v26 = vpop.f32.mrf.mxu1  ;;  %9677 = vmatprep.subr.mxu1 %v15554_v18 }
 0x28e   : > { %v11914_v34 = vadd.f32 %v2639_v52, %v2373_v2  ;;  %v3169_v2 = vld [vmem:[%s10840_s21 + $0x122] sm:$0xff] }
 0x28f   : > { %v2270_v37 = vpop.f32.mrf.mxu0  ;;  %v2642_v56 = vpop.f32.mrf.mxu1  ;;  %v3196_v26 = vpack.c.bf16 %v3169_v2, %v3168_v45 }
 0x290   : > { %v2374_v51 = vadd.f32 %v2270_v37, %v15573_v44 }
 0x291   : > { %v9195_v0 = vpop.f32.mrf.mxu0  ;;  %v9281_v4 = vpop.f32.mrf.mxu1 }
 0x292   : > { %v11923_v60 = vadd.f32 %v2642_v56, %v2374_v51  ;;  %v3170_v0 = vld [vmem:[%s10840_s21 + $0x12a] sm:$0xff] }
 0x293   : > { %v2275_v10 = vpop.f32.mrf.mxu0  ;;  %9381 = vmatmul.mubr.msk.bf16.gmra.mxu0 %vm744_vm2, %v11594_v46  ;;  %v2647_v8 = vpop.f32.mrf.mxu1  ;;  %9467 = vmatmul.mubr.msk.bf16.gmra.mxu1 %vm744_vm2, %v3195_v20 }
 0x294   : > { %v2375_v13 = vadd.f32 %v2275_v10, %v11591_v36  ;;  %9384 = vmatprep.mubr.msk.bf16.mxu0 %vm10670_vm1, %v15554_v18  ;;  %9470 = vmatprep.mubr.msk.bf16.mxu1 %vm10670_vm1, %v15554_v18  ;;  %v15575_v36 = vld [vmem:[#allocation15_spill] sm:$0xff] }
 0x295   : > { %v9198_v16 = vpop.f32.mrf.mxu0  ;;  %v9284_v46 = vpop.f32.mrf.mxu1 }
 0x296   : > { %v11936_v52 = vadd.f32 %v2647_v8, %v2375_v13  ;;  %v3197_v16 = vpack.c.bf16 %v3171_v11, %v3170_v0 }
 0x297   : > { %v2278_v23 = vpop.f32.mrf.mxu0  ;;  %v2650_v24 = vpop.f32.mrf.mxu1 }
 0x298   : > { %v2376_v3 = vadd.f32 %v2278_v23, %v15575_v36 }
 0x299   : > { %v9199_v37 = vpop.f32.mrf.mxu0  ;;  %v9285_v51 = vpop.f32.mrf.mxu1 }
 0x29a   : > { %v11939_v44 = vadd.f32 %v2650_v24, %v2376_v3  ;;  %v3173_v37 = vld [vmem:[%s10840_s21 + $0x142] sm:$0xff] }
 0x29b   : > { %v2283_v56 = vpop.f32.mrf.mxu0  ;;  %9385 = vmatmul.mubr.msk.bf16.gmra.mxu0 %vm744_vm2, %v11613_v5  ;;  %v2655_v63 = vpop.f32.mrf.mxu1  ;;  %9471 = vmatmul.mubr.msk.bf16.gmra.mxu1 %vm744_vm2, %v3196_v26  ;;  %v15576_v5 = vld [vmem:[#allocation16_spill] sm:$0xff]  ;;  %v3172_v26 = vld [vmem:[%s10840_s21 + $0x13a] sm:$0xff] }
 0x29c   : > { %v2377_v20 = vadd.f32 %v2283_v56, %v11610_v55  ;;  %9388 = vmatprep.mubr.msk.bf16.mxu0 %vm10670_vm1, %v15554_v18  ;;  %9474 = vmatprep.mubr.msk.bf16.mxu1 %vm10670_vm1, %v15554_v18 }
 0x29d   : > { %v9202_v17 = vpop.f32.mrf.mxu0  ;;  %v9288_v10 = vpop.f32.mrf.mxu1 }
 0x29e   : > { %v11951_v4 = vadd.f32 %v2655_v63, %v2377_v20  ;;  %v3198_v17 = vpack.c.bf16 %v3173_v37, %v3172_v26 }
 0x29f   : > { %v2286_v13 = vpop.f32.mrf.mxu0  ;;  %v2658_v8 = vpop.f32.mrf.mxu1 }
 0x2a0   : > { %v2378_v55 = vadd.f32 %v2286_v13, %v15576_v5 }
 0x2a1   : > { %v9203_v45 = vpop.f32.mrf.mxu0  ;;  %v9289_v46 = vpop.f32.mrf.mxu1 }
 0x2a2   : > { %v11954_v2 = vadd.f32 %v2658_v8, %v2378_v55  ;;  %v3175_v45 = vld [vmem:[%s10840_s21 + $0x152] sm:$0xff] }
 0x2a3   : > { %v2291_v23 = vpop.f32.mrf.mxu0  ;;  %9389 = vmatmul.mubr.msk.bf16.gmra.mxu0 %vm744_vm2, %v11632_v32  ;;  %v2663_v3 = vpop.f32.mrf.mxu1  ;;  %9475 = vmatmul.mubr.msk.bf16.gmra.mxu1 %vm744_vm2, %v3197_v16  ;;  %v15577_v32 = vld [vmem:[#allocation17_spill] sm:$0xff] }
 0x2a4   : > { %v2379_v36 = vadd.f32 %v2291_v23, %v11629_v9  ;;  %9392 = vmatprep.mubr.msk.bf16.mxu0 %vm10670_vm1, %v15554_v18  ;;  %9478 = vmatprep.mubr.msk.bf16.mxu1 %vm10670_vm1, %v15554_v18  ;;  %v3174_v16 = vld [vmem:[%s10840_s21 + $0x14a] sm:$0xff] }
 0x2a5   : > { %v9206_v24 = vpop.f32.mrf.mxu0  ;;  %v9292_v56 = vpop.f32.mrf.mxu1 }
 0x2a6   : > { %v11966_v51 = vadd.f32 %v2663_v3, %v2379_v36  ;;  %v3199_v24 = vpack.c.bf16 %v3175_v45, %v3174_v16 }
 0x2a7   : > { %v2294_v20 = vpop.f32.mrf.mxu0  ;;  %v2666_v63 = vpop.f32.mrf.mxu1 }
 0x2a8   : > { %v2380_v9 = vadd.f32 %v2294_v20, %v15577_v32 }
 0x2a9   : > { %v9207_v0 = vpop.f32.mrf.mxu0  ;;  %v9293_v10 = vpop.f32.mrf.mxu1 }
 0x2aa   : > { %v11969_v11 = vadd.f32 %v2666_v63, %v2380_v9  ;;  %v2805_v63 = vld [vmem:[%s10840_s21 + $0x161] sm:$0xff] }
 0x2ab   : > { %v2299_v13 = vpop.f32.mrf.mxu0  ;;  %9393 = vmatmul.mubr.msk.bf16.gmra.mxu0 %vm744_vm2, %v11651_v47  ;;  %v2671_v55 = vpop.f32.mrf.mxu1  ;;  %9479 = vmatmul.mubr.msk.bf16.gmra.mxu1 %vm744_vm2, %v3198_v17  ;;  %v15578_v47 = vld [vmem:[#allocation18_spill] sm:$0xff]  ;;  %v3176_v0 = vld [vmem:[%s10840_s21 + $0x15a] sm:$0xff]  ;;  %v3177_v10 = vld [vmem:[%s10840_s21 + $0x162] sm:$0xff] }
 0x2ac   : > { %v2381_v5 = vadd.f32 %v2299_v13, %v11648_v27  ;;  %9396 = vmatprep.mubr.msk.bf16.mxu0 %vm10670_vm1, %v15554_v18  ;;  %9482 = vmatprep.mubr.msk.bf16.mxu1 %vm10670_vm1, %v15554_v18  ;;  %v3200_v16 = vpack.c.bf16 %v3177_v10, %v3176_v0 }
 0x2ad   : > { %v9210_v8 = vpop.f32.mrf.mxu0  ;;  %v9296_v23 = vpop.f32.mrf.mxu1 }
 0x2ae   : > { %v11981_v46 = vadd.f32 %v2671_v55, %v2381_v5 }
 0x2af   : > { %v2302_v36 = vpop.f32.mrf.mxu0  ;;  %v2674_v3 = vpop.f32.mrf.mxu1 }
 0x2b0   : > { %v2382_v27 = vadd.f32 %v2302_v36, %v15578_v47 }
 0x2b1   : > { %v9211_v26 = vpop.f32.mrf.mxu0  ;;  %v9297_v56 = vpop.f32.mrf.mxu1 }
 0x2b2   : > { %v11984_v37 = vadd.f32 %v2674_v3, %v2382_v27 }
 0x2b3   : > { %v2307_v20 = vpop.f32.mrf.mxu0  ;;  %9397 = vmatmul.mubr.msk.bf16.gmra.mxu0 %vm744_vm2, %v11670_v62  ;;  %v2679_v9 = vpop.f32.mrf.mxu1  ;;  %9483 = vmatmul.mubr.msk.bf16.gmra.mxu1 %vm744_vm2, %v3199_v24 }
 0x2b4   : > { %v2383_v32 = vadd.f32 %v2307_v20, %v11667_v49  ;;  %9400 = vmatprep.mubr.msk.bf16.mxu0 %vm10670_vm1, %v15554_v18  ;;  %9486 = vmatprep.mubr.msk.bf16.mxu1 %vm10670_vm1, %v15554_v18  ;;  %v2828_v49 = vpack.c.bf16 %v2805_v63, %v11684_v61  ;;  %v2806_v61 = vld [vmem:[%s10840_s21 + $0x169] sm:$0xff] }
 0x2b5   : > { %v9214_v17 = vpop.f32.mrf.mxu0  ;;  %v9300_v5 = vpop.f32.mrf.mxu1 }
 0x2b6   : > { %v11997_v13 = vadd.f32 %v2679_v9, %v2383_v32  ;;  %v2829_v32 = vpack.c.bf16 %v2806_v61, %v2806_v61 }
 0x2b7   : > { %v2310_v62 = vpop.f32.mrf.mxu0  ;;  %v2682_v8 = vpop.f32.mrf.mxu1 }
 0x2b8   : > { %v2384_v55 = vadd.f32 %v2310_v62, %v11672_v21  ;;  %v3178_v21 = vld [vmem:[%s10840_s21 + $0x16a] sm:$0xff] }
 0x2b9   : > { %v9215_v45 = vpop.f32.mrf.mxu0  ;;  %v9301_v36 = vpop.f32.mrf.mxu1  ;;  %v3201_v17 = vpack.c.bf16 %v3178_v21, %v3178_v21 }
 0x2ba   : > { %v12001_v23 = vadd.f32 %v2682_v8, %v2384_v55  ;;  %v3510_v8 = vld [vmem:[%s10840_s21 + $0x2b] sm:$0xff] }
 0x2bb   : > { %v2315_v47 = vpop.f32.mrf.mxu0  ;;  %9401 = vmatmul.mubr.msk.bf16.gmra.mxu0 %vm744_vm2, %v2828_v49  ;;  %v2687_v3 = vpop.f32.mrf.mxu1  ;;  %9487 = vmatmul.mubr.msk.bf16.gmra.mxu1 %vm744_vm2, %v3200_v16  ;;  %v3511_v16 = vld [vmem:[%s10840_s21 + $0x33] sm:$0xff] }
 0x2bc   : > { %v2385_v27 = vadd.f32 %v2315_v47, %v11686_v58  ;;  %9404 = vmatprep.mubr.msk.bf16.mxu0 %vm10670_vm1, %v15554_v18  ;;  %9490 = vmatprep.mubr.msk.bf16.mxu1 %vm10670_vm1, %v15554_v18  ;;  %v15579_v58 = vld [vmem:[#allocation19_spill] sm:$0xff] }
 0x2bd   : > { %v9218_v24 = vpop.f32.mrf.mxu0  ;;  %v9304_v56 = vpop.f32.mrf.mxu1 }
 0x2be   : > { %v12012_v26 = vadd.f32 %v2687_v3, %v2385_v27  ;;  %v3553_v3 = vpack.c.bf16 %v3511_v16, %v3510_v8 }
 0x2bf   : > { %v2318_v20 = vpop.f32.mrf.mxu0  ;;  %v2690_v63 = vpop.f32.mrf.mxu1 }
 0x2c0   : > { %v2386_v9 = vadd.f32 %v2318_v20, %v15579_v58 }
 0x2c1   : > { %v9219_v0 = vpop.f32.mrf.mxu0  ;;  %v9305_v5 = vpop.f32.mrf.mxu1 }
 0x2c2   : > { %v12015_v10 = vadd.f32 %v2690_v63, %v2386_v9  ;;  %v3512_v9 = vld [vmem:[%s10840_s21 + $0x3b] sm:$0xff]  ;;  %v3513_v63 = vld [vmem:[%s10840_s21 + $0x43] sm:$0xff] }
 0x2c3   : > { %v2323_v62 = vpop.f32.mrf.mxu0  ;;  %9405 = vmatmul.mubr.msk.bf16.gmra.mxu0 %vm744_vm2, %v2829_v32  ;;  %v2695_v55 = vpop.f32.mrf.mxu1  ;;  %9491 = vmatmul.mubr.msk.bf16.gmra.mxu1 %vm744_vm2, %v3201_v17 }
 0x2c4   : > { %v2387_v49 = vadd.f32 %v2323_v62, %v11705_v53  ;;  %9496 = vmatprep.mubr.msk.bf16.mxu0 %vm10670_vm1, %v15554_v18  ;;  %9582 = vmatprep.mubr.msk.bf16.mxu1 %vm10670_vm1, %v15554_v18  ;;  %v3554_v62 = vpack.c.bf16 %v3513_v63, %v3512_v9 }
 0x2c5   : > { %v9222_v45 = vpop.f32.mrf.mxu0  ;;  %v9308_v47 = vpop.f32.mrf.mxu1 }
 0x2c6   : > { %v12026_v36 = vadd.f32 %v2695_v55, %v2387_v49 }
 0x2c7   : > { %v2326_v27 = vpop.f32.mrf.mxu0  ;;  %v2698_v61 = vpop.f32.mrf.mxu1 }
 0x2c8   : > { %v2388_v53 = vadd.f32 %v2326_v27, %v11709_v43 }
 0x2c9   : > { %v9223_v24 = vpop.f32.mrf.mxu0  ;;  %v9309_v56 = vpop.f32.mrf.mxu1 }
 0x2ca   : > { %v12029_v21 = vadd.f32 %v2698_v61, %v2388_v53  ;;  %v3515_v53 = vld [vmem:[%s10840_s21 + $0x53] sm:$0xff] }
 0x2cb   : > { %v2331_v20 = vpop.f32.mrf.mxu0  ;;  %9497 = vmatmul.mubr.msk.bf16.vlgmr.msra.gmra.mxu0 %vm744_vm2, %v3553_v3  ;;  %v2703_v58 = vpop.f32.mrf.mxu1  ;;  %v3514_v3 = vld [vmem:[%s10840_s21 + $0x4b] sm:$0xff] }
 0x2cc   : > { %v2389_v32 = vadd.f32 %v2331_v20, %v11721_v7  ;;  %9500 = vmatprep.mubr.msk.bf16.mxu0 %vm10670_vm1, %v15554_v18  ;;  %v3555_v20 = vpack.c.bf16 %v3515_v53, %v3514_v3 }
 0x2cd   : > { %v9226_v17 = vpop.f32.mrf.mxu0  ;;  %v9312_v0 = vpop.f32.mrf.mxu1 }
 0x2ce   : > { %v12037_v43 = vadd.f32 %v2703_v58, %v2389_v32 }
 0x2cf   : > { %v2334_v5 = vpop.f32.mrf.mxu0  ;;  %v2706_v55 = vpop.f32.mrf.mxu1 }
 0x2d0   : > { %v2390_v49 = vadd.f32 %v2334_v5, %v11725_v22 }
 0x2d1   : > { %v9227_v8 = vpop.f32.mrf.mxu0  ;;  %v9313_v7 = vpop.f32.mrf.mxu1 }
 0x2d2   : > { %v12040_v16 = vadd.f32 %v2706_v55, %v2390_v49  ;;  %v3517_v49 = vld [vmem:[%s10840_s21 + $0x63] sm:$0xff] }
 0x2d3   : > { %v2339_v45 = vpop.f32.mrf.mxu0  ;;  %9501 = vmatmul.mubr.msk.bf16.gmra.mxu0 %vm744_vm2, %v3554_v62  ;;  %v2711_v27 = vpop.f32.mrf.mxu1  ;;  %v3516_v62 = vld [vmem:[%s10840_s21 + $0x5b] sm:$0xff] }
 0x2d4   : > { %v2391_v47 = vadd.f32 %v2339_v45, %v11737_v42  ;;  %9504 = vmatprep.mubr.msk.bf16.mxu0 %vm10670_vm1, %v15554_v18  ;;  %v3556_v45 = vpack.c.bf16 %v3517_v49, %v3516_v62 }
 0x2d5   : > { %v9230_v61 = vpop.f32.mrf.mxu0  ;;  %v9316_v24 = vpop.f32.mrf.mxu1 }
 0x2d6   : > { %v12048_v22 = vadd.f32 %v2711_v27, %v2391_v47  ;;  %v3518_v24 = vld [vmem:[%s10840_s21 + $0x6b] sm:$0xff] }
 0x2d7   : > { %v2342_v56 = vpop.f32.mrf.mxu0  ;;  %v2714_v58 = vpop.f32.mrf.mxu1 }
 0x2d8   : > { %v2392_v32 = vadd.f32 %v2342_v56, %v11740_v15  ;;  %v3519_v56 = vld [vmem:[%s10840_s21 + $0x73] sm:$0xff] }
 0x2d9   : > { %v9231_v9 = vpop.f32.mrf.mxu0  ;;  %v9317_v42 = vpop.f32.mrf.mxu1 }
 0x2da   : > { %v12051_v63 = vadd.f32 %v2714_v58, %v2392_v32  ;;  %v3557_v42 = vpack.c.bf16 %v3519_v56, %v3518_v24 }
 0x2db   : > { %v2347_v17 = vpop.f32.mrf.mxu0  ;;  %9505 = vmatmul.mubr.msk.bf16.gmra.mxu0 %vm744_vm2, %v3555_v20  ;;  %v2719_v5 = vpop.f32.mrf.mxu1 }
 0x2dc   : > { %v2393_v0 = vadd.f32 %v2347_v17, %v11752_v41  ;;  %9508 = vmatprep.mubr.msk.bf16.mxu0 %vm10670_vm1, %v15554_v18 }
 0x2dd   : > { %v9234_v55 = vpop.f32.mrf.mxu0  ;;  %v9320_v8 = vpop.f32.mrf.mxu1 }
 0x2de   : > { %v12059_v15 = vadd.f32 %v2719_v5, %v2393_v0 }
 0x2df   : > { %v2350_v7 = vpop.f32.mrf.mxu0  ;;  %v2722_v47 = vpop.f32.mrf.mxu1 }
 0x2e0   : > { %v3520_v7 = vld [vmem:[%s10840_s21 + $0x7b] sm:$0xff] }
 0x2e1   : > { %v9235_v27 = vpop.f32.mrf.mxu0  ;;  %v9321_v3 = vpop.f32.mrf.mxu1 }
 0x2e3   : > { %v2931_v53 = vpop.f32.mrf.mxu0  ;;  %9509 = vmatmul.mubr.msk.bf16.gmra.mxu0 %vm744_vm2, %v3556_v45  ;;  %v3303_v61 = vpop.f32.mrf.mxu1  ;;  %v3521_v45 = vld [vmem:[%s10840_s21 + $0x83] sm:$0xff] }
 0x2e4   : > { %v3097_v41 = vadd.f32 %v2931_v53, %v11764_v29  ;;  %9512 = vmatprep.mubr.msk.bf16.mxu0 %vm10670_vm1, %v15554_v18  ;;  %v3558_v53 = vpack.c.bf16 %v3521_v45, %v3520_v7 }
 0x2e5   : > { %v9326_v20 = vpop.f32.mrf.mxu0  ;;  %v9412_v58 = vpop.f32.mrf.mxu1 }
 0x2e6   : > { %v12067_v32 = vadd.f32 %v3303_v61, %v3097_v41 }
 0x2e7   : > { %v2934_v9 = vpop.f32.mrf.mxu0  ;;  %v3306_v0 = vpop.f32.mrf.mxu1 }
 0x2e8   : > { %v3098_v17 = vadd.f32 %v2934_v9, %v11767_v39 }
 0x2e9   : > { %v9327_v5 = vpop.f32.mrf.mxu0  ;;  %v9413_v29 = vpop.f32.mrf.mxu1 }
 0x2ea   : > { %v12070_v62 = vadd.f32 %v3306_v0, %v3098_v17  ;;  %v3523_v17 = vld [vmem:[%s10840_s21 + $0x93] sm:$0xff] }
 0x2eb   : > { %v2939_v49 = vpop.f32.mrf.mxu0  ;;  %9513 = vmatmul.mubr.msk.bf16.gmra.mxu0 %vm744_vm2, %v3557_v42  ;;  %v3311_v8 = vpop.f32.mrf.mxu1  ;;  %v3522_v42 = vld [vmem:[%s10840_s21 + $0x8b] sm:$0xff] }
 0x2ec   : > { %v3099_v55 = vadd.f32 %v2939_v49, %v11779_v50  ;;  %9516 = vmatprep.mubr.msk.bf16.mxu0 %vm10670_vm1, %v15554_v18  ;;  %v3559_v49 = vpack.c.bf16 %v3523_v17, %v3522_v42 }
 0x2ed   : > { %v9330_v47 = vpop.f32.mrf.mxu0  ;;  %v9416_v27 = vpop.f32.mrf.mxu1 }
 0x2ee   : > { %v12078_v39 = vadd.f32 %v3311_v8, %v3099_v55 }
 0x2ef   : > { %v2942_v3 = vpop.f32.mrf.mxu0  ;;  %v3314_v61 = vpop.f32.mrf.mxu1 }
 0x2f0   : > { %v3100_v41 = vadd.f32 %v2942_v3, %v11782_v14 }
 0x2f1   : > { %v9331_v24 = vpop.f32.mrf.mxu0  ;;  %v9417_v50 = vpop.f32.mrf.mxu1 }
 0x2f2   : > { %v12081_v56 = vadd.f32 %v3314_v61, %v3100_v41  ;;  %v3525_v41 = vld [vmem:[%s10840_s21 + $0xa3] sm:$0xff] }
 0x2f3   : > { %v2947_v20 = vpop.f32.mrf.mxu0  ;;  %9517 = vmatmul.mubr.msk.bf16.gmra.mxu0 %vm744_vm2, %v3558_v53  ;;  %v3319_v9 = vpop.f32.mrf.mxu1  ;;  %v3524_v53 = vld [vmem:[%s10840_s21 + $0x9b] sm:$0xff] }
 0x2f4   : > { %v3101_v58 = vadd.f32 %v2947_v20, %v11794_v54  ;;  %9520 = vmatprep.mubr.msk.bf16.mxu0 %vm10670_vm1, %v15554_v18  ;;  %v3560_v20 = vpack.c.bf16 %v3525_v41, %v3524_v53 }
 0x2f5   : > { %v9334_v0 = vpop.f32.mrf.mxu0  ;;  %v9420_v5 = vpop.f32.mrf.mxu1 }
 0x2f6   : > { %v12089_v14 = vadd.f32 %v3319_v9, %v3101_v58 }
 0x2f7   : > { %v2950_v29 = vpop.f32.mrf.mxu0  ;;  %v3322_v8 = vpop.f32.mrf.mxu1 }
 0x2f8   : > { %v3102_v55 = vadd.f32 %v2950_v29, %v11797_v30 }
 0x2f9   : > { %v9335_v7 = vpop.f32.mrf.mxu0  ;;  %v9421_v54 = vpop.f32.mrf.mxu1 }
 0x2fa   : > { %v12092_v45 = vadd.f32 %v3322_v8, %v3102_v55  ;;  %v3527_v55 = vld [vmem:[%s10840_s21 + $0xb3] sm:$0xff] }
 0x2fb   : > { %v2955_v47 = vpop.f32.mrf.mxu0  ;;  %9521 = vmatmul.mubr.msk.bf16.gmra.mxu0 %vm744_vm2, %v3559_v49  ;;  %v3327_v3 = vpop.f32.mrf.mxu1  ;;  %v3526_v49 = vld [vmem:[%s10840_s21 + $0xab] sm:$0xff] }
 0x2fc   : > { %v3103_v27 = vadd.f32 %v2955_v47, %v11809_v59  ;;  %9524 = vmatprep.mubr.msk.bf16.mxu0 %vm10670_vm1, %v15554_v18  ;;  %v3561_v47 = vpack.c.bf16 %v3527_v55, %v3526_v49 }
 0x2fd   : > { %v9338_v61 = vpop.f32.mrf.mxu0  ;;  %v9424_v24 = vpop.f32.mrf.mxu1 }
 0x2fe   : > { %v12100_v30 = vadd.f32 %v3327_v3, %v3103_v27 }
 0x2ff   : > { %v2958_v50 = vpop.f32.mrf.mxu0  ;;  %v3330_v9 = vpop.f32.mrf.mxu1 }
 0x300   : > { %v3104_v58 = vadd.f32 %v2958_v50, %v11812_v31 }
 0x301   : > { %v9339_v42 = vpop.f32.mrf.mxu0  ;;  %v9425_v59 = vpop.f32.mrf.mxu1 }
 0x302   : > { %v12103_v17 = vadd.f32 %v3330_v9, %v3104_v58  ;;  %v3529_v58 = vld [vmem:[%s10840_s21 + $0xc3] sm:$0xff] }
 0x303   : > { %v2963_v0 = vpop.f32.mrf.mxu0  ;;  %9525 = vmatmul.mubr.msk.bf16.gmra.mxu0 %vm744_vm2, %v3560_v20  ;;  %v3335_v29 = vpop.f32.mrf.mxu1  ;;  %v3528_v20 = vld [vmem:[%s10840_s21 + $0xbb] sm:$0xff] }
 0x304   : > { %v3105_v5 = vadd.f32 %v2963_v0, %v11824_v6  ;;  %9528 = vmatprep.mubr.msk.bf16.mxu0 %vm10670_vm1, %v15554_v18  ;;  %v3562_v0 = vpack.c.bf16 %v3529_v58, %v3528_v20 }
 0x305   : > { %v9342_v8 = vpop.f32.mrf.mxu0  ;;  %v9428_v7 = vpop.f32.mrf.mxu1 }
 0x306   : > { %v12111_v31 = vadd.f32 %v3335_v29, %v3105_v5 }
 0x307   : > { %v2966_v54 = vpop.f32.mrf.mxu0  ;;  %v3338_v3 = vpop.f32.mrf.mxu1 }
 0x308   : > { %v3106_v27 = vadd.f32 %v2966_v54, %v11827_v1 }
 0x309   : > { %v9343_v53 = vpop.f32.mrf.mxu0  ;;  %v9429_v6 = vpop.f32.mrf.mxu1 }
 0x30a   : > { %v12114_v41 = vadd.f32 %v3338_v3, %v3106_v27  ;;  %v3531_v27 = vld [vmem:[%s10840_s21 + $0xd3] sm:$0xff] }
 0x30b   : > { %v2971_v61 = vpop.f32.mrf.mxu0  ;;  %9529 = vmatmul.mubr.msk.bf16.gmra.mxu0 %vm744_vm2, %v3561_v47  ;;  %v3343_v50 = vpop.f32.mrf.mxu1  ;;  %v3530_v47 = vld [vmem:[%s10840_s21 + $0xcb] sm:$0xff] }
 0x30c   : > { %v3107_v24 = vadd.f32 %v2971_v61, %v11839_v57  ;;  %9532 = vmatprep.mubr.msk.bf16.mxu0 %vm10670_vm1, %v15554_v18  ;;  %v3563_v61 = vpack.c.bf16 %v3531_v27, %v3530_v47 }
 0x30d   : > { %v9346_v9 = vpop.f32.mrf.mxu0  ;;  %v9432_v42 = vpop.f32.mrf.mxu1 }
 0x30e   : > { %v12122_v1 = vadd.f32 %v3343_v50, %v3107_v24 }
 0x30f   : > { %v2974_v59 = vpop.f32.mrf.mxu0  ;;  %v3346_v29 = vpop.f32.mrf.mxu1 }
 0x310   : > { %v3108_v5 = vadd.f32 %v2974_v59, %v11842_v12 }
 0x311   : > { %v9347_v49 = vpop.f32.mrf.mxu0  ;;  %v9433_v57 = vpop.f32.mrf.mxu1 }
 0x312   : > { %v12125_v55 = vadd.f32 %v3346_v29, %v3108_v5  ;;  %v3533_v5 = vld [vmem:[%s10840_s21 + $0xe3] sm:$0xff] }
 0x313   : > { %v2979_v8 = vpop.f32.mrf.mxu0  ;;  %9533 = vmatmul.mubr.msk.bf16.gmra.mxu0 %vm744_vm2, %v3562_v0  ;;  %v3351_v54 = vpop.f32.mrf.mxu1  ;;  %v3532_v0 = vld [vmem:[%s10840_s21 + $0xdb] sm:$0xff] }
 0x314   : > { %v3109_v7 = vadd.f32 %v2979_v8, %v11854_v28  ;;  %9536 = vmatprep.mubr.msk.bf16.mxu0 %vm10670_vm1, %v15554_v18  ;;  %v3564_v8 = vpack.c.bf16 %v3533_v5, %v3532_v0 }
 0x315   : > { %v9350_v3 = vpop.f32.mrf.mxu0  ;;  %v9436_v53 = vpop.f32.mrf.mxu1 }
 0x316   : > { %v12133_v12 = vadd.f32 %v3351_v54, %v3109_v7 }
 0x317   : > { %v2982_v6 = vpop.f32.mrf.mxu0  ;;  %v3354_v50 = vpop.f32.mrf.mxu1 }
 0x318   : > { %v3110_v24 = vadd.f32 %v2982_v6, %v11857_v33 }
 0x319   : > { %v9351_v20 = vpop.f32.mrf.mxu0  ;;  %v9437_v28 = vpop.f32.mrf.mxu1 }
 0x31a   : > { %v12136_v58 = vadd.f32 %v3354_v50, %v3110_v24  ;;  %v3535_v24 = vld [vmem:[%s10840_s21 + $0xf3] sm:$0xff] }
 0x31b   : > { %v2987_v9 = vpop.f32.mrf.mxu0  ;;  %9537 = vmatmul.mubr.msk.bf16.gmra.mxu0 %vm744_vm2, %v3563_v61  ;;  %v3359_v59 = vpop.f32.mrf.mxu1  ;;  %v3534_v61 = vld [vmem:[%s10840_s21 + $0xeb] sm:$0xff] }
 0x31c   : > { %v3111_v42 = vadd.f32 %v2987_v9, %v11869_v19  ;;  %9540 = vmatprep.mubr.msk.bf16.mxu0 %vm10670_vm1, %v15554_v18  ;;  %v3565_v9 = vpack.c.bf16 %v3535_v24, %v3534_v61 }
 0x31d   : > { %v9354_v29 = vpop.f32.mrf.mxu0  ;;  %v9440_v49 = vpop.f32.mrf.mxu1 }
 0x31e   : > { %v12144_v33 = vadd.f32 %v3359_v59, %v3111_v42 }
 0x31f   : > { %v2990_v57 = vpop.f32.mrf.mxu0  ;;  %v3362_v54 = vpop.f32.mrf.mxu1 }
 0x320   : > { %v3112_v7 = vadd.f32 %v2990_v57, %v11872_v38 }
 0x321   : > { %v9355_v47 = vpop.f32.mrf.mxu0  ;;  %v9441_v19 = vpop.f32.mrf.mxu1 }
 0x322   : > { %v12147_v27 = vadd.f32 %v3362_v54, %v3112_v7  ;;  %v3537_v7 = vld [vmem:[%s10840_s21 + $0x103] sm:$0xff] }
 0x323   : > { %v2995_v3 = vpop.f32.mrf.mxu0  ;;  %9541 = vmatmul.mubr.msk.bf16.gmra.mxu0 %vm744_vm2, %v3564_v8  ;;  %v3367_v6 = vpop.f32.mrf.mxu1  ;;  %v3536_v8 = vld [vmem:[%s10840_s21 + $0xfb] sm:$0xff] }
 0x324   : > { %v3113_v53 = vadd.f32 %v2995_v3, %v11884_v35  ;;  %9544 = vmatprep.mubr.msk.bf16.mxu0 %vm10670_vm1, %v15554_v18  ;;  %v3566_v3 = vpack.c.bf16 %v3537_v7, %v3536_v8 }
 0x325   : > { %v9358_v50 = vpop.f32.mrf.mxu0  ;;  %v9444_v20 = vpop.f32.mrf.mxu1 }
 0x326   : > { %v12155_v38 = vadd.f32 %v3367_v6, %v3113_v53 }
 0x327   : > { %v2998_v28 = vpop.f32.mrf.mxu0  ;;  %v3370_v59 = vpop.f32.mrf.mxu1 }
 0x328   : > { %v3114_v42 = vadd.f32 %v2998_v28, %v11887_v40 }
 0x329   : > { %v9359_v0 = vpop.f32.mrf.mxu0  ;;  %v9445_v35 = vpop.f32.mrf.mxu1 }
 0x32a   : > { %v12158_v5 = vadd.f32 %v3370_v59, %v3114_v42  ;;  %v3539_v42 = vld [vmem:[%s10840_s21 + $0x113] sm:$0xff] }
 0x32b   : > { %v3003_v29 = vpop.f32.mrf.mxu0  ;;  %9545 = vmatmul.mubr.msk.bf16.gmra.mxu0 %vm744_vm2, %v3565_v9  ;;  %v3375_v57 = vpop.f32.mrf.mxu1  ;;  %v3538_v9 = vld [vmem:[%s10840_s21 + $0x10b] sm:$0xff] }
 0x32c   : > { %v3115_v49 = vadd.f32 %v3003_v29, %v11899_v48  ;;  %9548 = vmatprep.mubr.msk.bf16.mxu0 %vm10670_vm1, %v15554_v18  ;;  %v3567_v29 = vpack.c.bf16 %v3539_v42, %v3538_v9 }
 0x32d   : > { %v9362_v54 = vpop.f32.mrf.mxu0  ;;  %v9448_v47 = vpop.f32.mrf.mxu1 }
 0x32e   : > { %v12166_v40 = vadd.f32 %v3375_v57, %v3115_v49 }
 0x32f   : > { %v3006_v19 = vpop.f32.mrf.mxu0  ;;  %v3378_v6 = vpop.f32.mrf.mxu1 }
 0x330   : > { %v3116_v53 = vadd.f32 %v3006_v19, %v11902_v25 }
 0x331   : > { %v9363_v61 = vpop.f32.mrf.mxu0  ;;  %v9449_v48 = vpop.f32.mrf.mxu1 }
 0x332   : > { %v12169_v24 = vadd.f32 %v3378_v6, %v3116_v53  ;;  %v3541_v53 = vld [vmem:[%s10840_s21 + $0x123] sm:$0xff] }
 0x333   : > { %v3011_v50 = vpop.f32.mrf.mxu0  ;;  %9549 = vmatmul.mubr.msk.bf16.gmra.mxu0 %vm744_vm2, %v3566_v3  ;;  %v3383_v28 = vpop.f32.mrf.mxu1  ;;  %v3540_v3 = vld [vmem:[%s10840_s21 + $0x11b] sm:$0xff] }
 0x334   : > { %v3117_v20 = vadd.f32 %v3011_v50, %v11914_v34  ;;  %9552 = vmatprep.mubr.msk.bf16.mxu0 %vm10670_vm1, %v15554_v18  ;;  %v3568_v50 = vpack.c.bf16 %v3541_v53, %v3540_v3 }
 0x335   : > { %v9366_v59 = vpop.f32.mrf.mxu0  ;;  %v9452_v0 = vpop.f32.mrf.mxu1 }
 0x336   : > { %v12177_v25 = vadd.f32 %v3383_v28, %v3117_v20 }
 0x337   : > { %v3014_v35 = vpop.f32.mrf.mxu0  ;;  %v3386_v57 = vpop.f32.mrf.mxu1 }
 0x338   : > { %v3118_v49 = vadd.f32 %v3014_v35, %v11923_v60 }
 0x339   : > { %v9367_v8 = vpop.f32.mrf.mxu0  ;;  %v9453_v34 = vpop.f32.mrf.mxu1 }
 0x33a   : > { %v12180_v7 = vadd.f32 %v3386_v57, %v3118_v49  ;;  %v3543_v49 = vld [vmem:[%s10840_s21 + $0x133] sm:$0xff] }
 0x33b   : > { %v3019_v54 = vpop.f32.mrf.mxu0  ;;  %9553 = vmatmul.mubr.msk.bf16.gmra.mxu0 %vm744_vm2, %v3567_v29  ;;  %v3391_v19 = vpop.f32.mrf.mxu1  ;;  %v3542_v29 = vld [vmem:[%s10840_s21 + $0x12b] sm:$0xff] }
 0x33c   : > { %v3119_v47 = vadd.f32 %v3019_v54, %v11936_v52  ;;  %9556 = vmatprep.mubr.msk.bf16.mxu0 %vm10670_vm1, %v15554_v18  ;;  %v3569_v54 = vpack.c.bf16 %v3543_v49, %v3542_v29 }
 0x33d   : > { %v9370_v6 = vpop.f32.mrf.mxu0  ;;  %v9456_v61 = vpop.f32.mrf.mxu1 }
 0x33e   : > { %v12188_v60 = vadd.f32 %v3391_v19, %v3119_v47 }
 0x33f   : > { %v3022_v48 = vpop.f32.mrf.mxu0  ;;  %v3394_v28 = vpop.f32.mrf.mxu1 }
 0x340   : > { %v3120_v20 = vadd.f32 %v3022_v48, %v11939_v44 }
 0x341   : > { %v9371_v9 = vpop.f32.mrf.mxu0  ;;  %v9457_v52 = vpop.f32.mrf.mxu1 }
 0x342   : > { %v12191_v42 = vadd.f32 %v3394_v28, %v3120_v20  ;;  %v3545_v20 = vld [vmem:[%s10840_s21 + $0x143] sm:$0xff] }
 0x343   : > { %v3027_v59 = vpop.f32.mrf.mxu0  ;;  %9557 = vmatmul.mubr.msk.bf16.gmra.mxu0 %vm744_vm2, %v3568_v50  ;;  %v3399_v35 = vpop.f32.mrf.mxu1  ;;  %v3544_v50 = vld [vmem:[%s10840_s21 + $0x13b] sm:$0xff] }
 0x344   : > { %v3121_v0 = vadd.f32 %v3027_v59, %v11951_v4  ;;  %9560 = vmatprep.mubr.msk.bf16.mxu0 %vm10670_vm1, %v15554_v18  ;;  %v3570_v59 = vpack.c.bf16 %v3545_v20, %v3544_v50 }
 0x345   : > { %v9374_v57 = vpop.f32.mrf.mxu0  ;;  %v9460_v8 = vpop.f32.mrf.mxu1 }
 0x346   : > { %v12199_v44 = vadd.f32 %v3399_v35, %v3121_v0 }
 0x347   : > { %v3030_v34 = vpop.f32.mrf.mxu0  ;;  %v3402_v19 = vpop.f32.mrf.mxu1 }
 0x348   : > { %v3122_v47 = vadd.f32 %v3030_v34, %v11954_v2 }
 0x349   : > { %v9375_v3 = vpop.f32.mrf.mxu0  ;;  %v9461_v4 = vpop.f32.mrf.mxu1 }
 0x34a   : > { %v12202_v53 = vadd.f32 %v3402_v19, %v3122_v47  ;;  %v3547_v47 = vld [vmem:[%s10840_s21 + $0x153] sm:$0xff] }
 0x34b   : > { %v3035_v6 = vpop.f32.mrf.mxu0  ;;  %9561 = vmatmul.mubr.msk.bf16.gmra.mxu0 %vm744_vm2, %v3569_v54  ;;  %v3407_v48 = vpop.f32.mrf.mxu1  ;;  %v3546_v54 = vld [vmem:[%s10840_s21 + $0x14b] sm:$0xff] }
 0x34c   : > { %v3123_v61 = vadd.f32 %v3035_v6, %v11966_v51  ;;  %9564 = vmatprep.mubr.msk.bf16.mxu0 %vm10670_vm1, %v15554_v18  ;;  %v3571_v6 = vpack.c.bf16 %v3547_v47, %v3546_v54 }
 0x34d   : > { %v9378_v28 = vpop.f32.mrf.mxu0  ;;  %v9464_v9 = vpop.f32.mrf.mxu1 }
 0x34e   : > { %v12210_v2 = vadd.f32 %v3407_v48, %v3123_v61 }
 0x34f   : > { %v3038_v52 = vpop.f32.mrf.mxu0  ;;  %v3410_v35 = vpop.f32.mrf.mxu1 }
 0x350   : > { %v3124_v0 = vadd.f32 %v3038_v52, %v11969_v11 }
 0x351   : > { %v9379_v29 = vpop.f32.mrf.mxu0  ;;  %v9465_v51 = vpop.f32.mrf.mxu1 }
 0x352   : > { %v12213_v49 = vadd.f32 %v3410_v35, %v3124_v0  ;;  %v3549_v0 = vld [vmem:[%s10840_s21 + $0x163] sm:$0xff] }
 0x353   : > { %v3043_v57 = vpop.f32.mrf.mxu0  ;;  %9565 = vmatmul.mubr.msk.bf16.gmra.mxu0 %vm744_vm2, %v3570_v59  ;;  %v3415_v34 = vpop.f32.mrf.mxu1  ;;  %v3548_v59 = vld [vmem:[%s10840_s21 + $0x15b] sm:$0xff] }
 0x354   : > { %v3125_v8 = vadd.f32 %v3043_v57, %v11981_v46  ;;  %9568 = vmatprep.mubr.msk.bf16.mxu0 %vm10670_vm1, %v15554_v18  ;;  %v3572_v57 = vpack.c.bf16 %v3549_v0, %v3548_v59 }
 0x355   : > { %v9382_v19 = vpop.f32.mrf.mxu0  ;;  %v9468_v3 = vpop.f32.mrf.mxu1 }
 0x356   : > { %v12221_v11 = vadd.f32 %v3415_v34, %v3125_v8 }
 0x357   : > { %v3046_v4 = vpop.f32.mrf.mxu0  ;;  %v3418_v48 = vpop.f32.mrf.mxu1 }
 0x358   : > { %v3126_v61 = vadd.f32 %v3046_v4, %v11984_v37 }
 0x359   : > { %v9383_v50 = vpop.f32.mrf.mxu0  ;;  %v9469_v46 = vpop.f32.mrf.mxu1 }
 0x35a   : > { %v12224_v20 = vadd.f32 %v3418_v48, %v3126_v61 }
 0x35b   : > { %v3051_v28 = vpop.f32.mrf.mxu0  ;;  %9569 = vmatmul.mubr.msk.bf16.gmra.mxu0 %vm744_vm2, %v3571_v6  ;;  %v3423_v52 = vpop.f32.mrf.mxu1  ;;  %v3550_v6 = vld [vmem:[%s10840_s21 + $0x16b] sm:$0xff]  ;;  %s10672_s21 = smov [#allocation3]  }
 0x35c   : > { %v3127_v9 = vadd.f32 %v3051_v28, %v11997_v13  ;;  %9572 = vmatprep.mubr.msk.bf16.mxu0 %vm10670_vm1, %v15554_v18  ;;  %v3573_v46 = vpack.c.bf16 %v3550_v6, %v3550_v6  ;;  %s10611_s0 = sshll.u32 %s10672_s21, 4  ;;  %s10612_s0 = int_to_ptr.vmem [resolvable:$false] %s10611_s0 }
 0x35d   : > { %v9386_v35 = vpop.f32.mrf.mxu0  ;;  %v9472_v37 = vpop.f32.mrf.mxu1 }
 0x35e   : > { %v12232_v29 = vadd.f32 %v3423_v52, %v3127_v9 }
 0x35f   : > { %v3054_v51 = vpop.f32.mrf.mxu0  ;;  %v3426_v34 = vpop.f32.mrf.mxu1 }
 0x360   : > { %v3128_v8 = vadd.f32 %v3054_v51, %v12001_v23 }
 0x361   : > { %v9387_v54 = vpop.f32.mrf.mxu0  ;;  %v9473_v13 = vpop.f32.mrf.mxu1 }
 0x362   : > { %v12235_v47 = vadd.f32 %v3426_v34, %v3128_v8 }
 0x363   : > { %v3059_v19 = vpop.f32.mrf.mxu0  ;;  %9573 = vmatmul.mubr.msk.bf16.gmra.mxu0 %vm744_vm2, %v3572_v57  ;;  %v3431_v4 = vpop.f32.mrf.mxu1 }
 0x364   : > { %v3129_v3 = vadd.f32 %v3059_v19, %v12012_v26  ;;  %9576 = vmatprep.mubr.msk.bf16.mxu0 %vm10670_vm1, %v15554_v18 }
 0x365   : > { %v9390_v61 = vpop.f32.mrf.mxu0  ;;  %v9476_v50 = vpop.f32.mrf.mxu1 }
 0x366   : > { %v12242_v48 = vadd.f32 %v3431_v4, %v3129_v3 }
 0x367   : > { %v3062_v23 = vpop.f32.mrf.mxu0  ;;  %v3434_v9 = vpop.f32.mrf.mxu1 }
 0x368   : > { %v3130_v28 = vadd.f32 %v3062_v23, %v12015_v10 }
 0x369   : > { %v9391_v52 = vpop.f32.mrf.mxu0  ;;  %v9477_v0 = vpop.f32.mrf.mxu1 }
 0x36a   : > { %v12245_v59 = vadd.f32 %v3434_v9, %v3130_v28 }
 0x36b   : > { %v3067_v35 = vpop.f32.mrf.mxu0  ;;  %9577 = vmatmul.mubr.msk.bf16.gmra.mxu0 %vm744_vm2, %v3573_v46  ;;  %v3439_v37 = vpop.f32.mrf.mxu1 }
 0x36c   : > { %v3131_v26 = vadd.f32 %v3067_v35, %v12026_v36  ;;  %9674 = vmatprep.mubr.msk.f32.mxu0 %vm10670_vm1, %v15554_v18 }
 0x36d   : > { %v9394_v51 = vpop.f32.mrf.mxu0  ;;  %v9480_v8 = vpop.f32.mrf.mxu1 }
 0x36e   : > { %v12251_v57 = vadd.f32 %v3439_v37, %v3131_v26 }
 0x36f   : > { %v3070_v34 = vpop.f32.mrf.mxu0  ;;  %v3442_v54 = vpop.f32.mrf.mxu1 }
 0x370   : > { %v3132_v10 = vadd.f32 %v3070_v34, %v12029_v21 }
 0x371   : > { %v9395_v13 = vpop.f32.mrf.mxu0  ;;  %v9481_v3 = vpop.f32.mrf.mxu1 }
 0x372   : > { %v12254_v19 = vadd.f32 %v3442_v54, %v3132_v10 }
 0x373   : > { %v3075_v4 = vpop.f32.mrf.mxu0  ;;  %v3447_v36 = vpop.f32.mrf.mxu1 }
 0x374   : > { %v3133_v6 = vadd.f32 %v3075_v4, %v12037_v43 }
 0x375   : > { %v9398_v61 = vpop.f32.mrf.mxu0  ;;  %v9484_v23 = vpop.f32.mrf.mxu1 }
 0x376   : > { %v12257_v50 = vadd.f32 %v3447_v36, %v3133_v6 }
 0x377   : > { %v3078_v46 = vpop.f32.mrf.mxu0  ;;  %v3450_v9 = vpop.f32.mrf.mxu1 }
 0x378   : > { %v3134_v28 = vadd.f32 %v3078_v46, %v12040_v16 }
 0x379   : > { %v9399_v52 = vpop.f32.mrf.mxu0  ;;  %v9485_v21 = vpop.f32.mrf.mxu1 }
 0x37a   : > { %v12260_v0 = vadd.f32 %v3450_v9, %v3134_v28 }
 0x37b   : > { %v3083_v35 = vpop.f32.mrf.mxu0  ;;  %v3455_v37 = vpop.f32.mrf.mxu1 }
 0x37c   : > { %v3135_v26 = vadd.f32 %v3083_v35, %v12048_v22 }
 0x37d   : > { %v9402_v51 = vpop.f32.mrf.mxu0  ;;  %v9488_v43 = vpop.f32.mrf.mxu1 }
 0x37e   : > { %v12263_v8 = vadd.f32 %v3455_v37, %v3135_v26 }
 0x37f   : > { %v3086_v34 = vpop.f32.mrf.mxu0  ;;  %v3458_v54 = vpop.f32.mrf.mxu1 }
 0x380   : > { %v3136_v10 = vadd.f32 %v3086_v34, %v12051_v63  ;;  %v12274_v63 = vld [vmem:[%s15580_s3] ss:$0 sm:$0xff] }
 0x381   : > { %v9403_v13 = vpop.f32.mrf.mxu0  ;;  %v9489_v16 = vpop.f32.mrf.mxu1 }
 0x382   : > { %v12266_v3 = vadd.f32 %v3458_v54, %v3136_v10 }
 0x383   : > { %v3091_v4 = vpop.f32.mrf.mxu0  ;;  %v3463_v36 = vpop.f32.mrf.mxu1 }
 0x384   : > { %v3137_v6 = vadd.f32 %v3091_v4, %v12059_v15 }
 0x385   : > { %v9406_v61 = vpop.f32.mrf.mxu0  ;;  %v9492_v22 = vpop.f32.mrf.mxu1 }
 0x386   : > { %v12269_v23 = vadd.f32 %v3463_v36, %v3137_v6 }
 0x387   : > { %v3094_v46 = vpop.f32.mrf.mxu0  ;;  %v3466_v28 = vpop.f32.mrf.mxu1 }
 0x389   : > { %v9407_v9 = vpop.f32.mrf.mxu0  ;;  %v9493_v52 = vpop.f32.mrf.mxu1 }
 0x38b   : > { %v3675_v21 = vpop.f32.mrf.mxu0 }
 0x38c   : > { %v3841_v35 = vadd.f32 %v3675_v21, %v12067_v32 }
 0x38d   : > { %v9498_v26 = vpop.f32.mrf.mxu0 }
 0x38e   : > { %v12278_v15 = vadd.f32 %v12274_v63, %v3841_v35  ;;  %v10671_v26 = vmov 0  }
 0x38f   : > { %v3678_v37 = vpop.f32.mrf.mxu0  ;;  %9910 = vset.pattern.permute.xlu0 %v10671_v26  ;;  %9911 = vset.pattern.permute.xlu1 %v10671_v26 }
 0x390   : > { %v8281_v51 = vmul.f32 -1.442695, %v12278_v15  ;;  %v3842_v43 = vadd.f32 %v3678_v37, %v12070_v62 }
 0x391   : > { %v9499_v34 = vpop.f32.mrf.mxu0 }
 0x392   : > { %9912 = vpow2.f32 %v8281_v51  ;;  %v12283_v10 = vadd.f32 %v12274_v63, %v3842_v43 }
 0x393   : > { %v3683_v54 = vpop.f32.mrf.mxu0 }
 0x394   : > { %v8282_v13 = vmul.f32 -1.442695, %v12283_v10  ;;  %v3843_v16 = vadd.f32 %v3683_v54, %v12078_v39 }
 0x395   : > { %v9502_v32 = vpop.f32.mrf.mxu0 }
 0x396   : > { %9914 = vpow2.f32 %v8282_v13  ;;  %v12288_v4 = vadd.f32 %v12274_v63, %v3843_v16  ;;  %v575_v16 = vld [vmem:[%s15581_s20 + $0x8] sm:$0xff] }
 0x397   : > { %v3686_v6 = vpop.f32.mrf.mxu0 }
 0x398   : > { %v8283_v36 = vmul.f32 -1.442695, %v12288_v4  ;;  %v3844_v62 = vadd.f32 %v3686_v6, %v12081_v56  ;;  %v574_v56 = vld [vmem:[%s15581_s20] sm:$0xff] }
 0x399   : > { %v9503_v61 = vpop.f32.mrf.mxu0  ;;  %4849 = vperm.xlu0 %9910, %v574_v56  }
 0x39a   : > { %9916 = vpow2.f32 %v8283_v36  ;;  %v12293_v22 = vadd.f32 %v12274_v63, %v3844_v62 }
 0x39b   : > { %v3691_v46 = vpop.f32.mrf.mxu0 }
 0x39c   : > { %v8284_v28 = vmul.f32 -1.442695, %v12293_v22  ;;  %v3845_v39 = vadd.f32 %v3691_v46, %v12089_v14 }
 0x39d   : > { %v9506_v9 = vpop.f32.mrf.mxu0  ;;  %4854 = vperm.xlu0 %9910, %v575_v16  }
 0x39e   : > { %9918 = vpow2.f32 %v8284_v28  ;;  %v12298_v52 = vadd.f32 %v12274_v63, %v3845_v39  ;;  %v576_v28 = vld [vmem:[%s15581_s20 + $0x10] sm:$0xff]  ;;  %v578_v39 = vld [vmem:[%s15581_s20 + $0x20] sm:$0xff] }
 0x39f   : > { %v9913_v21 = vpop.eup %9912  ;;  %v3694_v35 = vpop.f32.mrf.mxu0  ;;  %4859 = vperm.xlu1 %9911, %v576_v28  }
 0x3a0   : > { %v4053_v37 = vadd.f32 1.0, %v9913_v21  ;;  %v8285_v51 = vmul.f32 -1.442695, %v12298_v52  ;;  %v3846_v43 = vadd.f32 %v3694_v35, %v12092_v45 }
 0x3a1   : > { %v9507_v14 = vpop.f32.mrf.mxu0  ;;  %4869 = vperm.xlu0 %9910, %v578_v39  }
 0x3a2   : > { %v12306_v34 = vadd.f32 %v12274_v63, %v3846_v43  ;;  %9920 = vpow2.f32 %v8285_v51  ;;  %v577_v51 = vld [vmem:[%s15581_s20 + $0x18] sm:$0xff]  ;;  %v580_v43 = vld [vmem:[%s15581_s20 + $0x30] sm:$0xff] }
 0x3a3   : > { %v9915_v54 = vpop.eup %9914  ;;  %v3699_v13 = vpop.f32.mrf.mxu0  ;;  %9922 = vrcp.f32 %v4053_v37  ;;  %4864 = vperm.xlu1 %9911, %v577_v51  }
 0x3a4   : > { %v4054_v32 = vadd.f32 1.0, %v9915_v54  ;;  %v8286_v6 = vmul.f32 -1.442695, %v12306_v34  ;;  %v3847_v36 = vadd.f32 %v3699_v13, %v12100_v30 }
 0x3a5   : > { %v9510_v45 = vpop.f32.mrf.mxu0  ;;  %4879 = vperm.xlu0 %9910, %v580_v43  }
 0x3a6   : > { %9924 = vrcp.f32 %v4054_v32  ;;  %v12314_v62 = vadd.f32 %v12274_v63, %v3847_v36  ;;  %v582_v36 = vld [vmem:[%s15581_s20 + $0x40] sm:$0xff] }
 0x3a7   : > { %v9917_v61 = vpop.eup %9916  ;;  %9926 = vpow2.f32 %v8286_v6  ;;  %v3702_v46 = vpop.f32.mrf.mxu0  ;;  %v579_v6 = vld [vmem:[%s15581_s20 + $0x28] sm:$0xff] }
 0x3a8   : > { %v4055_v9 = vadd.f32 1.0, %v9917_v61  ;;  %v8287_v30 = vmul.f32 -1.442695, %v12314_v62  ;;  %v3848_v21 = vadd.f32 %v3702_v46, %v12103_v17  ;;  %4874 = vperm.xlu1 %9911, %v579_v6  }
 0x3a9   : > { %v9511_v35 = vpop.f32.mrf.mxu0  ;;  %4889 = vperm.xlu0 %9910, %v582_v36  }
 0x3aa   : > { %v12325_v26 = vadd.f32 %v12274_v63, %v3848_v21  ;;  %9928 = vpow2.f32 %v8287_v30  ;;  %v581_v35 = vld [vmem:[%s15581_s20 + $0x38] sm:$0xff] }
 0x3ab   : > { %v9919_v56 = vpop.eup %9918  ;;  %v3707_v37 = vpop.f32.mrf.mxu0  ;;  %9930 = vrcp.f32 %v4055_v9 }
 0x3ac   : > { %v4056_v14 = vadd.f32 1.0, %v9919_v56  ;;  %v8288_v17 = vmul.f32 -1.442695, %v12325_v26  ;;  %v3849_v54 = vadd.f32 %v3707_v37, %v12111_v31  ;;  %v584_v56 = vld [vmem:[%s15581_s20 + $0x50] sm:$0xff]  ;;  %4884 = vperm.xlu1 %9911, %v581_v35  }
 0x3ad   : > { %v9514_v13 = vpop.f32.mrf.mxu0  ;;  %4899 = vperm.xlu0 %9910, %v584_v56  }
 0x3ae   : > { %9932 = vrcp.f32 %v4056_v14  ;;  %v12336_v16 = vadd.f32 %v12274_v63, %v3849_v54 }
 0x3af   : > { %9934 = vpow2.f32 %v8288_v17  ;;  %v3710_v32 = vpop.f32.mrf.mxu0  ;;  %v9921_v45 = vpop.eup %9920 }
 0x3b0   : > { %v8289_v31 = vmul.f32 -1.442695, %v12336_v16  ;;  %v3850_v61 = vadd.f32 %v3710_v32, %v12114_v41  ;;  %v9923_v46 = vpop.eup %9922  ;;  %v4057_v28 = vadd.f32 1.0, %v9921_v45  ;;  %v583_v32 = vld [vmem:[%s15581_s20 + $0x48] sm:$0xff] }
 0x3b1   : > { %v9515_v39 = vpop.f32.mrf.mxu0  ;;  %v12356_v37 = vmul.f32 %v9923_v46, %v12278_v15  ;;  %4894 = vperm.xlu1 %9911, %v583_v32   ;;  %v587_v32 = vld [vmem:[%s15581_s20 + $0x68] sm:$0xff] }
 0x3b2   : > { %9936 = vpow2.f32 %v8289_v31  ;;  %v12347_v9 = vadd.f32 %v12274_v63, %v3850_v61 }
 0x3b3   : > { %v9925_v30 = vpop.eup %9924  ;;  %v3715_v21 = vpop.f32.mrf.mxu0  ;;  %15582 = vst [vmem:[#allocation7_spill] sm:$0xff] %v12356_v37  ;;  %9938 = vrcp.f32 %v4057_v28 }
 0x3b4   : > { %v9927_v41 = vpop.eup %9926  ;;  %v12359_v51 = vmul.f32 %v9925_v30, %v12283_v10  ;;  %v8290_v43 = vmul.f32 -1.442695, %v12347_v9  ;;  %v3851_v14 = vadd.f32 %v3715_v21, %v12122_v1  ;;  %v586_v1 = vld [vmem:[%s15581_s20 + $0x60] sm:$0xff]  ;;  %v588_v21 = vld [vmem:[%s15581_s20 + $0x70] sm:$0xff] }
 0x3b5   : > { %v4058_v17 = vadd.f32 1.0, %v9927_v41  ;;  %v9518_v54 = vpop.f32.mrf.mxu0  ;;  %4909 = vperm.xlu0 %9910, %v586_v1  }
 0x3b6   : > { %15583 = vst [vmem:[#allocation8_spill] sm:$0xff] %v12359_v51  ;;  %v4219_v13 = vpack.c.bf16 %v12359_v51, %v12356_v37  ;;  %9940 = vpow2.f32 %v8290_v43  ;;  %v12366_v15 = vadd.f32 %v12274_v63, %v3851_v14 }
 0x3b7   : > { %9942 = vrcp.f32 %v4058_v17  ;;  %v3718_v10 = vpop.f32.mrf.mxu0  ;;  %v9929_v6 = vpop.eup %9928 }
 0x3b8   : > { %v8291_v36 = vmul.f32 -1.442695, %v12366_v15  ;;  %v3852_v45 = vadd.f32 %v3718_v10, %v12125_v55  ;;  %9583 = vmatmul.mubr.msk.bf16.vlgmr.msra.gmra.mxu1 %vm4248_vm3, %v4219_v13  ;;  %v9931_v31 = vpop.eup %9930  ;;  %v4059_v61 = vadd.f32 1.0, %v9929_v6  ;;  %v585_v55 = vld [vmem:[%s15581_s20 + $0x58] sm:$0xff] }
 0x3b9   : > { %v9519_v46 = vpop.f32.mrf.mxu0  ;;  %9586 = vmatprep.mubr.msk.bf16.mxu1 %vm10670_vm1, %v15554_v18  ;;  %v12389_v56 = vmul.f32 %v9931_v31, %v12288_v4  ;;  %4904 = vperm.xlu1 %9911, %v585_v55  }
 0x3ba   : > { %9944 = vpow2.f32 %v8291_v36  ;;  %v12380_v28 = vadd.f32 %v12274_v63, %v3852_v45  ;;  %4919 = vperm.xlu0 %9910, %v588_v21  }
 0x3bb   : > { %v9933_v39 = vpop.eup %9932  ;;  %v3723_v30 = vpop.f32.mrf.mxu0  ;;  %15584 = vst [vmem:[#allocation9_spill] sm:$0xff] %v12389_v56  ;;  %9946 = vrcp.f32 %v4059_v61 }
 0x3bc   : > { %v9935_v35 = vpop.eup %9934  ;;  %v12392_v41 = vmul.f32 %v9933_v39, %v12293_v22  ;;  %v8292_v43 = vmul.f32 -1.442695, %v12380_v28  ;;  %v3853_v14 = vadd.f32 %v3723_v30, %v12133_v12  ;;  %v590_v12 = vld [vmem:[%s15581_s20 + $0x80] sm:$0xff]  ;;  %v589_v30 = vld [vmem:[%s15581_s20 + $0x78] sm:$0xff] }
 0x3bd   : > { %v4060_v17 = vadd.f32 1.0, %v9935_v35  ;;  %v9522_v54 = vpop.f32.mrf.mxu0  ;;  %4914 = vperm.xlu1 %9911, %v587_v32  }
 0x3be   : > { %15585 = vst [vmem:[#allocation10_spill] sm:$0xff] %v12392_v41  ;;  %v4220_v13 = vpack.c.bf16 %v12392_v41, %v12389_v56  ;;  %9948 = vpow2.f32 %v8292_v43  ;;  %v12399_v10 = vadd.f32 %v12274_v63, %v3853_v14  ;;  %4929 = vperm.xlu0 %9910, %v590_v12  }
 0x3bf   : > { %v9937_v4 = vpop.eup %9936  ;;  %9950 = vrcp.f32 %v4060_v17  ;;  %v3726_v22 = vpop.f32.mrf.mxu0 }
 0x3c0   : > { %v4061_v1 = vadd.f32 1.0, %v9937_v4  ;;  %v8293_v6 = vmul.f32 -1.442695, %v12399_v10  ;;  %v3854_v36 = vadd.f32 %v3726_v22, %v12136_v58  ;;  %9587 = vmatmul.mubr.msk.bf16.gmra.mxu1 %vm4248_vm3, %v4220_v13  ;;  %v9939_v31 = vpop.eup %9938  ;;  %v592_v58 = vld [vmem:[%s15581_s20 + $0x90] sm:$0xff] }
 0x3c1   : > { %v9523_v45 = vpop.f32.mrf.mxu0  ;;  %9590 = vmatprep.mubr.msk.bf16.mxu1 %vm10670_vm1, %v15554_v18  ;;  %4924 = vperm.xlu1 %9911, %v589_v30   ;;  %v12424_v14 = vmul.f32 %v9939_v31, %v12298_v52  ;;  %v594_v52 = vld [vmem:[%s15581_s20 + $0xa0] sm:$0xff] }
 0x3c2   : > { %v12413_v61 = vadd.f32 %v12274_v63, %v3854_v36  ;;  %9952 = vpow2.f32 %v8293_v6  ;;  %4939 = vperm.xlu0 %9910, %v592_v58  }
 0x3c3   : > { %v9941_v46 = vpop.eup %9940  ;;  %v3731_v39 = vpop.f32.mrf.mxu0  ;;  %9954 = vrcp.f32 %v4061_v1  ;;  %15586 = vst [vmem:[#allocation11_spill] sm:$0xff] %v12424_v14 }
 0x3c4   : > { %v9943_v55 = vpop.eup %9942  ;;  %v4062_v21 = vadd.f32 1.0, %v9941_v46  ;;  %v8294_v35 = vmul.f32 -1.442695, %v12413_v61  ;;  %v3855_v43 = vadd.f32 %v3731_v39, %v12144_v33  ;;  %v591_v33 = vld [vmem:[%s15581_s20 + $0x88] sm:$0xff]  ;;  %v593_v39 = vld [vmem:[%s15581_s20 + $0x98] sm:$0xff] }
 0x3c5   : > { %v12427_v17 = vmul.f32 %v9943_v55, %v12306_v34  ;;  %v9526_v54 = vpop.f32.mrf.mxu0  ;;  %4934 = vperm.xlu1 %9911, %v591_v33  }
 0x3c6   : > { %9956 = vrcp.f32 %v4062_v21  ;;  %v12430_v13 = vadd.f32 %v12274_v63, %v3855_v43  ;;  %4949 = vperm.xlu0 %9910, %v594_v52  }
 0x3c7   : > { %15587 = vst [vmem:[#allocation12_spill] sm:$0xff] %v12427_v17  ;;  %v9945_v4 = vpop.eup %9944  ;;  %v4221_v22 = vpack.c.bf16 %v12427_v17, %v12424_v14  ;;  %9958 = vpow2.f32 %v8294_v35  ;;  %v3734_v32 = vpop.f32.mrf.mxu0 }
 0x3c8   : > { %v4063_v34 = vadd.f32 1.0, %v9945_v4  ;;  %v8295_v12 = vmul.f32 -1.442695, %v12430_v13  ;;  %v3856_v1 = vadd.f32 %v3734_v32, %v12147_v27  ;;  %v9947_v36 = vpop.eup %9946  ;;  %v596_v27 = vld [vmem:[%s15581_s20 + $0xb0] sm:$0xff] }
 0x3c9   : > { %9591 = vmatmul.mubr.msk.bf16.gmra.mxu1 %vm4248_vm3, %v4221_v22  ;;  %v9527_v6 = vpop.f32.mrf.mxu0  ;;  %4944 = vperm.xlu1 %9911, %v593_v39   ;;  %v12457_v35 = vmul.f32 %v9947_v36, %v12314_v62  ;;  %v598_v62 = vld [vmem:[%s15581_s20 + $0xc0] sm:$0xff]  ;;  %v597_v36 = vld [vmem:[%s15581_s20 + $0xb8] sm:$0xff] }
 0x3ca   : > { %v12444_v45 = vadd.f32 %v12274_v63, %v3856_v1  ;;  %9594 = vmatprep.mubr.msk.bf16.mxu1 %vm10670_vm1, %v15554_v18  ;;  %9960 = vpow2.f32 %v8295_v12  ;;  %4959 = vperm.xlu0 %9910, %v596_v27  }
 0x3cb   : > { %v9949_v31 = vpop.eup %9948  ;;  %v3739_v46 = vpop.f32.mrf.mxu0  ;;  %9962 = vrcp.f32 %v4063_v34  ;;  %15588 = vst [vmem:[#allocation13_spill] sm:$0xff] %v12457_v35 }
 0x3cc   : > { %v9951_v30 = vpop.eup %9950  ;;  %v4064_v58 = vadd.f32 1.0, %v9949_v31  ;;  %v8296_v55 = vmul.f32 -1.442695, %v12444_v45  ;;  %v3857_v21 = vadd.f32 %v3739_v46, %v12155_v38  ;;  %v595_v38 = vld [vmem:[%s15581_s20 + $0xa8] sm:$0xff] }
 0x3cd   : > { %v12460_v43 = vmul.f32 %v9951_v30, %v12325_v26  ;;  %v9530_v54 = vpop.f32.mrf.mxu0  ;;  %4954 = vperm.xlu1 %9911, %v595_v38  }
 0x3ce   : > { %9964 = vrcp.f32 %v4064_v58  ;;  %v12463_v4 = vadd.f32 %v12274_v63, %v3857_v21  ;;  %4969 = vperm.xlu0 %9910, %v598_v62  }
 0x3cf   : > { %15589 = vst [vmem:[#allocation14_spill] sm:$0xff] %v12460_v43  ;;  %v4222_v22 = vpack.c.bf16 %v12460_v43, %v12457_v35  ;;  %9966 = vpow2.f32 %v8296_v55  ;;  %v3742_v32 = vpop.f32.mrf.mxu0  ;;  %v9953_v26 = vpop.eup %9952 }
 0x3d0   : > { %v8297_v33 = vmul.f32 -1.442695, %v12463_v4  ;;  %v3858_v52 = vadd.f32 %v3742_v32, %v12158_v5  ;;  %v9955_v34 = vpop.eup %9954  ;;  %v4065_v12 = vadd.f32 1.0, %v9953_v26  ;;  %v600_v5 = vld [vmem:[%s15581_s20 + $0xd0] sm:$0xff] }
 0x3d1   : > { %9595 = vmatmul.mubr.msk.bf16.gmra.mxu1 %vm4248_vm3, %v4222_v22  ;;  %v9531_v1 = vpop.f32.mrf.mxu0  ;;  %v12488_v27 = vmul.f32 %v9955_v34, %v12336_v16  ;;  %4964 = vperm.xlu1 %9911, %v597_v36   ;;  %v599_v22 = vld [vmem:[%s15581_s20 + $0xc8] sm:$0xff] }
 0x3d2   : > { %9968 = vpow2.f32 %v8297_v33  ;;  %v12477_v6 = vadd.f32 %v12274_v63, %v3858_v52  ;;  %9598 = vmatprep.mubr.msk.bf16.mxu1 %vm10670_vm1, %v15554_v18  ;;  %4979 = vperm.xlu0 %9910, %v600_v5  }
 0x3d3   : > { %v9957_v31 = vpop.eup %9956  ;;  %v3747_v46 = vpop.f32.mrf.mxu0  ;;  %15590 = vst [vmem:[#allocation15_spill] sm:$0xff] %v12488_v27  ;;  %9970 = vrcp.f32 %v4065_v12  ;;  %v601_v12 = vld [vmem:[%s15581_s20 + $0xd8] sm:$0xff] }
 0x3d4   : > { %v9959_v39 = vpop.eup %9958  ;;  %v12491_v30 = vmul.f32 %v9957_v31, %v12347_v9  ;;  %v8298_v58 = vmul.f32 -1.442695, %v12477_v6  ;;  %v3859_v55 = vadd.f32 %v3747_v46, %v12166_v40  ;;  %v602_v40 = vld [vmem:[%s15581_s20 + $0xe0] sm:$0xff] }
 0x3d5   : > { %v4066_v21 = vadd.f32 1.0, %v9959_v39  ;;  %v9534_v54 = vpop.f32.mrf.mxu0  ;;  %4974 = vperm.xlu1 %9911, %v599_v22   ;;  %v603_v22 = vld [vmem:[%s15581_s20 + $0xe8] sm:$0xff] }
 0x3d6   : > { %15591 = vst [vmem:[#allocation16_spill] sm:$0xff] %v12491_v30  ;;  %v4223_v16 = vpack.c.bf16 %v12491_v30, %v12488_v27  ;;  %9972 = vpow2.f32 %v8298_v58  ;;  %v12501_v9 = vadd.f32 %v12274_v63, %v3859_v55  ;;  %4989 = vperm.xlu0 %9910, %v602_v40  }
 0x3d7   : > { %9974 = vrcp.f32 %v4066_v21  ;;  %v3750_v32 = vpop.f32.mrf.mxu0  ;;  %v9961_v38 = vpop.eup %9960 }
 0x3d8   : > { %v8299_v62 = vmul.f32 -1.442695, %v12501_v9  ;;  %v3860_v26 = vadd.f32 %v3750_v32, %v12169_v24  ;;  %v9963_v33 = vpop.eup %9962  ;;  %v4067_v52 = vadd.f32 1.0, %v9961_v38  ;;  %v604_v24 = vld [vmem:[%s15581_s20 + $0xf0] sm:$0xff] }
 0x3d9   : > { %9599 = vmatmul.mubr.msk.bf16.gmra.mxu1 %vm4248_vm3, %v4223_v16  ;;  %v9535_v34 = vpop.f32.mrf.mxu0  ;;  %v12521_v46 = vmul.f32 %v9963_v33, %v12366_v15  ;;  %4984 = vperm.xlu1 %9911, %v601_v12   ;;  %v605_v33 = vld [vmem:[%s15581_s20 + $0xf8] sm:$0xff] }
 0x3da   : > { %9976 = vpow2.f32 %v8299_v62  ;;  %v12513_v1 = vadd.f32 %v12274_v63, %v3860_v26  ;;  %9602 = vmatprep.mubr.msk.bf16.mxu1 %vm10670_vm1, %v15554_v18  ;;  %4999 = vperm.xlu0 %9910, %v604_v24  }
 0x3db   : > { %v9965_v36 = vpop.eup %9964  ;;  %v3755_v5 = vpop.f32.mrf.mxu0  ;;  %15592 = vst [vmem:[#allocation17_spill] sm:$0xff] %v12521_v46  ;;  %9978 = vrcp.f32 %v4067_v52 }
 0x3dc   : > { %v9967_v31 = vpop.eup %9966  ;;  %v12524_v39 = vmul.f32 %v9965_v36, %v12380_v28  ;;  %v8300_v58 = vmul.f32 -1.442695, %v12513_v1  ;;  %v3861_v55 = vadd.f32 %v3755_v5, %v12177_v25  ;;  %v606_v25 = vld [vmem:[%s15581_s20 + $0x100] sm:$0xff] }
 0x3dd   : > { %v4068_v21 = vadd.f32 1.0, %v9967_v31  ;;  %v9538_v54 = vpop.f32.mrf.mxu0  ;;  %4994 = vperm.xlu1 %9911, %v603_v22   ;;  %v607_v22 = vld [vmem:[%s15581_s20 + $0x108] sm:$0xff] }
 0x3de   : > { %15593 = vst [vmem:[#allocation18_spill] sm:$0xff] %v12524_v39  ;;  %v4224_v15 = vpack.c.bf16 %v12524_v39, %v12521_v46  ;;  %9980 = vpow2.f32 %v8300_v58  ;;  %v12534_v28 = vadd.f32 %v12274_v63, %v3861_v55  ;;  %5009 = vperm.xlu0 %9910, %v606_v25  }
 0x3df   : > { %v9969_v16 = vpop.eup %9968  ;;  %9982 = vrcp.f32 %v4068_v21  ;;  %v3758_v40 = vpop.f32.mrf.mxu0 }
 0x3e0   : > { %v4069_v32 = vadd.f32 1.0, %v9969_v16  ;;  %v8301_v38 = vmul.f32 -1.442695, %v12534_v28  ;;  %v3862_v62 = vadd.f32 %v3758_v40, %v12180_v7  ;;  %v9971_v52 = vpop.eup %9970  ;;  %v608_v7 = vld [vmem:[%s15581_s20 + $0x110] sm:$0xff] }
 0x3e1   : > { %9603 = vmatmul.mubr.msk.bf16.gmra.mxu1 %vm4248_vm3, %v4224_v15  ;;  %v9539_v26 = vpop.f32.mrf.mxu0  ;;  %5004 = vperm.xlu1 %9911, %v605_v33   ;;  %v12556_v55 = vmul.f32 %v9971_v52, %v12399_v10 }
 0x3e2   : > { %v12546_v34 = vadd.f32 %v12274_v63, %v3862_v62  ;;  %9606 = vmatprep.mubr.msk.bf16.mxu1 %vm10670_vm1, %v15554_v18  ;;  %9984 = vpow2.f32 %v8301_v38  ;;  %5019 = vperm.xlu0 %9910, %v608_v7   ;;  %v609_v62 = vld [vmem:[%s15581_s20 + $0x118] sm:$0xff] }
 0x3e3   : > { %v9973_v12 = vpop.eup %9972  ;;  %v3763_v24 = vpop.f32.mrf.mxu0  ;;  %9986 = vrcp.f32 %v4069_v32  ;;  %15594 = vst [vmem:[#allocation19_spill] sm:$0xff] %v12556_v55 }
 0x3e4   : > { %v9975_v36 = vpop.eup %9974  ;;  %v4070_v5 = vadd.f32 1.0, %v9973_v12  ;;  %v8302_v31 = vmul.f32 -1.442695, %v12546_v34  ;;  %v3863_v58 = vadd.f32 %v3763_v24, %v12188_v60  ;;  %v610_v60 = vld [vmem:[%s15581_s20 + $0x120] sm:$0xff] }
 0x3e5   : > { %v12559_v21 = vmul.f32 %v9975_v36, %v12413_v61  ;;  %v9542_v54 = vpop.f32.mrf.mxu0  ;;  %5014 = vperm.xlu1 %9911, %v607_v22   ;;  %v611_v22 = vld [vmem:[%s15581_s20 + $0x128] sm:$0xff] }
 0x3e6   : > { %9988 = vrcp.f32 %v4070_v5  ;;  %v12565_v15 = vadd.f32 %v12274_v63, %v3863_v58  ;;  %5029 = vperm.xlu0 %9910, %v610_v60  }
 0x3e7   : > { %15595 = vst [vmem:[#allocation20_spill] sm:$0xff] %v12559_v21  ;;  %v9977_v25 = vpop.eup %9976  ;;  %v4225_v10 = vpack.c.bf16 %v12559_v21, %v12556_v55  ;;  %9990 = vpow2.f32 %v8302_v31  ;;  %v3766_v61 = vpop.f32.mrf.mxu0 }
 0x3e8   : > { %v4071_v16 = vadd.f32 1.0, %v9977_v25  ;;  %v8303_v40 = vmul.f32 -1.442695, %v12565_v15  ;;  %v3864_v32 = vadd.f32 %v3766_v61, %v12191_v42  ;;  %v9979_v26 = vpop.eup %9978  ;;  %v612_v42 = vld [vmem:[%s15581_s20 + $0x130] sm:$0xff] }
 0x3e9   : > { %9607 = vmatmul.mubr.msk.bf16.gmra.mxu1 %vm4248_vm3, %v4225_v10  ;;  %v9543_v38 = vpop.f32.mrf.mxu0  ;;  %5024 = vperm.xlu1 %9911, %v609_v62   ;;  %v12589_v31 = vmul.f32 %v9979_v26, %v12430_v13 }
 0x3ea   : > { %v12579_v33 = vadd.f32 %v12274_v63, %v3864_v32  ;;  %9610 = vmatprep.mubr.msk.bf16.mxu1 %vm10670_vm1, %v15554_v18  ;;  %9992 = vpow2.f32 %v8303_v40  ;;  %5039 = vperm.xlu0 %9910, %v612_v42   ;;  %v613_v38 = vld [vmem:[%s15581_s20 + $0x138] sm:$0xff] }
 0x3eb   : > { %v9981_v52 = vpop.eup %9980  ;;  %v3771_v7 = vpop.f32.mrf.mxu0  ;;  %9994 = vrcp.f32 %v4071_v16  ;;  %15596 = vst [vmem:[#allocation21_spill] sm:$0xff] %v12589_v31 }
 0x3ec   : > { %v9983_v12 = vpop.eup %9982  ;;  %v4072_v24 = vadd.f32 1.0, %v9981_v52  ;;  %v8304_v36 = vmul.f32 -1.442695, %v12579_v33  ;;  %v3865_v5 = vadd.f32 %v3771_v7, %v12199_v44  ;;  %v614_v44 = vld [vmem:[%s15581_s20 + $0x140] sm:$0xff] }
 0x3ed   : > { %v12592_v58 = vmul.f32 %v9983_v12, %v12444_v45  ;;  %v9546_v54 = vpop.f32.mrf.mxu0  ;;  %5034 = vperm.xlu1 %9911, %v611_v22  }
 0x3ee   : > { %9996 = vrcp.f32 %v4072_v24  ;;  %v12598_v60 = vadd.f32 %v12274_v63, %v3865_v5  ;;  %5049 = vperm.xlu0 %9910, %v614_v44  }
 0x3ef   : > { %15597 = vst [vmem:[#allocation22_spill] sm:$0xff] %v12592_v58  ;;  %v4226_v13 = vpack.c.bf16 %v12592_v58, %v12589_v31  ;;  %9998 = vpow2.f32 %v8304_v36  ;;  %v3774_v45 = vpop.f32.mrf.mxu0  ;;  %v9985_v25 = vpop.eup %9984 }
 0x3f0   : > { %v8305_v10 = vmul.f32 -1.442695, %v12598_v60  ;;  %v3866_v61 = vadd.f32 %v3774_v45, %v12202_v53  ;;  %v9987_v16 = vpop.eup %9986  ;;  %v4073_v40 = vadd.f32 1.0, %v9985_v25 }
 0x3f1   : > { %9611 = vmatmul.mubr.msk.bf16.gmra.mxu1 %vm4248_vm3, %v4226_v13  ;;  %v9547_v32 = vpop.f32.mrf.mxu0  ;;  %v12617_v52 = vmul.f32 %v9987_v16, %v12463_v4  ;;  %5044 = vperm.xlu1 %9911, %v613_v38  }
 0x3f2   : > { %10000 = vpow2.f32 %v8305_v10  ;;  %v12612_v62 = vadd.f32 %v12274_v63, %v3866_v61  ;;  %9614 = vmatprep.mubr.msk.bf16.mxu1 %vm10670_vm1, %v15554_v18 }
 0x3f3   : > { %v9989_v26 = vpop.eup %9988  ;;  %v3779_v53 = vpop.f32.mrf.mxu0  ;;  %15598 = vst [vmem:[#allocation23_spill] sm:$0xff] %v12617_v52  ;;  %10002 = vrcp.f32 %v4073_v40 }
 0x3f4   : > { %v9991_v42 = vpop.eup %9990  ;;  %v12620_v7 = vmul.f32 %v9989_v26, %v12477_v6  ;;  %v8306_v12 = vmul.f32 -1.442695, %v12612_v62  ;;  %v3867_v24 = vadd.f32 %v3779_v53, %v12210_v2 }
 0x3f5   : > { %v4074_v36 = vadd.f32 1.0, %v9991_v42  ;;  %v9550_v5 = vpop.f32.mrf.mxu0 }
 0x3f6   : > { %15599 = vst [vmem:[#allocation24_spill] sm:$0xff] %v12620_v7  ;;  %v4227_v54 = vpack.c.bf16 %v12620_v7, %v12617_v52  ;;  %10004 = vpow2.f32 %v8306_v12  ;;  %v12627_v22 = vadd.f32 %v12274_v63, %v3867_v24 }
 0x3f7   : > { %10006 = vrcp.f32 %v4074_v36  ;;  %v3782_v4 = vpop.f32.mrf.mxu0  ;;  %v9993_v44 = vpop.eup %9992 }
 0x3f8   : > { %v8307_v6 = vmul.f32 -1.442695, %v12627_v22  ;;  %v3868_v13 = vadd.f32 %v3782_v4, %v12213_v49  ;;  %v9995_v45 = vpop.eup %9994  ;;  %v4075_v2 = vadd.f32 1.0, %v9993_v44 }
 0x3f9   : > { %9615 = vmatmul.mubr.msk.bf16.gmra.mxu1 %vm4248_vm3, %v4227_v54  ;;  %v9551_v25 = vpop.f32.mrf.mxu0  ;;  %v12638_v32 = vmul.f32 %v9995_v45, %v12501_v9 }
 0x3fa   : > { %10008 = vpow2.f32 %v8307_v6  ;;  %v12633_v10 = vadd.f32 %v12274_v63, %v3868_v13  ;;  %9618 = vmatprep.mubr.msk.bf16.mxu1 %vm10670_vm1, %v15554_v18 }
 0x3fb   : > { %v9997_v61 = vpop.eup %9996  ;;  %v3787_v16 = vpop.f32.mrf.mxu0  ;;  %15600 = vst [vmem:[#allocation25_spill] sm:$0xff] %v12638_v32  ;;  %10010 = vrcp.f32 %v4075_v2 }
 0x3fc   : > { %v9999_v40 = vpop.eup %9998  ;;  %v12641_v49 = vmul.f32 %v9997_v61, %v12513_v1  ;;  %v8308_v38 = vmul.f32 -1.442695, %v12633_v10  ;;  %v3869_v26 = vadd.f32 %v3787_v16, %v12221_v11 }
 0x3fd   : > { %v4076_v53 = vadd.f32 1.0, %v9999_v40  ;;  %v9554_v42 = vpop.f32.mrf.mxu0 }
 0x3fe   : > { %15601 = vst [vmem:[#allocation26_spill] sm:$0xff] %v12641_v49  ;;  %v4228_v12 = vpack.c.bf16 %v12641_v49, %v12638_v32  ;;  %10012 = vpow2.f32 %v8308_v38  ;;  %v12648_v24 = vadd.f32 %v12274_v63, %v3869_v26 }
 0x3ff   : > { %v10001_v36 = vpop.eup %10000  ;;  %10014 = vrcp.f32 %v4076_v53  ;;  %v3790_v9 = vpop.f32.mrf.mxu0 }
 0x400   : > { %v4077_v5 = vadd.f32 1.0, %v10001_v36  ;;  %v8309_v1 = vmul.f32 -1.442695, %v12648_v24  ;;  %v3870_v54 = vadd.f32 %v3790_v9, %v12224_v20  ;;  %v10003_v4 = vpop.eup %10002 }
 0x401   : > { %9619 = vmatmul.mubr.msk.bf16.gmra.mxu1 %vm4248_vm3, %v4228_v12  ;;  %v9555_v11 = vpop.f32.mrf.mxu0  ;;  %v12661_v61 = vmul.f32 %v10003_v4, %v12534_v28 }
 0x402   : > { %v12654_v44 = vadd.f32 %v12274_v63, %v3870_v54  ;;  %9622 = vmatprep.mubr.msk.bf16.mxu1 %vm10670_vm1, %v15554_v18  ;;  %10016 = vpow2.f32 %v8309_v1 }
 0x403   : > { %v10005_v6 = vpop.eup %10004  ;;  %v3795_v13 = vpop.f32.mrf.mxu0  ;;  %10018 = vrcp.f32 %v4077_v5  ;;  %15602 = vst [vmem:[#allocation27_spill] sm:$0xff] %v12661_v61 }
 0x404   : > { %v10007_v45 = vpop.eup %10006  ;;  %v4078_v2 = vadd.f32 1.0, %v10005_v6  ;;  %v8310_v25 = vmul.f32 -1.442695, %v12654_v44  ;;  %v3871_v20 = vadd.f32 %v3795_v13, %v12232_v29 }
 0x405   : > { %v12664_v16 = vmul.f32 %v10007_v45, %v12546_v34  ;;  %v9558_v40 = vpop.f32.mrf.mxu0 }
 0x406   : > { %10020 = vrcp.f32 %v4078_v2  ;;  %v12667_v38 = vadd.f32 %v12274_v63, %v3871_v20 }
 0x407   : > { %15603 = vst [vmem:[#allocation28_spill] sm:$0xff] %v12664_v16  ;;  %v10009_v26 = vpop.eup %10008  ;;  %v4229_v53 = vpack.c.bf16 %v12664_v16, %v12661_v61  ;;  %10022 = vpow2.f32 %v8310_v25  ;;  %v3798_v42 = vpop.f32.mrf.mxu0 }
 0x408   : > { %v4079_v12 = vadd.f32 1.0, %v10009_v26  ;;  %v8311_v29 = vmul.f32 -1.442695, %v12667_v38  ;;  %v3872_v28 = vadd.f32 %v3798_v42, %v12235_v47  ;;  %v10011_v36 = vpop.eup %10010 }
 0x409   : > { %9623 = vmatmul.mubr.msk.bf16.gmra.mxu1 %vm4248_vm3, %v4229_v53  ;;  %v9559_v34 = vpop.f32.mrf.mxu0  ;;  %v12682_v6 = vmul.f32 %v10011_v36, %v12565_v15 }
 0x40a   : > { %10024 = vrcp.f32 %v4079_v12  ;;  %v12675_v9 = vadd.f32 %v12274_v63, %v3872_v28  ;;  %9626 = vmatprep.mubr.msk.bf16.mxu1 %vm10670_vm1, %v15554_v18 }
 0x40b   : > { %v10013_v5 = vpop.eup %10012  ;;  %10026 = vpow2.f32 %v8311_v29  ;;  %v3803_v1 = vpop.f32.mrf.mxu0  ;;  %15604 = vst [vmem:[#allocation29_spill] sm:$0xff] %v12682_v6 }
 0x40c   : > { %v10015_v54 = vpop.eup %10014  ;;  %v4080_v11 = vadd.f32 1.0, %v10013_v5  ;;  %v8312_v4 = vmul.f32 -1.442695, %v12675_v9  ;;  %v3873_v47 = vadd.f32 %v3803_v1, %v12242_v48 }
 0x40d   : > { %v12685_v13 = vmul.f32 %v10015_v54, %v12579_v33  ;;  %v9562_v45 = vpop.f32.mrf.mxu0 }
 0x40e   : > { %10028 = vrcp.f32 %v4080_v11  ;;  %v12688_v2 = vadd.f32 %v12274_v63, %v3873_v47 }
 0x40f   : > { %15605 = vst [vmem:[#allocation30_spill] sm:$0xff] %v12685_v13  ;;  %v4230_v25 = vpack.c.bf16 %v12685_v13, %v12682_v6  ;;  %10030 = vpow2.f32 %v8312_v4  ;;  %v3806_v20 = vpop.f32.mrf.mxu0  ;;  %v10017_v40 = vpop.eup %10016 }
 0x410   : > { %v8313_v26 = vmul.f32 -1.442695, %v12688_v2  ;;  %v3874_v48 = vadd.f32 %v3806_v20, %v12245_v59  ;;  %v10019_v15 = vpop.eup %10018  ;;  %v4081_v53 = vadd.f32 1.0, %v10017_v40 }
 0x411   : > { %9627 = vmatmul.mubr.msk.bf16.gmra.mxu1 %vm4248_vm3, %v4230_v25  ;;  %v9563_v33 = vpop.f32.mrf.mxu0  ;;  %v12701_v34 = vmul.f32 %v10019_v15, %v12598_v60 }
 0x412   : > { %10032 = vpow2.f32 %v8313_v26  ;;  %v12696_v42 = vadd.f32 %v12274_v63, %v3874_v48  ;;  %9630 = vmatprep.mubr.msk.bf16.mxu1 %vm10670_vm1, %v15554_v18 }
 0x413   : > { %v10021_v12 = vpop.eup %10020  ;;  %v3811_v29 = vpop.f32.mrf.mxu0  ;;  %15606 = vst [vmem:[#allocation31_spill] sm:$0xff] %v12701_v34  ;;  %10034 = vrcp.f32 %v4081_v53 }
 0x414   : > { %v10023_v28 = vpop.eup %10022  ;;  %v12704_v59 = vmul.f32 %v10021_v12, %v12612_v62  ;;  %v8314_v36 = vmul.f32 -1.442695, %v12696_v42  ;;  %v3875_v5 = vadd.f32 %v3811_v29, %v12251_v57 }
 0x415   : > { %v4082_v1 = vadd.f32 1.0, %v10023_v28  ;;  %v9566_v54 = vpop.f32.mrf.mxu0 }
 0x416   : > { %15607 = vst [vmem:[#allocation32_spill] sm:$0xff] %v12704_v59  ;;  %v4231_v11 = vpack.c.bf16 %v12704_v59, %v12701_v34  ;;  %10036 = vpow2.f32 %v8314_v36  ;;  %v12711_v4 = vadd.f32 %v12274_v63, %v3875_v5 }
 0x417   : > { %v10025_v47 = vpop.eup %10024  ;;  %10038 = vrcp.f32 %v4082_v1  ;;  %v3814_v60 = vpop.f32.mrf.mxu0 }
 0x418   : > { %v10027_v45 = vpop.eup %10026  ;;  %v8315_v62 = vmul.f32 -1.442695, %v12711_v4  ;;  %v3876_v25 = vadd.f32 %v3814_v60, %v12254_v19  ;;  %v12722_v48 = vmul.f32 %v10025_v47, %v12627_v22  ;;  %v10576_v22 = vld [vmem:[%s15580_s3] ss:$0 sm:$0xff]  ;;  %s10613_s3 = scalar_lea.vmem %s10612_s0, 32 }
 0x419   : > { %v4083_v20 = vadd.f32 1.0, %v10027_v45  ;;  %9631 = vmatmul.mubr.msk.bf16.gmra.mxu1 %vm4248_vm3, %v4231_v11  ;;  %v9567_v57 = vpop.f32.mrf.mxu0 }
 0x41a   : > { %10040 = vpow2.f32 %v8315_v62  ;;  %v12717_v40 = vadd.f32 %v12274_v63, %v3876_v25  ;;  %9634 = vmatprep.mubr.msk.bf16.mxu1 %vm10670_vm1, %v15554_v18  ;;  %15608 = vst [vmem:[#allocation33_spill] sm:$0xff] %v12722_v48 }
 0x41b   : > { %v10029_v26 = vpop.eup %10028  ;;  %v3819_v15 = vpop.f32.mrf.mxu0  ;;  %10042 = vrcp.f32 %v4083_v20 }
 0x41c   : > { %v10031_v53 = vpop.eup %10030  ;;  %v12725_v33 = vmul.f32 %v10029_v26, %v12633_v10  ;;  %v8316_v19 = vmul.f32 -1.442695, %v12717_v40  ;;  %v3877_v12 = vadd.f32 %v3819_v15, %v12257_v50 }
 0x41d   : > { %v4084_v63 = vadd.f32 1.0, %v10031_v53  ;;  %v9570_v29 = vpop.f32.mrf.mxu0 }
 0x41e   : > { %15609 = vst [vmem:[#allocation34_spill] sm:$0xff] %v12725_v33  ;;  %v4232_v50 = vpack.c.bf16 %v12725_v33, %v12722_v48  ;;  %10044 = vpow2.f32 %v8316_v19  ;;  %v12828_v10 = vadd.f32 %v10576_v22, %v3877_v12 }
 0x41f   : > { %v10033_v28 = vpop.eup %10032  ;;  %10046 = vrcp.f32 %v4084_v63  ;;  %v3822_v36 = vpop.f32.mrf.mxu0 }
 0x420   : > { %v4085_v5 = vadd.f32 1.0, %v10033_v28  ;;  %v8317_v1 = vmul.f32 -1.442695, %v12828_v10  ;;  %v3878_v54 = vadd.f32 %v3822_v36, %v12260_v0  ;;  %v10035_v47 = vpop.eup %10034 }
 0x421   : > { %9635 = vmatmul.mubr.msk.bf16.gmra.mxu1 %vm4248_vm3, %v4232_v50  ;;  %v9571_v11 = vpop.f32.mrf.mxu0  ;;  %v12840_v0 = vmul.f32 %v10035_v47, %v12648_v24 }
 0x422   : > { %v12833_v60 = vadd.f32 %v10576_v22, %v3878_v54  ;;  %9638 = vmatprep.mubr.msk.bf16.mxu1 %vm10670_vm1, %v15554_v18  ;;  %10048 = vpow2.f32 %v8317_v1 }
 0x423   : > { %v10037_v45 = vpop.eup %10036  ;;  %v3827_v62 = vpop.f32.mrf.mxu0  ;;  %10050 = vrcp.f32 %v4085_v5  ;;  %15610 = vst [vmem:[#allocation35_spill] sm:$0xff] %v12840_v0 }
 0x424   : > { %v10039_v25 = vpop.eup %10038  ;;  %v4086_v20 = vadd.f32 1.0, %v10037_v45  ;;  %v8318_v57 = vmul.f32 -1.442695, %v12833_v60  ;;  %v3879_v26 = vadd.f32 %v3827_v62, %v12263_v8 }
 0x425   : > { %v12843_v15 = vmul.f32 %v10039_v25, %v12654_v44  ;;  %v9574_v53 = vpop.f32.mrf.mxu0 }
 0x426   : > { %10052 = vrcp.f32 %v4086_v20  ;;  %v12845_v19 = vadd.f32 %v10576_v22, %v3879_v26 }
 0x427   : > { %15611 = vst [vmem:[#allocation36_spill] sm:$0xff] %v12843_v15  ;;  %v10041_v12 = vpop.eup %10040  ;;  %v4233_v63 = vpack.c.bf16 %v12843_v15, %v12840_v0  ;;  %10054 = vpow2.f32 %v8318_v57  ;;  %v3830_v29 = vpop.f32.mrf.mxu0  ;;  %v5390_v0 = vld [vmem:[#allocation2 + $0x7] sm:$0xff] }
 0x428   : > { %v4087_v50 = vadd.f32 1.0, %v10041_v12  ;;  %v8319_v28 = vmul.f32 -1.442695, %v12845_v19  ;;  %v3880_v8 = vadd.f32 %v3830_v29, %v12266_v3  ;;  %v10043_v44 = vpop.eup %10042 }
 0x429   : > { %9639 = vmatmul.mubr.msk.bf16.gmra.mxu1 %vm4248_vm3, %v4233_v63  ;;  %v9575_v24 = vpop.f32.mrf.mxu0  ;;  %v12856_v62 = vmul.f32 %v10043_v44, %v12667_v38 }
 0x42a   : > { %v3928_v36 = vadd.f32 %v10576_v22, %v3880_v8  ;;  %9642 = vmatprep.mubr.msk.bf16.mxu1 %vm10670_vm1, %v15554_v18  ;;  %10056 = vpow2.f32 %v8319_v28 }
 0x42b   : > { %v10045_v5 = vpop.eup %10044  ;;  %v3835_v1 = vpop.f32.mrf.mxu0  ;;  %10058 = vrcp.f32 %v4087_v50  ;;  %15612 = vst [vmem:[#allocation37_spill] sm:$0xff] %v12856_v62 }
 0x42c   : > { %v10047_v54 = vpop.eup %10046  ;;  %v4088_v11 = vadd.f32 1.0, %v10045_v5  ;;  %v8320_v47 = vmul.f32 -1.442695, %v3928_v36  ;;  %v3881_v45 = vadd.f32 %v3835_v1, %v12269_v23 }
 0x42d   : > { %v12859_v3 = vmul.f32 %v10047_v54, %v12675_v9  ;;  %v9578_v25 = vpop.f32.mrf.mxu0 }
 0x42e   : > { %10060 = vrcp.f32 %v4088_v11  ;;  %v3929_v20 = vadd.f32 %v10576_v22, %v3881_v45 }
 0x42f   : > { %15613 = vst [vmem:[#allocation38_spill] sm:$0xff] %v12859_v3  ;;  %v4234_v57 = vpack.c.bf16 %v12859_v3, %v12856_v62  ;;  %10062 = vpow2.f32 %v8320_v47  ;;  %v3838_v26 = vpop.f32.mrf.mxu0  ;;  %v10049_v53 = vpop.eup %10048 }
 0x430   : > { %v8321_v12 = vmul.f32 -1.442695, %v3929_v20  ;;  %v10051_v63 = vpop.eup %10050  ;;  %v4089_v29 = vadd.f32 1.0, %v10049_v53 }
 0x431   : > { %9643 = vmatmul.mubr.msk.bf16.gmra.mxu1 %vm4248_vm3, %v4234_v57  ;;  %v9579_v23 = vpop.f32.mrf.mxu0  ;;  %v12867_v22 = vmul.f32 %v10051_v63, %v12688_v2 }
 0x432   : > { %10064 = vpow2.f32 %v8321_v12  ;;  %9646 = vmatprep.mubr.msk.bf16.mxu1 %vm10670_vm1, %v15554_v18 }
 0x433   : > { %v10053_v38 = vpop.eup %10052  ;;  %15614 = vst [vmem:[#allocation39_spill] sm:$0xff] %v12867_v22  ;;  %10066 = vrcp.f32 %v4089_v29 }
 0x434   : > { %v10055_v9 = vpop.eup %10054  ;;  %v12870_v50 = vmul.f32 %v10053_v38, %v12696_v42 }
 0x435   : > { %v4090_v28 = vadd.f32 1.0, %v10055_v9 }
 0x436   : > { %15615 = vst [vmem:[#allocation40_spill] sm:$0xff] %v12870_v50  ;;  %v4235_v8 = vpack.c.bf16 %v12870_v50, %v12867_v22 }
 0x437   : > { %10068 = vrcp.f32 %v4090_v28  ;;  %v10057_v24 = vpop.eup %10056 }
 0x438   : > { %v10059_v44 = vpop.eup %10058  ;;  %v4091_v5 = vadd.f32 1.0, %v10057_v24 }
 0x439   : > { %9647 = vmatmul.mubr.msk.bf16.gmra.mxu1 %vm4248_vm3, %v4235_v8  ;;  %v12878_v54 = vmul.f32 %v10059_v44, %v12711_v4 }
 0x43a   : > { %9650 = vmatprep.mubr.msk.bf16.mxu1 %vm10670_vm1, %v15554_v18  ;;  %10070 = vrcp.f32 %v4091_v5 }
 0x43b   : > { %v10061_v1 = vpop.eup %10060  ;;  %15616 = vst [vmem:[#allocation41_spill] sm:$0xff] %v12878_v54 }
 0x43c   : > { %v10063_v2 = vpop.eup %10062  ;;  %v12881_v42 = vmul.f32 %v10061_v1, %v12717_v40 }
 0x43d   : > { %v4092_v11 = vadd.f32 1.0, %v10063_v2 }
 0x43e   : > { %15617 = vst [vmem:[#allocation42_spill] sm:$0xff] %v12881_v42  ;;  %v4236_v47 = vpack.c.bf16 %v12881_v42, %v12878_v54 }
 0x43f   : > { %v10065_v45 = vpop.eup %10064  ;;  %10072 = vrcp.f32 %v4092_v11 }
 0x440   : > { %v4093_v25 = vadd.f32 1.0, %v10065_v45  ;;  %v10067_v57 = vpop.eup %10066 }
 0x441   : > { %9651 = vmatmul.mubr.msk.bf16.gmra.mxu1 %vm4248_vm3, %v4236_v47  ;;  %v12889_v26 = vmul.f32 %v10067_v57, %v12828_v10 }
 0x442   : > { %9654 = vmatprep.mubr.msk.bf16.mxu1 %vm10670_vm1, %v15554_v18  ;;  %10074 = vrcp.f32 %v4093_v25 }
 0x443   : > { %15618 = vst [vmem:[#allocation43_spill] sm:$0xff] %v12889_v26 }
 0x444   : > { %v10069_v4 = vpop.eup %10068 }
 0x445   : > { %v12892_v40 = vmul.f32 %v10069_v4, %v12833_v60 }
 0x447   : > { %15619 = vst [vmem:[#allocation44_spill] sm:$0xff] %v12892_v40  ;;  %v4237_v53 = vpack.c.bf16 %v12892_v40, %v12889_v26  ;;  %v10071_v12 = vpop.eup %10070 }
 0x448   : > { %v12900_v29 = vmul.f32 %v10071_v12, %v12845_v19  ;;  %v12919_v19 = vld [vmem:[%s15623_s5] ss:$0 sm:$0xff] }
 0x449   : > { %9655 = vmatmul.mubr.msk.bf16.gmra.mxu1 %vm4248_vm3, %v4237_v53 }
 0x44a   : > { %9658 = vmatprep.mubr.msk.bf16.mxu1 %vm10670_vm1, %v15554_v18  ;;  %15620 = vst [vmem:[#allocation45_spill] sm:$0xff] %v12900_v29 }
 0x44c   : > { %v10073_v63 = vpop.eup %10072 }
 0x44d   : > { %v12902_v23 = vmul.f32 %v10073_v63, %v3928_v36 }
 0x44f   : > { %15621 = vst [vmem:[#allocation46_spill] sm:$0xff] %v12902_v23  ;;  %v4238_v10 = vpack.c.bf16 %v12902_v23, %v12900_v29  ;;  %v10075_v60 = vpop.eup %10074 }
 0x450   : > { %v12909_v38 = vmul.f32 %v10075_v60, %v3929_v20 }
 0x451   : > { %9659 = vmatmul.mubr.msk.bf16.gmra.mxu1 %vm4248_vm3, %v4238_v10 }
 0x452   : > { %9662 = vmatprep.mubr.msk.bf16.mxu1 %vm10670_vm1, %v15554_v18  ;;  %15622 = vst [vmem:[#allocation47_spill] sm:$0xff] %v12909_v38  ;;  %v4239_v9 = vpack.c.bf16 %v12909_v38, %v12909_v38 }
 0x459   : > { %9663 = vmatmul.mubr.msk.bf16.gmra.mxu1 %vm4248_vm3, %v4239_v9 }
 0x45a   : > { %9679 = vmatprep.mubr.msk.f32.mxu1 %vm10670_vm1, %v15554_v18 }
 0x478   : > { %v4346_v36 = vpop.f32.mrf.mxu1 }
 0x479   : > { %v4347_v28 = vadd.f32 %v12919_v19, %v4346_v36 }
 0x47a   : > { %v9584_v8 = vpop.f32.mrf.mxu1 }
 0x47b   : > { %v8344_v24 = vmul.f32 -1.442695, %v4347_v28 }
 0x47c   : > { %v4349_v20 = vpop.f32.mrf.mxu1 }
 0x47d   : > { %10076 = vpow2.f32 %v8344_v24  ;;  %v4350_v44 = vadd.f32 %v12919_v19, %v4349_v20 }
 0x47e   : > { %v9585_v5 = vpop.f32.mrf.mxu1 }
 0x47f   : > { %v8345_v1 = vmul.f32 -1.442695, %v4350_v44 }
 0x480   : > { %v4354_v2 = vpop.f32.mrf.mxu1 }
 0x481   : > { %10078 = vpow2.f32 %v8345_v1  ;;  %v12924_v11 = vadd.f32 %v12919_v19, %v4354_v2 }
 0x482   : > { %v9588_v47 = vpop.f32.mrf.mxu1 }
 0x483   : > { %v8346_v45 = vmul.f32 -1.442695, %v12924_v11 }
 0x484   : > { %v4357_v25 = vpop.f32.mrf.mxu1 }
 0x485   : > { %10080 = vpow2.f32 %v8346_v45  ;;  %v12928_v57 = vadd.f32 %v12919_v19, %v4357_v25 }
 0x486   : > { %v9589_v4 = vpop.f32.mrf.mxu1 }
 0x487   : > { %v8347_v53 = vmul.f32 -1.442695, %v12928_v57 }
 0x489   : > { %10082 = vpow2.f32 %v8347_v53  ;;  %v4362_v12 = vpop.f32.mrf.mxu1 }
 0x48a   : > { %v10077_v63 = vpop.eup %10076  ;;  %v12932_v10 = vadd.f32 %v12919_v19, %v4362_v12 }
 0x48b   : > { %v4635_v60 = vadd.f32 1.0, %v10077_v63  ;;  %v9592_v9 = vpop.f32.mrf.mxu1 }
 0x48c   : > { %v8348_v36 = vmul.f32 -1.442695, %v12932_v10 }
 0x48d   : > { %10084 = vrcp.f32 %v4635_v60  ;;  %v4365_v8 = vpop.f32.mrf.mxu1 }
 0x48e   : > { %v10079_v24 = vpop.eup %10078  ;;  %10086 = vpow2.f32 %v8348_v36  ;;  %v12936_v20 = vadd.f32 %v12919_v19, %v4365_v8 }
 0x48f   : > { %v4636_v5 = vadd.f32 1.0, %v10079_v24  ;;  %v9593_v1 = vpop.f32.mrf.mxu1 }
 0x490   : > { %v8349_v2 = vmul.f32 -1.442695, %v12936_v20 }
 0x491   : > { %10088 = vrcp.f32 %v4636_v5  ;;  %v4370_v47 = vpop.f32.mrf.mxu1 }
 0x492   : > { %v10081_v45 = vpop.eup %10080  ;;  %10090 = vpow2.f32 %v8349_v2  ;;  %v12940_v25 = vadd.f32 %v12919_v19, %v4370_v47  ;;  %v12949_v2 = vpop.permute.xlu0 %4849 }
 0x493   : > { %v4637_v4 = vadd.f32 1.0, %v10081_v45  ;;  %v9596_v53 = vpop.f32.mrf.mxu1  ;;  %15624 = vst [vmem:[#allocation48_spill] sm:$0xff] %v12949_v2 }
 0x494   : > { %v8350_v12 = vmul.f32 -1.442695, %v12940_v25 }
 0x495   : > { %10092 = vrcp.f32 %v4637_v4  ;;  %v4373_v63 = vpop.f32.mrf.mxu1 }
 0x496   : > { %v10083_v60 = vpop.eup %10082  ;;  %10094 = vpow2.f32 %v8350_v12  ;;  %v12944_v8 = vadd.f32 %v12919_v19, %v4373_v63 }
 0x497   : > { %v4638_v9 = vadd.f32 1.0, %v10083_v60  ;;  %v9597_v36 = vpop.f32.mrf.mxu1 }
 0x498   : > { %v8351_v12 = vmul.f32 -1.442695, %v12944_v8 }
 0x499   : > { %10096 = vrcp.f32 %v4638_v9  ;;  %v4378_v24 = vpop.f32.mrf.mxu1 }
 0x49a   : > { %v10085_v5 = vpop.eup %10084  ;;  %v12947_v1 = vadd.f32 %v12919_v19, %v4378_v24 }
 0x49b   : > { %v10087_v47 = vpop.eup %10086  ;;  %v4758_v45 = vmul.f32 %v10085_v5, %v4347_v28  ;;  %v9600_v53 = vpop.f32.mrf.mxu1 }
 0x49c   : > { %v4639_v4 = vadd.f32 1.0, %v10087_v47  ;;  %v8352_v38 = vmul.f32 -1.442695, %v12947_v1  ;;  %v12959_v47 = vpop.permute.xlu0 %4854 }
 0x49d   : > { %v5052_v60 = vmul.f32 %v12949_v2, %v4758_v45  ;;  %v4381_v9 = vpop.f32.mrf.mxu1  ;;  %15625 = vst [vmem:[#allocation49_spill] sm:$0xff] %v12959_v47 }
 0x49e   : > { %v10089_v63 = vpop.eup %10088  ;;  %10098 = vrcp.f32 %v4639_v4  ;;  %v12955_v36 = vadd.f32 %v12919_v19, %v4381_v9  ;;  %v12965_v9 = vpop.permute.xlu1 %4859 }
 0x49f   : > { %v10091_v24 = vpop.eup %10090  ;;  %v4759_v23 = vmul.f32 %v10089_v63, %v4350_v44  ;;  %5093 = vst.msk [vmem:[#allocation2 + $0x18] sm:$0xff] %vm4799_vm4, %v5052_v60  ;;  %v9601_v29 = vpop.f32.mrf.mxu1  ;;  %10100 = vpow2.f32 %v8352_v38  ;;  %15626 = vst [vmem:[#allocation50_spill] sm:$0xff] %v12965_v9 }
 0x4a0   : > { %v4640_v28 = vadd.f32 1.0, %v10091_v24  ;;  %v8353_v5 = vmul.f32 -1.442695, %v12955_v36  ;;  %10102 = vpow2.f32 %v8351_v12 }
 0x4a1   : > { %v5053_v45 = vmul.f32 %v12959_v47, %v4759_v23  ;;  %v4386_v53 = vpop.f32.mrf.mxu1 }
 0x4a2   : > { %v10093_v40 = vpop.eup %10092  ;;  %10104 = vrcp.f32 %v4640_v28  ;;  %v12963_v4 = vadd.f32 %v12919_v19, %v4386_v53 }
 0x4a3   : > { %v10095_v44 = vpop.eup %10094  ;;  %v4760_v29 = vmul.f32 %v10093_v40, %v12924_v11  ;;  %10106 = vpow2.f32 %v8353_v5  ;;  %5094 = vst.msk [vmem:[#allocation2 + $0x20] sm:$0xff] %vm4799_vm4, %v5053_v45  ;;  %v9604_v38 = vpop.f32.mrf.mxu1 }
 0x4a4   : > { %v4641_v60 = vadd.f32 1.0, %v10095_v44  ;;  %v8354_v12 = vmul.f32 -1.442695, %v12963_v4  ;;  %v12976_v11 = vpop.permute.xlu1 %4864 }
 0x4a5   : > { %v5054_v23 = vmul.f32 %v12965_v9, %v4760_v29  ;;  %v4389_v63 = vpop.f32.mrf.mxu1  ;;  %15627 = vst [vmem:[#allocation51_spill] sm:$0xff] %v12976_v11 }
 0x4a6   : > { %v10097_v24 = vpop.eup %10096  ;;  %10108 = vrcp.f32 %v4641_v60  ;;  %v12972_v28 = vadd.f32 %v12919_v19, %v4389_v63 }
 0x4a7   : > { %v4761_v53 = vmul.f32 %v10097_v24, %v12928_v57  ;;  %5095 = vst.msk [vmem:[#allocation2 + $0x28] sm:$0xff] %vm4799_vm4, %v5054_v23  ;;  %v9605_v40 = vpop.f32.mrf.mxu1  ;;  %10110 = vpow2.f32 %v8354_v12  ;;  %v12985_v23 = vpop.permute.xlu0 %4869 }
 0x4a8   : > { %v8355_v5 = vmul.f32 -1.442695, %v12972_v28  ;;  %15628 = vst [vmem:[#allocation52_spill] sm:$0xff] %v12985_v23 }
 0x4a9   : > { %v5055_v45 = vmul.f32 %v12976_v11, %v4761_v53  ;;  %v4394_v44 = vpop.f32.mrf.mxu1 }
 0x4aa   : > { %v12981_v29 = vadd.f32 %v12919_v19, %v4394_v44  ;;  %10112 = vpow2.f32 %v8355_v5  ;;  %v13030_v48 = vld [vmem:[#allocation2 + $0x1f] sm:$0xff] }
 0x4ab   : > { %v10099_v38 = vpop.eup %10098  ;;  %5096 = vst.msk [vmem:[#allocation2 + $0x30] sm:$0xff] %vm4799_vm4, %v5055_v45  ;;  %v9608_v60 = vpop.f32.mrf.mxu1  ;;  %v5608_v32 = vld [vmem:[#allocation2 + $0x20] sm:$0xff] }
 0x4ac   : > { %v4762_v57 = vmul.f32 %v10099_v38, %v12932_v10  ;;  %v10101_v63 = vpop.eup %10100  ;;  %v8356_v53 = vmul.f32 -1.442695, %v12981_v29  ;;  %v12993_v38 = vpop.permute.xlu1 %4874  ;;  %v5137_v31 = vld [vmem:[#allocation2 + $0x1d] sm:$0xff] }
 0x4ad   : > { %v12987_v12 = vpop.f32.mrf.mxu1  ;;  %v10103_v24 = vpop.eup %10102  ;;  %v4643_v45 = vadd.f32 1.0, %v10101_v63  ;;  %15629 = vst [vmem:[#allocation53_spill] sm:$0xff] %v12993_v38  ;;  %v5735_v39 = vld [vmem:[#allocation2 + $0x19] sm:$0xff] }
 0x4ae   : > { %v5056_v40 = vmul.f32 %v12985_v23, %v4762_v57  ;;  %v4642_v10 = vadd.f32 1.0, %v10103_v24  ;;  %10114 = vpow2.f32 %v8356_v53  ;;  %v13002_v24 = vpop.permute.xlu0 %4879  ;;  %v13113_v30 = vld [vmem:[#allocation2 + $0x27] sm:$0xff] }
 0x4af   : > { %v10105_v26 = vpop.eup %10104  ;;  %v9609_v44 = vpop.f32.mrf.mxu1  ;;  %10116 = vrcp.f32 %v4643_v45  ;;  %15630 = vst [vmem:[#allocation54_spill] sm:$0xff] %v13002_v24  ;;  %v5134_v45 = vld [vmem:[#allocation2 + $0x5] sm:$0xff] }
 0x4b0   : > { %v10107_v42 = vpop.eup %10106  ;;  %v4763_v54 = vmul.f32 %v10105_v26, %v12936_v20  ;;  %5097 = vst.msk [vmem:[#allocation2 + $0x38] sm:$0xff] %vm4799_vm4, %v5056_v40  ;;  %10118 = vrcp.f32 %v4642_v10  ;;  %v5135_v40 = vld [vmem:[#allocation2 + $0xd] sm:$0xff] }
 0x4b1   : > { %v12995_v60 = vpop.f32.mrf.mxu1  ;;  %v4644_v5 = vadd.f32 1.0, %v10107_v42  ;;  %v5263_v42 = vld [vmem:[#allocation2 + $0xe] sm:$0xff]  ;;  %v5262_v10 = vld [vmem:[#allocation2 + $0x6] sm:$0xff] }
 0x4b2   : > { %v5057_v50 = vmul.f32 %v12993_v38, %v4763_v54  ;;  %v5609_v14 = vld [vmem:[#allocation2 + $0x28] sm:$0xff] }
 0x4b3   : > { %v10109_v57 = vpop.eup %10108  ;;  %v9612_v22 = vpop.f32.mrf.mxu1  ;;  %10120 = vrcp.f32 %v4644_v5 }
 0x4b4   : > { %v4764_v3 = vmul.f32 %v10109_v57, %v12940_v25  ;;  %5098 = vst.msk [vmem:[#allocation2 + $0x40] sm:$0xff] %vm4799_vm4, %v5057_v50  ;;  %v10111_v26 = vpop.eup %10110  ;;  %v13008_v22 = vld [vmem:[%s15631_s6] ss:$0 sm:$0xff]  ;;  %v13013_v50 = vld [vmem:[%s15631_s6 + $0x1] ss:$0 sm:$0xff]  ;;  %v5391_v57 = vld [vmem:[#allocation2 + $0xf] sm:$0xff] }
 0x4b5   : > { %v13000_v20 = vpop.f32.mrf.mxu1  ;;  %v4645_v63 = vadd.f32 1.0, %v10111_v26  ;;  %v5309_v5 = vmul.f32 %v13013_v50, %v5263_v42  ;;  %v5308_v62 = vmul.f32 %v13013_v50, %v5262_v10 }
 0x4b6   : > { %v5058_v53 = vmul.f32 %v13002_v24, %v4764_v3  ;;  %v5181_v3 = vmul.f32 %v13008_v22, %v5135_v40 }
 0x4b7   : > { %v9613_v54 = vpop.f32.mrf.mxu1  ;;  %10122 = vrcp.f32 %v4645_v63  ;;  %v10113_v44 = vpop.eup %10112  ;;  %v5953_v35 = vld [vmem:[#allocation2 + $0x32] sm:$0xff] }
 0x4b8   : > { %5099 = vst.msk [vmem:[#allocation2 + $0x48] sm:$0xff] %vm4799_vm4, %v5058_v53  ;;  %v4646_v26 = vadd.f32 1.0, %v10113_v44  ;;  %v5180_v54 = vmul.f32 %v13008_v22, %v5134_v45  ;;  %v13025_v53 = vld [vmem:[%s15631_s6 + $0x2] ss:$0 sm:$0xff]  ;;  %v5350_v33 = vadd.f32 %v5309_v5, %v5181_v3  ;;  %v13032_v45 = vpop.permute.xlu1 %4884  ;;  %v13042_v5 = vld [vmem:[#allocation2 + $0x17] sm:$0xff] }
 0x4b9   : > { %v13016_v25 = vpop.f32.mrf.mxu1  ;;  %v5437_v40 = vmul.f32 %v13025_v53, %v5391_v57  ;;  %15632 = vst [vmem:[#allocation55_spill] sm:$0xff] %v13032_v45  ;;  %v5436_v34 = vmul.f32 %v13025_v53, %v5390_v0 }
 0x4ba   : > { %10124 = vrcp.f32 %v4646_v26  ;;  %v5349_v59 = vadd.f32 %v5308_v62, %v5180_v54  ;;  %v13038_v26 = vld [vmem:[%s15631_s6 + $0x3] ss:$0 sm:$0xff] }
 0x4bb   : > { %v9616_v63 = vpop.f32.mrf.mxu1  ;;  %v10115_v42 = vpop.eup %10114  ;;  %v5478_v57 = vadd.f32 %v5437_v40, %v5350_v33  ;;  %v5525_v49 = vmul.f32 %v13038_v26, %v13042_v5  ;;  %v5954_v37 = vld [vmem:[#allocation2 + $0x3a] sm:$0xff] }
 0x4bc   : > { %v4647_v63 = vadd.f32 1.0, %v10115_v42  ;;  %v10117_v10 = vpop.eup %10116  ;;  %v5526_v42 = vmul.f32 %v13038_v26, %v13030_v48  ;;  %v5477_v61 = vadd.f32 %v5436_v34, %v5349_v59  ;;  %v13056_v52 = vpop.permute.xlu1 %4894  ;;  %v13065_v34 = vadd.f32 %v12919_v19, %v12987_v12 }
 0x4bd   : > { %v13027_v15 = vpop.f32.mrf.mxu1  ;;  %v10119_v3 = vpop.eup %10118  ;;  %v4766_v0 = vmul.f32 %v10117_v10, %v12947_v1  ;;  %15634 = vst [vmem:[#allocation57_spill] sm:$0xff] %v13056_v52  ;;  %v13061_v1 = vld [vmem:[%s15631_s6 + $0x4] ss:$0 sm:$0xff]  ;;  %v5136_v10 = vld [vmem:[#allocation2 + $0x15] sm:$0xff] }
 0x4be   : > { %10126 = vrcp.f32 %v4647_v63  ;;  %v4765_v16 = vmul.f32 %v10119_v3, %v12944_v8  ;;  %v5567_v40 = vadd.f32 %v5526_v42, %v5478_v57  ;;  %v5736_v8 = vld [vmem:[#allocation2 + $0x21] sm:$0xff]  ;;  %v5264_v3 = vld [vmem:[#allocation2 + $0x16] sm:$0xff] }
 0x4bf   : > { %v9617_v44 = vpop.f32.mrf.mxu1  ;;  %v5607_v42 = vld [vmem:[#allocation2 + $0x18] sm:$0xff] }
 0x4c0   : > { %v13046_v44 = vpop.permute.xlu0 %4889  ;;  %v10121_v62 = vpop.eup %10120  ;;  %v5059_v12 = vmul.f32 %v13032_v45, %v4765_v16  ;;  %v5182_v16 = vmul.f32 %v13008_v22, %v5136_v10 }
 0x4c1   : > { %v13040_v13 = vpop.f32.mrf.mxu1  ;;  %15633 = vst [vmem:[#allocation56_spill] sm:$0xff] %v13046_v44  ;;  %v4767_v33 = vmul.f32 %v10121_v62, %v12955_v36  ;;  %v5654_v36 = vmul.f32 %v13061_v1, %v5608_v32  ;;  %v5060_v57 = vmul.f32 %v13046_v44, %v4766_v0  ;;  %v13074_v62 = vld [vmem:[%s15631_s6 + $0x5] ss:$0 sm:$0xff] }
 0x4c2   : > { %v5265_v0 = vld [vmem:[#allocation2 + $0x1e] sm:$0xff]  ;;  %5100 = vst.msk [vmem:[#allocation2 + $0x50] sm:$0xff] %vm4799_vm4, %v5059_v12 }
 0x4c3   : > { %v9620_v54 = vpop.f32.mrf.mxu1  ;;  %v5695_v21 = vadd.f32 %v5654_v36, %v5567_v40  ;;  %5101 = vst.msk [vmem:[#allocation2 + $0x58] sm:$0xff] %vm4799_vm4, %v5060_v57  ;;  %v5061_v55 = vmul.f32 %v13056_v52, %v4767_v33  ;;  %v13095_v40 = vld [vmem:[%s15631_s6 + $0x6] ss:$0 sm:$0xff]  ;;  %v5653_v33 = vmul.f32 %v13061_v1, %v5607_v42  ;;  %v5183_v36 = vmul.f32 %v13008_v22, %v5137_v31  ;;  %v5396_v52 = vld [vmem:[#allocation2 + $0x37] sm:$0xff] }
 0x4c4   : > { %v10123_v6 = vpop.eup %10122  ;;  %v13076_v54 = vld [vmem:[#allocation2 + $0x31] sm:$0xff]  ;;  %v5311_v57 = vmul.f32 %v13013_v50, %v5265_v0  ;;  %v5781_v42 = vmul.f32 %v13074_v62, %v5735_v39  ;;  %v5527_v39 = vmul.f32 %v13038_v26, %v13113_v30 }
 0x4c5   : > { %v13052_v7 = vpop.f32.mrf.mxu1  ;;  %v4768_v63 = vmul.f32 %v10123_v6, %v12963_v4  ;;  %v13069_v6 = vpop.permute.xlu0 %4899  ;;  %v5566_v4 = vadd.f32 %v5525_v49, %v5477_v61  ;;  %v5782_v49 = vmul.f32 %v13074_v62, %v5736_v8  ;;  %v13086_v61 = vadd.f32 %v12919_v19, %v12995_v60  ;;  %5102 = vst.msk [vmem:[#allocation2 + $0x60] sm:$0xff] %vm4799_vm4, %v5061_v55 }
 0x4c6   : > { %15635 = vst [vmem:[#allocation58_spill] sm:$0xff] %v13069_v6  ;;  %v8357_v8 = vmul.f32 -1.442695, %v13065_v34  ;;  %v5871_v10 = vmul.f32 %v13095_v40, %v13076_v54 }
 0x4c7   : > { %v9621_v59 = vpop.f32.mrf.mxu1  ;;  %v10125_v32 = vpop.eup %10124  ;;  %v5823_v27 = vadd.f32 %v5782_v49, %v5695_v21  ;;  %v13125_v21 = vld [vmem:[%s15631_s6 + $0x7] ss:$0 sm:$0xff]  ;;  %v13127_v49 = vld [vmem:[#allocation2 + $0x2f] sm:$0xff] }
 0x4c8   : > { %v5062_v59 = vmul.f32 %v13069_v6, %v4768_v63  ;;  %v5310_v63 = vmul.f32 %v13013_v50, %v5264_v3  ;;  %v4769_v46 = vmul.f32 %v10125_v32, %v12972_v28  ;;  %v8358_v3 = vmul.f32 -1.442695, %v13086_v61  ;;  %v13105_v28 = vpop.permute.xlu1 %4904  ;;  %v5737_v32 = vld [vmem:[#allocation2 + $0x29] sm:$0xff] }
 0x4c9   : > { %v13080_v58 = vpop.f32.mrf.mxu1  ;;  %15636 = vst [vmem:[#allocation59_spill] sm:$0xff] %v13105_v28  ;;  %v5870_v0 = vmul.f32 %v13095_v40, %v5737_v32  ;;  %v5912_v17 = vadd.f32 %v5871_v10, %v5823_v27  ;;  %v13133_v27 = vadd.f32 %v12919_v19, %v13000_v20  ;;  %v5952_v10 = vld [vmem:[#allocation2 + $0x2a] sm:$0xff]  ;;  %v5528_v20 = vmul.f32 %v13038_v26, %v13127_v49  ;;  %v5955_v6 = vld [vmem:[#allocation2 + $0x42] sm:$0xff] }
 0x4ca   : > { %5103 = vst.msk [vmem:[#allocation2 + $0x68] sm:$0xff] %vm4799_vm4, %v5062_v59  ;;  %v5063_v12 = vmul.f32 %v13105_v28, %v4769_v46  ;;  %10128 = vpow2.f32 %v8358_v3  ;;  %v5351_v55 = vadd.f32 %v5310_v63, %v5182_v16  ;;  %v13129_v16 = vpop.permute.xlu0 %4909  ;;  %v5999_v63 = vmul.f32 %v13125_v21, %v5953_v35  ;;  %v6081_v3 = vld [vmem:[#allocation2 + $0x33] sm:$0xff]  ;;  %v13147_v35 = vld [vmem:[%s15631_s6 + $0x8] ss:$0 sm:$0xff] }
 0x4cb   : > { %v9624_v60 = vpop.f32.mrf.mxu1  ;;  %v10127_v43 = vpop.eup %10126  ;;  %10130 = vpow2.f32 %v8357_v8  ;;  %15637 = vst [vmem:[#allocation60_spill] sm:$0xff] %v13129_v16 }
 0x4cc   : > { %v5694_v60 = vadd.f32 %v5653_v33, %v5566_v4  ;;  %5104 = vst.msk [vmem:[#allocation2 + $0x70] sm:$0xff] %vm4799_vm4, %v5063_v12  ;;  %v4770_v46 = vmul.f32 %v10127_v43, %v12981_v29  ;;  %v5438_v4 = vmul.f32 %v13025_v53, %v13042_v5  ;;  %v5352_v29 = vadd.f32 %v5311_v57, %v5183_v36 }
 0x4cd   : > { %v13110_v59 = vpop.f32.mrf.mxu1  ;;  %v6040_v56 = vadd.f32 %v5999_v63, %v5912_v17  ;;  %v8359_v57 = vmul.f32 -1.442695, %v13133_v27  ;;  %v5610_v17 = vld [vmem:[#allocation2 + $0x30] sm:$0xff] }
 0x4ce   : > { %v5822_v5 = vadd.f32 %v5781_v42, %v5694_v60  ;;  %v5064_v8 = vmul.f32 %v13129_v16, %v4770_v46  ;;  %v5479_v33 = vadd.f32 %v5438_v4, %v5351_v55  ;;  %v6127_v55 = vmul.f32 %v13147_v35, %v6081_v3  ;;  %v6080_v46 = vld [vmem:[#allocation2 + $0x2b] sm:$0xff] }
 0x4cf   : > { %v9625_v31 = vpop.f32.mrf.mxu1  ;;  %10132 = vpow2.f32 %v8359_v57  ;;  %v5267_v16 = vld [vmem:[#allocation2 + $0x2e] sm:$0xff] }
 0x4d0   : > { %v5439_v31 = vmul.f32 %v13025_v53, %v13030_v48  ;;  %v5911_v41 = vadd.f32 %v5870_v0, %v5822_v5  ;;  %5105 = vst.msk [vmem:[#allocation2 + $0x78] sm:$0xff] %vm4799_vm4, %v5064_v8  ;;  %v5568_v36 = vadd.f32 %v5527_v39, %v5479_v33  ;;  %v5998_v48 = vmul.f32 %v13125_v21, %v5952_v10  ;;  %v13155_v8 = vld [vmem:[#allocation2 + $0x39] sm:$0xff] }
 0x4d1   : > { %v13135_v43 = vpop.f32.mrf.mxu1  ;;  %v5655_v0 = vmul.f32 %v13061_v1, %v5609_v14  ;;  %v6168_v63 = vadd.f32 %v6127_v55, %v6040_v56  ;;  %v6126_v10 = vmul.f32 %v13147_v35, %v6080_v46  ;;  %v13165_v14 = vld [vmem:[%s15638_s7] ss:$0 sm:$0xff]  ;;  %v5872_v56 = vmul.f32 %v13095_v40, %v13155_v8  ;;  %v5139_v46 = vld [vmem:[#allocation2 + $0x2d] sm:$0xff] }
 0x4d2   : > { %v5480_v42 = vadd.f32 %v5439_v31, %v5352_v29  ;;  %v6039_v5 = vadd.f32 %v5998_v48, %v5911_v41  ;;  %v5656_v29 = vmul.f32 %v13061_v1, %v5610_v17  ;;  %v13167_v41 = vld [vmem:[#allocation2 + $0x41] sm:$0xff] }
 0x4d3   : > { %v9628_v12 = vpop.f32.mrf.mxu1  ;;  %v5696_v33 = vadd.f32 %v5655_v0, %v5568_v36  ;;  %v5784_v36 = vmul.f32 %v13074_v62, %v13076_v54  ;;  %v5138_v48 = vld [vmem:[#allocation2 + $0x25] sm:$0xff]  ;;  %v13182_v54 = vadd.f32 %v12919_v19, %v13016_v25  ;;  %v5313_v25 = vmul.f32 %v13013_v50, %v5267_v16 }
 0x4d4   : > { %v5569_v39 = vadd.f32 %v5528_v20, %v5480_v42  ;;  %v5783_v12 = vmul.f32 %v13074_v62, %v5737_v32  ;;  %v6167_v57 = vadd.f32 %v6126_v10, %v6039_v5  ;;  %v13174_v42 = vadd.f32 %v13165_v14, %v6168_v63  ;;  %v5266_v17 = vld [vmem:[#allocation2 + $0x26] sm:$0xff] }
 0x4d5   : > { %v13150_v60 = vpop.f32.mrf.mxu1  ;;  %v5184_v10 = vmul.f32 %v13008_v22, %v5138_v48  ;;  %v5312_v28 = vmul.f32 %v13013_v50, %v5266_v17  ;;  %v8360_v17 = vmul.f32 -1.442695, %v13182_v54  ;;  %v6001_v16 = vmul.f32 %v13125_v21, %v5955_v6 }
 0x4d6   : > { %v5697_v20 = vadd.f32 %v5656_v29, %v5569_v39  ;;  %v5824_v55 = vadd.f32 %v5783_v12, %v5696_v33  ;;  %v13185_v33 = vadd.f32 %v13165_v14, %v6167_v57  ;;  %v8396_v12 = vmul.f32 -1.442695, %v13174_v42  ;;  %v5140_v57 = vld [vmem:[#allocation2 + $0x35] sm:$0xff] }
 0x4d7   : > { %v9629_v4 = vpop.f32.mrf.mxu1  ;;  %v10129_v3 = vpop.eup %10128  ;;  %v5529_v6 = vmul.f32 %v13038_v26, %v5396_v52 }
 0x4d8   : > { %v10131_v32 = vpop.eup %10130  ;;  %v5873_v4 = vmul.f32 %v13095_v40, %v13167_v41  ;;  %v5913_v39 = vadd.f32 %v5872_v56, %v5824_v55  ;;  %v5825_v63 = vadd.f32 %v5784_v36, %v5697_v20  ;;  %v6000_v56 = vmul.f32 %v13125_v21, %v5954_v37  ;;  %v6082_v20 = vld [vmem:[#allocation2 + $0x3b] sm:$0xff] }
 0x4d9   : > { %v13158_v51 = vpop.f32.mrf.mxu1  ;;  %v4648_v29 = vadd.f32 1.0, %v10131_v32  ;;  %v13197_v36 = vadd.f32 %v12919_v19, %v13027_v15  ;;  %v8395_v37 = vmul.f32 -1.442695, %v13185_v33  ;;  %v6128_v15 = vmul.f32 %v13147_v35, %v6082_v20  ;;  %v5141_v20 = vld [vmem:[#allocation2 + $0x3d] sm:$0xff] }
 0x4da   : > { %v5914_v55 = vadd.f32 %v5873_v4, %v5825_v63  ;;  %v6041_v48 = vadd.f32 %v6000_v56, %v5913_v39  ;;  %v5353_v4 = vadd.f32 %v5312_v28, %v5184_v10  ;;  %v6083_v63 = vld [vmem:[#allocation2 + $0x43] sm:$0xff]  ;;  %v5441_v10 = vmul.f32 %v13025_v53, %v13127_v49 }
 0x4db   : > { %v9632_v31 = vpop.f32.mrf.mxu1  ;;  %v8361_v24 = vmul.f32 -1.442695, %v13197_v36  ;;  %v6129_v38 = vmul.f32 %v13147_v35, %v6083_v63 }
 0x4dc   : > { %v4649_v31 = vadd.f32 1.0, %v10129_v3  ;;  %v5185_v3 = vmul.f32 %v13008_v22, %v5139_v46  ;;  %v10133_v39 = vpop.eup %10132  ;;  %v6042_v45 = vadd.f32 %v6001_v16, %v5914_v55  ;;  %v6169_v28 = vadd.f32 %v6128_v15, %v6041_v48  ;;  %v5270_v55 = vld [vmem:[#allocation2 + $0x46] sm:$0xff]  ;;  %v5611_v15 = vld [vmem:[#allocation2 + $0x38] sm:$0xff] }
 0x4dd   : > { %v13176_v0 = vpop.f32.mrf.mxu1  ;;  %v4650_v23 = vadd.f32 1.0, %v10133_v39  ;;  %v5398_v48 = vld [vmem:[#allocation2 + $0x47] sm:$0xff] }
 0x4de   : > { %10134 = vrcp.f32 %v4649_v31  ;;  %v5440_v31 = vmul.f32 %v13025_v53, %v13113_v30  ;;  %v5354_v56 = vadd.f32 %v5313_v25, %v5185_v3  ;;  %v5142_v3 = vld [vmem:[#allocation2 + $0x45] sm:$0xff] }
 0x4df   : > { %v9633_v5 = vpop.f32.mrf.mxu1  ;;  %10136 = vrcp.f32 %v4648_v29  ;;  %v5186_v29 = vmul.f32 %v13008_v22, %v5140_v57  ;;  %v5269_v25 = vld [vmem:[#allocation2 + $0x3e] sm:$0xff]  ;;  %v5188_v63 = vmul.f32 %v13008_v22, %v5142_v3 }
 0x4e0   : > { %v5268_v5 = vld [vmem:[#allocation2 + $0x36] sm:$0xff]  ;;  %10138 = vpow2.f32 %v8396_v12  ;;  %v5481_v57 = vadd.f32 %v5440_v31, %v5353_v4  ;;  %v5482_v18 = vadd.f32 %v5441_v10, %v5354_v56  ;;  %v5187_v31 = vmul.f32 %v13008_v22, %v5141_v20  ;;  %v5612_v56 = vld [vmem:[#allocation2 + $0x40] sm:$0xff] }
 0x4e1   : > { %v13192_v32 = vpop.f32.mrf.mxu1  ;;  %v5314_v12 = vmul.f32 %v13013_v50, %v5268_v5  ;;  %10140 = vpow2.f32 %v8360_v17  ;;  %v6170_v17 = vadd.f32 %v6129_v38, %v6042_v45  ;;  %v5315_v39 = vmul.f32 %v13013_v50, %v5269_v25  ;;  %v5613_v25 = vld [vmem:[#allocation2 + $0x48] sm:$0xff] }
 0x4e2   : > { %15639 = vst [vmem:[#allocation61_spill] sm:$0xff] %v13192_v32  ;;  %10142 = vpow2.f32 %v8395_v37  ;;  %v5570_v49 = vadd.f32 %v5529_v6, %v5481_v57  ;;  %v13218_v37 = vadd.f32 %v13165_v14, %v6169_v28  ;;  %v5442_v38 = vmul.f32 %v13025_v53, %v5396_v52  ;;  %v13234_v57 = vld [vmem:[#allocation2 + $0x4f] sm:$0xff] }
 0x4e3   : > { %v9636_v46 = vpop.f32.mrf.mxu1  ;;  %10144 = vpow2.f32 %v8361_v24  ;;  %v5531_v24 = vmul.f32 %v13038_v26, %v5398_v48  ;;  %v5658_v10 = vmul.f32 %v13061_v1, %v5612_v56  ;;  %v5741_v56 = vld [vmem:[#allocation2 + $0x49] sm:$0xff] }
 0x4e4   : > { %v5397_v46 = vld [vmem:[#allocation2 + $0x3f] sm:$0xff]  ;;  %10146 = vrcp.f32 %v4650_v23  ;;  %v13230_v23 = vadd.f32 %v13165_v14, %v6170_v17  ;;  %v8397_v20 = vmul.f32 -1.442695, %v13218_v37 }
 0x4e5   : > { %v13205_v44 = vpop.f32.mrf.mxu1  ;;  %v5530_v16 = vmul.f32 %v13038_v26, %v5397_v46 }
 0x4e6   : > { %15640 = vst [vmem:[#allocation62_spill] sm:$0xff] %v13205_v44  ;;  %10148 = vpow2.f32 %v8397_v20 }
 0x4e7   : > { %v9637_v30 = vpop.f32.mrf.mxu1  ;;  %v5571_v45 = vadd.f32 %v5530_v16, %v5482_v18 }
 0x4e8   : > { %v5355_v30 = vadd.f32 %v5314_v12, %v5186_v29  ;;  %v5657_v12 = vmul.f32 %v13061_v1, %v5611_v15  ;;  %v5785_v15 = vmul.f32 %v13074_v62, %v13155_v8  ;;  %v5532_v8 = vmul.f32 %v13038_v26, %v13234_v57 }
 0x4e9   : > { %v13215_v5 = vpop.f32.mrf.mxu1 }
 0x4ea   : > { %15641 = vst [vmem:[#allocation63_spill] sm:$0xff] %v13215_v5  ;;  %v5316_v5 = vmul.f32 %v13013_v50, %v5270_v55  ;;  %v5483_v28 = vadd.f32 %v5442_v38, %v5355_v30  ;;  %v5356_v55 = vadd.f32 %v5315_v39, %v5187_v31  ;;  %v5698_v16 = vadd.f32 %v5657_v12, %v5570_v49 }
 0x4eb   : > { %v9640_v4 = vpop.f32.mrf.mxu1  ;;  %v10135_v6 = vpop.eup %10134  ;;  %v5786_v30 = vmul.f32 %v13074_v62, %v13167_v41  ;;  %v13242_v38 = vadd.f32 %v12919_v19, %v13040_v13  ;;  %v5443_v31 = vmul.f32 %v13025_v53, %v5397_v46  ;;  %v5444_v41 = vmul.f32 %v13025_v53, %v5398_v48  ;;  %v5742_v13 = vld [vmem:[#allocation2 + $0x51] sm:$0xff] }
 0x4ec   : > { %v10137_v52 = vpop.eup %10136  ;;  %v5357_v18 = vadd.f32 %v5316_v5, %v5188_v63  ;;  %v5572_v17 = vadd.f32 %v5531_v24, %v5483_v28  ;;  %v8398_v5 = vmul.f32 -1.442695, %v13230_v23  ;;  %v4772_v49 = vmul.f32 %v10135_v6, %v13086_v61  ;;  %v5614_v6 = vld [vmem:[#allocation2 + $0x50] sm:$0xff]  ;;  %v13259_v48 = vpop.permute.xlu0 %4919 }
 0x4ed   : > { %v13226_v29 = vpop.f32.mrf.mxu1  ;;  %v10139_v4 = vpop.eup %10138  ;;  %v5659_v63 = vmul.f32 %v13061_v1, %v5613_v25  ;;  %v4771_v39 = vmul.f32 %v10137_v52, %v13065_v34  ;;  %v5484_v28 = vadd.f32 %v5443_v31, %v5356_v55  ;;  %v5826_v46 = vadd.f32 %v5785_v15, %v5698_v16  ;;  %15645 = vst [vmem:[#allocation67_spill] sm:$0xff] %v13259_v48  ;;  %v5143_v52 = vld [vmem:[#allocation2 + $0x4d] sm:$0xff] }
 0x4ee   : > { %15642 = vst [vmem:[#allocation64_spill] sm:$0xff] %v13226_v29  ;;  %v5699_v29 = vadd.f32 %v5658_v10, %v5571_v45  ;;  %v10141_v45 = vpop.eup %10140  ;;  %v6380_v12 = vadd.f32 1.0, %v10139_v4  ;;  %v5874_v10 = vmul.f32 %v13095_v40, %v5741_v56  ;;  %v13257_v32 = vadd.f32 %v5444_v41, %v5357_v18  ;;  %v5956_v18 = vld [vmem:[#allocation2 + $0x4a] sm:$0xff] }
 0x4ef   : > { %v9641_v3 = vpop.f32.mrf.mxu1  ;;  %v10143_v44 = vpop.eup %10142  ;;  %v5700_v25 = vadd.f32 %v5659_v63, %v5572_v17  ;;  %v13262_v34 = vmul.f32 -1.442695, %v13242_v38  ;;  %10150 = vpow2.f32 %v8398_v5  ;;  %v5573_v55 = vadd.f32 %v5532_v8, %v5484_v28  ;;  %v5271_v41 = vld [vmem:[#allocation2 + $0x4e] sm:$0xff]  ;;  %v13278_v28 = vld [vmem:[#allocation2 + $0x59] sm:$0xff] }
 0x4f0   : > { %v5827_v61 = vadd.f32 %v5786_v30, %v5699_v29  ;;  %v5875_v16 = vmul.f32 %v13095_v40, %v5742_v13  ;;  %v5066_v15 = vmul.f32 %v13259_v48, %v4772_v49  ;;  %v10145_v4 = vpop.eup %10144  ;;  %v4651_v31 = vadd.f32 1.0, %v10141_v45  ;;  %v5957_v45 = vld [vmem:[#allocation2 + $0x52] sm:$0xff]  ;;  %v13283_v48 = vld [vmem:[#allocation2 + $0x61] sm:$0xff] }
 0x4f1   : > { %v13244_v3 = vpop.f32.mrf.mxu1  ;;  %v13271_v17 = vadd.f32 %v12919_v19, %v13052_v7  ;;  %v13275_v30 = vadd.f32 %v12919_v19, %v13080_v58  ;;  %v10147_v63 = vpop.eup %10146  ;;  %v6379_v8 = vadd.f32 1.0, %v10143_v44  ;;  %10152 = vrcp.f32 %v6380_v12  ;;  %v5144_v44 = vld [vmem:[#allocation2 + $0x55] sm:$0xff] }
 0x4f2   : > { %15643 = vst [vmem:[#allocation65_spill] sm:$0xff] %v13244_v3  ;;  %v13255_v3 = vpop.permute.xlu1 %4914  ;;  %v5660_v49 = vmul.f32 %v13061_v1, %v5614_v6  ;;  %5107 = vst.msk [vmem:[#allocation2 + $0x88] sm:$0xff] %vm4799_vm4, %v5066_v15  ;;  %v5787_v7 = vmul.f32 %v13074_v62, %v5741_v56  ;;  %v4773_v58 = vmul.f32 %v10147_v63, %v13133_v27  ;;  %10154 = vrcp.f32 %v4651_v31  ;;  %v5272_v12 = vld [vmem:[#allocation2 + $0x56] sm:$0xff] }
 0x4f3   : > { %v9644_v24 = vpop.f32.mrf.mxu1  ;;  %15644 = vst [vmem:[#allocation66_spill] sm:$0xff] %v13255_v3  ;;  %v5065_v29 = vmul.f32 %v13255_v3, %v4771_v39  ;;  %15647 = vst [vmem:[#allocation69_spill] sm:$0xff] %v13275_v30  ;;  %v5189_v39 = vmul.f32 %v13008_v22, %v5143_v52  ;;  %v6002_v15 = vmul.f32 %v13125_v21, %v5956_v18  ;;  %v6084_v52 = vld [vmem:[#allocation2 + $0x4b] sm:$0xff]  ;;  %v4652_v27 = vadd.f32 1.0, %v10145_v4  ;;  %v5400_v18 = vld [vmem:[#allocation2 + $0x57] sm:$0xff] }
 0x4f4   : > { %v5915_v24 = vadd.f32 %v5874_v10, %v5826_v46  ;;  %v5701_v6 = vadd.f32 %v5660_v49, %v5573_v55  ;;  %v5788_v46 = vmul.f32 %v13074_v62, %v5742_v13  ;;  %v5916_v10 = vadd.f32 %v5875_v16, %v5827_v61 }
 0x4f5   : > { %v13264_v20 = vpop.f32.mrf.mxu1  ;;  %5106 = vst.msk [vmem:[#allocation2 + $0x80] sm:$0xff] %vm4799_vm4, %v5065_v29  ;;  %v5317_v56 = vmul.f32 %v13013_v50, %v5271_v41  ;;  %v5876_v3 = vmul.f32 %v13095_v40, %v13278_v28  ;;  %10156 = vrcp.f32 %v6379_v8  ;;  %v6003_v29 = vmul.f32 %v13125_v21, %v5957_v45  ;;  %v6085_v41 = vld [vmem:[#allocation2 + $0x53] sm:$0xff] }
 0x4f6   : > { %15646 = vst [vmem:[#allocation68_spill] sm:$0xff] %v13264_v20  ;;  %v6043_v55 = vadd.f32 %v6002_v15, %v5915_v24  ;;  %v5877_v13 = vmul.f32 %v13095_v40, %v13283_v48  ;;  %v5190_v61 = vmul.f32 %v13008_v22, %v5144_v44  ;;  %v5318_v16 = vmul.f32 %v13013_v50, %v5272_v12  ;;  %v5615_v15 = vld [vmem:[#allocation2 + $0x58] sm:$0xff]  ;;  %v10149_v20 = vpop.eup %10148 }
 0x4f7   : > { %v9645_v5 = vpop.f32.mrf.mxu1  ;;  %v5828_v63 = vadd.f32 %v5787_v7, %v5700_v25  ;;  %v13303_v4 = vadd.f32 %v12919_v19, %v13110_v59  ;;  %v5829_v49 = vadd.f32 %v5788_v46, %v5701_v6  ;;  %v6044_v24 = vadd.f32 %v6003_v29, %v5916_v10  ;;  %v5959_v25 = vld [vmem:[#allocation2 + $0x62] sm:$0xff] }
 0x4f8   : > { %v13289_v5 = vpop.permute.xlu1 %4924  ;;  %v6130_v45 = vmul.f32 %v13147_v35, %v6084_v52  ;;  %v8363_v44 = vmul.f32 -1.442695, %v13271_v17  ;;  %v5358_v12 = vadd.f32 %v5317_v56, %v5189_v39  ;;  %10158 = vrcp.f32 %v4652_v27  ;;  %v13312_v46 = vld [vmem:[#allocation2 + $0x5f] sm:$0xff] }
 0x4f9   : > { %15648 = vst [vmem:[#allocation70_spill] sm:$0xff] %v13289_v5  ;;  %v5067_v31 = vmul.f32 %v13289_v5, %v4773_v58  ;;  %15649 = vst [vmem:[#allocation71_spill] sm:$0xff] %v13303_v4  ;;  %v13305_v8 = vpop.f32.mrf.mxu1  ;;  %v5958_v58 = vld [vmem:[#allocation2 + $0x5a] sm:$0xff]  ;;  %v5917_v5 = vadd.f32 %v5876_v3, %v5828_v63  ;;  %v8364_v7 = vmul.f32 -1.442695, %v13275_v30  ;;  %v5533_v19 = vmul.f32 %v13038_v26, %v5400_v18 }
 0x4fa   : > { %15650 = vst [vmem:[#allocation72_spill] sm:$0xff] %v13305_v8  ;;  %v6131_v59 = vmul.f32 %v13147_v35, %v6085_v41  ;;  %v6171_v6 = vadd.f32 %v6130_v45, %v6043_v55  ;;  %v5918_v10 = vadd.f32 %v5877_v13, %v5829_v49  ;;  %v5359_v52 = vadd.f32 %v5318_v16, %v5190_v61  ;;  %v5146_v41 = vld [vmem:[#allocation2 + $0x65] sm:$0xff]  ;;  %v6086_v45 = vld [vmem:[#allocation2 + $0x5b] sm:$0xff] }
 0x4fb   : > { %5108 = vst.msk [vmem:[#allocation2 + $0x90] sm:$0xff] %vm4799_vm4, %v5067_v31  ;;  %v9648_v31 = vpop.f32.mrf.mxu1  ;;  %v5445_v29 = vmul.f32 %v13025_v53, %v13234_v57  ;;  %v6004_v3 = vmul.f32 %v13125_v21, %v5958_v58  ;;  %v13318_v39 = vmul.f32 -1.442695, %v13303_v4  ;;  %v5661_v56 = vmul.f32 %v13061_v1, %v5615_v15  ;;  %v5273_v49 = vld [vmem:[#allocation2 + $0x5e] sm:$0xff] }
 0x4fc   : > { %v5446_v27 = vmul.f32 %v13025_v53, %v5400_v18  ;;  %v6172_v63 = vadd.f32 %v6131_v59, %v6044_v24  ;;  %v5145_v31 = vld [vmem:[#allocation2 + $0x5d] sm:$0xff]  ;;  %v6005_v55 = vmul.f32 %v13125_v21, %v5959_v25  ;;  %v10151_v61 = vpop.eup %10150  ;;  %v6381_v16 = vadd.f32 1.0, %v10149_v20 }
 0x4fd   : > { %v13323_v13 = vpop.f32.mrf.mxu1  ;;  %v5486_v57 = vadd.f32 %v5445_v29, %v5358_v12  ;;  %v5534_v58 = vmul.f32 %v13038_v26, %v13312_v46  ;;  %v6045_v8 = vadd.f32 %v6004_v3, %v5917_v5  ;;  %v6087_v4 = vld [vmem:[#allocation2 + $0x63] sm:$0xff]  ;;  %v5574_v15 = vadd.f32 %v5533_v19, %v13257_v32 }
 0x4fe   : > { %15651 = vst [vmem:[#allocation73_spill] sm:$0xff] %v13323_v13  ;;  %v13329_v18 = vadd.f32 %v13165_v14, %v6171_v6  ;;  %v6046_v24 = vadd.f32 %v6005_v55, %v5918_v10  ;;  %10160 = vpow2.f32 %v13262_v34  ;;  %v10153_v59 = vpop.eup %10152  ;;  %v13332_v13 = vadd.f32 %v5446_v27, %v5359_v52  ;;  %v5274_v29 = vld [vmem:[#allocation2 + $0x66] sm:$0xff] }
 0x4ff   : > { %v9649_v25 = vpop.f32.mrf.mxu1  ;;  %v5191_v20 = vmul.f32 %v13008_v22, %v5145_v31  ;;  %v5192_v12 = vmul.f32 %v13008_v22, %v5146_v41  ;;  %v6132_v5 = vmul.f32 %v13147_v35, %v6086_v45  ;;  %v10155_v3 = vpop.eup %10154  ;;  %v6382_v30 = vadd.f32 1.0, %v10151_v61  ;;  %v5616_v6 = vld [vmem:[#allocation2 + $0x60] sm:$0xff]  ;;  %v13345_v45 = vld [vmem:[#allocation2 + $0x69] sm:$0xff] }
 0x500   : > { %v13338_v32 = vadd.f32 %v13165_v14, %v6172_v63  ;;  %v5319_v19 = vmul.f32 %v13013_v50, %v5273_v49  ;;  %v6133_v34 = vmul.f32 %v13147_v35, %v6087_v4  ;;  %10162 = vrcp.f32 %v6381_v16  ;;  %v5617_v61 = vld [vmem:[#allocation2 + $0x68] sm:$0xff]  ;;  %v13350_v16 = vpop.permute.xlu0 %4929 }
 0x501   : > { %v5575_v10 = vadd.f32 %v5534_v58, %v5486_v57  ;;  %v6173_v52 = vadd.f32 %v6132_v5, %v6045_v8  ;;  %v4774_v27 = vmul.f32 %v10155_v3, %v13182_v54  ;;  %v8399_v31 = vmul.f32 -1.442695, %v13329_v18  ;;  %15652 = vst [vmem:[#allocation74_spill] sm:$0xff] %v13350_v16  ;;  %v13356_v57 = vld [vmem:[#allocation2 + $0x71] sm:$0xff]  ;;  %v13359_v58 = vpop.f32.mrf.mxu1 }
 0x502   : > { %v5320_v41 = vmul.f32 %v13013_v50, %v5274_v29  ;;  %v6174_v55 = vadd.f32 %v6133_v34, %v6046_v24  ;;  %10164 = vpow2.f32 %v8363_v44  ;;  %v10157_v63 = vpop.eup %10156  ;;  %v5662_v49 = vmul.f32 %v13061_v1, %v5616_v6  ;;  %15654 = vst [vmem:[#allocation76_spill] sm:$0xff] %v13359_v58  ;;  %v5402_v24 = vld [vmem:[#allocation2 + $0x67] sm:$0xff] }
 0x503   : > { %v5702_v25 = vadd.f32 %v5661_v56, %v5574_v15  ;;  %v5789_v4 = vmul.f32 %v13074_v62, %v13278_v28  ;;  %10166 = vpow2.f32 %v8364_v7  ;;  %v13353_v54 = vmul.f32 %v10153_v59, %v13174_v42 }
 0x504   : > { %10168 = vrcp.f32 %v6382_v30  ;;  %v8400_v8 = vmul.f32 -1.442695, %v13338_v32  ;;  %v5068_v44 = vmul.f32 %v13350_v16, %v4774_v27  ;;  %v5703_v56 = vadd.f32 %v5662_v49, %v5575_v10  ;;  %v5960_v27 = vld [vmem:[#allocation2 + $0x6a] sm:$0xff] }
 0x505   : > { %15653 = vst [vmem:[#allocation75_spill] sm:$0xff] %v13353_v54  ;;  %v5790_v28 = vmul.f32 %v13074_v62, %v13283_v48  ;;  %v13364_v15 = vadd.f32 %v13165_v14, %v6173_v52  ;;  %v5878_v42 = vmul.f32 %v13095_v40, %v13345_v45  ;;  %v10159_v30 = vpop.eup %10158  ;;  %v13369_v7 = vmul.f32 %v10157_v63, %v13185_v33  ;;  %v9652_v48 = vpop.f32.mrf.mxu1  ;;  %v5275_v52 = vld [vmem:[#allocation2 + $0x6e] sm:$0xff] }
 0x506   : > { %v13372_v59 = vmul.f32 %v13061_v1, %v5617_v61  ;;  %v5360_v29 = vadd.f32 %v5319_v19, %v5191_v20  ;;  %v13375_v5 = vadd.f32 %v13165_v14, %v6174_v55  ;;  %5109 = vst.msk [vmem:[#allocation2 + $0x98] sm:$0xff] %vm4799_vm4, %v5068_v44  ;;  %10170 = vpow2.f32 %v8399_v31  ;;  %v5147_v19 = vld [vmem:[#allocation2 + $0x6d] sm:$0xff]  ;;  %v5148_v63 = vld [vmem:[#allocation2 + $0x75] sm:$0xff] }
 0x507   : > { %15655 = vst [vmem:[#allocation77_spill] sm:$0xff] %v13369_v7  ;;  %v5447_v3 = vmul.f32 %v13025_v53, %v13312_v46  ;;  %v5830_v6 = vadd.f32 %v5789_v4, %v5702_v25  ;;  %v5879_v34 = vmul.f32 %v13095_v40, %v13356_v57  ;;  %v6544_v33 = vmul.f32 %v13353_v54, %v12959_v47  ;;  %v5276_v61 = vld [vmem:[#allocation2 + $0x76] sm:$0xff]  ;;  %v13387_v25 = vpop.f32.mrf.mxu1 }
 0x508   : > { %10172 = vpow2.f32 %v8400_v8  ;;  %v5361_v10 = vadd.f32 %v5320_v41, %v5192_v12  ;;  %v5448_v20 = vmul.f32 %v13025_v53, %v5402_v24  ;;  %v5831_v55 = vadd.f32 %v5790_v28, %v5703_v56  ;;  %15656 = vst [vmem:[#allocation78_spill] sm:$0xff] %v13387_v25  ;;  %v5961_v44 = vld [vmem:[#allocation2 + $0x72] sm:$0xff] }
 0x509   : > { %v8401_v31 = vmul.f32 -1.442695, %v13364_v15  ;;  %v5919_v46 = vadd.f32 %v5878_v42, %v5830_v6  ;;  %v4775_v49 = vmul.f32 %v10159_v30, %v13197_v36  ;;  %v6543_v4 = vmul.f32 %v13369_v7, %v12949_v2  ;;  %v5403_v47 = vld [vmem:[#allocation2 + $0x6f] sm:$0xff]  ;;  %v9653_v30 = vpop.f32.mrf.mxu1  ;;  %v13401_v2 = vpop.permute.xlu1 %4934 }
 0x50a   : > { %v5488_v8 = vadd.f32 %v5447_v3, %v5360_v29  ;;  %v5535_v12 = vmul.f32 %v13038_v26, %v5402_v24  ;;  %v8402_v41 = vmul.f32 -1.442695, %v13375_v5  ;;  %v5193_v56 = vmul.f32 %v13008_v22, %v5147_v19  ;;  %v6088_v3 = vld [vmem:[#allocation2 + $0x6b] sm:$0xff]  ;;  %15657 = vst [vmem:[#allocation79_spill] sm:$0xff] %v13401_v2  ;;  %v5619_v19 = vld [vmem:[#allocation2 + $0x78] sm:$0xff] }
 0x50b   : > { %v10161_v48 = vpop.eup %10160  ;;  %v5321_v28 = vmul.f32 %v13013_v50, %v5275_v52  ;;  %v5920_v42 = vadd.f32 %v5879_v34, %v5831_v55  ;;  %v6006_v36 = vmul.f32 %v13125_v21, %v5960_v27  ;;  %v6585_v6 = vsel %vm4799_vm4, %v6544_v33, 0.0  ;;  %v5404_v33 = vld [vmem:[#allocation2 + $0x77] sm:$0xff] }
 0x50c   : > { %v13397_v54 = vadd.f32 %v5448_v20, %v5361_v10  ;;  %v5194_v29 = vmul.f32 %v13008_v22, %v5148_v63  ;;  %v5322_v24 = vmul.f32 %v13013_v50, %v5276_v61  ;;  %10174 = vpow2.f32 %v8401_v31  ;;  %v6089_v22 = vld [vmem:[#allocation2 + $0x73] sm:$0xff] }
 0x50d   : > { %v6007_v52 = vmul.f32 %v13125_v21, %v5961_v44  ;;  %v6047_v7 = vadd.f32 %v6006_v36, %v5919_v46  ;;  %v5069_v34 = vmul.f32 %v13401_v2, %v4775_v49  ;;  %v10163_v27 = vpop.eup %10162  ;;  %v5576_v55 = vadd.f32 %v5535_v12, %v13332_v13 }
 0x50e   : > { %10176 = vpow2.f32 %v8402_v41  ;;  %v5536_v10 = vmul.f32 %v13038_v26, %v5403_v47  ;;  %v4653_v20 = vadd.f32 1.0, %v10161_v48  ;;  %v6584_v63 = vsel %vm4799_vm4, %v6543_v4, 0.0  ;;  %v13417_v41 = vld [vmem:[%s15623_s5] ss:$0 sm:$0xff] }
 0x50f   : > { %v10165_v50 = vpop.eup %10164  ;;  %v5362_v61 = vadd.f32 %v5321_v28, %v5193_v56  ;;  %v6048_v31 = vadd.f32 %v6007_v52, %v5920_v42  ;;  %v6134_v30 = vmul.f32 %v13147_v35, %v6088_v3  ;;  %5110 = vst.msk [vmem:[#allocation2 + $0xa0] sm:$0xff] %vm4799_vm4, %v5069_v34  ;;  %v13410_v49 = vadd.f32 %v6585_v6, %v6584_v63  ;;  %v5618_v28 = vld [vmem:[#allocation2 + $0x70] sm:$0xff] }
 0x510   : > { %v10167_v46 = vpop.eup %10166  ;;  %v5665_v13 = vmul.f32 %v13061_v1, %v5619_v19  ;;  %v5449_v12 = vmul.f32 %v13025_v53, %v5403_v47  ;;  %v13421_v4 = vadd.f32 %v13417_v41, %v13135_v43  ;;  %v5363_v48 = vadd.f32 %v5322_v24, %v5194_v29 }
 0x511   : > { %v10169_v44 = vpop.eup %10168  ;;  %v5450_v56 = vmul.f32 %v13025_v53, %v5404_v33  ;;  %v6135_v42 = vmul.f32 %v13147_v35, %v6089_v22  ;;  %v6175_v36 = vadd.f32 %v6134_v30, %v6047_v7  ;;  %v13426_v6 = vmul.f32 %v10163_v27, %v13218_v37  ;;  %v13444_v22 = vld [vmem:[#allocation2 + $0x7f] sm:$0xff] }
 0x512   : > { %v5537_v47 = vmul.f32 %v13038_v26, %v5404_v33  ;;  %v5577_v3 = vadd.f32 %v5536_v10, %v5488_v8  ;;  %10178 = vrcp.f32 %v4653_v20  ;;  %v5490_v19 = vadd.f32 %v5449_v12, %v5362_v61 }
 0x513   : > { %15658 = vst [vmem:[#allocation80_spill] sm:$0xff] %v13426_v6  ;;  %v6176_v52 = vadd.f32 %v6135_v42, %v6048_v31  ;;  %v4654_v34 = vadd.f32 1.0, %v10165_v50  ;;  %v4655_v43 = vadd.f32 1.0, %v10167_v46  ;;  %v10171_v63 = vpop.eup %10170  ;;  %v13430_v29 = vmul.f32 %v10169_v44, %v13230_v23  ;;  %v15663_v44 = vld [vmem:[#allocation61_spill] sm:$0xff] }
 0x514   : > { %v5664_v53 = vmul.f32 %v13061_v1, %v5618_v28  ;;  %v5704_v24 = vadd.f32 %v13372_v59, %v5576_v55  ;;  %v8366_v7 = vmul.f32 -1.442695, %v13421_v4  ;;  %v5791_v27 = vmul.f32 %v13074_v62, %v13345_v45 }
 0x515   : > { %15659 = vst [vmem:[#allocation81_spill] sm:$0xff] %v13430_v29  ;;  %v10173_v37 = vpop.eup %10172  ;;  %v5792_v8 = vmul.f32 %v13074_v62, %v13356_v57  ;;  %v13440_v33 = vadd.f32 %v13165_v14, %v6175_v36  ;;  %10180 = vrcp.f32 %v4654_v34  ;;  %v6545_v23 = vmul.f32 %v13426_v6, %v12965_v9  ;;  %v13525_v9 = vld [vmem:[%s15631_s6] ss:$0 sm:$0xff] }
 0x516   : > { %v5705_v10 = vadd.f32 %v5664_v53, %v5577_v3  ;;  %10182 = vrcp.f32 %v4655_v43  ;;  %v13448_v59 = vadd.f32 %v13417_v41, %v13150_v60  ;;  %v6383_v55 = vadd.f32 1.0, %v10171_v63  ;;  %v13463_v60 = vpop.f32.mrf.mxu1  ;;  %v5621_v3 = vld [vmem:[#allocation2 + $0x88] sm:$0xff]  ;;  %v5747_v43 = vld [vmem:[#allocation2 + $0x79] sm:$0xff] }
 0x517   : > { %v13451_v45 = vadd.f32 %v13165_v14, %v6176_v52  ;;  %10184 = vpow2.f32 %v13318_v39  ;;  %v13456_v57 = vadd.f32 %v13417_v41, %v13158_v51  ;;  %v6384_v20 = vadd.f32 1.0, %v10173_v37  ;;  %15662 = vst [vmem:[#allocation84_spill] sm:$0xff] %v13463_v60  ;;  %v5620_v52 = vld [vmem:[#allocation2 + $0x80] sm:$0xff]  ;;  %v15665_v53 = vld [vmem:[#allocation62_spill] sm:$0xff] }
 0x518   : > { %v5578_v50 = vadd.f32 %v5537_v47, %v13397_v54  ;;  %10186 = vpow2.f32 %v8366_v7  ;;  %v13461_v61 = vadd.f32 %v13417_v41, %v13176_v0  ;;  %v13467_v31 = vmul.f32 %v13430_v29, %v12976_v11  ;;  %v9656_v42 = vpop.f32.mrf.mxu1  ;;  %v5149_v37 = vld [vmem:[#allocation2 + $0x7d] sm:$0xff]  ;;  %v5150_v11 = vld [vmem:[#allocation2 + $0x85] sm:$0xff]  ;;  %v13538_v60 = vld [vmem:[#allocation2 + $0x91] sm:$0xff] }
 0x519   : > { %15660 = vst [vmem:[#allocation82_spill] sm:$0xff] %v13456_v57  ;;  %v5491_v30 = vadd.f32 %v5450_v56, %v5363_v48  ;;  %v8403_v39 = vmul.f32 -1.442695, %v13440_v33  ;;  %v5538_v51 = vmul.f32 %v13038_v26, %v13444_v22  ;;  %v10175_v46 = vpop.eup %10174  ;;  %v13473_v54 = vsel %vm4799_vm4, %v6545_v23, 0.0  ;;  %v13485_v26 = vld [vmem:[#allocation2 + $0x87] sm:$0xff]  ;;  %v15667_v23 = vld [vmem:[#allocation63_spill] sm:$0xff] }
 0x51a   : > { %15661 = vst [vmem:[#allocation83_spill] sm:$0xff] %v13461_v61  ;;  %v5832_v12 = vadd.f32 %v5791_v27, %v5704_v24  ;;  %v13476_v0 = vmul.f32 -1.442695, %v13448_v59  ;;  %v13480_v28 = vadd.f32 %v13417_v41, %v15663_v44  ;;  %10188 = vrcp.f32 %v6383_v55  ;;  %v5277_v27 = vld [vmem:[#allocation2 + $0x7e] sm:$0xff]  ;;  %v5278_v29 = vld [vmem:[#allocation2 + $0x86] sm:$0xff] }
 0x51b   : > { %v10177_v36 = vpop.eup %10176  ;;  %v13482_v48 = vadd.f32 %v5792_v8, %v5705_v10  ;;  %v8404_v56 = vmul.f32 -1.442695, %v13451_v45  ;;  %v13488_v47 = vmul.f32 -1.442695, %v13456_v57  ;;  %10190 = vrcp.f32 %v6384_v20  ;;  %v5963_v57 = vld [vmem:[#allocation2 + $0x82] sm:$0xff] }
 0x51c   : > { %15664 = vst [vmem:[#allocation61_spill] sm:$0xff] %v13480_v28  ;;  %v5706_v34 = vadd.f32 %v5665_v13, %v5578_v50  ;;  %v13491_v63 = vmul.f32 -1.442695, %v13461_v61  ;;  %v13495_v24 = vadd.f32 %v13417_v41, %v15665_v53  ;;  %v6385_v7 = vadd.f32 1.0, %v10175_v46  ;;  %v13506_v13 = vld [vmem:[%s15631_s6 + $0x3] ss:$0 sm:$0xff] }
 0x51d   : > { %10192 = vpow2.f32 %v8403_v39  ;;  %v5579_v8 = vadd.f32 %v5538_v51, %v5490_v19  ;;  %v13499_v10 = vadd.f32 %v13417_v41, %v15667_v23  ;;  %v13501_v55 = vadd.f32 1.0, %v10177_v36  ;;  %v5748_v50 = vld [vmem:[#allocation2 + $0x81] sm:$0xff]  ;;  %v5749_v53 = vld [vmem:[#allocation2 + $0x89] sm:$0xff]  ;;  %v13520_v23 = vpop.permute.xlu0 %4939 }
 0x51e   : > { %15666 = vst [vmem:[#allocation62_spill] sm:$0xff] %v13495_v24  ;;  %v5539_v20 = vmul.f32 %v13506_v13, %v13485_v26  ;;  %v13511_v39 = vmul.f32 -1.442695, %v13480_v28  ;;  %v15668_v46 = vld [vmem:[#allocation64_spill] sm:$0xff]  ;;  %10194 = vpow2.f32 %v8404_v56  ;;  %v5667_v44 = vmul.f32 %v13061_v1, %v5621_v3  ;;  %15669 = vst [vmem:[#allocation63_spill] sm:$0xff] %v13520_v23  ;;  %v5962_v28 = vld [vmem:[#allocation2 + $0x7a] sm:$0xff] }
 0x51f   : > { %v13515_v19 = vadd.f32 %v13417_v41, %v15668_v46  ;;  %v10179_v51 = vpop.eup %10178  ;;  %v5666_v42 = vmul.f32 %v13061_v1, %v5620_v52  ;;  %v5880_v36 = vmul.f32 %v13095_v40, %v5747_v43  ;;  %v5195_v46 = vmul.f32 %v13525_v9, %v5149_v37  ;;  %v13531_v56 = vld [vmem:[%s15631_s6 + $0x1] ss:$0 sm:$0xff] }
 0x520   : > { %v5323_v1 = vmul.f32 %v13531_v56, %v5277_v27  ;;  %v5793_v3 = vmul.f32 %v13074_v62, %v5747_v43  ;;  %v4776_v52 = vmul.f32 %v10179_v51, %v13242_v38  ;;  %v5794_v2 = vmul.f32 %v13074_v62, %v5748_v50 }
 0x521   : > { %v5707_v6 = vadd.f32 %v5666_v42, %v5579_v8  ;;  %v5881_v16 = vmul.f32 %v13095_v40, %v5748_v50  ;;  %v13541_v37 = vmul.f32 -1.442695, %v13495_v24  ;;  %10196 = vrcp.f32 %v6385_v7 }
 0x522   : > { %v10181_v25 = vpop.eup %10180  ;;  %v5580_v58 = vadd.f32 %v5539_v20, %v5491_v30  ;;  %v5882_v27 = vmul.f32 %v13095_v40, %v5749_v53  ;;  %v5070_v43 = vmul.f32 %v13520_v23, %v4776_v52  ;;  %v5196_v38 = vmul.f32 %v13525_v9, %v5150_v11  ;;  %v13551_v30 = vld [vmem:[%s15631_s6 + $0x6] ss:$0 sm:$0xff]  ;;  %v13556_v11 = vpop.permute.xlu1 %4944  ;;  %v6090_v52 = vld [vmem:[#allocation2 + $0x7b] sm:$0xff] }
 0x523   : > { %v10183_v61 = vpop.eup %10182  ;;  %v5324_v62 = vmul.f32 %v13531_v56, %v5278_v29  ;;  %v5921_v8 = vadd.f32 %v5880_v36, %v5832_v12  ;;  %v4777_v50 = vmul.f32 %v10181_v25, %v13271_v17  ;;  %v5364_v42 = vadd.f32 %v5323_v1, %v5195_v46  ;;  %15670 = vst [vmem:[#allocation64_spill] sm:$0xff] %v13556_v11  ;;  %v15671_v29 = vld [vmem:[#allocation69_spill] sm:$0xff]  ;;  %v6675_v17 = vld [vmem:[%s15672_s8 + $0x18] sm:$0xff]  ;;  %v13566_v1 = vpop.permute.xlu0 %4949 }
 0x524   : > { %v10185_v51 = vpop.eup %10184  ;;  %v5834_v24 = vadd.f32 %v5793_v3, %v5706_v34  ;;  %v5883_v40 = vmul.f32 %v13551_v30, %v13538_v60  ;;  %5111 = vst.msk [vmem:[#allocation2 + $0xa8] sm:$0xff] %vm4799_vm4, %v5070_v43  ;;  %v4778_v12 = vmul.f32 %v10183_v61, %v15671_v29  ;;  %v5835_v34 = vadd.f32 %v5794_v2, %v5707_v6  ;;  %v5964_v36 = vld [vmem:[#allocation2 + $0x8a] sm:$0xff]  ;;  %v13564_v46 = vld [vmem:[#allocation2 + $0x99] sm:$0xff]  ;;  %v13572_v43 = vld [vmem:[%s15631_s6 + $0x5] ss:$0 sm:$0xff]  ;;  %v13592_v23 = vpop.f32.mrf.mxu1 }
 0x525   : > { %v10187_v25 = vpop.eup %10186  ;;  %v5922_v7 = vadd.f32 %v5881_v16, %v13482_v48  ;;  %v6008_v20 = vmul.f32 %v13125_v21, %v5962_v28  ;;  %15673 = vst [vmem:[#allocation69_spill] sm:$0xff] %v13566_v1  ;;  %v5071_v3 = vmul.f32 %v13556_v11, %v4777_v50  ;;  %9667 = vmatpush3.msra.mxu0 %v6675_v17  ;;  %v15674_v28 = vmov 0.0   ;;  %v13580_v48 = vld [vmem:[%s15631_s6 + $0x2] ss:$0 sm:$0xff]  ;;  %v5965_v29 = vld [vmem:[#allocation2 + $0x92] sm:$0xff]  ;;  %15675 = vst [vmem:[#allocation85_spill] sm:$0xff] %v13592_v23 }
 0x526   : > { %v5708_v61 = vadd.f32 %v5667_v44, %v5580_v58  ;;  %v5795_v2 = vmul.f32 %v13572_v43, %v5749_v53  ;;  %v5923_v16 = vadd.f32 %v5882_v27, %v5834_v24  ;;  %v5072_v6 = vmul.f32 %v13566_v1, %v4778_v12  ;;  %9668 = vmatprep.subr.mxu0 %v15674_v28  ;;  %v6091_v27 = vld [vmem:[#allocation2 + $0x83] sm:$0xff]  ;;  %v5151_v12 = vld [vmem:[#allocation2 + $0x8d] sm:$0xff]  ;;  %v5966_v23 = vld [vmem:[#allocation2 + $0x9a] sm:$0xff] }
 0x527   : > { %v5451_v58 = vmul.f32 %v13580_v48, %v13444_v22  ;;  %v6009_v44 = vmul.f32 %v13125_v21, %v5963_v57  ;;  %v6049_v50 = vadd.f32 %v6008_v20, %v5921_v8  ;;  %5112 = vst.msk [vmem:[#allocation2 + $0xb0] sm:$0xff] %vm4799_vm4, %v5071_v3  ;;  %v4656_v53 = vadd.f32 1.0, %v10185_v51  ;;  %v13586_v24 = vpop.eup %10188 }
 0x528   : > { %v5924_v17 = vadd.f32 %v5883_v40, %v5835_v34  ;;  %v6010_v1 = vmul.f32 %v13125_v21, %v5964_v36  ;;  %v5884_v11 = vmul.f32 %v13551_v30, %v13564_v46  ;;  %5113 = vst.msk [vmem:[#allocation2 + $0xb8] sm:$0xff] %vm4799_vm4, %v5072_v6  ;;  %v4657_v22 = vadd.f32 1.0, %v10187_v25  ;;  %v13594_v57 = vpop.eup %10190  ;;  %v6092_v40 = vld [vmem:[#allocation2 + $0x8b] sm:$0xff]  ;;  %v13606_v25 = vld [vmem:[%s15631_s6 + $0x7] ss:$0 sm:$0xff]  ;;  %v6093_v6 = vld [vmem:[#allocation2 + $0x93] sm:$0xff] }
 0x529   : > { %v5365_v8 = vadd.f32 %v5324_v62, %v5196_v38  ;;  %v5452_v51 = vmul.f32 %v13580_v48, %v13485_v26  ;;  %v6050_v20 = vadd.f32 %v6009_v44, %v5922_v7  ;;  %v6136_v3 = vmul.f32 %v13147_v35, %v6090_v52  ;;  %v13601_v36 = vld [vmem:[#allocation2 + $0x8f] sm:$0xff]  ;;  %v9657_v26 = vpop.f32.mrf.mxu1 }
 0x52a   : > { %v13599_v34 = vpop.eup %10192  ;;  %v5492_v21 = vadd.f32 %v5451_v58, %v5364_v42  ;;  %v5836_v28 = vadd.f32 %v5795_v2, %v5708_v61  ;;  %v6011_v38 = vmul.f32 %v13606_v25, %v5965_v29  ;;  %v6051_v62 = vadd.f32 %v6010_v1, %v5923_v16  ;;  %v5279_v61 = vld [vmem:[#allocation2 + $0x8e] sm:$0xff]  ;;  %v13613_v2 = vld [vmem:[#allocation2 + $0x97] sm:$0xff]  ;;  %v13618_v29 = vld [vmem:[%s15631_s6 + $0x8] ss:$0 sm:$0xff] }
 0x52b   : > { %v6137_v7 = vmul.f32 %v13147_v35, %v6091_v27  ;;  %v6177_v52 = vadd.f32 %v6136_v3, %v6049_v50  ;;  %v5197_v44 = vmul.f32 %v13525_v9, %v5151_v12  ;;  %10198 = vrcp.f32 %v4656_v53  ;;  %v13611_v42 = vpop.eup %10194  ;;  %v13625_v27 = vpop.f32.mrf.mxu1 }
 0x52c   : > { %v6052_v58 = vadd.f32 %v6011_v38, %v5924_v17  ;;  %v6138_v1 = vmul.f32 %v13618_v29, %v6092_v40  ;;  %v5925_v16 = vadd.f32 %v5884_v11, %v5836_v28  ;;  %10200 = vrcp.f32 %v4657_v22  ;;  %15676 = vst [vmem:[#allocation86_spill] sm:$0xff] %v13625_v27  ;;  %v5622_v38 = vld [vmem:[#allocation2 + $0x90] sm:$0xff] }
 0x52d   : > { %v6178_v35 = vadd.f32 %v6137_v7, %v6050_v20  ;;  %v5540_v50 = vmul.f32 %v13506_v13, %v13601_v36  ;;  %v6139_v53 = vmul.f32 %v13618_v29, %v6093_v6  ;;  %10202 = vpow2.f32 %v13476_v0  ;;  %v6094_v0 = vld [vmem:[#allocation2 + $0x9b] sm:$0xff]  ;;  %v9660_v20 = vpop.f32.mrf.mxu1 }
 0x52e   : > { %v6179_v12 = vadd.f32 %v6138_v1, %v6051_v62  ;;  %v6012_v17 = vmul.f32 %v13606_v25, %v5966_v23  ;;  %10204 = vpow2.f32 %v13488_v47  ;;  %v8372_v3 = vmul.f32 -1.442695, %v13499_v10  ;;  %v13630_v40 = vpop.eup %10196  ;;  %v13671_v1 = vld [vmem:[#allocation2 + $0xa1] sm:$0xff]  ;;  %v5280_v27 = vld [vmem:[#allocation2 + $0x96] sm:$0xff] }
 0x52f   : > { %v13633_v11 = vadd.f32 %v13165_v14, %v6177_v52  ;;  %v5325_v28 = vmul.f32 %v13531_v56, %v5279_v61  ;;  %v5541_v22 = vmul.f32 %v13506_v13, %v13613_v2  ;;  %10206 = vpow2.f32 %v13491_v63  ;;  %v13644_v14 = vld [vmem:[%s15638_s7] ss:$0 sm:$0xff]  ;;  %v5623_v52 = vld [vmem:[#allocation2 + $0x98] sm:$0xff] }
 0x530   : > { %v6180_v23 = vadd.f32 %v6139_v53, %v6052_v58  ;;  %v6053_v62 = vadd.f32 %v6012_v17, %v5925_v16  ;;  %10208 = vpow2.f32 %v13511_v39  ;;  %v8373_v47 = vmul.f32 -1.442695, %v13515_v19  ;;  %v13677_v53 = vpop.f32.mrf.mxu1 }
 0x531   : > { %v5493_v6 = vadd.f32 %v5452_v51, %v5365_v8  ;;  %v13647_v26 = vadd.f32 %v13644_v14, %v6178_v35  ;;  %v5581_v7 = vadd.f32 %v5540_v50, %v5492_v21  ;;  %10210 = vpow2.f32 %v13541_v37  ;;  %v13662_v21 = vld [vmem:[%s15631_s6 + $0x4] ss:$0 sm:$0xff]  ;;  %15678 = vst [vmem:[#allocation88_spill] sm:$0xff] %v13677_v53  ;;  %v5152_v53 = vld [vmem:[#allocation2 + $0x95] sm:$0xff] }
 0x532   : > { %v13652_v63 = vmul.f32 %v13586_v24, %v13329_v18  ;;  %v13655_v39 = vadd.f32 %v13644_v14, %v6179_v12  ;;  %v6140_v8 = vmul.f32 %v13618_v29, %v6094_v0  ;;  %10212 = vpow2.f32 %v8372_v3  ;;  %v13665_v18 = vld [vmem:[#allocation2 + $0x9f] sm:$0xff] }
 0x533   : > { %10214 = vrcp.f32 %v13501_v55  ;;  %v5366_v51 = vadd.f32 %v5325_v28, %v5197_v44  ;;  %v5582_v61 = vadd.f32 %v5541_v22, %v5493_v6  ;;  %v5668_v37 = vmul.f32 %v13662_v21, %v5622_v38  ;;  %v13688_v22 = vld [vmem:[#allocation2 + $0xa9] sm:$0xff] }
 0x534   : > { %15677 = vst [vmem:[#allocation87_spill] sm:$0xff] %v13652_v63  ;;  %v8405_v24 = vmul.f32 -1.442695, %v13633_v11  ;;  %v13669_v58 = vadd.f32 %v13644_v14, %v6180_v23  ;;  %v6181_v16 = vadd.f32 %v6140_v8, %v6053_v62  ;;  %10216 = vpow2.f32 %v8373_v47 }
 0x535   : > { %v8406_v55 = vmul.f32 -1.442695, %v13647_v26  ;;  %v5669_v44 = vmul.f32 %v13662_v21, %v5623_v52  ;;  %v5709_v35 = vadd.f32 %v5668_v37, %v5581_v7  ;;  %v5796_v50 = vmul.f32 %v13572_v43, %v13538_v60 }
 0x536   : > { %v13681_v12 = vmul.f32 %v13594_v57, %v13338_v32  ;;  %v5453_v17 = vmul.f32 %v13580_v48, %v13601_v36  ;;  %v8407_v3 = vmul.f32 -1.442695, %v13655_v39  ;;  %v5542_v28 = vmul.f32 %v13506_v13, %v13665_v18  ;;  %v9661_v57 = vpop.f32.mrf.mxu1 }
 0x537   : > { %v6387_v0 = vadd.f32 1.0, %v13599_v34  ;;  %v5710_v20 = vadd.f32 %v5669_v44, %v5582_v61  ;;  %v5797_v60 = vmul.f32 %v13572_v43, %v13564_v46  ;;  %v5885_v32 = vmul.f32 %v13551_v30, %v13671_v1  ;;  %v5624_v46 = vld [vmem:[#allocation2 + $0xa0] sm:$0xff] }
 0x538   : > { %15679 = vst [vmem:[#allocation89_spill] sm:$0xff] %v13681_v12  ;;  %v10199_v38 = vpop.eup %10198  ;;  %10218 = vpow2.f32 %v8405_v24  ;;  %v5494_v36 = vadd.f32 %v5453_v17, %v5366_v51  ;;  %v8408_v23 = vmul.f32 -1.442695, %v13669_v58  ;;  %v13697_v62 = vadd.f32 %v13644_v14, %v6181_v16  ;;  %v13705_v52 = vpop.f32.mrf.mxu1  ;;  %v5967_v24 = vld [vmem:[#allocation2 + $0xa2] sm:$0xff]  ;;  %v15682_v17 = vld [vmem:[#allocation53_spill] sm:$0xff] }
 0x539   : > { %v10201_v47 = vpop.eup %10200  ;;  %v13701_v34 = vadd.f32 %v13473_v54, %v13410_v49  ;;  %10220 = vpow2.f32 %v8406_v55  ;;  %v5837_v6 = vadd.f32 %v5796_v50, %v5709_v35  ;;  %v5886_v7 = vmul.f32 %v13551_v30, %v13688_v22  ;;  %15680 = vst [vmem:[#allocation90_spill] sm:$0xff] %v13705_v52  ;;  %v15681_v54 = vld [vmem:[#allocation52_spill] sm:$0xff] }
 0x53a   : > { %v10203_v8 = vpop.eup %10202  ;;  %v13709_v51 = vsel %vm4799_vm4, %v13467_v31, 0.0  ;;  %v6388_v61 = vadd.f32 1.0, %v13611_v42  ;;  %10222 = vpow2.f32 %v8407_v3  ;;  %v5583_v37 = vadd.f32 %v5542_v28, %v5494_v36  ;;  %v9664_v35 = vpop.f32.mrf.mxu1  ;;  %v5968_v3 = vld [vmem:[#allocation2 + $0xaa] sm:$0xff] }
 0x53b   : > { %v10205_v49 = vpop.eup %10204  ;;  %v13714_v16 = vmul.f32 %v13652_v63, %v15681_v54  ;;  %10224 = vrcp.f32 %v6387_v0  ;;  %v5838_v55 = vadd.f32 %v5797_v60, %v5710_v20  ;;  %v5926_v44 = vadd.f32 %v5885_v32, %v5837_v6  ;;  %v15683_v54 = vld [vmem:[#allocation71_spill] sm:$0xff]  ;;  %v6095_v6 = vld [vmem:[#allocation2 + $0xa3] sm:$0xff]  ;;  %v13723_v35 = vpop.permute.xlu0 %4959 }
 0x53c   : > { %v10207_v50 = vpop.eup %10206  ;;  %v6548_v57 = vmul.f32 %v13681_v12, %v15682_v17  ;;  %10226 = vpow2.f32 %v8408_v23  ;;  %v5670_v31 = vmul.f32 %v13662_v21, %v5624_v46  ;;  %v8409_v42 = vmul.f32 -1.442695, %v13697_v62  ;;  %v4509_v20 = vpop.f32.mrf.mxu1  ;;  %15684 = vst [vmem:[#allocation71_spill] sm:$0xff] %v13723_v35 }
 0x53d   : > { %v10209_v28 = vpop.eup %10208  ;;  %v6013_v36 = vmul.f32 %v13606_v25, %v5967_v24  ;;  %v5927_v52 = vadd.f32 %v5886_v7, %v5838_v55  ;;  %v4779_v63 = vmul.f32 %v10199_v38, %v15683_v54  ;;  %v4780_v0 = vmul.f32 %v10201_v47, %v13421_v4  ;;  %v13725_v23 = vpop.permute.xlu1 %4954  ;;  %v6096_v54 = vld [vmem:[#allocation2 + $0xab] sm:$0xff] }
 0x53e   : > { %v10211_v60 = vpop.eup %10210  ;;  %10228 = vrcp.f32 %v6388_v61  ;;  %v5711_v32 = vadd.f32 %v5670_v31, %v5583_v37  ;;  %15685 = vst [vmem:[#allocation91_spill] sm:$0xff] %v13725_v23  ;;  %v4658_v46 = vadd.f32 1.0, %v10203_v8  ;;  %v4659_v17 = vadd.f32 1.0, %v10205_v49  ;;  %v9665_v47 = vpop.f32.mrf.mxu1  ;;  %v13732_v55 = vld [vmem:[#allocation2 + $0xb1] sm:$0xff] }
 0x53f   : > { %v10213_v12 = vpop.eup %10212  ;;  %v6054_v24 = vadd.f32 %v6013_v36, %v5926_v44  ;;  %v6014_v7 = vmul.f32 %v13606_v25, %v5968_v3  ;;  %v5073_v38 = vmul.f32 %v13725_v23, %v4779_v63  ;;  %v5074_v4 = vmul.f32 %v13723_v35, %v4780_v0 }
 0x540   : > { %v10215_v61 = vpop.eup %10214  ;;  %v5798_v37 = vmul.f32 %v13572_v43, %v13671_v1  ;;  %10230 = vpow2.f32 %v8409_v42  ;;  %v4660_v8 = vadd.f32 1.0, %v10207_v50  ;;  %v4661_v49 = vadd.f32 1.0, %v10209_v28 }
 0x541   : > { %v10217_v31 = vpop.eup %10216  ;;  %v6141_v44 = vmul.f32 %v13618_v29, %v6095_v6  ;;  %v6055_v36 = vadd.f32 %v6014_v7, %v5927_v52  ;;  %5114 = vst.msk [vmem:[#allocation2 + $0xc0] sm:$0xff] %vm4799_vm4, %v5073_v38  ;;  %5115 = vst.msk [vmem:[#allocation2 + $0xc8] sm:$0xff] %vm4799_vm4, %v5074_v4  ;;  %10232 = vrcp.f32 %v4658_v46  ;;  %v4662_v63 = vadd.f32 1.0, %v10211_v60  ;;  %v5153_v60 = vld [vmem:[#allocation2 + $0x9d] sm:$0xff]  ;;  %v13753_v4 = vld [vmem:[#allocation2 + $0xa7] sm:$0xff] }
 0x542   : > { %v5198_v3 = vmul.f32 %v13525_v9, %v5152_v53  ;;  %v5326_v1 = vmul.f32 %v13531_v56, %v5280_v27  ;;  %10234 = vrcp.f32 %v4659_v17  ;;  %v4663_v42 = vadd.f32 1.0, %v10213_v12  ;;  %v5281_v46 = vld [vmem:[#allocation2 + $0x9e] sm:$0xff]  ;;  %v13744_v27 = vpop.permute.xlu1 %4964 }
 0x543   : > { %v6182_v0 = vadd.f32 %v6141_v44, %v6054_v24  ;;  %v6142_v50 = vmul.f32 %v13618_v29, %v6096_v54  ;;  %v5887_v28 = vmul.f32 %v13551_v30, %v13732_v55  ;;  %10236 = vrcp.f32 %v4660_v8  ;;  %15686 = vst [vmem:[#allocation92_spill] sm:$0xff] %v13744_v27 }
 0x544   : > { %10238 = vrcp.f32 %v4661_v49  ;;  %v4664_v52 = vadd.f32 1.0, %v10217_v31  ;;  %v6590_v6 = vadd.f32 %v13709_v51, %v13701_v34  ;;  %v5839_v53 = vadd.f32 %v5798_v37, %v5711_v32  ;;  %v5969_v34 = vld [vmem:[#allocation2 + $0xb2] sm:$0xff] }
 0x545   : > { %v10219_v20 = vpop.eup %10218  ;;  %v6183_v7 = vadd.f32 %v6142_v50, %v6055_v36  ;;  %10240 = vrcp.f32 %v4662_v63  ;;  %v6591_v17 = vsel %vm4799_vm4, %v13714_v16, 0.0  ;;  %v6593_v24 = vsel %vm4799_vm4, %v6548_v57, 0.0  ;;  %v13768_v36 = vpop.permute.xlu0 %4969  ;;  %v15690_v50 = vld [vmem:[#allocation54_spill] sm:$0xff] }
 0x546   : > { %v10221_v12 = vpop.eup %10220  ;;  %v13751_v38 = vmul.f32 %v13630_v40, %v13364_v15  ;;  %10242 = vrcp.f32 %v4663_v42  ;;  %v5367_v32 = vadd.f32 %v5326_v1, %v5198_v3  ;;  %v5454_v47 = vmul.f32 %v13580_v48, %v13613_v2  ;;  %15688 = vst [vmem:[#allocation94_spill] sm:$0xff] %v13768_v36  ;;  %v6097_v42 = vld [vmem:[#allocation2 + $0xb3] sm:$0xff] }
 0x547   : > { %v10223_v51 = vpop.eup %10222  ;;  %v13758_v37 = vadd.f32 %v13644_v14, %v6182_v0  ;;  %v5928_v54 = vadd.f32 %v5887_v28, %v5839_v53  ;;  %v6389_v8 = vadd.f32 1.0, %v10219_v20  ;;  %v5199_v57 = vmul.f32 %v13525_v9, %v5153_v60  ;;  %v13776_v60 = vld [vmem:[#allocation2 + $0xaf] sm:$0xff]  ;;  %v13778_v53 = vpop.permute.xlu1 %4974 }
 0x548   : > { %15687 = vst [vmem:[#allocation93_spill] sm:$0xff] %v13751_v38  ;;  %v10225_v16 = vpop.eup %10224  ;;  %v5327_v15 = vmul.f32 %v13531_v56, %v5281_v46  ;;  %10244 = vrcp.f32 %v4664_v52  ;;  %v6390_v49 = vadd.f32 1.0, %v10221_v12  ;;  %v5543_v31 = vmul.f32 %v13506_v13, %v13753_v4  ;;  %15691 = vst [vmem:[#allocation96_spill] sm:$0xff] %v13778_v53 }
 0x549   : > { %v10227_v40 = vpop.eup %10226  ;;  %v13765_v44 = vadd.f32 %v13644_v14, %v6183_v7  ;;  %v6015_v2 = vmul.f32 %v13606_v25, %v5969_v34  ;;  %v6592_v63 = vadd.f32 %v6591_v17, %v6590_v6  ;;  %v13771_v3 = vmul.f32 %v10215_v61, %v13375_v5  ;;  %v5625_v5 = vld [vmem:[#allocation2 + $0xa8] sm:$0xff] }
 0x54a   : > { %v6391_v1 = vadd.f32 1.0, %v10223_v51  ;;  %v6549_v28 = vmul.f32 %v13751_v38, %v15690_v50  ;;  %v5495_v52 = vadd.f32 %v5454_v47, %v5367_v32  ;;  %v8410_v20 = vmul.f32 -1.442695, %v13758_v37  ;;  %v15692_v47 = vld [vmem:[#allocation55_spill] sm:$0xff] }
 0x54b   : > { %15689 = vst [vmem:[#allocation95_spill] sm:$0xff] %v13771_v3  ;;  %v10229_v0 = vpop.eup %10228  ;;  %v6056_v46 = vadd.f32 %v6015_v2, %v5928_v54  ;;  %v13780_v7 = vadd.f32 %v6593_v24, %v6592_v63  ;;  %10246 = vrcp.f32 %v6389_v8  ;;  %v6392_v6 = vadd.f32 1.0, %v10227_v40 }
 0x54c   : > { %v5368_v61 = vadd.f32 %v5327_v15, %v5199_v57  ;;  %10248 = vrcp.f32 %v6390_v49  ;;  %v5584_v17 = vadd.f32 %v5543_v31, %v5495_v52  ;;  %v8411_v34 = vmul.f32 -1.442695, %v13765_v44  ;;  %v13792_v49 = vpop.permute.xlu0 %4979 }
 0x54d   : > { %v10231_v12 = vpop.eup %10230  ;;  %v6143_v51 = vmul.f32 %v13618_v29, %v6097_v42  ;;  %v6550_v50 = vmul.f32 %v13771_v3, %v15692_v47  ;;  %10250 = vrcp.f32 %v6391_v1  ;;  %v5455_v24 = vmul.f32 %v13580_v48, %v13665_v18  ;;  %15693 = vst [vmem:[#allocation97_spill] sm:$0xff] %v13792_v49  ;;  %v13797_v1 = vld [vmem:[#allocation2 + $0xb9] sm:$0xff]  ;;  %v15695_v18 = vld [vmem:[#allocation65_spill] sm:$0xff] }
 0x54e   : > { %v10233_v32 = vpop.eup %10232  ;;  %v5544_v54 = vmul.f32 %v13506_v13, %v13776_v60  ;;  %v6595_v57 = vsel %vm4799_vm4, %v6549_v28, 0.0  ;;  %v5671_v15 = vmul.f32 %v13662_v21, %v5625_v5  ;;  %10252 = vpow2.f32 %v8410_v20  ;;  %v13808_v5 = vpop.permute.xlu1 %4984 }
 0x54f   : > { %v10235_v8 = vpop.eup %10234  ;;  %v6184_v40 = vadd.f32 %v6143_v51, %v6056_v46  ;;  %v13795_v2 = vmul.f32 %v10225_v16, %v13440_v33  ;;  %10254 = vrcp.f32 %v6392_v6  ;;  %v5496_v63 = vadd.f32 %v5455_v24, %v5368_v61  ;;  %15697 = vst [vmem:[#allocation99_spill] sm:$0xff] %v13808_v5  ;;  %v5626_v6 = vld [vmem:[#allocation2 + $0xb0] sm:$0xff] }
 0x550   : > { %v10237_v31 = vpop.eup %10236  ;;  %v13801_v42 = vadd.f32 %v13417_v41, %v15695_v18  ;;  %v13804_v28 = vmul.f32 %v10229_v0, %v13451_v45  ;;  %v5712_v20 = vadd.f32 %v5671_v15, %v5584_v17  ;;  %v5799_v46 = vmul.f32 %v13572_v43, %v13688_v22  ;;  %v15698_v51 = vld [vmem:[#allocation82_spill] sm:$0xff]  ;;  %v15699_v18 = vld [vmem:[#allocation83_spill] sm:$0xff]  ;;  %v15700_v22 = vld [vmem:[#allocation61_spill] sm:$0xff]  ;;  %v13827_v38 = vpop.permute.xlu0 %4989 }
 0x551   : > { %15694 = vst [vmem:[#allocation98_spill] sm:$0xff] %v13795_v2  ;;  %v10239_v52 = vpop.eup %10238  ;;  %10256 = vpow2.f32 %v8411_v34  ;;  %v5585_v16 = vadd.f32 %v5544_v54, %v5496_v63  ;;  %v4781_v61 = vmul.f32 %v10233_v32, %v13448_v59  ;;  %v4782_v24 = vmul.f32 %v10235_v8, %v15698_v51  ;;  %v15701_v34 = vld [vmem:[#allocation62_spill] sm:$0xff]  ;;  %15703 = vst [vmem:[#allocation82_spill] sm:$0xff] %v13827_v38 }
 0x552   : > { %15696 = vst [vmem:[#allocation65_spill] sm:$0xff] %v13804_v28  ;;  %v10241_v33 = vpop.eup %10240  ;;  %v4783_v47 = vmul.f32 %v10237_v31, %v15699_v18  ;;  %v13814_v45 = vadd.f32 %v13644_v14, %v6184_v40  ;;  %v5888_v0 = vmul.f32 %v13551_v30, %v13797_v1  ;;  %v4784_v17 = vmul.f32 %v10239_v52, %v15700_v22  ;;  %v15702_v31 = vld [vmem:[#allocation56_spill] sm:$0xff] }
 0x553   : > { %v10243_v3 = vpop.eup %10242  ;;  %v4785_v15 = vmul.f32 %v10241_v33, %v15701_v34  ;;  %v5075_v54 = vmul.f32 %v13744_v27, %v4781_v61  ;;  %v5076_v63 = vmul.f32 %v13768_v36, %v4782_v24  ;;  %v6551_v40 = vmul.f32 %v13795_v2, %v15702_v31  ;;  %v13830_v22 = vld [vmem:[#allocation2 + $0xc1] sm:$0xff]  ;;  %v13842_v24 = vpop.permute.xlu1 %4994 }
 0x554   : > { %v5077_v59 = vmul.f32 %v13778_v53, %v4783_v47  ;;  %v4786_v32 = vmul.f32 %v10243_v3, %v13499_v10  ;;  %v6393_v51 = vadd.f32 1.0, %v10231_v12  ;;  %v5672_v18 = vmul.f32 %v13662_v21, %v5626_v6  ;;  %v5970_v61 = vld [vmem:[#allocation2 + $0xba] sm:$0xff]  ;;  %15704 = vst [vmem:[#allocation83_spill] sm:$0xff] %v13842_v24 }
 0x555   : > { %v10245_v8 = vpop.eup %10244  ;;  %v5078_v52 = vmul.f32 %v13792_v49, %v4784_v17  ;;  %v5840_v33 = vadd.f32 %v5799_v46, %v5712_v20  ;;  %5116 = vst.msk [vmem:[#allocation2 + $0xd0] sm:$0xff] %vm4799_vm4, %v5075_v54  ;;  %5117 = vst.msk [vmem:[#allocation2 + $0xd8] sm:$0xff] %vm4799_vm4, %v5076_v63  ;;  %v5079_v10 = vmul.f32 %v13808_v5, %v4785_v15  ;;  %v6597_v47 = vsel %vm4799_vm4, %v6550_v50, 0.0 }
 0x556   : > { %5118 = vst.msk [vmem:[#allocation2 + $0xe0] sm:$0xff] %vm4799_vm4, %v5077_v59  ;;  %v5080_v3 = vmul.f32 %v13827_v38, %v4786_v32  ;;  %v4787_v12 = vmul.f32 %v10245_v8, %v13515_v19  ;;  %v5713_v6 = vadd.f32 %v5672_v18, %v5585_v16  ;;  %v5800_v20 = vmul.f32 %v13572_v43, %v13732_v55  ;;  %v15705_v16 = vld [vmem:[#allocation57_spill] sm:$0xff]  ;;  %v6098_v8 = vld [vmem:[#allocation2 + $0xbb] sm:$0xff] }
 0x557   : > { %v8412_v46 = vmul.f32 -1.442695, %v13814_v45  ;;  %5119 = vst.msk [vmem:[#allocation2 + $0xe8] sm:$0xff] %vm4799_vm4, %v5078_v52  ;;  %v6596_v17 = vadd.f32 %v6595_v57, %v13780_v7  ;;  %v5929_v34 = vadd.f32 %v5888_v0, %v5840_v33  ;;  %5120 = vst.msk [vmem:[#allocation2 + $0xf0] sm:$0xff] %vm4799_vm4, %v5079_v10  ;;  %v6552_v55 = vmul.f32 %v13804_v28, %v15705_v16  ;;  %v5154_v33 = vld [vmem:[#allocation2 + $0xa5] sm:$0xff]  ;;  %v5627_v38 = vld [vmem:[#allocation2 + $0xb8] sm:$0xff] }
 0x558   : > { %5121 = vst.msk [vmem:[#allocation2 + $0xf8] sm:$0xff] %vm4799_vm4, %v5080_v3  ;;  %v5081_v19 = vmul.f32 %v13842_v24, %v4787_v12  ;;  %v10247_v50 = vpop.eup %10246  ;;  %v6599_v15 = vsel %vm4799_vm4, %v6551_v40, 0.0  ;;  %v5889_v54 = vmul.f32 %v13551_v30, %v13830_v22  ;;  %10258 = vrcp.f32 %v6393_v51  ;;  %v5282_v10 = vld [vmem:[#allocation2 + $0xa6] sm:$0xff] }
 0x559   : > { %v10249_v63 = vpop.eup %10248  ;;  %v6598_v59 = vadd.f32 %v6597_v47, %v6596_v17  ;;  %v6016_v7 = vmul.f32 %v13606_v25, %v5970_v61  ;;  %v8374_v57 = vmul.f32 -1.442695, %v13801_v42  ;;  %v5841_v32 = vadd.f32 %v5800_v20, %v5713_v6  ;;  %v5971_v12 = vld [vmem:[#allocation2 + $0xc2] sm:$0xff] }
 0x55a   : > { %5122 = vst.msk [vmem:[#allocation2 + $0x100] sm:$0xff] %vm4799_vm4, %v5081_v19  ;;  %v10251_v0 = vpop.eup %10250  ;;  %10260 = vpow2.f32 %v8412_v46  ;;  %v13858_v40 = vmul.f32 %v10247_v50, %v13633_v11  ;;  %v15707_v51 = vld [vmem:[#allocation68_spill] sm:$0xff]  ;;  %v6601_v17 = vsel %vm4799_vm4, %v6552_v55, 0.0  ;;  %v15709_v46 = vld [vmem:[#allocation73_spill] sm:$0xff]  ;;  %v5200_v55 = vmul.f32 %v13525_v9, %v5154_v33 }
 0x55b   : > { %v10253_v18 = vpop.eup %10252  ;;  %v6600_v52 = vadd.f32 %v6599_v15, %v6598_v59  ;;  %v6057_v3 = vadd.f32 %v6016_v7, %v5929_v34  ;;  %v13862_v47 = vadd.f32 %v13417_v41, %v15707_v51  ;;  %v5930_v19 = vadd.f32 %v5889_v54, %v5841_v32  ;;  %v15708_v6 = vld [vmem:[#allocation72_spill] sm:$0xff] }
 0x55c   : > { %15706 = vst [vmem:[#allocation61_spill] sm:$0xff] %v13858_v40  ;;  %v10255_v61 = vpop.eup %10254  ;;  %v13867_v20 = vadd.f32 %v13417_v41, %v15708_v6  ;;  %v13871_v11 = vadd.f32 %v13417_v41, %v15709_v46  ;;  %v13874_v34 = vmul.f32 %v10249_v63, %v13647_v26  ;;  %v6144_v15 = vmul.f32 %v13618_v29, %v6098_v8  ;;  %v15711_v59 = vld [vmem:[#allocation76_spill] sm:$0xff]  ;;  %v15712_v46 = vld [vmem:[#allocation58_spill] sm:$0xff] }
 0x55d   : > { %10262 = vpow2.f32 %v8374_v57  ;;  %v13879_v7 = vadd.f32 %v13417_v41, %v15711_v59  ;;  %v5328_v54 = vmul.f32 %v13531_v56, %v5282_v10  ;;  %v6394_v32 = vadd.f32 1.0, %v10253_v18  ;;  %v6099_v57 = vld [vmem:[#allocation2 + $0xc3] sm:$0xff]  ;;  %v15714_v18 = vld [vmem:[#allocation59_spill] sm:$0xff] }
 0x55e   : > { %v10257_v50 = vpop.eup %10256  ;;  %15710 = vst [vmem:[#allocation62_spill] sm:$0xff] %v13874_v34  ;;  %v6017_v51 = vmul.f32 %v13606_v25, %v5971_v12  ;;  %v6602_v6 = vadd.f32 %v6601_v17, %v6600_v52  ;;  %v6553_v16 = vmul.f32 %v13858_v40, %v15712_v46  ;;  %v13887_v26 = vmul.f32 %v10251_v0, %v13655_v39  ;;  %v5155_v52 = vld [vmem:[#allocation2 + $0xad] sm:$0xff]  ;;  %v5412_v12 = vld [vmem:[#allocation2 + $0xb7] sm:$0xff]  ;;  %v15717_v40 = vld [vmem:[#allocation60_spill] sm:$0xff] }
 0x55f   : > { %v6185_v63 = vadd.f32 %v6144_v15, %v6057_v3  ;;  %v6395_v8 = vadd.f32 1.0, %v10257_v50  ;;  %v13890_v59 = vmul.f32 -1.442695, %v13862_v47  ;;  %v13893_v33 = vmul.f32 -1.442695, %v13867_v20  ;;  %v15715_v0 = vld [vmem:[#allocation78_spill] sm:$0xff] }
 0x560   : > { %15713 = vst [vmem:[#allocation68_spill] sm:$0xff] %v13887_v26  ;;  %v6058_v31 = vadd.f32 %v6017_v51, %v5930_v19  ;;  %v6554_v10 = vmul.f32 %v13874_v34, %v15714_v18  ;;  %v13898_v17 = vmul.f32 -1.442695, %v13871_v11  ;;  %v13901_v39 = vmul.f32 -1.442695, %v13879_v7  ;;  %v5283_v15 = vld [vmem:[#allocation2 + $0xae] sm:$0xff] }
 0x561   : > { %v13905_v3 = vadd.f32 %v13417_v41, %v15715_v0  ;;  %v13908_v19 = vmul.f32 %v10255_v61, %v13669_v58  ;;  %v5369_v50 = vadd.f32 %v5328_v54, %v5200_v55  ;;  %10264 = vrcp.f32 %v6394_v32  ;;  %v5156_v51 = vld [vmem:[#allocation2 + $0xb5] sm:$0xff] }
 0x562   : > { %v5284_v18 = vld [vmem:[#allocation2 + $0xb6] sm:$0xff]  ;;  %v6145_v46 = vmul.f32 %v13618_v29, %v6099_v57  ;;  %v6603_v34 = vsel %vm4799_vm4, %v6553_v16, 0.0  ;;  %v6555_v28 = vmul.f32 %v13887_v26, %v15717_v40  ;;  %v5456_v2 = vmul.f32 %v13580_v48, %v13753_v4 }
 0x563   : > { %15716 = vst [vmem:[#allocation72_spill] sm:$0xff] %v13908_v19  ;;  %v13917_v0 = vadd.f32 %v13644_v14, %v6185_v63  ;;  %v5201_v58 = vmul.f32 %v13525_v9, %v5155_v52  ;;  %10266 = vrcp.f32 %v6395_v8  ;;  %v5545_v61 = vmul.f32 %v13506_v13, %v5412_v12  ;;  %v15718_v4 = vld [vmem:[#allocation66_spill] sm:$0xff] }
 0x564   : > { %v6186_v55 = vadd.f32 %v6145_v46, %v6058_v31  ;;  %v6605_v54 = vsel %vm4799_vm4, %v6554_v10, 0.0  ;;  %v5329_v32 = vmul.f32 %v13531_v56, %v5283_v15  ;;  %v5202_v16 = vmul.f32 %v13525_v9, %v5156_v51  ;;  %v15719_v10 = vld [vmem:[#allocation84_spill] sm:$0xff] }
 0x565   : > { %v5330_v57 = vmul.f32 %v13531_v56, %v5284_v18  ;;  %v10259_v40 = vpop.eup %10258  ;;  %v6604_v26 = vadd.f32 %v6603_v34, %v6602_v6  ;;  %v6556_v63 = vmul.f32 %v13908_v19, %v15718_v4  ;;  %v5497_v24 = vadd.f32 %v5456_v2, %v5369_v50  ;;  %v15721_v18 = vld [vmem:[#allocation85_spill] sm:$0xff]  ;;  %v5157_v51 = vld [vmem:[#allocation2 + $0xbd] sm:$0xff] }
 0x566   : > { %v13928_v8 = vmul.f32 -1.442695, %v13905_v3  ;;  %v6607_v31 = vsel %vm4799_vm4, %v6555_v28, 0.0  ;;  %v8413_v46 = vmul.f32 -1.442695, %v13917_v0  ;;  %v13934_v15 = vadd.f32 %v13417_v41, %v15719_v10  ;;  %v5285_v4 = vld [vmem:[#allocation2 + $0xbe] sm:$0xff] }
 0x567   : > { %v10261_v52 = vpop.eup %10260  ;;  %v13938_v34 = vadd.f32 %v13417_v41, %v15721_v18  ;;  %v6606_v6 = vadd.f32 %v6605_v54, %v6604_v26  ;;  %v5457_v2 = vmul.f32 %v13580_v48, %v13776_v60  ;;  %v5586_v50 = vadd.f32 %v5545_v61, %v5497_v24  ;;  %v5413_v19 = vld [vmem:[#allocation2 + $0xbf] sm:$0xff] }
 0x568   : > { %15720 = vst [vmem:[#allocation73_spill] sm:$0xff] %v13934_v15  ;;  %v13943_v28 = vadd.f32 %v13644_v14, %v6186_v55  ;;  %v5370_v5 = vadd.f32 %v5329_v32, %v5201_v58  ;;  %v5371_v49 = vadd.f32 %v5330_v57, %v5202_v16  ;;  %v5458_v10 = vmul.f32 %v13580_v48, %v5412_v12  ;;  %v13954_v58 = vld [vmem:[#allocation2 + $0xc9] sm:$0xff]  ;;  %v10588_v18 = vld [vmem:[%s15623_s5] ss:$0 sm:$0xff]  ;;  %s567_s5 = scalar_lea.vmem [#allocation3], %s566_s24 }
 0x569   : > { %15722 = vst [vmem:[#allocation76_spill] sm:$0xff] %v13938_v34  ;;  %v5673_v53 = vmul.f32 %v13662_v21, %v5627_v38  ;;  %v6608_v41 = vadd.f32 %v6607_v31, %v6606_v6  ;;  %v6609_v26 = vsel %vm4799_vm4, %v6556_v63, 0.0  ;;  %v13949_v54 = vmul.f32 %v10259_v40, %v13697_v62  ;;  %v5158_v63 = vld [vmem:[#allocation2 + $0xc5] sm:$0xff]  ;;  %v15724_v6 = vld [vmem:[#allocation86_spill] sm:$0xff]  ;;  %s8023_s25 = sshll.u32 %s567_s5, 4  ;;  %s8024_s25 = int_to_ptr.vmem [resolvable:$true] %s8023_s25 }
 0x56a   : > { %v10263_v36 = vpop.eup %10262  ;;  %v6396_v60 = vadd.f32 1.0, %v10261_v52  ;;  %v5203_v24 = vmul.f32 %v13525_v9, %v5157_v51  ;;  %v5331_v61 = vmul.f32 %v13531_v56, %v5285_v4  ;;  %v5546_v55 = vmul.f32 %v13506_v13, %v5413_v19  ;;  %v5286_v52 = vld [vmem:[#allocation2 + $0xc6] sm:$0xff]  ;;  %p10614_p0 = scmp.lt.s32.totalorder %s8024_s25, %s10612_s0 }
 0x56b   : > { %15723 = vst [vmem:[#allocation78_spill] sm:$0xff] %v13949_v54  ;;  %10268 = vpow2.f32 %v8413_v46  ;;  %v5714_v12 = vadd.f32 %v5673_v53, %v5586_v50  ;;  %v5801_v38 = vmul.f32 %v13572_v43, %v13797_v1  ;;  %v8414_v32 = vmul.f32 -1.442695, %v13943_v28  ;;  %v5628_v31 = vld [vmem:[#allocation2 + $0xc0] sm:$0xff] }
 0x56c   : > { %v13960_v16 = vmul.f32 -1.442695, %v13934_v15  ;;  %v6610_v62 = vadd.f32 %v6609_v26, %v6608_v41  ;;  %v5498_v40 = vadd.f32 %v5457_v2, %v5370_v5  ;;  %v5499_v57 = vadd.f32 %v5458_v10, %v5371_v49  ;;  %v5414_v46 = vld [vmem:[#allocation2 + $0xc7] sm:$0xff]  ;;  %v15725_v5 = vld [vmem:[#allocation67_spill] sm:$0xff] }
 0x56d   : > { %v13963_v4 = vmul.f32 -1.442695, %v13938_v34  ;;  %10270 = vrcp.f32 %v6396_v60  ;;  %v5890_v53 = vmul.f32 %v13551_v30, %v13954_v58  ;;  %v4665_v1 = vadd.f32 1.0, %v10263_v36  ;;  %v15726_v41 = vld [vmem:[#allocation88_spill] sm:$0xff]  ;;  %v5972_v15 = vld [vmem:[#allocation2 + $0xca] sm:$0xff] }
 0x56e   : > { %v13971_v50 = vadd.f32 %v10588_v18, %v15724_v6  ;;  %v10265_v49 = vpop.eup %10264  ;;  %v6557_v2 = vmul.f32 %v13949_v54, %v15725_v5  ;;  %v5372_v51 = vadd.f32 %v5331_v61, %v5203_v24  ;;  %v5587_v10 = vadd.f32 %v5546_v55, %v5498_v40  ;;  %v15727_v5 = vld [vmem:[#allocation90_spill] sm:$0xff] }
 0x56f   : > { %v13976_v26 = vadd.f32 %v10588_v18, %v15726_v41  ;;  %v5842_v60 = vadd.f32 %v5801_v38, %v5714_v12  ;;  %v5204_v27 = vmul.f32 %v13525_v9, %v5158_v63  ;;  %v5332_v36 = vmul.f32 %v13531_v56, %v5286_v52  ;;  %v5415_v55 = vld [vmem:[#allocation2 + $0xcf] sm:$0xff] }
 0x570   : > { %10272 = vpow2.f32 %v8414_v32  ;;  %v10267_v35 = vpop.eup %10266  ;;  %v5459_v23 = vmul.f32 %v13580_v48, %v5413_v19  ;;  %v5674_v6 = vmul.f32 %v13662_v21, %v5628_v31  ;;  %v5547_v34 = vmul.f32 %v13506_v13, %v5414_v46  ;;  %v5629_v63 = vld [vmem:[#allocation2 + $0xc8] sm:$0xff] }
 0x571   : > { %v13984_v24 = vadd.f32 %v10588_v18, %v15727_v5  ;;  %v13987_v61 = vmul.f32 %v10265_v49, %v13758_v37  ;;  %v5931_v12 = vadd.f32 %v5890_v53, %v5842_v60  ;;  %10274 = vrcp.f32 %v4665_v1  ;;  %v5159_v18 = vld [vmem:[#allocation2 + $0xcd] sm:$0xff] }
 0x572   : > { %v13990_v38 = vmul.f32 -1.442695, %v13971_v50  ;;  %v6611_v32 = vsel %vm4799_vm4, %v6557_v2, 0.0  ;;  %v5500_v19 = vadd.f32 %v5459_v23, %v5372_v51  ;;  %v5715_v40 = vadd.f32 %v5674_v6, %v5587_v10  ;;  %v5287_v37 = vld [vmem:[#allocation2 + $0xce] sm:$0xff] }
 0x573   : > { %15728 = vst [vmem:[#allocation84_spill] sm:$0xff] %v13987_v61  ;;  %10276 = vpow2.f32 %v13890_v59  ;;  %v13995_v52 = vmul.f32 %v10267_v35, %v13765_v44  ;;  %v5373_v31 = vadd.f32 %v5332_v36, %v5204_v27  ;;  %v6018_v49 = vmul.f32 %v13606_v25, %v5972_v15  ;;  %v5758_v53 = vld [vmem:[#allocation2 + $0xd1] sm:$0xff] }
 0x574   : > { %10278 = vpow2.f32 %v13893_v33  ;;  %v5588_v1 = vadd.f32 %v5547_v34, %v5499_v57  ;;  %v5802_v5 = vmul.f32 %v13572_v43, %v13830_v22  ;;  %v5548_v23 = vmul.f32 %v13506_v13, %v5415_v55  ;;  %v6100_v2 = vld [vmem:[#allocation2 + $0xcb] sm:$0xff] }
 0x575   : > { %15729 = vst [vmem:[#allocation85_spill] sm:$0xff] %v13995_v52  ;;  %10280 = vpow2.f32 %v13898_v17  ;;  %v15730_v59 = vld [vmem:[#allocation70_spill] sm:$0xff]  ;;  %v5460_v27 = vmul.f32 %v13580_v48, %v5414_v46  ;;  %v6059_v44 = vadd.f32 %v6018_v49, %v5931_v12  ;;  %v5675_v15 = vmul.f32 %v13662_v21, %v5629_v63 }
 0x576   : > { %v6558_v35 = vmul.f32 %v13987_v61, %v15730_v59  ;;  %10282 = vpow2.f32 %v13901_v39  ;;  %v5205_v33 = vmul.f32 %v13525_v9, %v5159_v18  ;;  %v5333_v34 = vmul.f32 %v13531_v56, %v5287_v37  ;;  %v15731_v51 = vld [vmem:[#allocation74_spill] sm:$0xff] }
 0x577   : > { %v5891_v22 = vmul.f32 %v13551_v30, %v5758_v53  ;;  %v6612_v57 = vadd.f32 %v6611_v32, %v6610_v62  ;;  %v6559_v17 = vmul.f32 %v13995_v52, %v15731_v51  ;;  %v5630_v10 = vld [vmem:[#allocation2 + $0xd0] sm:$0xff]  ;;  %v6146_v41 = vmul.f32 %v13618_v29, %v6100_v2  ;;  %v14017_v56 = vld [vmem:[#allocation2 + $0xd9] sm:$0xff] }
 0x578   : > { %v10269_v13 = vpop.eup %10268  ;;  %v14015_v46 = vmul.f32 -1.442695, %v13976_v26  ;;  %v5501_v39 = vadd.f32 %v5460_v27, %v5373_v31  ;;  %v5716_v60 = vadd.f32 %v5675_v15, %v5588_v1  ;;  %v5843_v36 = vadd.f32 %v5802_v5, %v5715_v40  ;;  %v5160_v9 = vld [vmem:[#allocation2 + $0xd5] sm:$0xff]  ;;  %v14028_v5 = vld [vmem:[%s15631_s6] ss:$0 sm:$0xff] }
 0x579   : > { %v5589_v6 = vadd.f32 %v5548_v23, %v5500_v19  ;;  %v5288_v12 = vld [vmem:[#allocation2 + $0xd6] sm:$0xff]  ;;  %v6613_v63 = vsel %vm4799_vm4, %v6558_v35, 0.0  ;;  %v5461_v62 = vmul.f32 %v13580_v48, %v5415_v55  ;;  %v5803_v32 = vmul.f32 %v13572_v43, %v13954_v58  ;;  %v14034_v58 = vld [vmem:[%s15631_s6 + $0x1] ss:$0 sm:$0xff] }
 0x57a   : > { %v6187_v18 = vadd.f32 %v6146_v41, %v6059_v44  ;;  %v5416_v37 = vld [vmem:[#allocation2 + $0xd7] sm:$0xff]  ;;  %v10271_v2 = vpop.eup %10270  ;;  %v6397_v51 = vadd.f32 1.0, %v10269_v13  ;;  %v5374_v31 = vadd.f32 %v5333_v34, %v5205_v33  ;;  %v5676_v40 = vmul.f32 %v13662_v21, %v5630_v10  ;;  %v6673_v44 = vld [vmem:[%s15672_s8 + $0x8] sm:$0xff]  ;;  %v14048_v34 = vld [vmem:[%s15631_s6 + $0x3] ss:$0 sm:$0xff] }
 0x57b   : > { %v5973_v49 = vld [vmem:[#allocation2 + $0xd2] sm:$0xff]  ;;  %v5932_v19 = vadd.f32 %v5891_v22, %v5843_v36  ;;  %v6615_v1 = vsel %vm4799_vm4, %v6559_v17, 0.0  ;;  %v5206_v55 = vmul.f32 %v14028_v5, %v5160_v9  ;;  %v5334_v23 = vmul.f32 %v14034_v58, %v5288_v12 }
 0x57c   : > { %v5892_v35 = vmul.f32 %v13551_v30, %v14017_v56  ;;  %v6674_v27 = vld [vmem:[%s15672_s8 + $0x10] sm:$0xff]  ;;  %v5717_v33 = vadd.f32 %v5676_v40, %v5589_v6  ;;  %v5549_v22 = vmul.f32 %v14048_v34, %v5416_v37  ;;  %v5804_v13 = vmul.f32 %v13572_v43, %v5758_v53  ;;  %v5631_v6 = vld [vmem:[#allocation2 + $0xd8] sm:$0xff]  ;;  %v6672_v40 = vld [vmem:[%s15672_s8] sm:$0xff]  ;;  %s10607_s8 = scalar_lea.vmem %s8024_s25, 16 }
 0x57d   : > { %v10273_v15 = vpop.eup %10272  ;;  %v6019_v30 = vmul.f32 %v13606_v25, %v5973_v49  ;;  %9669 = vmatpush3.msra.mxu0 %v6674_v27  ;;  %v6614_v17 = vadd.f32 %v6613_v63, %v6612_v57  ;;  %v14054_v10 = vmul.f32 %v10271_v2, %v13814_v45  ;;  %v5844_v41 = vadd.f32 %v5803_v32, %v5716_v60  ;;  %v6101_v9 = vld [vmem:[#allocation2 + $0xd3] sm:$0xff]  ;;  %v5161_v2 = vld [vmem:[#allocation2 + $0xdd] sm:$0xff]  ;;  %p10608_p11 = scmp.ne.s32.totalorder %s8024_s25, %s10607_s8  ;;  %p10615_p1 = scmp.lt.s32.totalorder %s10613_s3, %s10607_s8 }
 0x57e   : > { %v14057_v36 = vadd.f32 %v13644_v14, %v6187_v18  ;;  %v15733_v12 = vmov 0.0   ;;  %v10275_v43 = vpop.eup %10274  ;;  %10284 = vrcp.f32 %v6397_v51  ;;  %v5502_v53 = vadd.f32 %v5461_v62, %v5374_v31  ;;  %v5974_v63 = vld [vmem:[#allocation2 + $0xda] sm:$0xff] }
 0x57f   : > { %15732 = vst [vmem:[#allocation86_spill] sm:$0xff] %v14054_v10  ;;  %9670 = vmatprep.subr.mxu0 %v15733_v12  ;;  %v14064_v57 = vmul.f32 %v13580_v48, %v5416_v37  ;;  %v6060_v45 = vadd.f32 %v6019_v30, %v5932_v19  ;;  %v14066_v32 = vadd.f32 %v6615_v1, %v6614_v17  ;;  %v6398_v18 = vadd.f32 1.0, %v10273_v15  ;;  %v5289_v27 = vld [vmem:[#allocation2 + $0xde] sm:$0xff]  ;;  %v14079_v15 = vpop.permute.xlu0 %4999  ;;  %p10609_p12 = pnand %p10608_p11, %p10806_p5  ;;  %p10616_p2 = por %p10615_p1, %p10614_p0 }
 0x580   : > { %9671 = vmatpush3.msra.mxu0 %v6673_v44  ;;  %v10277_v60 = vpop.eup %10276  ;;  %v5375_v49 = vadd.f32 %v5334_v23, %v5206_v55  ;;  %v5933_v59 = vadd.f32 %v5892_v35, %v5844_v41  ;;  %v5590_v61 = vadd.f32 %v5549_v22, %v5501_v39  ;;  %v5677_v51 = vmul.f32 %v13662_v21, %v5631_v6  ;;  %v5417_v37 = vld [vmem:[#allocation2 + $0xdf] sm:$0xff] }
 0x581   : > { %9672 = vmatprep.subr.mxu0 %v15733_v12  ;;  %v10279_v52 = vpop.eup %10278  ;;  %v5845_v62 = vadd.f32 %v5804_v13, %v5717_v33  ;;  %v6147_v48 = vmul.f32 %v13618_v29, %v6101_v9  ;;  %v15734_v19 = vld [vmem:[#allocation79_spill] sm:$0xff]  ;;  %v8415_v55 = vmul.f32 -1.442695, %v14057_v36  ;;  %v6020_v23 = vmul.f32 %v13606_v25, %v5974_v63  ;;  %15735 = vst [vmem:[#allocation88_spill] sm:$0xff] %v14079_v15  ;;  %v5418_v9 = vld [vmem:[#allocation2 + $0xe7] sm:$0xff]  ;;  %p10610_p13 = pneg %p10609_p12 }
 0x582   : > { %9673 = vmatpush3.msra.mxu0 %v6672_v40  ;;  %v10281_v31 = vpop.eup %10280  ;;  %v6560_v1 = vmul.f32 %v14054_v10, %v15734_v19  ;;  %v14075_v35 = vld [vmem:[#allocation2 + $0xe1] sm:$0xff]  ;;  %v4788_v44 = vmul.f32 %v10275_v43, %v13801_v42  ;;  %v5207_v22 = vmul.f32 %v14028_v5, %v5161_v2  ;;  %v5335_v13 = vmul.f32 %v14034_v58, %v5289_v27  ;;  %v5762_v19 = vld [vmem:[#allocation2 + $0xf1] sm:$0xff] }
 0x583   : > { %9682 = vmatprep.subr.bf16.mxu0 %v15733_v12  ;;  %v10283_v39 = vpop.eup %10282  ;;  %v6188_v33 = vadd.f32 %v6147_v48, %v6060_v45  ;;  %v6102_v30 = vld [vmem:[#allocation2 + $0xdb] sm:$0xff]  ;;  %v4666_v17 = vadd.f32 1.0, %v10277_v60  ;;  %10286 = vrcp.f32 %v6398_v18  ;;  %v5550_v41 = vmul.f32 %v14048_v34, %v5417_v37  ;;  %v14088_v42 = vld [vmem:[%s15631_s6 + $0x6] ss:$0 sm:$0xff]  ;;  %v14161_v54 = vpop.permute.xlu0 %5009  ;;  %p10617_p3 = pnand %p10616_p2, %p10610_p13 }
 0x584   : > { %v6061_v25 = vadd.f32 %v6020_v23, %v5933_v59  ;;  %v5082_v6 = vmul.f32 %v14079_v15, %v4788_v44  ;;  %v5893_v40 = vmul.f32 %v14088_v42, %v14075_v35  ;;  %v4667_v43 = vadd.f32 1.0, %v10279_v52  ;;  %v5162_v59 = vld [vmem:[#allocation2 + $0xe5] sm:$0xff]  ;;  %v14101_v23 = vld [vmem:[%s15631_s6 + $0x2] ss:$0 sm:$0xff]  ;;  %15738 = vst [vmem:[#allocation101_spill] sm:$0xff] %v14161_v54 }
 0x585   : > { %10288 = vrcp.f32 %v4666_v17  ;;  %v4668_v45 = vadd.f32 1.0, %v10281_v31  ;;  %v6617_v63 = vsel %vm4799_vm4, %v6560_v1, 0.0  ;;  %v6148_v60 = vmul.f32 %v13618_v29, %v6102_v30  ;;  %v5290_v18 = vld [vmem:[#allocation2 + $0xe6] sm:$0xff] }
 0x586   : > { %10290 = vpow2.f32 %v8415_v55  ;;  %5123 = vst.msk [vmem:[#allocation2 + $0x108] sm:$0xff] %vm4799_vm4, %v5082_v6  ;;  %v4669_v2 = vadd.f32 1.0, %v10283_v39  ;;  %v14096_v27 = vadd.f32 %v13644_v14, %v6188_v33  ;;  %v5376_v48 = vadd.f32 %v5335_v13, %v5207_v22  ;;  %v5632_v31 = vld [vmem:[#allocation2 + $0xe0] sm:$0xff] }
 0x587   : > { %v5463_v52 = vmul.f32 %v14101_v23, %v5417_v37  ;;  %10292 = vrcp.f32 %v4667_v43  ;;  %v5591_v1 = vadd.f32 %v5550_v41, %v5502_v53  ;;  %v6189_v29 = vadd.f32 %v6148_v60, %v6061_v25  ;;  %v5975_v44 = vld [vmem:[#allocation2 + $0xe2] sm:$0xff] }
 0x588   : > { %v5551_v55 = vmul.f32 %v14048_v34, %v5418_v9  ;;  %10294 = vrcp.f32 %v4668_v45  ;;  %v5208_v39 = vmul.f32 %v14028_v5, %v5162_v59  ;;  %v5336_v14 = vmul.f32 %v14034_v58, %v5290_v18  ;;  %v5633_v37 = vld [vmem:[#allocation2 + $0xe8] sm:$0xff]  ;;  %v14118_v25 = vld [vmem:[%s15631_s6 + $0x5] ss:$0 sm:$0xff]  ;;  %v14132_v45 = vld [vmem:[%s15638_s7] ss:$0 sm:$0xff] }
 0x589   : > { %v5934_v33 = vadd.f32 %v5893_v40, %v5845_v62  ;;  %10296 = vrcp.f32 %v4669_v2  ;;  %v5503_v22 = vadd.f32 %v14064_v57, %v5375_v49  ;;  %v5718_v13 = vadd.f32 %v5677_v51, %v5590_v61  ;;  %v14125_v61 = vld [vmem:[%s15631_s6 + $0x7] ss:$0 sm:$0xff]  ;;  %v5163_v49 = vld [vmem:[#allocation2 + $0xed] sm:$0xff] }
 0x58a   : > { %v5678_v30 = vmul.f32 %v13662_v21, %v5632_v31  ;;  %v14110_v17 = vmul.f32 -1.442695, %v13984_v24  ;;  %v14113_v53 = vadd.f32 %v6617_v63, %v14066_v32  ;;  %v5504_v41 = vadd.f32 %v5463_v52, %v5376_v48  ;;  %v5291_v51 = vld [vmem:[#allocation2 + $0xee] sm:$0xff]  ;;  %v6103_v60 = vld [vmem:[#allocation2 + $0xe3] sm:$0xff] }
 0x58b   : > { %v5805_v62 = vmul.f32 %v14118_v25, %v14017_v56  ;;  %v6021_v57 = vmul.f32 %v14125_v61, %v5975_v44  ;;  %v5761_v32 = vld [vmem:[#allocation2 + $0xe9] sm:$0xff]  ;;  %v10285_v6 = vpop.eup %10284  ;;  %v8416_v40 = vmul.f32 -1.442695, %v14096_v27  ;;  %v14135_v56 = vadd.f32 %v14132_v45, %v6189_v29 }
 0x58c   : > { %v5719_v43 = vadd.f32 %v5678_v30, %v5591_v1  ;;  %v5592_v63 = vadd.f32 %v5551_v55, %v5503_v22  ;;  %v5419_v59 = vld [vmem:[#allocation2 + $0xef] sm:$0xff]  ;;  %v5377_v18 = vadd.f32 %v5336_v14, %v5208_v39  ;;  %v5464_v2 = vmul.f32 %v14101_v23, %v5418_v9  ;;  %v14150_v55 = vld [vmem:[%s15631_s6 + $0x8] ss:$0 sm:$0xff] }
 0x58d   : > { %v5806_v48 = vmul.f32 %v14118_v25, %v14075_v35  ;;  %v6062_v52 = vadd.f32 %v6021_v57, %v5934_v33  ;;  %v5679_v31 = vmul.f32 %v13662_v21, %v5633_v37  ;;  %v5209_v1 = vmul.f32 %v14028_v5, %v5163_v49  ;;  %v5634_v39 = vld [vmem:[#allocation2 + $0xf0] sm:$0xff]  ;;  %v14157_v57 = vpop.permute.xlu1 %5004 }
 0x58e   : > { %v5337_v44 = vmul.f32 %v14034_v58, %v5291_v51  ;;  %v5894_v30 = vmul.f32 %v14088_v42, %v5761_v32  ;;  %v14145_v29 = vmul.f32 %v10285_v6, %v13917_v0  ;;  %v6149_v9 = vmul.f32 %v14150_v55, %v6103_v60  ;;  %v5976_v0 = vld [vmem:[#allocation2 + $0xea] sm:$0xff]  ;;  %15737 = vst [vmem:[#allocation100_spill] sm:$0xff] %v14157_v57 }
 0x58f   : > { %v5552_v35 = vmul.f32 %v14048_v34, %v5419_v59  ;;  %10298 = vpow2.f32 %v13928_v8  ;;  %v5846_v21 = vadd.f32 %v5805_v62, %v5718_v13  ;;  %v8417_v14 = vmul.f32 -1.442695, %v14135_v56  ;;  %v6104_v60 = vld [vmem:[#allocation2 + $0xeb] sm:$0xff]  ;;  %v14167_v62 = vld [vmem:[%s15631_s6 + $0x4] ss:$0 sm:$0xff] }
 0x590   : > { %15736 = vst [vmem:[#allocation90_spill] sm:$0xff] %v14145_v29  ;;  %v5720_v33 = vadd.f32 %v5679_v31, %v5592_v63  ;;  %v5807_v22 = vmul.f32 %v14118_v25, %v5761_v32  ;;  %v10287_v37 = vpop.eup %10286  ;;  %10300 = vpow2.f32 %v8416_v40  ;;  %v14159_v49 = vadd.f32 %v5464_v2, %v5377_v18  ;;  %v15739_v18 = vld [vmem:[#allocation63_spill] sm:$0xff] }
 0x591   : > { %v5847_v51 = vadd.f32 %v5806_v48, %v5719_v43  ;;  %v6190_v6 = vadd.f32 %v6149_v9, %v6062_v52  ;;  %v5378_v8 = vadd.f32 %v5337_v44, %v5209_v1  ;;  %v5465_v13 = vmul.f32 %v14101_v23, %v5419_v59  ;;  %v5164_v52 = vld [vmem:[#allocation2 + $0xf5] sm:$0xff] }
 0x592   : > { %v10289_v10 = vpop.eup %10288  ;;  %v5680_v32 = vmul.f32 %v14167_v62, %v5634_v39  ;;  %v5935_v40 = vadd.f32 %v5894_v30, %v5846_v21  ;;  %v6561_v43 = vmul.f32 %v14145_v29, %v15739_v18  ;;  %v5593_v2 = vadd.f32 %v5552_v35, %v5504_v41  ;;  %v5292_v31 = vld [vmem:[#allocation2 + $0xf6] sm:$0xff]  ;;  %v14192_v18 = vpop.permute.xlu1 %5014 }
 0x593   : > { %v10291_v63 = vpop.eup %10290  ;;  %v6022_v48 = vmul.f32 %v14125_v61, %v5976_v0  ;;  %v4789_v1 = vmul.f32 %v10289_v10, %v13862_v47  ;;  %10302 = vpow2.f32 %v8417_v14  ;;  %v5848_v44 = vadd.f32 %v5807_v22, %v5720_v33  ;;  %v5420_v41 = vld [vmem:[#allocation2 + $0xf7] sm:$0xff]  ;;  %15741 = vst [vmem:[#allocation103_spill] sm:$0xff] %v14192_v18 }
 0x594   : > { %v10293_v59 = vpop.eup %10292  ;;  %v6150_v9 = vmul.f32 %v14150_v55, %v6104_v60  ;;  %v5895_v15 = vmul.f32 %v14088_v42, %v5762_v19  ;;  %v14177_v30 = vmul.f32 %v10287_v37, %v13943_v28  ;;  %v14180_v21 = vadd.f32 %v14132_v45, %v6190_v6  ;;  %v14182_v35 = vld [vmem:[#allocation2 + $0xf9] sm:$0xff] }
 0x595   : > { %v10295_v39 = vpop.eup %10294  ;;  %v5083_v0 = vmul.f32 %v14157_v57, %v4789_v1  ;;  %v4790_v47 = vmul.f32 %v10293_v59, %v13867_v20  ;;  %v6063_v14 = vadd.f32 %v6022_v48, %v5935_v40  ;;  %v5210_v33 = vmul.f32 %v14028_v5, %v5164_v52  ;;  %v14188_v60 = vld [vmem:[#allocation2 + $0xff] sm:$0xff]  ;;  %v5977_v29 = vld [vmem:[#allocation2 + $0xf2] sm:$0xff]  ;;  %v14197_v48 = vpop.permute.xlu0 %5019 }
 0x596   : > { %15740 = vst [vmem:[#allocation102_spill] sm:$0xff] %v14177_v30  ;;  %v10297_v10 = vpop.eup %10296  ;;  %v5338_v22 = vmul.f32 %v14034_v58, %v5292_v31  ;;  %v4791_v28 = vmul.f32 %v10295_v39, %v13871_v11  ;;  %v6619_v37 = vsel %vm4799_vm4, %v6561_v43, 0.0  ;;  %v6399_v6 = vadd.f32 1.0, %v10291_v63  ;;  %15742 = vst [vmem:[#allocation104_spill] sm:$0xff] %v14197_v48  ;;  %v15743_v63 = vld [vmem:[#allocation64_spill] sm:$0xff] }
 0x597   : > { %5124 = vst.msk [vmem:[#allocation2 + $0x110] sm:$0xff] %vm4799_vm4, %v5083_v0  ;;  %v5084_v20 = vmul.f32 %v14161_v54, %v4790_v47  ;;  %v4792_v40 = vmul.f32 %v10297_v10, %v13879_v7  ;;  %v5553_v52 = vmul.f32 %v14048_v34, %v5420_v41  ;;  %v5936_v31 = vadd.f32 %v5895_v15, %v5847_v51  ;;  %v5635_v10 = vld [vmem:[#allocation2 + $0xf8] sm:$0xff]  ;;  %v5764_v54 = vld [vmem:[#allocation2 + $0x101] sm:$0xff] }
 0x598   : > { %v5896_v11 = vmul.f32 %v14088_v42, %v14182_v35  ;;  %v5085_v43 = vmul.f32 %v14192_v18, %v4791_v28  ;;  %v6562_v1 = vmul.f32 %v14177_v30, %v15743_v63  ;;  %v5506_v59 = vadd.f32 %v5465_v13, %v5378_v8 }
 0x599   : > { %v5554_v39 = vmul.f32 %v14048_v34, %v14188_v60  ;;  %5125 = vst.msk [vmem:[#allocation2 + $0x118] sm:$0xff] %vm4799_vm4, %v5084_v20  ;;  %v5086_v7 = vmul.f32 %v14197_v48, %v4792_v40  ;;  %v5721_v0 = vadd.f32 %v5680_v32, %v5593_v2  ;;  %v6191_v47 = vadd.f32 %v6150_v9, %v6063_v14  ;;  %v6105_v40 = vld [vmem:[#allocation2 + $0xf3] sm:$0xff]  ;;  %v5165_v9 = vld [vmem:[#allocation2 + $0xfd] sm:$0xff] }
 0x59a   : > { %v5808_v15 = vmul.f32 %v14118_v25, %v5762_v19  ;;  %v6023_v51 = vmul.f32 %v14125_v61, %v5977_v29  ;;  %5126 = vst.msk [vmem:[#allocation2 + $0x120] sm:$0xff] %vm4799_vm4, %v5085_v43  ;;  %v14213_v28 = vadd.f32 %v6619_v37, %v14113_v53  ;;  %v14216_v8 = vmul.f32 -1.442695, %v14180_v21  ;;  %v5978_v32 = vld [vmem:[#allocation2 + $0xfa] sm:$0xff] }
 0x59b   : > { %v5379_v13 = vadd.f32 %v5338_v22, %v5210_v33  ;;  %v5466_v20 = vmul.f32 %v14101_v23, %v5420_v41  ;;  %5127 = vst.msk [vmem:[#allocation2 + $0x128] sm:$0xff] %vm4799_vm4, %v5086_v7  ;;  %10304 = vrcp.f32 %v6399_v6  ;;  %v5594_v19 = vadd.f32 %v5553_v52, %v14159_v49  ;;  %v5293_v14 = vld [vmem:[#allocation2 + $0xfe] sm:$0xff] }
 0x59c   : > { %v10299_v2 = vpop.eup %10298  ;;  %v6064_v29 = vadd.f32 %v6023_v51, %v5936_v31  ;;  %v5636_v43 = vld [vmem:[#allocation2 + $0x100] sm:$0xff]  ;;  %v5937_v53 = vadd.f32 %v5896_v11, %v5848_v44  ;;  %v14222_v37 = vsel %vm4799_vm4, %v6562_v1, 0.0  ;;  %v5681_v33 = vmul.f32 %v14167_v62, %v5635_v10 }
 0x59d   : > { %v5595_v22 = vadd.f32 %v5554_v39, %v5506_v59  ;;  %v5897_v41 = vmul.f32 %v14088_v42, %v5764_v54  ;;  %v14226_v63 = vpop.eup %10300  ;;  %v14229_v7 = vadd.f32 %v14132_v45, %v6191_v47  ;;  %v5849_v6 = vadd.f32 %v5808_v15, %v5721_v0  ;;  %v6106_v1 = vld [vmem:[#allocation2 + $0xfb] sm:$0xff]  ;;  %v14236_v59 = vld [vmem:[#allocation2 + $0x107] sm:$0xff] }
 0x59e   : > { %v6151_v49 = vmul.f32 %v14150_v55, %v6105_v40  ;;  %v6024_v52 = vmul.f32 %v14125_v61, %v5978_v32  ;;  %v5211_v44 = vmul.f32 %v14028_v5, %v5165_v9  ;;  %v5339_v31 = vmul.f32 %v14034_v58, %v5293_v14  ;;  %v5979_v15 = vld [vmem:[#allocation2 + $0x102] sm:$0xff] }
 0x59f   : > { %v5682_v11 = vmul.f32 %v14167_v62, %v5636_v43  ;;  %v4670_v39 = vadd.f32 1.0, %v10299_v2  ;;  %v5722_v10 = vadd.f32 %v5681_v33, %v5594_v19  ;;  %v5809_v47 = vmul.f32 %v14118_v25, %v14182_v35  ;;  %v5765_v40 = vld [vmem:[#allocation2 + $0x109] sm:$0xff] }
 0x5a0   : > { %v6192_v51 = vadd.f32 %v6151_v49, %v6064_v29  ;;  %v6065_v0 = vadd.f32 %v6024_v52, %v5937_v53  ;;  %v10303_v30 = vpop.eup %10302  ;;  %v5810_v9 = vmul.f32 %v14118_v25, %v5764_v54  ;;  %v5938_v48 = vadd.f32 %v5897_v41, %v5849_v6  ;;  %v14245_v19 = vld [vmem:[#allocation2 + $0x111] sm:$0xff]  ;;  %v6107_v33 = vld [vmem:[#allocation2 + $0x103] sm:$0xff] }
 0x5a1   : > { %v5723_v32 = vadd.f32 %v5682_v11, %v5595_v22  ;;  %10306 = vpow2.f32 %v13960_v16  ;;  %v5507_v14 = vadd.f32 %v5466_v20, %v5379_v13  ;;  %v6152_v43 = vmul.f32 %v14150_v55, %v6106_v1  ;;  %v14249_v53 = vld [vmem:[#allocation2 + $0x10f] sm:$0xff] }
 0x5a2   : > { %v5555_v2 = vmul.f32 %v14048_v34, %v14236_v59  ;;  %10308 = vpow2.f32 %v13963_v4  ;;  %v5380_v35 = vadd.f32 %v5339_v31, %v5211_v44  ;;  %v6025_v29 = vmul.f32 %v14125_v61, %v5979_v15  ;;  %v5637_v22 = vld [vmem:[#allocation2 + $0x108] sm:$0xff]  ;;  %v5981_v1 = vld [vmem:[#allocation2 + $0x112] sm:$0xff] }
 0x5a3   : > { %v5898_v54 = vmul.f32 %v14088_v42, %v5765_v40  ;;  %10310 = vrcp.f32 %v4670_v39  ;;  %v14253_v16 = vadd.f32 %v14132_v45, %v6192_v51  ;;  %v5850_v13 = vadd.f32 %v5809_v47, %v5722_v10  ;;  %v5980_v11 = vld [vmem:[#allocation2 + $0x10a] sm:$0xff] }
 0x5a4   : > { %v6193_v20 = vadd.f32 %v6152_v43, %v6065_v0  ;;  %10312 = vpow2.f32 %v13990_v38  ;;  %v5851_v41 = vadd.f32 %v5810_v9, %v5723_v32  ;;  %v6066_v6 = vadd.f32 %v6025_v29, %v5938_v48  ;;  %v5166_v0 = vld [vmem:[#allocation2 + $0x105] sm:$0xff]  ;;  %v5638_v32 = vld [vmem:[#allocation2 + $0x110] sm:$0xff] }
 0x5a5   : > { %v5899_v4 = vmul.f32 %v14088_v42, %v14245_v19  ;;  %10314 = vpow2.f32 %v14015_v46  ;;  %v8419_v49 = vmul.f32 -1.442695, %v14229_v7  ;;  %v5467_v52 = vmul.f32 %v14101_v23, %v14188_v60 }
 0x5a6   : > { %v5596_v44 = vadd.f32 %v5555_v2, %v5507_v14  ;;  %v5556_v31 = vmul.f32 %v14048_v34, %v14249_v53  ;;  %v6153_v38 = vmul.f32 %v14150_v55, %v6107_v33  ;;  %v5939_v39 = vadd.f32 %v5898_v54, %v5850_v13  ;;  %v5294_v2 = vld [vmem:[#allocation2 + $0x106] sm:$0xff] }
 0x5a7   : > { %v5940_v48 = vadd.f32 %v5899_v4, %v5851_v41  ;;  %10316 = vpow2.f32 %v14110_v17  ;;  %v8420_v10 = vmul.f32 -1.442695, %v14253_v16  ;;  %v5508_v46 = vadd.f32 %v5467_v52, %v5380_v35  ;;  %v6757_v17 = vld [vmem:[%s15371_s10] sm:$0xff]  ;;  %v6108_v13 = vld [vmem:[#allocation2 + $0x10b] sm:$0xff] }
 0x5a8   : > { %v14268_v51 = vadd.f32 %v14132_v45, %v6193_v20  ;;  %v5683_v60 = vmul.f32 %v14167_v62, %v5637_v22  ;;  %v14271_v47 = vpop.eup %10304  ;;  %10318 = vpow2.f32 %v14216_v8  ;;  %v6194_v15 = vadd.f32 %v6153_v38, %v6066_v6  ;;  %v6109_v8 = vld [vmem:[#allocation2 + $0x113] sm:$0xff]  ;;  %9678 = vmatpush3.msra.mxu1 %v6757_v17 }
 0x5a9   : > { %v6026_v9 = vmul.f32 %v14125_v61, %v5980_v11  ;;  %v6027_v14 = vmul.f32 %v14125_v61, %v5981_v1  ;;  %v6400_v43 = vadd.f32 1.0, %v14226_v63  ;;  %v5597_v29 = vadd.f32 %v5556_v31, %v5508_v46  ;;  %v14281_v41 = vld [vmem:[#allocation2 + $0x119] sm:$0xff]  ;;  %9770 = vmatprep.subr.bf16.mxu1 %v15733_v12 }
 0x5aa   : > { %15744 = vst [vmem:[#allocation105_spill] sm:$0xff] %v14268_v51  ;;  %v5724_v35 = vadd.f32 %v5683_v60, %v5596_v44  ;;  %v5811_v54 = vmul.f32 %v14118_v25, %v5765_v40  ;;  %v6401_v20 = vadd.f32 1.0, %v10303_v30  ;;  %10320 = vpow2.f32 %v8419_v49  ;;  %v5982_v44 = vld [vmem:[#allocation2 + $0x11a] sm:$0xff] }
 0x5ab   : > { %v6067_v33 = vadd.f32 %v6026_v9, %v5939_v39  ;;  %v6068_v22 = vadd.f32 %v6027_v14, %v5940_v48  ;;  %10322 = vpow2.f32 %v8420_v10  ;;  %v8421_v6 = vmul.f32 -1.442695, %v14268_v51  ;;  %v6110_v60 = vld [vmem:[#allocation2 + $0x11b] sm:$0xff] }
 0x5ac   : > { %v5212_v63 = vmul.f32 %v14028_v5, %v5166_v0  ;;  %v5684_v4 = vmul.f32 %v14167_v62, %v5638_v32  ;;  %v5340_v40 = vmul.f32 %v14034_v58, %v5294_v2  ;;  %v14289_v52 = vadd.f32 %v14132_v45, %v6194_v15  ;;  %v14297_v0 = vld [vmem:[#allocation2 + $0x121] sm:$0xff]  ;;  %v14303_v9 = vld [vmem:[#allocation2 + $0x117] sm:$0xff] }
 0x5ad   : > { %v6154_v30 = vmul.f32 %v14150_v55, %v6108_v13  ;;  %v6155_v49 = vmul.f32 %v14150_v55, %v6109_v8  ;;  %v5852_v1 = vadd.f32 %v5811_v54, %v5724_v35  ;;  %v5812_v38 = vmul.f32 %v14118_v25, %v14245_v19 }
 0x5ae   : > { %15745 = vst [vmem:[#allocation106_spill] sm:$0xff] %v14289_v52  ;;  %v10307_v31 = vpop.eup %10306  ;;  %v5725_v11 = vadd.f32 %v5684_v4, %v5597_v29  ;;  %v5900_v39 = vmul.f32 %v14088_v42, %v14281_v41  ;;  %10324 = vrcp.f32 %v6400_v43  ;;  %v14301_v32 = vadd.f32 %v14222_v37, %v14213_v28  ;;  %v5983_v29 = vld [vmem:[#allocation2 + $0x122] sm:$0xff]  ;;  %v14321_v4 = vpop.permute.xlu1 %5024 }
 0x5af   : > { %v10309_v48 = vpop.eup %10308  ;;  %v6195_v10 = vadd.f32 %v6154_v30, %v6067_v33  ;;  %v6196_v46 = vadd.f32 %v6155_v49, %v6068_v22  ;;  %10326 = vrcp.f32 %v6401_v20  ;;  %v6028_v19 = vmul.f32 %v14125_v61, %v5982_v44  ;;  %15749 = vst [vmem:[#allocation110_spill] sm:$0xff] %v14321_v4 }
 0x5b0   : > { %v10311_v15 = vpop.eup %10310  ;;  %15746 = vst [vmem:[#allocation107_spill] sm:$0xff] %v14301_v32  ;;  %v5941_v14 = vadd.f32 %v5900_v39, %v5852_v1  ;;  %10328 = vpow2.f32 %v8421_v6  ;;  %v5381_v2 = vadd.f32 %v5340_v40, %v5212_v63  ;;  %v5468_v43 = vmul.f32 %v14101_v23, %v14236_v59  ;;  %v6111_v59 = vld [vmem:[#allocation2 + $0x123] sm:$0xff] }
 0x5b1   : > { %v10313_v17 = vpop.eup %10312  ;;  %v8422_v35 = vmul.f32 -1.442695, %v14289_v52  ;;  %v5853_v13 = vadd.f32 %v5812_v38, %v5725_v11  ;;  %v6156_v28 = vmul.f32 %v14150_v55, %v6110_v60  ;;  %v5901_v37 = vmul.f32 %v14088_v42, %v14297_v0  ;;  %v5863_v11 = vld [vmem:[#allocation2 + $0x161] sm:$0xff] }
 0x5b2   : > { %v10315_v54 = vpop.eup %10314  ;;  %v6069_v8 = vadd.f32 %v6028_v19, %v5941_v14  ;;  %v14313_v20 = vadd.f32 %v14132_v45, %v6195_v10  ;;  %v5557_v33 = vmul.f32 %v14048_v34, %v14303_v9  ;;  %v14318_v22 = vadd.f32 %v14132_v45, %v6196_v46  ;;  %v5641_v32 = vld [vmem:[#allocation2 + $0x128] sm:$0xff] }
 0x5b3   : > { %v4793_v6 = vmul.f32 %v10311_v15, %v13905_v3  ;;  %v5942_v30 = vadd.f32 %v5901_v37, %v5853_v13  ;;  %v6029_v49 = vmul.f32 %v14125_v61, %v5983_v29  ;;  %v4671_v44 = vadd.f32 1.0, %v10307_v31  ;;  %v5864_v15 = vld [vmem:[#allocation2 + $0x169] sm:$0xff] }
 0x5b4   : > { %15747 = vst [vmem:[#allocation108_spill] sm:$0xff] %v14313_v20  ;;  %15748 = vst [vmem:[#allocation109_spill] sm:$0xff] %v14318_v22  ;;  %v10317_v63 = vpop.eup %10316  ;;  %v6197_v40 = vadd.f32 %v6156_v28, %v6069_v8  ;;  %v4672_v38 = vadd.f32 1.0, %v10309_v48  ;;  %v4673_v39 = vadd.f32 1.0, %v10313_v17  ;;  %v4674_v10 = vadd.f32 1.0, %v10315_v54  ;;  %v5167_v13 = vld [vmem:[#allocation2 + $0x10d] sm:$0xff] }
 0x5b5   : > { %v5087_v1 = vmul.f32 %v14321_v4, %v4793_v6  ;;  %v10319_v60 = vpop.eup %10318  ;;  %v6070_v14 = vadd.f32 %v6029_v49, %v5942_v30  ;;  %v6157_v3 = vmul.f32 %v14150_v55, %v6111_v59  ;;  %10330 = vrcp.f32 %v4671_v44  ;;  %v5295_v8 = vld [vmem:[#allocation2 + $0x10e] sm:$0xff]  ;;  %v5639_v28 = vld [vmem:[#allocation2 + $0x118] sm:$0xff]  ;;  %v5170_v4 = vld [vmem:[#allocation2 + $0x125] sm:$0xff] }
 0x5b6   : > { %v14326_v46 = vadd.f32 %v14132_v45, %v6197_v40  ;;  %v5509_v19 = vadd.f32 %v5468_v43, %v5381_v2  ;;  %10332 = vrcp.f32 %v4672_v38  ;;  %v4675_v31 = vadd.f32 1.0, %v10317_v63  ;;  %v5168_v43 = vld [vmem:[#allocation2 + $0x115] sm:$0xff]  ;;  %v15753_v38 = vld [vmem:[#allocation69_spill] sm:$0xff] }
 0x5b7   : > { %5128 = vst.msk [vmem:[#allocation2 + $0x130] sm:$0xff] %vm4799_vm4, %v5087_v1  ;;  %v14331_v48 = vmul.f32 %v14088_v42, %v5863_v11  ;;  %v10321_v17 = vpop.eup %10320  ;;  %v14335_v29 = vmul.f32 %v14271_v47, %v14057_v36  ;;  %v8423_v54 = vmul.f32 -1.442695, %v14313_v20  ;;  %v6198_v37 = vadd.f32 %v6157_v3, %v6070_v14  ;;  %v5296_v59 = vld [vmem:[#allocation2 + $0x116] sm:$0xff]  ;;  %v5992_v14 = vld [vmem:[#allocation2 + $0x16a] sm:$0xff] }
 0x5b8   : > { %15750 = vst [vmem:[#allocation111_spill] sm:$0xff] %v14326_v46  ;;  %10334 = vrcp.f32 %v4673_v39  ;;  %v10323_v2 = vpop.eup %10322  ;;  %v5598_v6 = vadd.f32 %v5557_v33, %v5509_v19  ;;  %v8424_v40 = vmul.f32 -1.442695, %v14318_v22  ;;  %v14340_v63 = vmul.f32 %v14088_v42, %v5864_v15  ;;  %v5991_v33 = vld [vmem:[#allocation2 + $0x162] sm:$0xff] }
 0x5b9   : > { %15751 = vst [vmem:[#allocation112_spill] sm:$0xff] %v14335_v29  ;;  %10336 = vrcp.f32 %v4674_v10  ;;  %v5213_v30 = vmul.f32 %v14028_v5, %v5167_v13  ;;  %v5341_v36 = vmul.f32 %v14034_v58, %v5295_v8  ;;  %v8425_v47 = vmul.f32 -1.442695, %v14326_v46  ;;  %v6119_v3 = vld [vmem:[#allocation2 + $0x163] sm:$0xff] }
 0x5ba   : > { %10338 = vpow2.f32 %v8422_v35  ;;  %v6402_v49 = vadd.f32 1.0, %v10319_v60  ;;  %v5685_v44 = vmul.f32 %v14167_v62, %v5639_v28  ;;  %v14347_v11 = vadd.f32 %v14132_v45, %v6198_v37  ;;  %v6120_v60 = vld [vmem:[#allocation2 + $0x16b] sm:$0xff]  ;;  %v14359_v28 = vpop.permute.xlu0 %5029 }
 0x5bb   : > { %10340 = vrcp.f32 %v4675_v31  ;;  %v14349_v1 = vpop.eup %10324  ;;  %v6563_v39 = vmul.f32 %v14335_v29, %v15753_v38  ;;  %v5214_v35 = vmul.f32 %v14028_v5, %v5168_v43  ;;  %v5342_v10 = vmul.f32 %v14034_v58, %v5296_v59  ;;  %15754 = vst [vmem:[#allocation114_spill] sm:$0xff] %v14359_v28  ;;  %v5425_v38 = vld [vmem:[#allocation2 + $0x11f] sm:$0xff] }
 0x5bc   : > { %15752 = vst [vmem:[#allocation113_spill] sm:$0xff] %v14347_v11  ;;  %10342 = vpow2.f32 %v8423_v54  ;;  %v14355_v15 = vpop.eup %10326  ;;  %v6403_v19 = vadd.f32 1.0, %v10321_v17  ;;  %v5726_v13 = vadd.f32 %v5685_v44, %v5598_v6  ;;  %v5813_v8 = vmul.f32 %v14118_v25, %v14281_v41  ;;  %v5297_v44 = vld [vmem:[#allocation2 + $0x11e] sm:$0xff] }
 0x5bd   : > { %10344 = vpow2.f32 %v8424_v40  ;;  %v10329_v31 = vpop.eup %10328  ;;  %v6404_v37 = vadd.f32 1.0, %v10323_v2  ;;  %v5382_v54 = vadd.f32 %v5341_v36, %v5213_v30  ;;  %v14362_v43 = vmul.f32 %v14125_v61, %v5991_v33  ;;  %v5169_v36 = vld [vmem:[#allocation2 + $0x11d] sm:$0xff] }
 0x5be   : > { %10346 = vpow2.f32 %v8425_v47  ;;  %v8426_v59 = vmul.f32 -1.442695, %v14347_v11  ;;  %v14365_v29 = vld [vmem:[#allocation2 + $0x129] sm:$0xff]  ;;  %v14368_v17 = vmul.f32 %v14125_v61, %v5992_v14  ;;  %v14371_v6 = vmul.f32 %v14150_v55, %v6119_v3 }
 0x5bf   : > { %v14374_v41 = vmul.f32 %v14150_v55, %v6120_v60  ;;  %v14377_v2 = vsel %vm4799_vm4, %v6563_v39, 0.0  ;;  %10348 = vrcp.f32 %v6402_v49  ;;  %v5469_v40 = vmul.f32 %v14101_v23, %v14249_v53  ;;  %v5984_v47 = vld [vmem:[#allocation2 + $0x12a] sm:$0xff]  ;;  %v14386_v39 = vpop.permute.xlu1 %5034 }
 0x5c0   : > { %15755 = vst [vmem:[#allocation115_spill] sm:$0xff] %v14377_v2  ;;  %v5383_v30 = vadd.f32 %v5342_v10, %v5214_v35  ;;  %10350 = vrcp.f32 %v6403_v19  ;;  %v5558_v33 = vmul.f32 %v14048_v34, %v5425_v38  ;;  %v5854_v14 = vadd.f32 %v5813_v8, %v5726_v13  ;;  %v14382_v3 = vld [vmem:[#allocation2 + $0x127] sm:$0xff]  ;;  %15756 = vst [vmem:[#allocation116_spill] sm:$0xff] %v14386_v39 }
 0x5c1   : > { %v5902_v60 = vmul.f32 %v14088_v42, %v14365_v29  ;;  %10352 = vrcp.f32 %v6404_v37  ;;  %v14388_v49 = vadd.f32 1.0, %v10329_v31  ;;  %v5510_v12 = vadd.f32 %v5469_v40, %v5382_v54  ;;  %v6112_v35 = vld [vmem:[#allocation2 + $0x12b] sm:$0xff]  ;;  %v14394_v37 = vpop.permute.xlu0 %5039 }
 0x5c2   : > { %v5470_v53 = vmul.f32 %v14101_v23, %v14303_v9  ;;  %v10331_v10 = vpop.eup %10330  ;;  %v5215_v19 = vmul.f32 %v14028_v5, %v5169_v36  ;;  %v5298_v13 = vld [vmem:[#allocation2 + $0x126] sm:$0xff]  ;;  %10354 = vpow2.f32 %v8426_v59  ;;  %v6030_v18 = vmul.f32 %v14125_v61, %v5984_v47  ;;  %15757 = vst [vmem:[#allocation117_spill] sm:$0xff] %v14394_v37 }
 0x5c3   : > { %v5943_v8 = vadd.f32 %v5902_v60, %v5854_v14  ;;  %v10333_v57 = vpop.eup %10332  ;;  %v5343_v31 = vmul.f32 %v14034_v58, %v5297_v44  ;;  %v5559_v54 = vmul.f32 %v14048_v34, %v14382_v3  ;;  %v15758_v9 = vld [vmem:[#allocation73_spill] sm:$0xff]  ;;  %v5599_v22 = vadd.f32 %v5558_v33, %v5510_v12  ;;  %v5640_v36 = vld [vmem:[#allocation2 + $0x120] sm:$0xff] }
 0x5c4   : > { %v5511_v11 = vadd.f32 %v5470_v53, %v5383_v30  ;;  %v4794_v40 = vmul.f32 %v10331_v10, %v15758_v9  ;;  %v6158_v59 = vmul.f32 %v14150_v55, %v6112_v35  ;;  %v15759_v14 = vld [vmem:[#allocation76_spill] sm:$0xff]  ;;  %v5216_v52 = vmul.f32 %v14028_v5, %v5170_v4  ;;  %v5171_v53 = vld [vmem:[#allocation2 + $0x12d] sm:$0xff]  ;;  %v14409_v9 = vpop.permute.xlu1 %5044 }
 0x5c5   : > { %v10335_v46 = vpop.eup %10334  ;;  %v6071_v20 = vadd.f32 %v6030_v18, %v5943_v8  ;;  %v4795_v60 = vmul.f32 %v10333_v57, %v15759_v14  ;;  %v5344_v30 = vmul.f32 %v14034_v58, %v5298_v13  ;;  %v5299_v44 = vld [vmem:[#allocation2 + $0x12e] sm:$0xff]  ;;  %v5471_v12 = vmul.f32 %v14101_v23, %v5425_v38  ;;  %15760 = vst [vmem:[#allocation73_spill] sm:$0xff] %v14409_v9 }
 0x5c6   : > { %v10337_v47 = vpop.eup %10336  ;;  %v5088_v51 = vmul.f32 %v14359_v28, %v4794_v40  ;;  %v4796_v2 = vmul.f32 %v10335_v46, %v13971_v50  ;;  %v5427_v33 = vld [vmem:[#allocation2 + $0x12f] sm:$0xff]  ;;  %v5384_v4 = vadd.f32 %v5343_v31, %v5215_v19  ;;  %v5686_v13 = vmul.f32 %v14167_v62, %v5640_v36  ;;  %v14419_v31 = vpop.permute.xlu0 %5049 }
 0x5c7   : > { %v10339_v10 = vpop.eup %10338  ;;  %v6199_v18 = vadd.f32 %v6158_v59, %v6071_v20  ;;  %v5089_v35 = vmul.f32 %v14386_v39, %v4795_v60  ;;  %v4797_v57 = vmul.f32 %v10337_v47, %v13976_v26  ;;  %v5600_v14 = vadd.f32 %v5559_v54, %v5511_v11  ;;  %15761 = vst [vmem:[#allocation76_spill] sm:$0xff] %v14419_v31 }
 0x5c8   : > { %v10341_v8 = vpop.eup %10340  ;;  %5129 = vst.msk [vmem:[#allocation2 + $0x138] sm:$0xff] %vm4799_vm4, %v5088_v51  ;;  %v5090_v50 = vmul.f32 %v14394_v37, %v4796_v2  ;;  %v5217_v38 = vmul.f32 %v14028_v5, %v5171_v53  ;;  %v5345_v20 = vmul.f32 %v14034_v58, %v5299_v44  ;;  %v6406_v11 = vadd.f32 1.0, %v10339_v10 }
 0x5c9   : > { %v10343_v46 = vpop.eup %10342  ;;  %5130 = vst.msk [vmem:[#allocation2 + $0x140] sm:$0xff] %vm4799_vm4, %v5089_v35  ;;  %v5091_v26 = vmul.f32 %v14409_v9, %v4797_v57  ;;  %v4798_v40 = vmul.f32 %v10341_v8, %v13984_v24  ;;  %v5727_v54 = vadd.f32 %v5686_v13, %v5599_v22  ;;  %v5385_v36 = vadd.f32 %v5344_v30, %v5216_v52 }
 0x5ca   : > { %v10345_v19 = vpop.eup %10344  ;;  %v5560_v51 = vmul.f32 %v14048_v34, %v5427_v33  ;;  %5131 = vst.msk [vmem:[#allocation2 + $0x148] sm:$0xff] %vm4799_vm4, %v5090_v50  ;;  %v5687_v59 = vmul.f32 %v14167_v62, %v5641_v32  ;;  %v5814_v60 = vmul.f32 %v14118_v25, %v14297_v0  ;;  %v14427_v47 = vadd.f32 %v14132_v45, %v6199_v18  ;;  %v5642_v0 = vld [vmem:[#allocation2 + $0x130] sm:$0xff] }
 0x5cb   : > { %v10347_v2 = vpop.eup %10346  ;;  %5132 = vst.msk [vmem:[#allocation2 + $0x150] sm:$0xff] %vm4799_vm4, %v5091_v26  ;;  %v5092_v24 = vmul.f32 %v14419_v31, %v4798_v40  ;;  %10356 = vrcp.f32 %v14388_v49  ;;  %v6407_v52 = vadd.f32 1.0, %v10343_v46  ;;  %v5512_v22 = vadd.f32 %v5471_v12, %v5384_v4 }
 0x5cc   : > { %v5472_v30 = vmul.f32 %v14101_v23, %v14382_v3  ;;  %v14434_v53 = vpop.eup %10348  ;;  %v6408_v32 = vadd.f32 1.0, %v10345_v19  ;;  %v5728_v44 = vadd.f32 %v5687_v59, %v5600_v14  ;;  %v5386_v10 = vadd.f32 %v5345_v20, %v5217_v38 }
 0x5cd   : > { %v5815_v18 = vmul.f32 %v14118_v25, %v14365_v29  ;;  %5133 = vst.msk [vmem:[#allocation2 + $0x158] sm:$0xff] %vm4799_vm4, %v5092_v24  ;;  %v14439_v35 = vpop.eup %10350  ;;  %v14443_v49 = vmul.f32 %v14349_v1, %v14096_v27  ;;  %10358 = vrcp.f32 %v6406_v11  ;;  %v6409_v12 = vadd.f32 1.0, %v10347_v2 }
 0x5ce   : > { %v5601_v3 = vadd.f32 %v5560_v51, %v5512_v22  ;;  %v14445_v57 = vpop.eup %10352  ;;  %v5513_v8 = vadd.f32 %v5472_v30, %v5385_v36  ;;  %v5855_v4 = vadd.f32 %v5814_v60, %v5727_v54  ;;  %v5473_v13 = vmul.f32 %v14101_v23, %v5427_v33 }
 0x5cf   : > { %v8427_v14 = vmul.f32 -1.442695, %v14427_v47  ;;  %v5172_v29 = vld [vmem:[#allocation2 + $0x135] sm:$0xff]  ;;  %v10355_v38 = vpop.eup %10354  ;;  %10360 = vrcp.f32 %v6407_v52  ;;  %v5688_v20 = vmul.f32 %v14167_v62, %v5642_v0  ;;  %v5856_v19 = vadd.f32 %v5815_v18, %v5728_v44 }
 0x5d0   : > { %v5300_v50 = vld [vmem:[#allocation2 + $0x136] sm:$0xff]  ;;  %v5218_v27 = vmul.f32 %v14028_v5, %v5172_v29  ;;  %10362 = vrcp.f32 %v6408_v32  ;;  %v5514_v40 = vadd.f32 %v5473_v13, %v5386_v10  ;;  %v5301_v24 = vld [vmem:[#allocation2 + $0x13e] sm:$0xff]  ;;  %v14454_v5 = vadd.f32 1.0, %v10355_v38 }
 0x5d1   : > { %v5428_v46 = vld [vmem:[#allocation2 + $0x137] sm:$0xff]  ;;  %v5346_v1 = vmul.f32 %v14034_v58, %v5300_v50  ;;  %10364 = vrcp.f32 %v6409_v12  ;;  %v5729_v51 = vadd.f32 %v5688_v20, %v5601_v3  ;;  %v5429_v52 = vld [vmem:[#allocation2 + $0x13f] sm:$0xff] }
 0x5d2   : > { %v5770_v26 = vld [vmem:[#allocation2 + $0x131] sm:$0xff]  ;;  %v5561_v11 = vmul.f32 %v14048_v34, %v5428_v46  ;;  %v5173_v60 = vld [vmem:[#allocation2 + $0x13d] sm:$0xff]  ;;  %10366 = vpow2.f32 %v8427_v14  ;;  %v5474_v58 = vmul.f32 %v14101_v23, %v5428_v46  ;;  %v5174_v18 = vld [vmem:[#allocation2 + $0x145] sm:$0xff]  ;;  %v5475_v20 = vmul.f32 %v14101_v23, %v5429_v52 }
 0x5d3   : > { %v5643_v33 = vld [vmem:[#allocation2 + $0x138] sm:$0xff]  ;;  %v5387_v2 = vadd.f32 %v5346_v1, %v5218_v27  ;;  %v5903_v59 = vmul.f32 %v14088_v42, %v5770_v26  ;;  %v5816_v32 = vmul.f32 %v14118_v25, %v5770_v26  ;;  %v5644_v0 = vld [vmem:[#allocation2 + $0x140] sm:$0xff] }
 0x5d4   : > { %v5985_v54 = vld [vmem:[#allocation2 + $0x132] sm:$0xff]  ;;  %v5602_v22 = vadd.f32 %v5561_v11, %v5513_v8  ;;  %v5689_v34 = vmul.f32 %v14167_v62, %v5643_v33  ;;  %v10599_v3 = vld [vmem:[%s15631_s6] ss:$0 sm:$0xff]  ;;  %v10600_v8 = vld [vmem:[%s15631_s6 + $0x1] ss:$0 sm:$0xff] }
 0x5d5   : > { %v6113_v36 = vld [vmem:[#allocation2 + $0x133] sm:$0xff]  ;;  %v5944_v44 = vadd.f32 %v5903_v59, %v5855_v4  ;;  %v6031_v10 = vmul.f32 %v14125_v61, %v5985_v54  ;;  %v5219_v13 = vmul.f32 %v10599_v3, %v5173_v60  ;;  %v5347_v14 = vmul.f32 %v10600_v8, %v5301_v24  ;;  %v14470_v4 = vld [vmem:[%s15631_s6 + $0x3] ss:$0 sm:$0xff]  ;;  %v6114_v1 = vld [vmem:[#allocation2 + $0x13b] sm:$0xff] }
 0x5d6   : > { %v5771_v30 = vld [vmem:[#allocation2 + $0x139] sm:$0xff]  ;;  %v6159_v12 = vmul.f32 %v14150_v55, %v6113_v36  ;;  %v5562_v29 = vmul.f32 %v14470_v4, %v5429_v52  ;;  %v5515_v46 = vadd.f32 %v5474_v58, %v5387_v2  ;;  %v5302_v26 = vld [vmem:[#allocation2 + $0x146] sm:$0xff]  ;;  %v5730_v33 = vadd.f32 %v5689_v34, %v5602_v22 }
 0x5d7   : > { %v5986_v50 = vld [vmem:[#allocation2 + $0x13a] sm:$0xff]  ;;  %v6072_v38 = vadd.f32 %v6031_v10, %v5944_v44  ;;  %v5904_v27 = vmul.f32 %v14088_v42, %v5771_v30  ;;  %v5430_v11 = vld [vmem:[#allocation2 + $0x147] sm:$0xff]  ;;  %v5690_v36 = vmul.f32 %v14167_v62, %v5644_v0  ;;  %v5220_v59 = vmul.f32 %v10599_v3, %v5174_v18 }
 0x5d8   : > { %v5603_v54 = vadd.f32 %v5562_v29, %v5514_v40  ;;  %v5817_v24 = vmul.f32 %v14118_v25, %v5771_v30  ;;  %v6032_v9 = vmul.f32 %v14125_v61, %v5986_v50  ;;  %v5645_v2 = vld [vmem:[#allocation2 + $0x148] sm:$0xff]  ;;  %v14478_v44 = vpop.eup %10356  ;;  %v5388_v52 = vadd.f32 %v5347_v14, %v5219_v13 }
 0x5d9   : > { %v6200_v60 = vadd.f32 %v6159_v12, %v6072_v38  ;;  %v5945_v31 = vadd.f32 %v5904_v27, %v5856_v19  ;;  %v5772_v58 = vld [vmem:[#allocation2 + $0x141] sm:$0xff]  ;;  %v6160_v10 = vmul.f32 %v14150_v55, %v6114_v1  ;;  %v5348_v37 = vmul.f32 %v10600_v8, %v5302_v26  ;;  %v5518_v1 = vld [vmem:[#allocation2 + $0x14f] sm:$0xff] }
 0x5da   : > { %v5563_v22 = vmul.f32 %v14470_v4, %v5430_v11  ;;  %v5731_v34 = vadd.f32 %v5690_v36, %v5603_v54  ;;  %v5476_v30 = vmul.f32 %v14101_v23, %v5430_v11  ;;  %v14486_v19 = vpop.eup %10358  ;;  %v5691_v3 = vmul.f32 %v14167_v62, %v5645_v2  ;;  %v5987_v14 = vld [vmem:[#allocation2 + $0x142] sm:$0xff]  ;;  %v5988_v54 = vld [vmem:[#allocation2 + $0x14a] sm:$0xff] }
 0x5db   : > { %v14483_v40 = vadd.f32 %v14132_v45, %v6200_v60  ;;  %v6073_v0 = vadd.f32 %v6032_v9, %v5945_v31  ;;  %v5389_v18 = vadd.f32 %v5348_v37, %v5220_v59  ;;  %v5818_v13 = vmul.f32 %v14118_v25, %v5772_v58  ;;  %v6115_v27 = vld [vmem:[#allocation2 + $0x143] sm:$0xff]  ;;  %v5646_v9 = vld [vmem:[#allocation2 + $0x150] sm:$0xff] }
 0x5dc   : > { %v5604_v12 = vadd.f32 %v5563_v22, %v5515_v46  ;;  %v5857_v29 = vadd.f32 %v5816_v32, %v5729_v51  ;;  %v5905_v38 = vmul.f32 %v14088_v42, %v5772_v58  ;;  %v14492_v31 = vpop.eup %10360  ;;  %v5516_v23 = vadd.f32 %v5475_v20, %v5388_v52  ;;  %v5773_v11 = vld [vmem:[#allocation2 + $0x149] sm:$0xff]  ;;  %v5519_v60 = vld [vmem:[#allocation2 + $0x157] sm:$0xff] }
 0x5dd   : > { %v8428_v8 = vmul.f32 -1.442695, %v14483_v40  ;;  %v6201_v50 = vadd.f32 %v6160_v10, %v6073_v0  ;;  %v5858_v26 = vadd.f32 %v5817_v24, %v5730_v33  ;;  %v5517_v37 = vadd.f32 %v5476_v30, %v5389_v18  ;;  %v14494_v36 = vpop.eup %10362  ;;  %v6116_v42 = vld [vmem:[#allocation2 + $0x14b] sm:$0xff]  ;;  %v5647_v52 = vld [vmem:[#allocation2 + $0x158] sm:$0xff] }
 0x5de   : > { %v5732_v46 = vadd.f32 %v5691_v3, %v5604_v12  ;;  %v5859_v32 = vadd.f32 %v5818_v13, %v5731_v34  ;;  %v5946_v59 = vadd.f32 %v5905_v38, %v5857_v29  ;;  %v14499_v2 = vpop.eup %10364  ;;  %v6033_v58 = vmul.f32 %v14125_v61, %v5987_v14  ;;  %v10602_v34 = vld [vmem:[%s15631_s6 + $0x6] ss:$0 sm:$0xff]  ;;  %v5774_v18 = vld [vmem:[#allocation2 + $0x151] sm:$0xff]  ;;  %v5775_v29 = vld [vmem:[#allocation2 + $0x159] sm:$0xff] }
 0x5df   : > { %10368 = vpow2.f32 %v8428_v8  ;;  %v14497_v51 = vadd.f32 %v14132_v45, %v6201_v50  ;;  %v6161_v20 = vmul.f32 %v14150_v55, %v6115_v27  ;;  %v5564_v33 = vmul.f32 %v14470_v4, %v5518_v1  ;;  %v10367_v10 = vpop.eup %10366  ;;  %v5989_v38 = vld [vmem:[#allocation2 + $0x152] sm:$0xff] }
 0x5e0   : > { %v5692_v24 = vmul.f32 %v14167_v62, %v5646_v9  ;;  %v5819_v45 = vmul.f32 %v14118_v25, %v5773_v11  ;;  %v5906_v0 = vmul.f32 %v10602_v34, %v5773_v11  ;;  %v6034_v30 = vmul.f32 %v14125_v61, %v5988_v54  ;;  %v10603_v61 = vld [vmem:[%s15631_s6 + $0x5] ss:$0 sm:$0xff] }
 0x5e1   : > { %v8429_v22 = vmul.f32 -1.442695, %v14497_v51  ;;  %v6074_v12 = vadd.f32 %v6033_v58, %v5946_v59  ;;  %v5605_v3 = vadd.f32 %v5564_v33, %v5516_v23  ;;  %v6162_v13 = vmul.f32 %v14150_v55, %v6116_v42  ;;  %v5990_v23 = vld [vmem:[#allocation2 + $0x15a] sm:$0xff]  ;;  %v10605_v58 = vld [vmem:[%s15631_s6 + $0x7] ss:$0 sm:$0xff] }
 0x5e2   : > { %v5565_v14 = vmul.f32 %v14470_v4, %v5519_v60  ;;  %v5860_v8 = vadd.f32 %v5819_v45, %v5732_v46  ;;  %v5947_v50 = vadd.f32 %v5906_v0, %v5858_v26  ;;  %v5693_v25 = vmul.f32 %v14167_v62, %v5647_v52  ;;  %v6117_v42 = vld [vmem:[#allocation2 + $0x153] sm:$0xff]  ;;  %v6118_v60 = vld [vmem:[#allocation2 + $0x15b] sm:$0xff]  ;;  %v10606_v0 = vld [vmem:[%s15631_s6 + $0x8] ss:$0 sm:$0xff]  ;;  %s15326_s6 = scalar_lea.hbm %s15379_s18, %s8526_s4 }
 0x5e3   : > { %10370 = vpow2.f32 %v8429_v22  ;;  %v6202_v27 = vadd.f32 %v6161_v20, %v6074_v12  ;;  %v5733_v1 = vadd.f32 %v5692_v24, %v5605_v3  ;;  %v5820_v11 = vmul.f32 %v10603_v61, %v5774_v18  ;;  %v10604_v62 = vld [vmem:[%s15638_s7] ss:$0 sm:$0xff]  ;;  %s8011_s7 = scalar_lea.sflag [#allocation4], %s566_s24 }
 0x5e4   : > { %v5606_v9 = vadd.f32 %v5565_v14, %v5517_v37  ;;  %v6075_v54 = vadd.f32 %v6034_v30, %v5947_v50  ;;  %v5821_v55 = vmul.f32 %v10603_v61, %v5775_v29  ;;  %v5907_v59 = vmul.f32 %v10602_v34, %v5774_v18 }
 0x5e5   : > { %v5908_v4 = vmul.f32 %v10602_v34, %v5775_v29  ;;  %v14520_v26 = vadd.f32 %v10604_v62, %v6202_v27  ;;  %v5861_v37 = vadd.f32 %v5820_v11, %v5733_v1  ;;  %v6035_v20 = vmul.f32 %v10605_v58, %v5989_v38  ;;  %v15763_v11 = vld [vmem:[#allocation71_spill] sm:$0xff] }
 0x5e6   : > { %v5734_v46 = vadd.f32 %v5693_v25, %v5606_v9  ;;  %v6203_v33 = vadd.f32 %v6162_v13, %v6075_v54  ;;  %v5948_v24 = vadd.f32 %v5907_v59, %v5859_v32  ;;  %v6036_v22 = vmul.f32 %v10605_v58, %v5990_v23  ;;  %v15762_v9 = vld [vmem:[#allocation91_spill] sm:$0xff]  ;;  %v15764_v59 = vld [vmem:[#allocation92_spill] sm:$0xff] }
 0x5e7   : > { %v5949_v52 = vadd.f32 %v5908_v4, %v5860_v8  ;;  %v8430_v45 = vmul.f32 -1.442695, %v14520_v26  ;;  %v6163_v30 = vmul.f32 %v10606_v0, %v6117_v42  ;;  %v6164_v18 = vmul.f32 %v10606_v0, %v6118_v60  ;;  %v15765_v60 = vld [vmem:[#allocation107_spill] sm:$0xff] }
 0x5e8   : > { %v5862_v34 = vadd.f32 %v5821_v55, %v5734_v46  ;;  %v6076_v12 = vadd.f32 %v6035_v20, %v5948_v24  ;;  %v5950_v14 = vadd.f32 %v14331_v48, %v5861_v37  ;;  %v14530_v29 = vadd.f32 %v10604_v62, %v6203_v33  ;;  %v15766_v46 = vld [vmem:[#allocation115_spill] sm:$0xff]  ;;  %v15767_v33 = vld [vmem:[#allocation94_spill] sm:$0xff]  ;;  %v15768_v24 = vld [vmem:[#allocation105_spill] sm:$0xff] }
 0x5e9   : > { %v6077_v3 = vadd.f32 %v6036_v22, %v5949_v52  ;;  %v14534_v32 = vmul.f32 %v14355_v15, %v14135_v56  ;;  %v6411_v13 = vadd.f32 1.0, %v10367_v10  ;;  %10372 = vpow2.f32 %v8430_v45  ;;  %v15769_v22 = vld [vmem:[#allocation96_spill] sm:$0xff] }
 0x5ea   : > { %v5951_v8 = vadd.f32 %v14340_v63, %v5862_v34  ;;  %v6204_v50 = vadd.f32 %v6163_v30, %v6076_v12  ;;  %v6078_v25 = vadd.f32 %v14362_v43, %v5950_v14  ;;  %v8431_v27 = vmul.f32 -1.442695, %v14530_v29  ;;  %v15770_v34 = vld [vmem:[#allocation106_spill] sm:$0xff]  ;;  %v15772_v14 = vld [vmem:[#allocation108_spill] sm:$0xff] }
 0x5eb   : > { %v6205_v38 = vadd.f32 %v6164_v18, %v6077_v3  ;;  %v6564_v48 = vmul.f32 %v14443_v49, %v15762_v9  ;;  %v14543_v61 = vmul.f32 %v14434_v53, %v14180_v21  ;;  %10374 = vrcp.f32 %v14454_v5  ;;  %v15771_v3 = vld [vmem:[#allocation97_spill] sm:$0xff] }
 0x5ec   : > { %v10369_v1 = vpop.eup %10368  ;;  %v6079_v56 = vadd.f32 %v14368_v17, %v5951_v8  ;;  %v6206_v63 = vadd.f32 %v14371_v6, %v6078_v25  ;;  %v14548_v10 = vadd.f32 %v10604_v62, %v6204_v50  ;;  %v6565_v23 = vmul.f32 %v14534_v32, %v15763_v11 }
 0x5ed   : > { %v6412_v15 = vadd.f32 1.0, %v10369_v1  ;;  %v14550_v43 = vadd.f32 %v10604_v62, %v6205_v38  ;;  %v14556_v54 = vmul.f32 %v14439_v35, %v14229_v7  ;;  %10376 = vpow2.f32 %v8431_v27  ;;  %v15773_v27 = vld [vmem:[#allocation99_spill] sm:$0xff]  ;;  %v15774_v1 = vld [vmem:[#allocation109_spill] sm:$0xff] }
 0x5ee   : > { %v6207_v21 = vadd.f32 %v14374_v41, %v6079_v56  ;;  %10378 = vrcp.f32 %v6411_v13  ;;  %v14559_v53 = vadd.f32 %v10604_v62, %v6206_v63  ;;  %v8432_v17 = vmul.f32 -1.442695, %v14548_v10 }
 0x5ef   : > { %v8433_v6 = vmul.f32 -1.442695, %v14550_v43  ;;  %v6625_v55 = vsel %vm4799_vm4, %v6564_v48, 0.0  ;;  %v6566_v4 = vmul.f32 %v14543_v61, %v15764_v59  ;;  %10380 = vrcp.f32 %v6412_v15 }
 0x5f0   : > { %v10371_v5 = vpop.eup %10370  ;;  %v14566_v42 = vadd.f32 %v10604_v62, %v6207_v21  ;;  %v14570_v7 = vmul.f32 %v14445_v57, %v14253_v16  ;;  %10382 = vpow2.f32 %v8432_v17  ;;  %v8434_v35 = vmul.f32 -1.442695, %v14559_v53  ;;  %v15776_v21 = vld [vmem:[#allocation111_spill] sm:$0xff] }
 0x5f1   : > { %v6413_v41 = vadd.f32 1.0, %v10371_v5  ;;  %v6624_v37 = vadd.f32 %v15766_v46, %v15765_v60  ;;  %10384 = vpow2.f32 %v8433_v6  ;;  %v6627_v20 = vsel %vm4799_vm4, %v6565_v23, 0.0  ;;  %v15775_v23 = vld [vmem:[#allocation82_spill] sm:$0xff]  ;;  %v15778_v60 = vld [vmem:[#allocation113_spill] sm:$0xff] }
 0x5f2   : > { %v8435_v58 = vmul.f32 -1.442695, %v14566_v42  ;;  %v6567_v62 = vmul.f32 %v14556_v54, %v15767_v33  ;;  %v14581_v52 = vmul.f32 %v14478_v44, %v15768_v24  ;;  %v6629_v57 = vsel %vm4799_vm4, %v6566_v4, 0.0 }
 0x5f3   : > { %10386 = vrcp.f32 %v6413_v41  ;;  %v6626_v16 = vadd.f32 %v6625_v55, %v6624_v37  ;;  %v6568_v45 = vmul.f32 %v14570_v7, %v15769_v22  ;;  %v14588_v0 = vmul.f32 %v14486_v19, %v15770_v34 }
 0x5f4   : > { %10388 = vpow2.f32 %v8434_v35  ;;  %v6631_v12 = vsel %vm4799_vm4, %v6567_v62, 0.0  ;;  %v6569_v44 = vmul.f32 %v14581_v52, %v15771_v3  ;;  %v14595_v13 = vmul.f32 %v14492_v31, %v15772_v14 }
 0x5f5   : > { %10390 = vpow2.f32 %v8435_v58  ;;  %v6628_v30 = vadd.f32 %v6627_v20, %v6626_v16  ;;  %v6633_v38 = vsel %vm4799_vm4, %v6568_v45, 0.0  ;;  %v6570_v19 = vmul.f32 %v14588_v0, %v15773_v27 }
 0x5f6   : > { %v10373_v18 = vpop.eup %10372  ;;  %v14602_v48 = vmul.f32 %v14494_v36, %v15774_v1  ;;  %v6635_v63 = vsel %vm4799_vm4, %v6569_v44, 0.0  ;;  %v6571_v31 = vmul.f32 %v14595_v13, %v15775_v23  ;;  %v14609_v17 = vmul.f32 %v14499_v2, %v15776_v21  ;;  %v15777_v36 = vld [vmem:[#allocation83_spill] sm:$0xff]  ;;  %v15779_v2 = vld [vmem:[#allocation88_spill] sm:$0xff]  ;;  %v15781_v1 = vld [vmem:[#allocation101_spill] sm:$0xff] }
 0x5f7   : > { %v6630_v8 = vadd.f32 %v6629_v57, %v6628_v30  ;;  %v6414_v50 = vadd.f32 1.0, %v10373_v18  ;;  %v6637_v41 = vsel %vm4799_vm4, %v6570_v19, 0.0  ;;  %v15780_v44 = vld [vmem:[#allocation100_spill] sm:$0xff] }
 0x5f8   : > { %v10375_v25 = vpop.eup %10374  ;;  %v6572_v35 = vmul.f32 %v14602_v48, %v15777_v36  ;;  %v6639_v62 = vsel %vm4799_vm4, %v6571_v31, 0.0  ;;  %v6573_v24 = vmul.f32 %v14609_v17, %v15779_v2  ;;  %v15782_v31 = vld [vmem:[#allocation103_spill] sm:$0xff] }
 0x5f9   : > { %v6632_v56 = vadd.f32 %v6631_v12, %v6630_v8  ;;  %10392 = vrcp.f32 %v6414_v50  ;;  %v14615_v46 = vmul.f32 %v10375_v25, %v15778_v60 }
 0x5fa   : > { %v10377_v15 = vpop.eup %10376  ;;  %v6641_v12 = vsel %vm4799_vm4, %v6572_v35, 0.0 }
 0x5fb   : > { %v10379_v6 = vpop.eup %10378  ;;  %v6634_v5 = vadd.f32 %v6633_v38, %v6632_v56  ;;  %v6415_v55 = vadd.f32 1.0, %v10377_v15  ;;  %v6574_v14 = vmul.f32 %v14615_v46, %v15780_v44  ;;  %v6643_v15 = vsel %vm4799_vm4, %v6573_v24, 0.0 }
 0x5fc   : > { %v10381_v4 = vpop.eup %10380  ;;  %v14621_v16 = vmul.f32 %v10379_v6, %v14427_v47 }
 0x5fd   : > { %v10383_v37 = vpop.eup %10382  ;;  %v6636_v58 = vadd.f32 %v6635_v63, %v6634_v5  ;;  %10394 = vrcp.f32 %v6415_v55  ;;  %v14627_v8 = vmul.f32 %v10381_v4, %v14483_v40  ;;  %v6645_v21 = vsel %vm4799_vm4, %v6574_v14, 0.0  ;;  %v15783_v55 = vld [vmem:[#allocation104_spill] sm:$0xff] }
 0x5fe   : > { %v10385_v20 = vpop.eup %10384  ;;  %v6416_v57 = vadd.f32 1.0, %v10383_v37  ;;  %v6575_v56 = vmul.f32 %v14621_v16, %v15781_v1  ;;  %v15784_v37 = vld [vmem:[#allocation110_spill] sm:$0xff] }
 0x5ff   : > { %v6638_v34 = vadd.f32 %v6637_v41, %v6636_v58  ;;  %v6417_v30 = vadd.f32 1.0, %v10385_v20  ;;  %v6576_v40 = vmul.f32 %v14627_v8, %v15782_v31 }
 0x600   : > { %v10387_v45 = vpop.eup %10386  ;;  %10396 = vrcp.f32 %v6416_v57 }
 0x601   : > { %v10389_v18 = vpop.eup %10388  ;;  %v6640_v25 = vadd.f32 %v6639_v62, %v6638_v34  ;;  %10398 = vrcp.f32 %v6417_v30  ;;  %v14630_v19 = vmul.f32 %v10387_v45, %v14497_v51  ;;  %v6647_v51 = vsel %vm4799_vm4, %v6575_v56, 0.0 }
 0x602   : > { %v10391_v50 = vpop.eup %10390  ;;  %v6418_v38 = vadd.f32 1.0, %v10389_v18  ;;  %v6649_v60 = vsel %vm4799_vm4, %v6576_v40, 0.0 }
 0x603   : > { %v6419_v47 = vadd.f32 1.0, %v10391_v50  ;;  %v6642_v63 = vadd.f32 %v6641_v12, %v6640_v25  ;;  %v6577_v4 = vmul.f32 %v14630_v19, %v15783_v55 }
 0x604   : > { %10400 = vrcp.f32 %v6418_v38 }
 0x605   : > { %10402 = vrcp.f32 %v6419_v47  ;;  %v6644_v6 = vadd.f32 %v6643_v15, %v6642_v63  ;;  %v6651_v24 = vsel %vm4799_vm4, %v6577_v4, 0.0  ;;  %v15785_v63 = vld [vmem:[#allocation117_spill] sm:$0xff] }
 0x606   : > { %v10393_v5 = vpop.eup %10392 }
 0x607   : > { %v14642_v41 = vmul.f32 %v10393_v5, %v14520_v26  ;;  %v6646_v35 = vadd.f32 %v6645_v21, %v6644_v6  ;;  %v15786_v6 = vld [vmem:[#allocation73_spill] sm:$0xff] }
 0x609   : > { %v6578_v58 = vmul.f32 %v14642_v41, %v15784_v37  ;;  %v6648_v20 = vadd.f32 %v6647_v51, %v6646_v35  ;;  %v15787_v51 = vld [vmem:[#allocation76_spill] sm:$0xff] }
 0x60a   : > { %v10395_v62 = vpop.eup %10394 }
 0x60b   : > { %v14649_v57 = vmul.f32 %v10395_v62, %v14530_v29  ;;  %v6650_v45 = vadd.f32 %v6649_v60, %v6648_v20  ;;  %v6653_v34 = vsel %vm4799_vm4, %v6578_v58, 0.0 }
 0x60d   : > { %v10397_v30 = vpop.eup %10396  ;;  %v6579_v26 = vmul.f32 %v14649_v57, %v14359_v28  ;;  %v6652_v18 = vadd.f32 %v6651_v24, %v6650_v45 }
 0x60e   : > { %v10399_v12 = vpop.eup %10398  ;;  %v14655_v14 = vmul.f32 %v10397_v30, %v14548_v10 }
 0x60f   : > { %v14658_v50 = vmul.f32 %v10399_v12, %v14550_v43  ;;  %v6654_v25 = vadd.f32 %v6653_v34, %v6652_v18  ;;  %v6655_v38 = vsel %vm4799_vm4, %v6579_v26, 0.0 }
 0x610   : > { %v6580_v47 = vmul.f32 %v14655_v14, %v14386_v39 }
 0x611   : > { %v10401_v29 = vpop.eup %10400  ;;  %v6581_v40 = vmul.f32 %v14658_v50, %v15785_v63  ;;  %v6656_v21 = vadd.f32 %v6655_v38, %v6654_v25  ;;  %v15788_v25 = vmov 0.0   ;;  %v6676_v38 = vld [vmem:[%s15370_s9] sm:$0x1] }
 0x612   : > { %v10403_v56 = vpop.eup %10402  ;;  %v14664_v15 = vmul.f32 %v10401_v29, %v14559_v53  ;;  %v6657_v43 = vsel %vm4799_vm4, %v6580_v47, 0.0 }
 0x613   : > { %v14669_v10 = vmul.f32 %v10403_v56, %v14566_v42  ;;  %v6658_v4 = vadd.f32 %v6657_v43, %v6656_v21  ;;  %v6659_v60 = vsel %vm4799_vm4, %v6581_v40, 0.0 }
 0x614   : > { %v6582_v5 = vmul.f32 %v14664_v15, %v15786_v6  ;;  %v15861_v6 = vld [vmem:[#allocation58_spill] sm:$0xff] }
 0x615   : > { %v6583_v35 = vmul.f32 %v14669_v10, %v15787_v51  ;;  %v6660_v53 = vadd.f32 %v6659_v60, %v6658_v4  ;;  %v6886_v60 = vld [vmem:[%s15373_s12 + $0x18] sm:$0xff] }
 0x616   : > { %v6661_v58 = vsel %vm4799_vm4, %v6582_v5, 0.0 }
 0x617   : > { %v6663_v20 = vsel %vm4799_vm4, %v6583_v35, 0.0  ;;  %v6662_v62 = vadd.f32 %v6661_v58, %v6660_v53  ;;  %v6885_v35 = vld [vmem:[%s15373_s12 + $0x10] sm:$0xff]  ;;  %v6883_v58 = vld [vmem:[%s15373_s12] sm:$0xff] }
 0x618   : > { %v6909_v53 = vpack.c.bf16 %v6886_v60, %v6885_v35  ;;  %v15791_v35 = vld [vmem:[#allocation80_spill] sm:$0xff] }
 0x619   : > { %v6664_v24 = vadd.f32 %v6663_v20, %v6662_v62  ;;  %v6884_v20 = vld [vmem:[%s15373_s12 + $0x8] sm:$0xff] }
 0x61a   : > { %v6908_v62 = vpack.c.bf16 %v6884_v20, %v6883_v58 }
 0x61b   : > { %v6665_v42 = vrot.slane %v6664_v24, 4 }
 0x61d   : > { %v6666_v45 = vadd.f32 %v6665_v42, %v6664_v24  ;;  %v6758_v24 = vld [vmem:[%s15372_s11] sm:$0x1] }
 0x61f   : > { %v6667_v34 = vrot.slane %v6666_v45, 2 }
 0x621   : > { %v6668_v30 = vadd.f32 %v6667_v34, %v6666_v45 }
 0x623   : > { %v6669_v26 = vrot.slane %v6668_v30, 1 }
 0x625   : > { %v6670_v18 = vadd.f32 %v6669_v26, %v6668_v30 }
 0x627   : > { %v6671_v12 = vmul.f32 0.00390625, %v6670_v18 }
 0x629   : > { %9675 = vmatmul.mubr.msk.f32.vlgmr.msra.gmra.mxu0 %vm4799_vm4, %v6671_v12  ;;  %v6838_v12 = vlaneseq }
 0x62a   : > { %9686 = vmatprep.mubr.msk.bf16.mxu0 %vm10670_vm1, %v15788_v25  ;;  %9683 = vmatpush3.bf16.msra.mxu0 %v6909_v53  ;;  %v15792_v53 = vld [vmem:[#allocation81_spill] sm:$0xff] }
 0x62b   : > { %9684 = vmatprep.subr.bf16.mxu0 %v15788_v25 }
 0x62e   : > { %9685 = vmatpush3.bf16.msra.mxu0 %v6908_v62  ;;  %v15793_v62 = vld [vmem:[#allocation87_spill] sm:$0xff] }
 0x6e9   : > { %v6746_v29 = vpop.f32.mrf.mxu0 }
 0x6ea   : > { %v6747_v47 = vadd.f32 %v6746_v29, %v6676_v38  ;;  %v6839_v38 = vshrl.u32 %v6838_v12, 7 }
 0x6eb   : > { %v9676_v56 = vpop.f32.mrf.mxu0 }
 0x6ec   : > { %v8437_v40 = vmul.f32 -1.442695, %v6747_v47  ;;  %v6840_v29 = vsub.s32 0, %v6839_v38 }
 0x6ee   : > { %10404 = vpow2.f32 %v8437_v40  ;;  %v15789_v40 = vld [vmem:[#allocation77_spill] sm:$0xff] }
 0x6fb   : > { %v10405_v21 = vpop.eup %10404 }
 0x6fc   : > { %v6753_v43 = vadd.f32 1.0, %v10405_v21 }
 0x6fe   : > { %10406 = vrcp.f32 %v6753_v43  ;;  %v15790_v43 = vld [vmem:[#allocation75_spill] sm:$0xff] }
 0x70b   : > { %v10407_v5 = vpop.eup %10406 }
 0x70c   : > { %v6756_v4 = vmul.f32 %v10407_v5, %v6747_v47 }
 0x70e   : > { %9680 = vmatmul.mubr.msk.f32.vlgmr.msra.gmra.mxu1 %vm744_vm2, %v6756_v4 }
 0x70f   : > { %9772 = vmatprep.mubr.msk.bf16.mxu1 %vm10670_vm1, %v15788_v25 }
 0x7ce   : > { %v6828_v42 = vpop.f32.mrf.mxu1 }
 0x7cf   : > { %v6829_v45 = vadd.f32 %v6828_v42, %v6758_v24  ;;  %v15794_v42 = vld [vmem:[#allocation89_spill] sm:$0xff] }
 0x7d0   : > { %v9681_v34 = vpop.f32.mrf.mxu1 }
 0x7d1   : > { %v8439_v30 = vmul.f32 -1.442695, %v6829_v45 }
 0x7d3   : > { %10408 = vpow2.f32 %v8439_v30  ;;  %v15795_v30 = vld [vmem:[#allocation93_spill] sm:$0xff] }
 0x7e0   : > { %v10409_v26 = vpop.eup %10408 }
 0x7e1   : > { %v6835_v18 = vadd.f32 1.0, %v10409_v26 }
 0x7e3   : > { %10410 = vrcp.f32 %v6835_v18  ;;  %v15796_v18 = vld [vmem:[#allocation95_spill] sm:$0xff] }
 0x7f0   : > { %v10411_v47 = vpop.eup %10410 }
 0x7f1   : > { %v14704_v56 = vrot.slane %v10411_v47, %v6840_v29  ;;  %v15797_v29 = vld [vmem:[#allocation98_spill] sm:$0xff] }
 0x7f3   : > { %v6842_v21 = vmul.f32 %v14704_v56, %v15789_v40  ;;  %v6843_v5 = vmul.f32 %v14704_v56, %v15790_v43  ;;  %v6844_v60 = vmul.f32 %v14704_v56, %v15791_v35  ;;  %v6845_v58 = vmul.f32 %v14704_v56, %v15792_v53  ;;  %v15798_v40 = vld [vmem:[#allocation65_spill] sm:$0xff]  ;;  %v15800_v35 = vld [vmem:[#allocation62_spill] sm:$0xff] }
 0x7f4   : > { %v6846_v24 = vmul.f32 %v14704_v56, %v15793_v62  ;;  %v6847_v45 = vmul.f32 %v14704_v56, %v15794_v42  ;;  %v6848_v26 = vmul.f32 %v14704_v56, %v15795_v30  ;;  %v6849_v12 = vmul.f32 %v14704_v56, %v15796_v18  ;;  %v15802_v62 = vld [vmem:[#allocation72_spill] sm:$0xff] }
 0x7f5   : > { %v6887_v4 = vpack.c.bf16 %v6843_v5, %v6842_v21  ;;  %v6888_v20 = vpack.c.bf16 %v6845_v58, %v6844_v60  ;;  %v6850_v47 = vmul.f32 %v14704_v56, %v15797_v29  ;;  %v6851_v21 = vmul.f32 %v14704_v56, %v15798_v40  ;;  %v15799_v5 = vld [vmem:[#allocation61_spill] sm:$0xff]  ;;  %v15801_v58 = vld [vmem:[#allocation68_spill] sm:$0xff]  ;;  %v15806_v29 = vld [vmem:[#allocation86_spill] sm:$0xff] }
 0x7f6   : > { %v6889_v34 = vpack.c.bf16 %v6847_v45, %v6846_v24  ;;  %v6890_v38 = vpack.c.bf16 %v6849_v12, %v6848_v26  ;;  %v6853_v60 = vmul.f32 %v14704_v56, %v15800_v35  ;;  %v6855_v24 = vmul.f32 %v14704_v56, %v15802_v62  ;;  %v15803_v45 = vld [vmem:[#allocation78_spill] sm:$0xff]  ;;  %v15804_v30 = vld [vmem:[#allocation84_spill] sm:$0xff]  ;;  %v15805_v12 = vld [vmem:[#allocation85_spill] sm:$0xff] }
 0x7f7   : > { %9687 = vmatmul.mubr.msk.bf16.vlgmr.msra.gmra.mxu0 %vm4799_vm4, %v6887_v4  ;;  %v6891_v43 = vpack.c.bf16 %v6851_v21, %v6850_v47  ;;  %v6852_v4 = vmul.f32 %v14704_v56, %v15799_v5  ;;  %v6857_v26 = vmul.f32 %v14704_v56, %v15804_v30  ;;  %v6859_v47 = vmul.f32 %v14704_v56, %v15806_v29  ;;  %v15807_v21 = vld [vmem:[#allocation90_spill] sm:$0xff] }
 0x7f8   : > { %9690 = vmatprep.mubr.msk.bf16.mxu0 %vm10670_vm1, %v15788_v25  ;;  %v15808_v5 = vld [vmem:[#allocation102_spill] sm:$0xff]  ;;  %v6863_v62 = vmul.f32 %v14704_v56, %v14443_v49  ;;  %v6866_v49 = vmul.f32 %v14704_v56, %v14556_v54  ;;  %v6870_v54 = vmul.f32 %v14704_v56, %v14595_v13  ;;  %v6874_v13 = vmul.f32 %v14704_v56, %v14621_v16 }
 0x7f9   : > { %v6892_v53 = vpack.c.bf16 %v6853_v60, %v6852_v4  ;;  %v6861_v4 = vmul.f32 %v14704_v56, %v15808_v5  ;;  %v7221_v60 = vld [vmem:[%s15375_s14] sm:$0xff]  ;;  %v6878_v16 = vmul.f32 %v14704_v56, %v14649_v57  ;;  %v6882_v57 = vmul.f32 %v14704_v56, %v14669_v10 }
 0x7fa   : > { %v14859_v5 = vld [vmem:[%s15374_s13] ss:$0 sm:$0xff] }
 0x7ff   : > { %9691 = vmatmul.mubr.msk.bf16.gmra.mxu0 %vm4799_vm4, %v6888_v20  ;;  %v6854_v20 = vmul.f32 %v14704_v56, %v15801_v58  ;;  %v15809_v58 = vld [vmem:[#allocation112_spill] sm:$0xff] }
 0x800   : > { %9694 = vmatprep.mubr.msk.bf16.mxu0 %vm10670_vm1, %v15788_v25 }
 0x801   : > { %v6893_v42 = vpack.c.bf16 %v6855_v24, %v6854_v20  ;;  %v6862_v20 = vmul.f32 %v14704_v56, %v15809_v58  ;;  %v15810_v58 = vld [vmem:[#allocation7_spill] sm:$0xff] }
 0x807   : > { %9695 = vmatmul.mubr.msk.bf16.gmra.mxu0 %vm4799_vm4, %v6889_v34  ;;  %v6856_v34 = vmul.f32 %v14704_v56, %v15803_v45  ;;  %v6864_v45 = vmul.f32 %v14704_v56, %v14534_v32  ;;  %v6868_v32 = vmul.f32 %v14704_v56, %v14581_v52  ;;  %v6872_v52 = vmul.f32 %v14704_v56, %v14609_v17 }
 0x808   : > { %9698 = vmatprep.mubr.msk.bf16.mxu0 %vm10670_vm1, %v15788_v25  ;;  %v6876_v17 = vmul.f32 %v14704_v56, %v14630_v19  ;;  %v6880_v19 = vmul.f32 %v14704_v56, %v14658_v50 }
 0x809   : > { %v6894_v18 = vpack.c.bf16 %v6857_v26, %v6856_v34  ;;  %v6865_v34 = vmul.f32 %v14704_v56, %v14543_v61  ;;  %v6867_v26 = vmul.f32 %v14704_v56, %v14570_v7  ;;  %v6869_v61 = vmul.f32 %v14704_v56, %v14588_v0 }
 0x80a   : > { %v6871_v7 = vmul.f32 %v14704_v56, %v14602_v48  ;;  %v6873_v0 = vmul.f32 %v14704_v56, %v14615_v46  ;;  %v6875_v48 = vmul.f32 %v14704_v56, %v14627_v8  ;;  %v6877_v46 = vmul.f32 %v14704_v56, %v14642_v41 }
 0x80b   : > { %v6898_v30 = vpack.c.bf16 %v6865_v34, %v6864_v45  ;;  %v6879_v8 = vmul.f32 %v14704_v56, %v14655_v14  ;;  %v6881_v41 = vmul.f32 %v14704_v56, %v14664_v15  ;;  %v6907_v14 = vpack.c.bf16 %v6882_v57, %v6882_v57 }
 0x80c   : > { %v6902_v29 = vpack.c.bf16 %v6873_v0, %v6872_v52 }
 0x80f   : > { %9699 = vmatmul.mubr.msk.bf16.gmra.mxu0 %vm4799_vm4, %v6890_v38  ;;  %v6858_v38 = vmul.f32 %v14704_v56, %v15805_v12  ;;  %v6900_v12 = vpack.c.bf16 %v6869_v61, %v6868_v32  ;;  %v15813_v32 = vld [vmem:[#allocation10_spill] sm:$0xff] }
 0x810   : > { %9702 = vmatprep.mubr.msk.bf16.mxu0 %vm10670_vm1, %v15788_v25 }
 0x811   : > { %v6895_v40 = vpack.c.bf16 %v6859_v47, %v6858_v38  ;;  %v6901_v38 = vpack.c.bf16 %v6871_v7, %v6870_v54  ;;  %v6903_v47 = vpack.c.bf16 %v6875_v48, %v6874_v13  ;;  %v15814_v13 = vld [vmem:[#allocation11_spill] sm:$0xff] }
 0x817   : > { %9703 = vmatmul.mubr.msk.bf16.gmra.mxu0 %vm4799_vm4, %v6891_v43  ;;  %v6860_v43 = vmul.f32 %v14704_v56, %v15807_v21  ;;  %v6905_v21 = vpack.c.bf16 %v6879_v8, %v6878_v16 }
 0x818   : > { %9706 = vmatprep.mubr.msk.bf16.mxu0 %vm10670_vm1, %v15788_v25 }
 0x819   : > { %v6896_v35 = vpack.c.bf16 %v6861_v4, %v6860_v43  ;;  %v6906_v43 = vpack.c.bf16 %v6881_v41, %v6880_v19 }
 0x81f   : > { %9707 = vmatmul.mubr.msk.bf16.gmra.mxu0 %vm4799_vm4, %v6892_v53  ;;  %v7222_v53 = vld [vmem:[%s15375_s14 + $0x8] sm:$0xff] }
 0x820   : > { %9710 = vmatprep.mubr.msk.bf16.mxu0 %vm10670_vm1, %v15788_v25  ;;  %v7244_v24 = vpack.c.bf16 %v7222_v53, %v7221_v60 }
 0x822   : > { %9771 = vmatpush3.bf16.msra.mxu1 %v7244_v24 }
 0x823   : > { %9856 = vmatprep.subr.mxu1 %v15788_v25 }
 0x827   : > { %9711 = vmatmul.mubr.msk.bf16.gmra.mxu0 %vm4799_vm4, %v6893_v42  ;;  %v6897_v42 = vpack.c.bf16 %v6863_v62, %v6862_v20  ;;  %v15811_v62 = vld [vmem:[#allocation8_spill] sm:$0xff] }
 0x828   : > { %9714 = vmatprep.mubr.msk.bf16.mxu0 %vm10670_vm1, %v15788_v25 }
 0x82f   : > { %9715 = vmatmul.mubr.msk.bf16.gmra.mxu0 %vm4799_vm4, %v6894_v18  ;;  %v6899_v18 = vpack.c.bf16 %v6867_v26, %v6866_v49  ;;  %v15812_v26 = vld [vmem:[#allocation9_spill] sm:$0xff] }
 0x830   : > { %9718 = vmatprep.mubr.msk.bf16.mxu0 %vm10670_vm1, %v15788_v25 }
 0x837   : > { %9719 = vmatmul.mubr.msk.bf16.gmra.mxu0 %vm4799_vm4, %v6895_v40  ;;  %v6904_v40 = vpack.c.bf16 %v6877_v46, %v6876_v17 }
 0x838   : > { %9722 = vmatprep.mubr.msk.bf16.mxu0 %vm10670_vm1, %v15788_v25 }
 0x83f   : > { %9723 = vmatmul.mubr.msk.bf16.gmra.mxu0 %vm4799_vm4, %v6896_v35 }
 0x840   : > { %9726 = vmatprep.mubr.msk.bf16.mxu0 %vm10670_vm1, %v15788_v25 }
 0x847   : > { %9727 = vmatmul.mubr.msk.bf16.gmra.mxu0 %vm4799_vm4, %v6897_v42 }
 0x848   : > { %9730 = vmatprep.mubr.msk.bf16.mxu0 %vm10670_vm1, %v15788_v25 }
 0x84f   : > { %9731 = vmatmul.mubr.msk.bf16.gmra.mxu0 %vm4799_vm4, %v6898_v30 }
 0x850   : > { %9734 = vmatprep.mubr.msk.bf16.mxu0 %vm10670_vm1, %v15788_v25 }
 0x857   : > { %9735 = vmatmul.mubr.msk.bf16.gmra.mxu0 %vm4799_vm4, %v6899_v18 }
 0x858   : > { %9738 = vmatprep.mubr.msk.bf16.mxu0 %vm10670_vm1, %v15788_v25 }
 0x85f   : > { %9739 = vmatmul.mubr.msk.bf16.gmra.mxu0 %vm4799_vm4, %v6900_v12 }
 0x860   : > { %9742 = vmatprep.mubr.msk.bf16.mxu0 %vm10670_vm1, %v15788_v25 }
 0x867   : > { %9743 = vmatmul.mubr.msk.bf16.gmra.mxu0 %vm4799_vm4, %v6901_v38 }
 0x868   : > { %9746 = vmatprep.mubr.msk.bf16.mxu0 %vm10670_vm1, %v15788_v25 }
 0x86f   : > { %9747 = vmatmul.mubr.msk.bf16.gmra.mxu0 %vm4799_vm4, %v6902_v29 }
 0x870   : > { %9750 = vmatprep.mubr.msk.bf16.mxu0 %vm10670_vm1, %v15788_v25 }
 0x877   : > { %9751 = vmatmul.mubr.msk.bf16.gmra.mxu0 %vm4799_vm4, %v6903_v47  ;;  %v15815_v47 = vld [vmem:[#allocation12_spill] sm:$0xff] }
 0x878   : > { %9754 = vmatprep.mubr.msk.bf16.mxu0 %vm10670_vm1, %v15788_v25 }
 0x87f   : > { %9755 = vmatmul.mubr.msk.bf16.gmra.mxu0 %vm4799_vm4, %v6904_v40 }
 0x880   : > { %9758 = vmatprep.mubr.msk.bf16.mxu0 %vm10670_vm1, %v15788_v25 }
 0x887   : > { %9759 = vmatmul.mubr.msk.bf16.gmra.mxu0 %vm4799_vm4, %v6905_v21 }
 0x888   : > { %9762 = vmatprep.mubr.msk.bf16.mxu0 %vm10670_vm1, %v15788_v25 }
 0x88f   : > { %9763 = vmatmul.mubr.msk.bf16.gmra.mxu0 %vm4799_vm4, %v6906_v43  ;;  %v15816_v43 = vld [vmem:[#allocation13_spill] sm:$0xff] }
 0x890   : > { %9766 = vmatprep.mubr.msk.bf16.mxu0 %vm10670_vm1, %v15788_v25 }
 0x897   : > { %9767 = vmatmul.mubr.msk.bf16.gmra.mxu0 %vm4799_vm4, %v6907_v14  ;;  %v15817_v14 = vld [vmem:[#allocation14_spill] sm:$0xff] }
 0x8b7   : > { %v7014_v50 = vpop.f32.mrf.mxu0 }
 0x8b8   : > { %v7015_v15 = vadd.f32 %v14859_v5, %v7014_v50 }
 0x8b9   : > { %v9688_v4 = vpop.f32.mrf.mxu0 }
 0x8ba   : > { %v7180_v20 = vadd.f32 %v7015_v15, %v15810_v58 }
 0x8bb   : > { %v7017_v35 = vpop.f32.mrf.mxu0 }
 0x8bc   : > { %v7018_v60 = vadd.f32 %v14859_v5, %v7017_v35 }
 0x8bd   : > { %v9689_v53 = vpop.f32.mrf.mxu0 }
 0x8be   : > { %v7181_v10 = vadd.f32 %v7018_v60, %v15811_v62  ;;  %v15818_v62 = vld [vmem:[#allocation15_spill] sm:$0xff] }
 0x8bf   : > { %v7022_v56 = vpop.f32.mrf.mxu0 }
 0x8c0   : > { %v7223_v24 = vpack.c.bf16 %v7181_v10, %v7180_v20  ;;  %v7023_v45 = vadd.f32 %v14859_v5, %v7022_v56  ;;  %v15819_v56 = vld [vmem:[#allocation16_spill] sm:$0xff] }
 0x8c1   : > { %v9692_v42 = vpop.f32.mrf.mxu0 }
 0x8c2   : > { %9773 = vmatmul.mubr.msk.bf16.vlgmr.msra.gmra.mxu1 %vm4248_vm3, %v7223_v24  ;;  %v7182_v18 = vadd.f32 %v7023_v45, %v15812_v26 }
 0x8c3   : > { %v7025_v34 = vpop.f32.mrf.mxu0  ;;  %9776 = vmatprep.mubr.msk.bf16.mxu1 %vm10670_vm1, %v15788_v25 }
 0x8c4   : > { %v7026_v30 = vadd.f32 %v14859_v5, %v7025_v34 }
 0x8c5   : > { %v9693_v49 = vpop.f32.mrf.mxu0 }
 0x8c6   : > { %v7183_v61 = vadd.f32 %v7026_v30, %v15813_v32  ;;  %v15820_v32 = vld [vmem:[#allocation17_spill] sm:$0xff] }
 0x8c7   : > { %v7030_v12 = vpop.f32.mrf.mxu0 }
 0x8c8   : > { %v7224_v54 = vpack.c.bf16 %v7183_v61, %v7182_v18  ;;  %v7031_v38 = vadd.f32 %v14859_v5, %v7030_v12  ;;  %v15821_v12 = vld [vmem:[#allocation18_spill] sm:$0xff] }
 0x8c9   : > { %v9696_v7 = vpop.f32.mrf.mxu0 }
 0x8ca   : > { %9777 = vmatmul.mubr.msk.bf16.gmra.mxu1 %vm4248_vm3, %v7224_v54  ;;  %v7184_v48 = vadd.f32 %v7031_v38, %v15814_v13 }
 0x8cb   : > { %v7033_v52 = vpop.f32.mrf.mxu0  ;;  %9780 = vmatprep.mubr.msk.bf16.mxu1 %vm10670_vm1, %v15788_v25 }
 0x8cc   : > { %v7034_v0 = vadd.f32 %v14859_v5, %v7033_v52 }
 0x8cd   : > { %v9697_v29 = vpop.f32.mrf.mxu0 }
 0x8ce   : > { %v7185_v17 = vadd.f32 %v7034_v0, %v15815_v47  ;;  %v15822_v47 = vld [vmem:[#allocation19_spill] sm:$0xff] }
 0x8cf   : > { %v7038_v46 = vpop.f32.mrf.mxu0 }
 0x8d0   : > { %v7225_v40 = vpack.c.bf16 %v7185_v17, %v7184_v48  ;;  %v7039_v8 = vadd.f32 %v14859_v5, %v7038_v46  ;;  %v15823_v46 = vld [vmem:[#allocation20_spill] sm:$0xff] }
 0x8d1   : > { %v9700_v16 = vpop.f32.mrf.mxu0 }
 0x8d2   : > { %9781 = vmatmul.mubr.msk.bf16.gmra.mxu1 %vm4248_vm3, %v7225_v40  ;;  %v7186_v57 = vadd.f32 %v7039_v8, %v15816_v43 }
 0x8d3   : > { %v7041_v21 = vpop.f32.mrf.mxu0  ;;  %9784 = vmatprep.mubr.msk.bf16.mxu1 %vm10670_vm1, %v15788_v25 }
 0x8d4   : > { %v7042_v19 = vadd.f32 %v14859_v5, %v7041_v21 }
 0x8d5   : > { %v9701_v41 = vpop.f32.mrf.mxu0 }
 0x8d6   : > { %v7187_v50 = vadd.f32 %v7042_v19, %v15817_v14  ;;  %v15824_v14 = vld [vmem:[#allocation21_spill] sm:$0xff] }
 0x8d7   : > { %v7046_v4 = vpop.f32.mrf.mxu0 }
 0x8d8   : > { %v7226_v15 = vpack.c.bf16 %v7187_v50, %v7186_v57  ;;  %v7047_v60 = vadd.f32 %v14859_v5, %v7046_v4  ;;  %v15825_v4 = vld [vmem:[#allocation22_spill] sm:$0xff] }
 0x8d9   : > { %v9704_v35 = vpop.f32.mrf.mxu0 }
 0x8da   : > { %9785 = vmatmul.mubr.msk.bf16.gmra.mxu1 %vm4248_vm3, %v7226_v15  ;;  %v7188_v10 = vadd.f32 %v7047_v60, %v15818_v62 }
 0x8db   : > { %v7049_v53 = vpop.f32.mrf.mxu0  ;;  %9788 = vmatprep.mubr.msk.bf16.mxu1 %vm10670_vm1, %v15788_v25 }
 0x8dc   : > { %v7050_v58 = vadd.f32 %v14859_v5, %v7049_v53 }
 0x8dd   : > { %v9705_v20 = vpop.f32.mrf.mxu0 }
 0x8de   : > { %v7189_v24 = vadd.f32 %v7050_v58, %v15819_v56  ;;  %v15826_v56 = vld [vmem:[#allocation23_spill] sm:$0xff] }
 0x8df   : > { %v7054_v42 = vpop.f32.mrf.mxu0 }
 0x8e0   : > { %v7227_v45 = vpack.c.bf16 %v7189_v24, %v7188_v10  ;;  %v7055_v30 = vadd.f32 %v14859_v5, %v7054_v42  ;;  %v15827_v42 = vld [vmem:[#allocation24_spill] sm:$0xff] }
 0x8e1   : > { %v9708_v34 = vpop.f32.mrf.mxu0 }
 0x8e2   : > { %9789 = vmatmul.mubr.msk.bf16.gmra.mxu1 %vm4248_vm3, %v7227_v45  ;;  %v7190_v61 = vadd.f32 %v7055_v30, %v15820_v32 }
 0x8e3   : > { %v7057_v49 = vpop.f32.mrf.mxu0  ;;  %9792 = vmatprep.mubr.msk.bf16.mxu1 %vm10670_vm1, %v15788_v25 }
 0x8e4   : > { %v7058_v26 = vadd.f32 %v14859_v5, %v7057_v49 }
 0x8e5   : > { %v9709_v18 = vpop.f32.mrf.mxu0 }
 0x8e6   : > { %v7191_v54 = vadd.f32 %v7058_v26, %v15821_v12  ;;  %v15828_v12 = vld [vmem:[#allocation25_spill] sm:$0xff] }
 0x8e7   : > { %v7062_v7 = vpop.f32.mrf.mxu0 }
 0x8e8   : > { %v7228_v38 = vpack.c.bf16 %v7191_v54, %v7190_v61  ;;  %v7063_v0 = vadd.f32 %v14859_v5, %v7062_v7  ;;  %v15829_v7 = vld [vmem:[#allocation26_spill] sm:$0xff] }
 0x8e9   : > { %v9712_v52 = vpop.f32.mrf.mxu0 }
 0x8ea   : > { %9793 = vmatmul.mubr.msk.bf16.gmra.mxu1 %vm4248_vm3, %v7228_v38  ;;  %v7192_v17 = vadd.f32 %v7063_v0, %v15822_v47 }
 0x8eb   : > { %v7065_v29 = vpop.f32.mrf.mxu0  ;;  %9796 = vmatprep.mubr.msk.bf16.mxu1 %vm10670_vm1, %v15788_v25 }
 0x8ec   : > { %v7066_v13 = vadd.f32 %v14859_v5, %v7065_v29 }
 0x8ed   : > { %v9713_v48 = vpop.f32.mrf.mxu0 }
 0x8ee   : > { %v7193_v40 = vadd.f32 %v7066_v13, %v15823_v46  ;;  %v15830_v46 = vld [vmem:[#allocation27_spill] sm:$0xff] }
 0x8ef   : > { %v7070_v16 = vpop.f32.mrf.mxu0 }
 0x8f0   : > { %v7229_v8 = vpack.c.bf16 %v7193_v40, %v7192_v17  ;;  %v7071_v19 = vadd.f32 %v14859_v5, %v7070_v16  ;;  %v15831_v16 = vld [vmem:[#allocation28_spill] sm:$0xff] }
 0x8f1   : > { %v9716_v21 = vpop.f32.mrf.mxu0 }
 0x8f2   : > { %9797 = vmatmul.mubr.msk.bf16.gmra.mxu1 %vm4248_vm3, %v7229_v8  ;;  %v7194_v50 = vadd.f32 %v7071_v19, %v15824_v14 }
 0x8f3   : > { %v7073_v41 = vpop.f32.mrf.mxu0  ;;  %9800 = vmatprep.mubr.msk.bf16.mxu1 %vm10670_vm1, %v15788_v25 }
 0x8f4   : > { %v7074_v43 = vadd.f32 %v14859_v5, %v7073_v41 }
 0x8f5   : > { %v9717_v57 = vpop.f32.mrf.mxu0 }
 0x8f6   : > { %v7195_v15 = vadd.f32 %v7074_v43, %v15825_v4  ;;  %v15832_v4 = vld [vmem:[#allocation29_spill] sm:$0xff] }
 0x8f7   : > { %v7078_v35 = vpop.f32.mrf.mxu0 }
 0x8f8   : > { %v7230_v60 = vpack.c.bf16 %v7195_v15, %v7194_v50  ;;  %v7079_v58 = vadd.f32 %v14859_v5, %v7078_v35  ;;  %v15833_v35 = vld [vmem:[#allocation30_spill] sm:$0xff] }
 0x8f9   : > { %v9720_v53 = vpop.f32.mrf.mxu0 }
 0x8fa   : > { %9801 = vmatmul.mubr.msk.bf16.gmra.mxu1 %vm4248_vm3, %v7230_v60  ;;  %v7196_v24 = vadd.f32 %v7079_v58, %v15826_v56 }
 0x8fb   : > { %v7081_v20 = vpop.f32.mrf.mxu0  ;;  %9804 = vmatprep.mubr.msk.bf16.mxu1 %vm10670_vm1, %v15788_v25 }
 0x8fc   : > { %v7082_v62 = vadd.f32 %v14859_v5, %v7081_v20 }
 0x8fd   : > { %v9721_v10 = vpop.f32.mrf.mxu0 }
 0x8fe   : > { %v7197_v45 = vadd.f32 %v7082_v62, %v15827_v42  ;;  %v15834_v42 = vld [vmem:[#allocation31_spill] sm:$0xff] }
 0x8ff   : > { %v7086_v34 = vpop.f32.mrf.mxu0 }
 0x900   : > { %v7231_v30 = vpack.c.bf16 %v7197_v45, %v7196_v24  ;;  %v7087_v26 = vadd.f32 %v14859_v5, %v7086_v34  ;;  %v15835_v34 = vld [vmem:[#allocation32_spill] sm:$0xff] }
 0x901   : > { %v9724_v49 = vpop.f32.mrf.mxu0 }
 0x902   : > { %9805 = vmatmul.mubr.msk.bf16.gmra.mxu1 %vm4248_vm3, %v7231_v30  ;;  %v7198_v54 = vadd.f32 %v7087_v26, %v15828_v12 }
 0x903   : > { %v7089_v18 = vpop.f32.mrf.mxu0  ;;  %9808 = vmatprep.mubr.msk.bf16.mxu1 %vm10670_vm1, %v15788_v25 }
 0x904   : > { %v7090_v32 = vadd.f32 %v14859_v5, %v7089_v18 }
 0x905   : > { %v9725_v61 = vpop.f32.mrf.mxu0 }
 0x906   : > { %v7199_v38 = vadd.f32 %v7090_v32, %v15829_v7  ;;  %v15836_v7 = vld [vmem:[#allocation33_spill] sm:$0xff] }
 0x907   : > { %v7094_v52 = vpop.f32.mrf.mxu0 }
 0x908   : > { %v7232_v0 = vpack.c.bf16 %v7199_v38, %v7198_v54  ;;  %v7095_v13 = vadd.f32 %v14859_v5, %v7094_v52  ;;  %v15837_v52 = vld [vmem:[#allocation34_spill] sm:$0xff] }
 0x909   : > { %v9728_v29 = vpop.f32.mrf.mxu0 }
 0x90a   : > { %9809 = vmatmul.mubr.msk.bf16.gmra.mxu1 %vm4248_vm3, %v7232_v0  ;;  %v7200_v40 = vadd.f32 %v7095_v13, %v15830_v46 }
 0x90b   : > { %v7097_v48 = vpop.f32.mrf.mxu0  ;;  %9812 = vmatprep.mubr.msk.bf16.mxu1 %vm10670_vm1, %v15788_v25 }
 0x90c   : > { %v7098_v47 = vadd.f32 %v14859_v5, %v7097_v48 }
 0x90d   : > { %v9729_v17 = vpop.f32.mrf.mxu0 }
 0x90e   : > { %v7201_v8 = vadd.f32 %v7098_v47, %v15831_v16  ;;  %v15838_v16 = vld [vmem:[#allocation35_spill] sm:$0xff] }
 0x90f   : > { %v7102_v21 = vpop.f32.mrf.mxu0 }
 0x910   : > { %v7233_v19 = vpack.c.bf16 %v7201_v8, %v7200_v40  ;;  %v7103_v43 = vadd.f32 %v14859_v5, %v7102_v21  ;;  %v15839_v21 = vld [vmem:[#allocation36_spill] sm:$0xff] }
 0x911   : > { %v9732_v41 = vpop.f32.mrf.mxu0 }
 0x912   : > { %9813 = vmatmul.mubr.msk.bf16.gmra.mxu1 %vm4248_vm3, %v7233_v19  ;;  %v7202_v15 = vadd.f32 %v7103_v43, %v15832_v4 }
 0x913   : > { %v7105_v57 = vpop.f32.mrf.mxu0  ;;  %9816 = vmatprep.mubr.msk.bf16.mxu1 %vm10670_vm1, %v15788_v25 }
 0x914   : > { %v7106_v14 = vadd.f32 %v14859_v5, %v7105_v57 }
 0x915   : > { %v9733_v50 = vpop.f32.mrf.mxu0 }
 0x916   : > { %v7203_v60 = vadd.f32 %v7106_v14, %v15833_v35  ;;  %v15840_v35 = vld [vmem:[#allocation37_spill] sm:$0xff] }
 0x917   : > { %v7110_v53 = vpop.f32.mrf.mxu0 }
 0x918   : > { %v7234_v58 = vpack.c.bf16 %v7203_v60, %v7202_v15  ;;  %v7111_v62 = vadd.f32 %v14859_v5, %v7110_v53  ;;  %v15841_v53 = vld [vmem:[#allocation38_spill] sm:$0xff] }
 0x919   : > { %v9736_v20 = vpop.f32.mrf.mxu0 }
 0x91a   : > { %9817 = vmatmul.mubr.msk.bf16.gmra.mxu1 %vm4248_vm3, %v7234_v58  ;;  %v7204_v45 = vadd.f32 %v7111_v62, %v15834_v42 }
 0x91b   : > { %v7113_v10 = vpop.f32.mrf.mxu0  ;;  %9820 = vmatprep.mubr.msk.bf16.mxu1 %vm10670_vm1, %v15788_v25 }
 0x91c   : > { %v7114_v56 = vadd.f32 %v14859_v5, %v7113_v10 }
 0x91d   : > { %v9737_v24 = vpop.f32.mrf.mxu0 }
 0x91e   : > { %v7205_v30 = vadd.f32 %v7114_v56, %v15835_v34  ;;  %v15842_v34 = vld [vmem:[#allocation39_spill] sm:$0xff] }
 0x91f   : > { %v7118_v49 = vpop.f32.mrf.mxu0 }
 0x920   : > { %v7235_v26 = vpack.c.bf16 %v7205_v30, %v7204_v45  ;;  %v7119_v32 = vadd.f32 %v14859_v5, %v7118_v49  ;;  %v15843_v49 = vld [vmem:[#allocation40_spill] sm:$0xff] }
 0x921   : > { %v9740_v18 = vpop.f32.mrf.mxu0 }
 0x922   : > { %9821 = vmatmul.mubr.msk.bf16.gmra.mxu1 %vm4248_vm3, %v7235_v26  ;;  %v7206_v38 = vadd.f32 %v7119_v32, %v15836_v7 }
 0x923   : > { %v7121_v61 = vpop.f32.mrf.mxu0  ;;  %9824 = vmatprep.mubr.msk.bf16.mxu1 %vm10670_vm1, %v15788_v25 }
 0x924   : > { %v7122_v12 = vadd.f32 %v14859_v5, %v7121_v61 }
 0x925   : > { %v9741_v54 = vpop.f32.mrf.mxu0 }
 0x926   : > { %v7207_v0 = vadd.f32 %v7122_v12, %v15837_v52  ;;  %v15844_v52 = vld [vmem:[#allocation41_spill] sm:$0xff] }
 0x927   : > { %v7126_v29 = vpop.f32.mrf.mxu0 }
 0x928   : > { %v7236_v13 = vpack.c.bf16 %v7207_v0, %v7206_v38  ;;  %v7127_v47 = vadd.f32 %v14859_v5, %v7126_v29  ;;  %v15845_v29 = vld [vmem:[#allocation42_spill] sm:$0xff] }
 0x929   : > { %v9744_v48 = vpop.f32.mrf.mxu0 }
 0x92a   : > { %9825 = vmatmul.mubr.msk.bf16.gmra.mxu1 %vm4248_vm3, %v7236_v13  ;;  %v7208_v8 = vadd.f32 %v7127_v47, %v15838_v16 }
 0x92b   : > { %v7129_v17 = vpop.f32.mrf.mxu0  ;;  %9828 = vmatprep.mubr.msk.bf16.mxu1 %vm10670_vm1, %v15788_v25 }
 0x92c   : > { %v7130_v46 = vadd.f32 %v14859_v5, %v7129_v17 }
 0x92d   : > { %v9745_v40 = vpop.f32.mrf.mxu0 }
 0x92e   : > { %v7209_v19 = vadd.f32 %v7130_v46, %v15839_v21  ;;  %v15846_v21 = vld [vmem:[#allocation43_spill] sm:$0xff] }
 0x92f   : > { %v7134_v41 = vpop.f32.mrf.mxu0 }
 0x930   : > { %v7237_v43 = vpack.c.bf16 %v7209_v19, %v7208_v8  ;;  %v7135_v14 = vadd.f32 %v14859_v5, %v7134_v41  ;;  %v15847_v41 = vld [vmem:[#allocation44_spill] sm:$0xff] }
 0x931   : > { %v9748_v57 = vpop.f32.mrf.mxu0 }
 0x932   : > { %9829 = vmatmul.mubr.msk.bf16.gmra.mxu1 %vm4248_vm3, %v7237_v43  ;;  %v7210_v60 = vadd.f32 %v7135_v14, %v15840_v35 }
 0x933   : > { %v7137_v50 = vpop.f32.mrf.mxu0  ;;  %9832 = vmatprep.mubr.msk.bf16.mxu1 %vm10670_vm1, %v15788_v25 }
 0x934   : > { %v7138_v4 = vadd.f32 %v14859_v5, %v7137_v50 }
 0x935   : > { %v9749_v15 = vpop.f32.mrf.mxu0 }
 0x936   : > { %v7211_v58 = vadd.f32 %v7138_v4, %v15841_v53  ;;  %v15848_v53 = vld [vmem:[#allocation45_spill] sm:$0xff] }
 0x937   : > { %v7142_v20 = vpop.f32.mrf.mxu0 }
 0x938   : > { %v7238_v62 = vpack.c.bf16 %v7211_v58, %v7210_v60  ;;  %v7143_v56 = vadd.f32 %v14859_v5, %v7142_v20  ;;  %v15849_v20 = vld [vmem:[#allocation46_spill] sm:$0xff] }
 0x939   : > { %v9752_v10 = vpop.f32.mrf.mxu0 }
 0x93a   : > { %9833 = vmatmul.mubr.msk.bf16.gmra.mxu1 %vm4248_vm3, %v7238_v62  ;;  %v7212_v30 = vadd.f32 %v7143_v56, %v15842_v34  ;;  %v7934_v34 = vld [vmem:[%s15377_s16 + $0x18] sm:$0xff] }
 0x93b   : > { %v7145_v24 = vpop.f32.mrf.mxu0  ;;  %9836 = vmatprep.mubr.msk.bf16.mxu1 %vm10670_vm1, %v15788_v25  ;;  %9857 = vmatpush3.msra.mxu1 %v7934_v34 }
 0x93c   : > { %v7146_v42 = vadd.f32 %v14859_v5, %v7145_v24  ;;  %9858 = vmatprep.subr.mxu1 %v15788_v25 }
 0x93d   : > { %v9753_v45 = vpop.f32.mrf.mxu0 }
 0x93e   : > { %v7213_v26 = vadd.f32 %v7146_v42, %v15843_v49 }
 0x93f   : > { %v7150_v18 = vpop.f32.mrf.mxu0 }
 0x940   : > { %v7239_v32 = vpack.c.bf16 %v7213_v26, %v7212_v30  ;;  %v7151_v12 = vadd.f32 %v14859_v5, %v7150_v18  ;;  %v15850_v30 = vld [vmem:[#allocation47_spill] sm:$0xff] }
 0x941   : > { %v9756_v61 = vpop.f32.mrf.mxu0 }
 0x942   : > { %9837 = vmatmul.mubr.msk.bf16.gmra.mxu1 %vm4248_vm3, %v7239_v32  ;;  %v7214_v0 = vadd.f32 %v7151_v12, %v15844_v52  ;;  %v7933_v12 = vld [vmem:[%s15377_s16 + $0x10] sm:$0xff] }
 0x943   : > { %v7153_v54 = vpop.f32.mrf.mxu0  ;;  %9840 = vmatprep.mubr.msk.bf16.mxu1 %vm10670_vm1, %v15788_v25  ;;  %9859 = vmatpush3.msra.mxu1 %v7933_v12 }
 0x944   : > { %v7154_v7 = vadd.f32 %v14859_v5, %v7153_v54  ;;  %9860 = vmatprep.subr.mxu1 %v15788_v25 }
 0x945   : > { %v9757_v38 = vpop.f32.mrf.mxu0 }
 0x946   : > { %v7215_v13 = vadd.f32 %v7154_v7, %v15845_v29 }
 0x947   : > { %v7158_v48 = vpop.f32.mrf.mxu0 }
 0x948   : > { %v7240_v47 = vpack.c.bf16 %v7215_v13, %v7214_v0  ;;  %v7159_v46 = vadd.f32 %v14859_v5, %v7158_v48 }
 0x949   : > { %v9760_v17 = vpop.f32.mrf.mxu0 }
 0x94a   : > { %9841 = vmatmul.mubr.msk.bf16.gmra.mxu1 %vm4248_vm3, %v7240_v47  ;;  %v7216_v19 = vadd.f32 %v7159_v46, %v15846_v21 }
 0x94b   : > { %v7161_v40 = vpop.f32.mrf.mxu0  ;;  %9844 = vmatprep.mubr.msk.bf16.mxu1 %vm10670_vm1, %v15788_v25 }
 0x94c   : > { %v7162_v16 = vadd.f32 %v14859_v5, %v7161_v40 }
 0x94d   : > { %v9761_v8 = vpop.f32.mrf.mxu0 }
 0x94e   : > { %v7217_v43 = vadd.f32 %v7162_v16, %v15847_v41 }
 0x94f   : > { %v7166_v57 = vpop.f32.mrf.mxu0 }
 0x950   : > { %v7241_v14 = vpack.c.bf16 %v7217_v43, %v7216_v19  ;;  %v7167_v4 = vadd.f32 %v14859_v5, %v7166_v57 }
 0x951   : > { %v9764_v50 = vpop.f32.mrf.mxu0 }
 0x952   : > { %9845 = vmatmul.mubr.msk.bf16.gmra.mxu1 %vm4248_vm3, %v7241_v14  ;;  %v7218_v58 = vadd.f32 %v7167_v4, %v15848_v53 }
 0x953   : > { %v7169_v15 = vpop.f32.mrf.mxu0  ;;  %9848 = vmatprep.mubr.msk.bf16.mxu1 %vm10670_vm1, %v15788_v25 }
 0x954   : > { %v7170_v35 = vadd.f32 %v14859_v5, %v7169_v15 }
 0x955   : > { %v9765_v60 = vpop.f32.mrf.mxu0 }
 0x956   : > { %v7219_v62 = vadd.f32 %v7170_v35, %v15849_v20 }
 0x957   : > { %v7174_v10 = vpop.f32.mrf.mxu0 }
 0x958   : > { %v7242_v56 = vpack.c.bf16 %v7219_v62, %v7218_v58  ;;  %v7175_v24 = vadd.f32 %v14859_v5, %v7174_v10  ;;  %v15013_v5 = vld [vmem:[%s15376_s15] ss:$0 sm:$0xff] }
 0x959   : > { %v9768_v42 = vpop.f32.mrf.mxu0 }
 0x95a   : > { %9849 = vmatmul.mubr.msk.bf16.gmra.mxu1 %vm4248_vm3, %v7242_v56  ;;  %v7220_v49 = vadd.f32 %v7175_v24, %v15850_v30 }
 0x95b   : > { %v7177_v45 = vpop.f32.mrf.mxu0  ;;  %9852 = vmatprep.mubr.msk.bf16.mxu1 %vm10670_vm1, %v15788_v25 }
 0x95c   : > { %v7243_v18 = vpack.c.bf16 %v7220_v49, %v7220_v49 }
 0x95d   : > { %v9769_v26 = vpop.f32.mrf.mxu0 }
 0x962   : > { %9853 = vmatmul.mubr.msk.bf16.gmra.mxu1 %vm4248_vm3, %v7243_v18 }
 0x963   : > { %9864 = vmatprep.mubr.msk.f32.mxu1 %vm10670_vm1, %v15788_v25 }
 0x982   : > { %v7349_v32 = vpop.f32.mrf.mxu1 }
 0x983   : > { %v7350_v61 = vadd.f32 %v15013_v5, %v7349_v32 }
 0x984   : > { %v9774_v54 = vpop.f32.mrf.mxu1 }
 0x985   : > { %v8484_v7 = vmul.f32 -1.442695, %v7350_v61 }
 0x986   : > { %v7352_v38 = vpop.f32.mrf.mxu1 }
 0x987   : > { %10412 = vpow2.f32 %v8484_v7  ;;  %v7353_v52 = vadd.f32 %v15013_v5, %v7352_v38 }
 0x988   : > { %v9775_v0 = vpop.f32.mrf.mxu1 }
 0x989   : > { %v8485_v29 = vmul.f32 -1.442695, %v7353_v52 }
 0x98a   : > { %v7357_v13 = vpop.f32.mrf.mxu1 }
 0x98b   : > { %10414 = vpow2.f32 %v8485_v29  ;;  %v15022_v48 = vadd.f32 %v15013_v5, %v7357_v13 }
 0x98c   : > { %v9778_v47 = vpop.f32.mrf.mxu1 }
 0x98d   : > { %v8486_v17 = vmul.f32 -1.442695, %v15022_v48 }
 0x98e   : > { %v7360_v46 = vpop.f32.mrf.mxu1 }
 0x98f   : > { %10416 = vpow2.f32 %v8486_v17  ;;  %v15026_v40 = vadd.f32 %v15013_v5, %v7360_v46 }
 0x990   : > { %v9779_v16 = vpop.f32.mrf.mxu1 }
 0x991   : > { %v8487_v8 = vmul.f32 -1.442695, %v15026_v40  ;;  %v15851_v16 = vld [vmem:[#allocation48_spill] sm:$0xff] }
 0x992   : > { %v7365_v21 = vpop.f32.mrf.mxu1 }
 0x993   : > { %10418 = vpow2.f32 %v8487_v8  ;;  %v15030_v19 = vadd.f32 %v15013_v5, %v7365_v21 }
 0x994   : > { %v10413_v41 = vpop.eup %10412  ;;  %v9782_v43 = vpop.f32.mrf.mxu1 }
 0x995   : > { %v7638_v57 = vadd.f32 1.0, %v10413_v41  ;;  %v8488_v14 = vmul.f32 -1.442695, %v15030_v19 }
 0x996   : > { %v7368_v50 = vpop.f32.mrf.mxu1 }
 0x997   : > { %10420 = vrcp.f32 %v7638_v57  ;;  %v15034_v4 = vadd.f32 %v15013_v5, %v7368_v50  ;;  %v15852_v57 = vld [vmem:[#allocation49_spill] sm:$0xff] }
 0x998   : > { %v10415_v15 = vpop.eup %10414  ;;  %10422 = vpow2.f32 %v8488_v14  ;;  %v9783_v35 = vpop.f32.mrf.mxu1 }
 0x999   : > { %v7639_v60 = vadd.f32 1.0, %v10415_v15  ;;  %v8489_v53 = vmul.f32 -1.442695, %v15034_v4 }
 0x99a   : > { %v7373_v58 = vpop.f32.mrf.mxu1 }
 0x99b   : > { %10424 = vrcp.f32 %v7639_v60  ;;  %v15038_v20 = vadd.f32 %v15013_v5, %v7373_v58 }
 0x99c   : > { %v10417_v62 = vpop.eup %10416  ;;  %10426 = vpow2.f32 %v8489_v53  ;;  %v9786_v10 = vpop.f32.mrf.mxu1 }
 0x99d   : > { %v7640_v56 = vadd.f32 1.0, %v10417_v62  ;;  %v8490_v24 = vmul.f32 -1.442695, %v15038_v20 }
 0x99e   : > { %v7376_v42 = vpop.f32.mrf.mxu1 }
 0x99f   : > { %10428 = vrcp.f32 %v7640_v56  ;;  %v15042_v45 = vadd.f32 %v15013_v5, %v7376_v42  ;;  %v15853_v56 = vld [vmem:[#allocation50_spill] sm:$0xff] }
 0x9a0   : > { %v10419_v34 = vpop.eup %10418  ;;  %10430 = vpow2.f32 %v8490_v24  ;;  %v9787_v30 = vpop.f32.mrf.mxu1 }
 0x9a1   : > { %v7641_v49 = vadd.f32 1.0, %v10419_v34  ;;  %v8491_v26 = vmul.f32 -1.442695, %v15042_v45 }
 0x9a2   : > { %v7381_v18 = vpop.f32.mrf.mxu1 }
 0x9a3   : > { %10432 = vrcp.f32 %v7641_v49  ;;  %v15046_v32 = vadd.f32 %v15013_v5, %v7381_v18 }
 0x9a4   : > { %v10421_v12 = vpop.eup %10420  ;;  %10434 = vpow2.f32 %v8491_v26  ;;  %v9790_v54 = vpop.f32.mrf.mxu1 }
 0x9a5   : > { %v10423_v7 = vpop.eup %10422  ;;  %v7761_v38 = vmul.f32 %v10421_v12, %v7350_v61  ;;  %v8492_v0 = vmul.f32 -1.442695, %v15046_v32  ;;  %v15854_v54 = vld [vmem:[#allocation51_spill] sm:$0xff] }
 0x9a6   : > { %v7642_v29 = vadd.f32 1.0, %v10423_v7  ;;  %v15049_v13 = vpop.f32.mrf.mxu1 }
 0x9a7   : > { %10436 = vpow2.f32 %v8492_v0  ;;  %v7802_v8 = vmul.f32 %v7761_v38, %v15851_v16 }
 0x9a8   : > { %v10425_v47 = vpop.eup %10424  ;;  %10438 = vrcp.f32 %v7642_v29  ;;  %v9791_v17 = vpop.f32.mrf.mxu1 }
 0x9a9   : > { %v10427_v46 = vpop.eup %10426  ;;  %v7762_v21 = vmul.f32 %v10425_v47, %v7353_v52  ;;  %v7843_v35 = vsel %vm4799_vm4, %v7802_v8, 0.0  ;;  %v7932_v52 = vld [vmem:[%s15377_s16 + $0x8] sm:$0xff] }
 0x9aa   : > { %v7643_v41 = vadd.f32 1.0, %v10427_v46  ;;  %v15052_v43 = vpop.f32.mrf.mxu1  ;;  %9861 = vmatpush3.msra.mxu1 %v7932_v52  ;;  %v15855_v8 = vld [vmem:[#allocation52_spill] sm:$0xff] }
 0x9ab   : > { %v7803_v14 = vmul.f32 %v7762_v21, %v15852_v57  ;;  %9862 = vmatprep.subr.mxu1 %v15788_v25 }
 0x9ac   : > { %v10429_v50 = vpop.eup %10428  ;;  %10440 = vrcp.f32 %v7643_v41  ;;  %v9794_v61 = vpop.f32.mrf.mxu1 }
 0x9ad   : > { %v10431_v15 = vpop.eup %10430  ;;  %v7844_v60 = vsel %vm4799_vm4, %v7803_v14, 0.0  ;;  %v7763_v53 = vmul.f32 %v10429_v50, %v15022_v48 }
 0x9ae   : > { %v7845_v58 = vadd.f32 %v7844_v60, %v7843_v35  ;;  %v7644_v62 = vadd.f32 1.0, %v10431_v15  ;;  %v15058_v10 = vpop.f32.mrf.mxu1  ;;  %v15856_v15 = vld [vmem:[#allocation53_spill] sm:$0xff] }
 0x9af   : > { %v7804_v24 = vmul.f32 %v7763_v53, %v15853_v56  ;;  %v15857_v56 = vld [vmem:[#allocation54_spill] sm:$0xff] }
 0x9b0   : > { %v10433_v42 = vpop.eup %10432  ;;  %10442 = vrcp.f32 %v7644_v62  ;;  %v9795_v34 = vpop.f32.mrf.mxu1 }
 0x9b1   : > { %v10435_v30 = vpop.eup %10434  ;;  %v7846_v49 = vsel %vm4799_vm4, %v7804_v24, 0.0  ;;  %v7764_v48 = vmul.f32 %v10433_v42, %v15026_v40 }
 0x9b2   : > { %v7847_v26 = vadd.f32 %v7846_v49, %v7845_v58  ;;  %v7645_v18 = vadd.f32 1.0, %v10435_v30  ;;  %v7397_v12 = vpop.f32.mrf.mxu1 }
 0x9b3   : > { %v7805_v7 = vmul.f32 %v7764_v48, %v15854_v54 }
 0x9b4   : > { %v10437_v38 = vpop.eup %10436  ;;  %10444 = vrcp.f32 %v7645_v18  ;;  %v9798_v0 = vpop.f32.mrf.mxu1  ;;  %v15858_v18 = vld [vmem:[#allocation55_spill] sm:$0xff] }
 0x9b5   : > { %v10439_v29 = vpop.eup %10438  ;;  %v7848_v47 = vsel %vm4799_vm4, %v7805_v7, 0.0  ;;  %v7646_v17 = vadd.f32 1.0, %v10437_v38 }
 0x9b6   : > { %v7849_v46 = vadd.f32 %v7848_v47, %v7847_v26  ;;  %v7765_v25 = vmul.f32 %v10439_v29, %v15030_v19  ;;  %v7400_v16 = vpop.f32.mrf.mxu1  ;;  %v15859_v47 = vld [vmem:[#allocation56_spill] sm:$0xff] }
 0x9b7   : > { %10446 = vrcp.f32 %v7646_v17 }
 0x9b8   : > { %v7806_v21 = vmul.f32 %v7765_v25, %v15855_v8  ;;  %v9799_v40 = vpop.f32.mrf.mxu1 }
 0x9b9   : > { %v10441_v41 = vpop.eup %10440 }
 0x9ba   : > { %v7850_v57 = vsel %vm4799_vm4, %v7806_v21, 0.0  ;;  %v7766_v14 = vmul.f32 %v10441_v41, %v15034_v4  ;;  %v7405_v50 = vpop.f32.mrf.mxu1 }
 0x9bb   : > { %v7851_v61 = vadd.f32 %v7850_v57, %v7849_v46  ;;  %v15088_v57 = vadd.f32 %v15013_v5, %v15049_v13 }
 0x9bc   : > { %v7807_v35 = vmul.f32 %v7766_v14, %v15856_v15  ;;  %v9802_v60 = vpop.f32.mrf.mxu1  ;;  %v15093_v15 = vadd.f32 %v15013_v5, %v15052_v43 }
 0x9bd   : > { %v10443_v53 = vpop.eup %10442  ;;  %v15097_v60 = vadd.f32 %v15013_v5, %v15058_v10 }
 0x9be   : > { %v7852_v58 = vsel %vm4799_vm4, %v7807_v35, 0.0  ;;  %v7767_v19 = vmul.f32 %v10443_v53, %v15038_v20  ;;  %v7408_v62 = vpop.f32.mrf.mxu1  ;;  %v8494_v13 = vmul.f32 -1.442695, %v15093_v15 }
 0x9bf   : > { %v7853_v52 = vadd.f32 %v7852_v58, %v7851_v61  ;;  %v8493_v61 = vmul.f32 -1.442695, %v15088_v57  ;;  %v7931_v58 = vld [vmem:[%s15377_s16] sm:$0xff]  ;;  %v8495_v43 = vmul.f32 -1.442695, %v15097_v60 }
 0x9c0   : > { %v7808_v24 = vmul.f32 %v7767_v19, %v15857_v56  ;;  %v9803_v42 = vpop.f32.mrf.mxu1  ;;  %v15104_v19 = vadd.f32 %v15013_v5, %v7397_v12  ;;  %9863 = vmatpush3.msra.mxu1 %v7931_v58  ;;  %v15108_v56 = vadd.f32 %v15013_v5, %v7400_v16  ;;  %v15116_v12 = vadd.f32 %v15013_v5, %v7408_v62 }
 0x9c1   : > { %v10445_v34 = vpop.eup %10444  ;;  %10448 = vpow2.f32 %v8493_v61  ;;  %v15112_v42 = vadd.f32 %v15013_v5, %v7405_v50 }
 0x9c2   : > { %v7854_v30 = vsel %vm4799_vm4, %v7808_v24, 0.0  ;;  %v7768_v4 = vmul.f32 %v10445_v34, %v15042_v45  ;;  %v7413_v49 = vpop.f32.mrf.mxu1  ;;  %10450 = vpow2.f32 %v8494_v13  ;;  %v8496_v24 = vmul.f32 -1.442695, %v15104_v19 }
 0x9c3   : > { %v7855_v48 = vadd.f32 %v7854_v30, %v7853_v52  ;;  %10452 = vpow2.f32 %v8495_v43  ;;  %v8497_v30 = vmul.f32 -1.442695, %v15108_v56  ;;  %v8498_v16 = vmul.f32 -1.442695, %v15112_v42 }
 0x9c4   : > { %v10447_v26 = vpop.eup %10446  ;;  %v7809_v54 = vmul.f32 %v7768_v4, %v15858_v18  ;;  %v9806_v7 = vpop.f32.mrf.mxu1  ;;  %v15119_v4 = vadd.f32 %v15013_v5, %v7413_v49  ;;  %10454 = vpow2.f32 %v8496_v24  ;;  %v8499_v18 = vmul.f32 -1.442695, %v15116_v12 }
 0x9c5   : > { %v7769_v38 = vmul.f32 %v10447_v26, %v15046_v32  ;;  %10456 = vpow2.f32 %v8497_v30 }
 0x9c6   : > { %v7856_v20 = vsel %vm4799_vm4, %v7809_v54, 0.0  ;;  %v7416_v0 = vpop.f32.mrf.mxu1  ;;  %v8500_v50 = vmul.f32 -1.442695, %v15119_v4  ;;  %10458 = vpow2.f32 %v8498_v16 }
 0x9c7   : > { %v7857_v29 = vadd.f32 %v7856_v20, %v7855_v48  ;;  %v7810_v17 = vmul.f32 %v7769_v38, %v15859_v47  ;;  %v15125_v54 = vadd.f32 %v15013_v5, %v7416_v0  ;;  %10460 = vpow2.f32 %v8499_v18 }
 0x9c8   : > { %v9807_v46 = vpop.f32.mrf.mxu1  ;;  %10462 = vpow2.f32 %v8500_v50 }
 0x9c9   : > { %v7858_v25 = vsel %vm4799_vm4, %v7810_v17, 0.0  ;;  %v8501_v20 = vmul.f32 -1.442695, %v15125_v54 }
 0x9ca   : > { %v15084_v8 = vadd.f32 %v7858_v25, %v7857_v29  ;;  %v7421_v45 = vpop.f32.mrf.mxu1 }
 0x9cb   : > { %v15128_v38 = vadd.f32 %v15013_v5, %v7421_v45  ;;  %10464 = vpow2.f32 %v8501_v20 }
 0x9cc   : > { %v9810_v21 = vpop.f32.mrf.mxu1 }
 0x9cd   : > { %v8502_v0 = vmul.f32 -1.442695, %v15128_v38 }
 0x9ce   : > { %v7424_v40 = vpop.f32.mrf.mxu1  ;;  %v10449_v62 = vpop.eup %10448 }
 0x9cf   : > { %v15132_v29 = vadd.f32 %v15013_v5, %v7424_v40  ;;  %v7647_v17 = vadd.f32 1.0, %v10449_v62  ;;  %v10451_v46 = vpop.eup %10450 }
 0x9d0   : > { %v9811_v41 = vpop.f32.mrf.mxu1  ;;  %v7648_v40 = vadd.f32 1.0, %v10451_v46 }
 0x9d1   : > { %v10453_v41 = vpop.eup %10452  ;;  %v8503_v45 = vmul.f32 -1.442695, %v15132_v29  ;;  %10466 = vrcp.f32 %v7647_v17 }
 0x9d2   : > { %v7429_v32 = vpop.f32.mrf.mxu1  ;;  %10468 = vpow2.f32 %v8502_v0  ;;  %v7649_v43 = vadd.f32 1.0, %v10453_v41 }
 0x9d3   : > { %v15136_v25 = vadd.f32 %v15013_v5, %v7429_v32  ;;  %10470 = vpow2.f32 %v8503_v45 }
 0x9d4   : > { %v9814_v14 = vpop.f32.mrf.mxu1  ;;  %10472 = vrcp.f32 %v7648_v40 }
 0x9d5   : > { %v8504_v58 = vmul.f32 -1.442695, %v15136_v25 }
 0x9d6   : > { %v7432_v35 = vpop.f32.mrf.mxu1 }
 0x9d7   : > { %v15140_v14 = vadd.f32 %v15013_v5, %v7432_v35  ;;  %10474 = vpow2.f32 %v8504_v58 }
 0x9d8   : > { %v9815_v53 = vpop.f32.mrf.mxu1  ;;  %10476 = vrcp.f32 %v7649_v43 }
 0x9d9   : > { %v10455_v53 = vpop.eup %10454  ;;  %v8505_v24 = vmul.f32 -1.442695, %v15140_v14 }
 0x9da   : > { %v7437_v52 = vpop.f32.mrf.mxu1 }
 0x9db   : > { %v15144_v13 = vadd.f32 %v15013_v5, %v7437_v52  ;;  %10478 = vpow2.f32 %v8505_v24 }
 0x9dc   : > { %v9818_v10 = vpop.f32.mrf.mxu1 }
 0x9dd   : > { %v10457_v10 = vpop.eup %10456  ;;  %v8506_v18 = vmul.f32 -1.442695, %v15144_v13 }
 0x9de   : > { %v7440_v34 = vpop.f32.mrf.mxu1  ;;  %v10459_v16 = vpop.eup %10458 }
 0x9df   : > { %v15148_v30 = vadd.f32 %v15013_v5, %v7440_v34  ;;  %v10461_v62 = vpop.eup %10460  ;;  %v7652_v17 = vadd.f32 1.0, %v10459_v16 }
 0x9e0   : > { %v9819_v48 = vpop.f32.mrf.mxu1  ;;  %v10463_v34 = vpop.eup %10462  ;;  %v7653_v45 = vadd.f32 1.0, %v10461_v62 }
 0x9e1   : > { %v7650_v48 = vadd.f32 1.0, %v10455_v53  ;;  %v8507_v20 = vmul.f32 -1.442695, %v15148_v30  ;;  %v10465_v53 = vpop.eup %10464 }
 0x9e2   : > { %v7445_v26 = vpop.f32.mrf.mxu1 }
 0x9e3   : > { %v15152_v50 = vadd.f32 %v15013_v5, %v7445_v26  ;;  %10480 = vrcp.f32 %v7650_v48  ;;  %v7655_v48 = vadd.f32 1.0, %v10465_v53 }
 0x9e4   : > { %v9822_v7 = vpop.f32.mrf.mxu1  ;;  %10482 = vpow2.f32 %v8506_v18 }
 0x9e5   : > { %v7651_v7 = vadd.f32 1.0, %v10457_v10  ;;  %v8508_v0 = vmul.f32 -1.442695, %v15152_v50 }
 0x9e6   : > { %v7448_v49 = vpop.f32.mrf.mxu1 }
 0x9e7   : > { %v15156_v46 = vadd.f32 %v15013_v5, %v7448_v49  ;;  %10484 = vrcp.f32 %v7651_v7  ;;  %v10467_v49 = vpop.eup %10466 }
 0x9e8   : > { %v9823_v47 = vpop.f32.mrf.mxu1  ;;  %10486 = vpow2.f32 %v8507_v20  ;;  %v7770_v20 = vmul.f32 %v10467_v49, %v15088_v57 }
 0x9e9   : > { %10488 = vrcp.f32 %v7652_v17  ;;  %v8509_v58 = vmul.f32 -1.442695, %v15156_v46 }
 0x9ea   : > { %v7453_v21 = vpop.f32.mrf.mxu1  ;;  %10490 = vpow2.f32 %v8508_v0 }
 0x9eb   : > { %v15160_v26 = vadd.f32 %v15013_v5, %v7453_v21  ;;  %v10469_v21 = vpop.eup %10468  ;;  %10492 = vrcp.f32 %v7653_v45 }
 0x9ec   : > { %v9826_v61 = vpop.f32.mrf.mxu1  ;;  %v10471_v18 = vpop.eup %10470 }
 0x9ed   : > { %v7654_v61 = vadd.f32 1.0, %v10463_v34  ;;  %v8510_v10 = vmul.f32 -1.442695, %v15160_v26  ;;  %v10473_v62 = vpop.eup %10472 }
 0x9ee   : > { %v7456_v32 = vpop.f32.mrf.mxu1  ;;  %v10475_v17 = vpop.eup %10474 }
 0x9ef   : > { %v15164_v43 = vadd.f32 %v15013_v5, %v7456_v32  ;;  %10494 = vrcp.f32 %v7654_v61  ;;  %v10477_v45 = vpop.eup %10476  ;;  %v7657_v61 = vadd.f32 1.0, %v10471_v18 }
 0x9f0   : > { %v9827_v35 = vpop.f32.mrf.mxu1  ;;  %10496 = vpow2.f32 %v8509_v58  ;;  %v10479_v53 = vpop.eup %10478 }
 0x9f1   : > { %v8511_v7 = vmul.f32 -1.442695, %v15164_v43  ;;  %10498 = vpow2.f32 %v8510_v10  ;;  %v10481_v49 = vpop.eup %10480  ;;  %v15860_v10 = vld [vmem:[#allocation57_spill] sm:$0xff] }
 0x9f2   : > { %v7461_v52 = vpop.f32.mrf.mxu1  ;;  %10500 = vrcp.f32 %v7655_v48  ;;  %v10483_v51 = vpop.eup %10482  ;;  %v7773_v39 = vmul.f32 %v10481_v49, %v15104_v19 }
 0x9f3   : > { %v15168_v35 = vadd.f32 %v15013_v5, %v7461_v52  ;;  %10502 = vpow2.f32 %v8511_v7  ;;  %v7772_v7 = vmul.f32 %v10477_v45, %v15097_v60 }
 0x9f4   : > { %v9830_v47 = vpop.f32.mrf.mxu1 }
 0x9f5   : > { %v7656_v47 = vadd.f32 1.0, %v10469_v21  ;;  %v8512_v52 = vmul.f32 -1.442695, %v15168_v35  ;;  %v7811_v21 = vmul.f32 %v7770_v20, %v15860_v10 }
 0x9f6   : > { %v7464_v41 = vpop.f32.mrf.mxu1 }
 0x9f7   : > { %v15172_v32 = vadd.f32 %v15013_v5, %v7464_v41  ;;  %v7771_v41 = vmul.f32 %v10473_v62, %v15093_v15  ;;  %10504 = vrcp.f32 %v7656_v47  ;;  %v10485_v15 = vpop.eup %10484  ;;  %v7659_v62 = vadd.f32 1.0, %v10479_v53 }
 0x9f8   : > { %v9831_v40 = vpop.f32.mrf.mxu1  ;;  %10506 = vpow2.f32 %v8512_v52  ;;  %v7660_v52 = vadd.f32 1.0, %v10483_v51  ;;  %v7774_v51 = vmul.f32 %v10485_v15, %v15108_v56 }
 0x9f9   : > { %v8513_v58 = vmul.f32 -1.442695, %v15172_v32  ;;  %10508 = vrcp.f32 %v7657_v61  ;;  %v7812_v63 = vmul.f32 %v7771_v41, %v15861_v6  ;;  %v15862_v6 = vld [vmem:[#allocation59_spill] sm:$0xff] }
 0x9fa   : > { %v7469_v24 = vpop.f32.mrf.mxu1  ;;  %v7813_v53 = vmul.f32 %v7772_v7, %v15862_v6 }
 0x9fb   : > { %v15177_v0 = vadd.f32 %v15013_v5, %v7469_v24  ;;  %10510 = vpow2.f32 %v8513_v58 }
 0x9fc   : > { %v9834_v16 = vpop.f32.mrf.mxu1  ;;  %v7864_v56 = vsel %vm4799_vm4, %v7813_v53, 0.0 }
 0x9fd   : > { %v7658_v16 = vadd.f32 1.0, %v10475_v17  ;;  %v8514_v48 = vmul.f32 -1.442695, %v15177_v0  ;;  %v7860_v17 = vsel %vm4799_vm4, %v7811_v21, 0.0  ;;  %v7862_v21 = vsel %vm4799_vm4, %v7812_v63, 0.0 }
 0x9fe   : > { %v7472_v34 = vpop.f32.mrf.mxu1 }
 0x9ff   : > { %v15182_v57 = vadd.f32 %v15013_v5, %v7472_v34  ;;  %10512 = vrcp.f32 %v7658_v16  ;;  %v7861_v16 = vadd.f32 %v7860_v17, %v15084_v8  ;;  %v15864_v17 = vld [vmem:[#allocation66_spill] sm:$0xff] }
 0xa00   : > { %v9835_v40 = vpop.f32.mrf.mxu1  ;;  %10514 = vpow2.f32 %v8514_v48 }
 0xa01   : > { %v10487_v40 = vpop.eup %10486  ;;  %v8515_v20 = vmul.f32 -1.442695, %v15182_v57  ;;  %10516 = vrcp.f32 %v7659_v62  ;;  %v15863_v62 = vld [vmem:[#allocation60_spill] sm:$0xff]  ;;  %v7863_v63 = vadd.f32 %v7862_v21, %v7861_v16 }
 0xa02   : > { %v7477_v24 = vpop.f32.mrf.mxu1  ;;  %v10489_v47 = vpop.eup %10488  ;;  %v7661_v41 = vadd.f32 1.0, %v10487_v40  ;;  %v7814_v40 = vmul.f32 %v7773_v39, %v15863_v62  ;;  %v15865_v39 = vld [vmem:[#allocation67_spill] sm:$0xff] }
 0xa03   : > { %v15187_v18 = vadd.f32 %v15013_v5, %v7477_v24  ;;  %v10491_v24 = vpop.eup %10490  ;;  %10518 = vpow2.f32 %v8515_v20  ;;  %v7775_v48 = vmul.f32 %v10489_v47, %v15112_v42  ;;  %v7815_v42 = vmul.f32 %v7774_v51, %v15864_v17  ;;  %v15867_v17 = vld [vmem:[#allocation74_spill] sm:$0xff] }
 0xa04   : > { %v9838_v34 = vpop.f32.mrf.mxu1  ;;  %v10493_v61 = vpop.eup %10492  ;;  %10520 = vrcp.f32 %v7660_v52  ;;  %v7865_v51 = vadd.f32 %v7864_v56, %v7863_v63 }
 0xa05   : > { %v8516_v60 = vmul.f32 -1.442695, %v15187_v18  ;;  %v10495_v34 = vpop.eup %10494  ;;  %v7776_v15 = vmul.f32 %v10493_v61, %v15116_v12  ;;  %v7866_v12 = vsel %vm4799_vm4, %v7814_v40, 0.0 }
 0xa06   : > { %v7480_v10 = vpop.f32.mrf.mxu1  ;;  %v10497_v49 = vpop.eup %10496  ;;  %v7867_v40 = vadd.f32 %v7866_v12, %v7865_v51 }
 0xa07   : > { %v15196_v45 = vadd.f32 %v15013_v5, %v7480_v10  ;;  %v7662_v10 = vadd.f32 1.0, %v10491_v24  ;;  %v10499_v7 = vpop.eup %10498  ;;  %10522 = vpow2.f32 %v8516_v60  ;;  %v7663_v47 = vadd.f32 1.0, %v10497_v49 }
 0xa08   : > { %v9839_v58 = vpop.f32.mrf.mxu1  ;;  %10524 = vrcp.f32 %v7661_v41  ;;  %v10501_v8 = vpop.eup %10500  ;;  %v7816_v60 = vmul.f32 %v7775_v48, %v15865_v39  ;;  %v15868_v39 = vld [vmem:[#allocation79_spill] sm:$0xff] }
 0xa09   : > { %v8517_v19 = vmul.f32 -1.442695, %v15196_v45  ;;  %v10503_v24 = vpop.eup %10502  ;;  %v7664_v58 = vadd.f32 1.0, %v10499_v7  ;;  %v7778_v16 = vmul.f32 %v10501_v8, %v15125_v54 }
 0xa0a   : > { %v7485_v28 = vpop.f32.mrf.mxu1  ;;  %v10505_v53 = vpop.eup %10504 }
 0xa0b   : > { %v15206_v6 = vadd.f32 %v15013_v5, %v7485_v28  ;;  %10526 = vpow2.f32 %v8517_v19  ;;  %v7777_v28 = vmul.f32 %v10495_v34, %v15119_v4  ;;  %v10507_v41 = vpop.eup %10506  ;;  %v15866_v19 = vld [vmem:[#allocation70_spill] sm:$0xff]  ;;  %v7868_v4 = vsel %vm4799_vm4, %v7815_v42, 0.0 }
 0xa0c   : > { %v9842_v20 = vpop.f32.mrf.mxu1  ;;  %10528 = vrcp.f32 %v7662_v10  ;;  %v7817_v49 = vmul.f32 %v7776_v15, %v15866_v19  ;;  %v10509_v48 = vpop.eup %10508  ;;  %v7665_v34 = vadd.f32 1.0, %v10503_v24  ;;  %v7779_v15 = vmul.f32 %v10505_v53, %v15128_v38 }
 0xa0d   : > { %v8518_v52 = vmul.f32 -1.442695, %v15206_v6  ;;  %v10511_v7 = vpop.eup %10510  ;;  %v7870_v20 = vsel %vm4799_vm4, %v7816_v60, 0.0  ;;  %v7666_v54 = vadd.f32 1.0, %v10507_v41 }
 0xa0e   : > { %v7488_v21 = vpop.f32.mrf.mxu1  ;;  %v10513_v56 = vpop.eup %10512  ;;  %v7872_v24 = vsel %vm4799_vm4, %v7817_v49, 0.0 }
 0xa0f   : > { %10530 = vpow2.f32 %v8518_v52  ;;  %v15216_v61 = vadd.f32 %v15013_v5, %v7488_v21  ;;  %v7818_v52 = vmul.f32 %v7777_v28, %v15867_v17  ;;  %v10515_v42 = vpop.eup %10514  ;;  %v7819_v21 = vmul.f32 %v7778_v16, %v15868_v39 }
 0xa10   : > { %v9843_v62 = vpop.f32.mrf.mxu1  ;;  %10532 = vrcp.f32 %v7663_v47  ;;  %v7869_v47 = vadd.f32 %v7868_v4, %v7867_v40  ;;  %v10517_v60 = vpop.eup %10516  ;;  %v7780_v28 = vmul.f32 %v10509_v48, %v15132_v29  ;;  %v7781_v19 = vmul.f32 %v10513_v56, %v15136_v25 }
 0xa11   : > { %v8519_v10 = vmul.f32 -1.442695, %v15216_v61  ;;  %10534 = vrcp.f32 %v7664_v58  ;;  %v7667_v58 = vadd.f32 1.0, %v10511_v7  ;;  %v10519_v38 = vpop.eup %10518  ;;  %v7874_v41 = vsel %vm4799_vm4, %v7818_v52, 0.0  ;;  %v15870_v52 = vld [vmem:[#allocation64_spill] sm:$0xff] }
 0xa12   : > { %v7493_v63 = vpop.f32.mrf.mxu1  ;;  %v7871_v53 = vadd.f32 %v7870_v20, %v7869_v47  ;;  %v10521_v4 = vpop.eup %10520  ;;  %v7668_v16 = vadd.f32 1.0, %v10515_v42  ;;  %v7782_v7 = vmul.f32 %v10517_v60, %v15140_v14  ;;  %v7821_v25 = vmul.f32 %v7780_v28, %v15870_v52  ;;  %v15871_v42 = vld [vmem:[#allocation69_spill] sm:$0xff] }
 0xa13   : > { %10536 = vpow2.f32 %v8519_v10  ;;  %v15226_v8 = vadd.f32 %v15013_v5, %v7493_v63  ;;  %v15869_v10 = vld [vmem:[#allocation63_spill] sm:$0xff]  ;;  %v7669_v63 = vadd.f32 1.0, %v10519_v38  ;;  %v7822_v47 = vmul.f32 %v7781_v19, %v15871_v42 }
 0xa14   : > { %v9846_v12 = vpop.f32.mrf.mxu1  ;;  %10538 = vrcp.f32 %v7665_v34  ;;  %v7820_v49 = vmul.f32 %v7779_v15, %v15869_v10  ;;  %v10523_v29 = vpop.eup %10522  ;;  %v7873_v48 = vadd.f32 %v7872_v24, %v7871_v53  ;;  %v7876_v34 = vsel %vm4799_vm4, %v7819_v21, 0.0 }
 0xa15   : > { %v8520_v51 = vmul.f32 -1.442695, %v15226_v8  ;;  %10540 = vrcp.f32 %v7666_v54  ;;  %v10525_v17 = vpop.eup %10524  ;;  %v7783_v39 = vmul.f32 %v10521_v4, %v15144_v13  ;;  %v7670_v14 = vadd.f32 1.0, %v10523_v29 }
 0xa16   : > { %v7496_v62 = vpop.f32.mrf.mxu1  ;;  %v7875_v54 = vadd.f32 %v7874_v41, %v7873_v48  ;;  %v7878_v21 = vsel %vm4799_vm4, %v7820_v49, 0.0  ;;  %v7784_v38 = vmul.f32 %v10525_v17, %v15148_v30  ;;  %v7880_v41 = vsel %vm4799_vm4, %v7821_v25, 0.0 }
 0xa17   : > { %v15236_v40 = vadd.f32 %v15013_v5, %v7496_v62  ;;  %10542 = vpow2.f32 %v8520_v51  ;;  %v7823_v51 = vmul.f32 %v7782_v7, %v15762_v9  ;;  %v7882_v10 = vsel %vm4799_vm4, %v7822_v47, 0.0 }
 0xa18   : > { %v9847_v20 = vpop.f32.mrf.mxu1  ;;  %10544 = vrcp.f32 %v7667_v58  ;;  %v10527_v15 = vpop.eup %10526  ;;  %v7877_v58 = vadd.f32 %v7876_v34, %v7875_v54  ;;  %v7824_v49 = vmul.f32 %v7783_v39, %v15763_v11  ;;  %v7825_v17 = vmul.f32 %v7784_v38, %v15764_v59 }
 0xa19   : > { %v8521_v56 = vmul.f32 -1.442695, %v15236_v40  ;;  %v10529_v12 = vpop.eup %10528  ;;  %10546 = vrcp.f32 %v7668_v16  ;;  %v7671_v13 = vadd.f32 1.0, %v10527_v15  ;;  %v7884_v20 = vsel %vm4799_vm4, %v7823_v51, 0.0 }
 0xa1a   : > { %v7501_v24 = vpop.f32.mrf.mxu1  ;;  %v7879_v4 = vadd.f32 %v7878_v21, %v7877_v58  ;;  %v7785_v9 = vmul.f32 %v10529_v12, %v15152_v50  ;;  %v7886_v15 = vsel %vm4799_vm4, %v7824_v49, 0.0 }
 0xa1b   : > { %v15246_v60 = vadd.f32 %v15013_v5, %v7501_v24  ;;  %10548 = vpow2.f32 %v8521_v56 }
 0xa1c   : > { %v10531_v28 = vpop.eup %10530  ;;  %v9850_v53 = vpop.f32.mrf.mxu1  ;;  %10550 = vrcp.f32 %v7669_v63  ;;  %v7881_v7 = vadd.f32 %v7880_v41, %v7879_v4  ;;  %v7826_v42 = vmul.f32 %v7785_v9, %v15767_v33 }
 0xa1d   : > { %v8522_v19 = vmul.f32 -1.442695, %v15246_v60  ;;  %v10533_v62 = vpop.eup %10532  ;;  %10552 = vrcp.f32 %v7670_v14  ;;  %v7672_v30 = vadd.f32 1.0, %v10531_v28 }
 0xa1e   : > { %v7504_v16 = vpop.f32.mrf.mxu1  ;;  %v10535_v29 = vpop.eup %10534  ;;  %v7786_v25 = vmul.f32 %v10533_v62, %v15156_v46  ;;  %v7883_v56 = vadd.f32 %v7882_v10, %v7881_v7  ;;  %v7888_v46 = vsel %vm4799_vm4, %v7825_v17, 0.0 }
 0xa1f   : > { %v15256_v48 = vadd.f32 %v15013_v5, %v7504_v16  ;;  %10554 = vpow2.f32 %v8522_v19  ;;  %v7787_v47 = vmul.f32 %v10535_v29, %v15160_v26 }
 0xa20   : > { %v10537_v34 = vpop.eup %10536  ;;  %v9851_v52 = vpop.f32.mrf.mxu1  ;;  %10556 = vrcp.f32 %v7671_v13  ;;  %v7885_v24 = vadd.f32 %v7884_v20, %v7883_v56  ;;  %v7827_v14 = vmul.f32 %v7786_v25, %v15769_v22 }
 0xa21   : > { %v7673_v11 = vadd.f32 1.0, %v10537_v34  ;;  %v8523_v63 = vmul.f32 -1.442695, %v15256_v48  ;;  %v10539_v50 = vpop.eup %10538  ;;  %10558 = vrcp.f32 %v7672_v30  ;;  %v7828_v53 = vmul.f32 %v7787_v47, %v15771_v3 }
 0xa22   : > { %v7509_v54 = vpop.f32.mrf.mxu1  ;;  %v10541_v39 = vpop.eup %10540  ;;  %v7788_v28 = vmul.f32 %v10539_v50, %v15164_v43  ;;  %v7887_v26 = vadd.f32 %v7886_v15, %v7885_v24  ;;  %v7892_v43 = vsel %vm4799_vm4, %v7827_v14, 0.0 }
 0xa23   : > { %v15266_v59 = vadd.f32 %v15013_v5, %v7509_v54  ;;  %10560 = vpow2.f32 %v8523_v63  ;;  %v7890_v5 = vsel %vm4799_vm4, %v7826_v42, 0.0  ;;  %v7789_v41 = vmul.f32 %v10541_v39, %v15168_v35 }
 0xa24   : > { %v9854_v12 = vpop.f32.mrf.mxu1  ;;  %v10543_v21 = vpop.eup %10542  ;;  %10562 = vrcp.f32 %v7673_v11  ;;  %v7889_v19 = vadd.f32 %v7888_v46, %v7887_v26  ;;  %v7829_v4 = vmul.f32 %v7788_v28, %v15773_v27  ;;  %v7894_v9 = vsel %vm4799_vm4, %v7828_v53, 0.0  ;;  %v15872_v53 = vld [vmem:[#allocation114_spill] sm:$0xff] }
 0xa25   : > { %v8524_v33 = vmul.f32 -1.442695, %v15266_v59  ;;  %v10545_v58 = vpop.eup %10544  ;;  %v7674_v51 = vadd.f32 1.0, %v10543_v21  ;;  %v7830_v3 = vmul.f32 %v7789_v41, %v15775_v23 }
 0xa26   : > { %v7512_v38 = vpop.f32.mrf.mxu1  ;;  %v10547_v13 = vpop.eup %10546  ;;  %v7790_v10 = vmul.f32 %v10545_v58, %v15172_v32  ;;  %v7891_v16 = vadd.f32 %v7890_v5, %v7889_v19  ;;  %v7896_v20 = vsel %vm4799_vm4, %v7829_v4, 0.0 }
 0xa27   : > { %10564 = vpow2.f32 %v8524_v33  ;;  %v7791_v35 = vmul.f32 %v10547_v13, %v15177_v0  ;;  %v7898_v11 = vsel %vm4799_vm4, %v7830_v3, 0.0 }
 0xa28   : > { %10566 = vrcp.f32 %v7674_v51  ;;  %v9855_v22 = vpop.f32.mrf.mxu1  ;;  %v10549_v62 = vpop.eup %10548  ;;  %v7893_v34 = vadd.f32 %v7892_v43, %v7891_v16  ;;  %v7831_v17 = vmul.f32 %v7790_v10, %v15777_v36 }
 0xa29   : > { %v10551_v49 = vpop.eup %10550  ;;  %v7675_v29 = vadd.f32 1.0, %v10549_v62  ;;  %v7832_v63 = vmul.f32 %v7791_v35, %v15779_v2  ;;  %v15873_v22 = vld [vmem:[#allocation116_spill] sm:$0xff] }
 0xa2a   : > { %v10553_v30 = vpop.eup %10552  ;;  %v7792_v27 = vmul.f32 %v10551_v49, %v15182_v57  ;;  %v7895_v52 = vadd.f32 %v7894_v9, %v7893_v34  ;;  %v7900_v15 = vsel %vm4799_vm4, %v7831_v17, 0.0  ;;  %v15875_v34 = vld [vmem:[#allocation73_spill] sm:$0xff] }
 0xa2b   : > { %10568 = vrcp.f32 %v7675_v29  ;;  %v7793_v23 = vmul.f32 %v10553_v30, %v15187_v18  ;;  %v7902_v39 = vsel %vm4799_vm4, %v7832_v63, 0.0 }
 0xa2c   : > { %v10555_v7 = vpop.eup %10554  ;;  %v7897_v50 = vadd.f32 %v7896_v20, %v7895_v52  ;;  %v7833_v54 = vmul.f32 %v7792_v27, %v15780_v44  ;;  %v15876_v27 = vld [vmem:[#allocation76_spill] sm:$0xff] }
 0xa2d   : > { %v10557_v32 = vpop.eup %10556  ;;  %v7676_v25 = vadd.f32 1.0, %v10555_v7  ;;  %v7834_v24 = vmul.f32 %v7793_v23, %v15781_v1 }
 0xa2e   : > { %v10559_v0 = vpop.eup %10558  ;;  %v7794_v36 = vmul.f32 %v10557_v32, %v15196_v45  ;;  %v7899_v42 = vadd.f32 %v7898_v11, %v7897_v50  ;;  %v7904_v21 = vsel %vm4799_vm4, %v7833_v54, 0.0 }
 0xa2f   : > { %10570 = vrcp.f32 %v7676_v25  ;;  %v7795_v2 = vmul.f32 %v10559_v0, %v15206_v6  ;;  %v7906_v33 = vsel %vm4799_vm4, %v7834_v24, 0.0 }
 0xa30   : > { %v10561_v56 = vpop.eup %10560  ;;  %v7901_v46 = vadd.f32 %v7900_v15, %v7899_v42  ;;  %v7835_v14 = vmul.f32 %v7794_v36, %v15782_v31 }
 0xa31   : > { %v10563_v57 = vpop.eup %10562  ;;  %v7677_v47 = vadd.f32 1.0, %v10561_v56  ;;  %v7836_v58 = vmul.f32 %v7795_v2, %v15783_v55 }
 0xa32   : > { %v7796_v44 = vmul.f32 %v10563_v57, %v15216_v61  ;;  %v7903_v28 = vadd.f32 %v7902_v39, %v7901_v46  ;;  %v7908_v51 = vsel %vm4799_vm4, %v7835_v14, 0.0 }
 0xa33   : > { %10572 = vrcp.f32 %v7677_v47  ;;  %v7910_v61 = vsel %vm4799_vm4, %v7836_v58, 0.0 }
 0xa34   : > { %v10565_v18 = vpop.eup %10564  ;;  %v7905_v6 = vadd.f32 %v7904_v21, %v7903_v28  ;;  %v7837_v38 = vmul.f32 %v7796_v44, %v15784_v37  ;;  %v15874_v37 = vld [vmem:[#allocation117_spill] sm:$0xff] }
 0xa35   : > { %v10567_v12 = vpop.eup %10566  ;;  %v7678_v45 = vadd.f32 1.0, %v10565_v18 }
 0xa36   : > { %v7797_v1 = vmul.f32 %v10567_v12, %v15226_v8  ;;  %v7907_v5 = vadd.f32 %v7906_v33, %v7905_v6  ;;  %v7912_v55 = vsel %vm4799_vm4, %v7837_v38, 0.0 }
 0xa37   : > { %10574 = vrcp.f32 %v7678_v45 }
 0xa38   : > { %v10569_v26 = vpop.eup %10568  ;;  %v7838_v41 = vmul.f32 %v7797_v1, %v15872_v53  ;;  %v7909_v13 = vadd.f32 %v7908_v51, %v7907_v5 }
 0xa39   : > { %v7798_v31 = vmul.f32 %v10569_v26, %v15236_v40 }
 0xa3a   : > { %v7911_v62 = vadd.f32 %v7910_v61, %v7909_v13  ;;  %v7914_v4 = vsel %vm4799_vm4, %v7838_v41, 0.0 }
 0xa3b   : > { %v7839_v8 = vmul.f32 %v7798_v31, %v15873_v22 }
 0xa3c   : > { %v10571_v19 = vpop.eup %10570  ;;  %v7913_v10 = vadd.f32 %v7912_v55, %v7911_v62 }
 0xa3d   : > { %v7799_v43 = vmul.f32 %v10571_v19, %v15246_v60  ;;  %v7916_v40 = vsel %vm4799_vm4, %v7839_v8, 0.0 }
 0xa3e   : > { %v7915_v29 = vadd.f32 %v7914_v4, %v7913_v10 }
 0xa3f   : > { %v7840_v49 = vmul.f32 %v7799_v43, %v15874_v37 }
 0xa40   : > { %v10573_v16 = vpop.eup %10572  ;;  %v7917_v30 = vadd.f32 %v7916_v40, %v7915_v29 }
 0xa41   : > { %v7800_v9 = vmul.f32 %v10573_v16, %v15256_v48  ;;  %v7918_v3 = vsel %vm4799_vm4, %v7840_v49, 0.0 }
 0xa42   : > { %v7919_v20 = vadd.f32 %v7918_v3, %v7917_v30 }
 0xa43   : > { %v7841_v7 = vmul.f32 %v7800_v9, %v15875_v34 }
 0xa44   : > { %v10575_v35 = vpop.eup %10574 }
 0xa45   : > { %v7801_v60 = vmul.f32 %v10575_v35, %v15266_v59  ;;  %v7920_v17 = vsel %vm4799_vm4, %v7841_v7, 0.0  ;;  %v7935_v59 = vld [vmem:[%s15378_s17] sm:$0x1] }
 0xa46   : > { %v7921_v52 = vadd.f32 %v7920_v17, %v7919_v20 }
 0xa47   : > { %v7842_v32 = vmul.f32 %v7801_v60, %v15876_v27 }
 0xa49   : > { %v7922_v25 = vsel %vm4799_vm4, %v7842_v32, 0.0 }
 0xa4a   : > { %v7923_v11 = vadd.f32 %v7922_v25, %v7921_v52 }
 0xa4c   : > { %v7924_v48 = vrot.slane %v7923_v11, 4 }
 0xa4e   : > { %v7925_v63 = vadd.f32 %v7924_v48, %v7923_v11 }
 0xa50   : > { %v7926_v23 = vrot.slane %v7925_v63, 2 }
 0xa52   : > { %v7927_v0 = vadd.f32 %v7926_v23, %v7925_v63 }
 0xa54   : > { %v7928_v50 = vrot.slane %v7927_v0, 1 }
 0xa56   : > { %v7929_v56 = vadd.f32 %v7928_v50, %v7927_v0 }
 0xa58   : > { %v7930_v15 = vmul.f32 0.00390625, %v7929_v56 }
 0xa5a   : > { %9865 = vmatmul.mubr.msk.f32.vlgmr.msra.gmra.mxu1 %vm4799_vm4, %v7930_v15 }
 0xb1a   : > { %v8005_v54 = vpop.f32.mrf.mxu1 }
 0xb1b   : > { %v8006_v36 = vadd.f32 %v8005_v54, %v7935_v59 }
 0xb1c   : > { %v9866_v57 = vpop.f32.mrf.mxu1 }
 0xb1d   : > { %8009 = vst [vmem:[%s567_s5] sm:$0x1] %v8006_v36 }
 0xb1e   : > { %10620 = shalt.err (!%p10617_p3)
}
 0xb1f   : > { %s10621_s4 = scalar_lea.hbm %s15326_s6, 16  ;;  %s10625_s22 = scalar_lea.hbm %s15379_s18, 32 }
 0xb20   : > { %p10622_p4 = scmp.ne.s32.totalorder %s15326_s6, %s10621_s4  ;;  %p10626_p9 = scmp.lt.s32.totalorder %s15326_s6, %s15379_s18 }
 0xb21   : > { %p10627_p10 = scmp.lt.s32.totalorder %s10625_s22, %s10621_s4 }
 0xb22   : > { %p10623_p7 = pnand %p10622_p4, %p10806_p5 }
 0xb23   : > { %p10628_p11 = por %p10627_p10, %p10626_p9 }
 0xb24   : > { %p10624_p8 = pneg %p10623_p7 }
 0xb26   : > { %p10629_p12 = pnand %p10628_p11, %p10624_p8 }
 0xb28   : > { %10632 = shalt.err (!%p10629_p12)
}
 0xb29   : > { %9868 = dma.vmem_to_hbm [thread:$0]  (%p10806_p5), %s8024_s25, 16, %s15326_s6, %s8011_s7  }
 0xb2a PF: > { %p9874_p13 = scmp.ge.s32.totalorder %s10667_s30, 2  ;;  %s8035_s8 = sand.u32 1, %s10655_s27  }
 0xb2b   : > { %s8036_s0 = scalar_lea.sflag [#allocation4], %s8035_s8 }
 0xb2c   : > { %p9871_p0 = pnand %p9874_p13, %p10810_p6 }
 0xb2e   : > { %p9872_p1 = pneg %p9871_p0 }
 0xb30   : > { %10650 = dma.done.wait (%p9872_p1), %s8036_s0, 16  }
 0xb31   : > { %10652 = vsyncadd (%p9872_p1), %s8036_s0, 4294967280  ;;  %s15877_s3 = sld [smem:[#allocation6_spill]]  ;;  %p28_p2 = scmp.ge.s32.totalorder %s10793_s1, 4  }
 0xb32   : > { %s15878_s27 = smov %s10659_s28  ;;  %s15879_s28 = smov %s10663_s29 }
 0xb33   : > { %s15881_s30 = smov %s10793_s1  ;;  %30 = sbr.rel (!%p28_p2) target bundleno = 13 (0xd), region = 135 }
 0xb37   : > { %s15880_s29 = smov %s15877_s3 }
 0xb38   :  { %8040 = vsyncpa [#allocation4], 1 }
 0xb39   :  { %8042 = vsyncpa [#allocation4 + $0x1], 1 }

</bundles_post_ra>
